<compile_context>
chip_gen: v6e
topology: v6e:2x2x1
jax: 0.10.0
libtpu: 0.0.40
codegen_flags: <defaults>
</compile_context>

<pallas_src>
import functools
import math

import jax
import jax.numpy as jnp
from jax.experimental import pallas as pl
from jax.experimental.pallas import tpu as pltpu

EPS_BN = 1e-5


def _round_up(x, m):
    return (x + m - 1) // m * m


def _pick_tile(n, candidates):
    for c in candidates:
        if n % c == 0:
            return c
    return None


# ---------------------------------------------------------------------------
# Pallas tiled matmul (the conv hot path), bf16 operands, f32 accumulation.
# ---------------------------------------------------------------------------
def _mm_kernel(a_ref, b_ref, o_ref, acc_ref):
    @pl.when(pl.program_id(2) == 0)
    def _():
        acc_ref[...] = jnp.zeros_like(acc_ref)

    acc_ref[...] += jnp.dot(a_ref[...], b_ref[...],
                            preferred_element_type=jnp.float32)

    @pl.when(pl.program_id(2) == pl.num_programs(2) - 1)
    def _():
        o_ref[...] = acc_ref[...].astype(o_ref.dtype)


def pallas_matmul(a, b):
    """a: [M, K], b: [K, N] -> [M, N] float32."""
    M, K = a.shape
    K2, N = b.shape
    assert K == K2
    Mp, Kp, Np = _round_up(M, 128), _round_up(K, 128), _round_up(N, 128)
    tm = _pick_tile(Mp, (512, 256, 128))
    tk = _pick_tile(Kp, (1024, 512, 256, 128))
    tn = 256 if Np % 256 == 0 else 128           # >=256-wide N for v6e/v7x MXU
    if (Mp, Kp) != (M, K):                       # skip pad when tile-aligned
        a = jnp.pad(a, ((0, Mp - M), (0, Kp - K)))
    if (Kp, Np) != (K, N):
        b = jnp.pad(b, ((0, Kp - K), (0, Np - N)))
    out = pl.pallas_call(
        _mm_kernel,
        out_shape=jax.ShapeDtypeStruct((Mp, Np), jnp.float32),
        grid_spec=pltpu.PrefetchScalarGridSpec(
            num_scalar_prefetch=0,
            grid=(Mp // tm, Np // tn, Kp // tk),
            in_specs=[pl.BlockSpec((tm, tk), lambda i, j, k: (i, k)),
                      pl.BlockSpec((tk, tn), lambda i, j, k: (k, j))],
            out_specs=pl.BlockSpec((tm, tn), lambda i, j, k: (i, j)),
            scratch_shapes=[pltpu.VMEM((tm, tn), jnp.float32)]),
        compiler_params=pltpu.CompilerParams(
            dimension_semantics=("parallel", "parallel", "arbitrary")),
    )(a, b)
    if (Mp, Np) != (M, N):
        out = out[:M, :N]
    return out


def matmul(a, b):
    """Dispatch: Pallas MXU matmul for well-shaped tiles, plain XLA otherwise
    (tiny bottleneck layers would waste >90% of padded MXU rows/lanes)."""
    M, K = a.shape
    N = b.shape[1]
    if M < 128 or K < 128 or N < 16:
        return jnp.dot(a, b, preferred_element_type=jnp.float32)
    return pallas_matmul(a, b)


# ---------------------------------------------------------------------------
# Fused BatchNorm (batch statistics) + activation, lane-dense layout.
# ---------------------------------------------------------------------------
def _stats_kernel(x_ref, s_ref, q_ref):
    # Single-pass per-lane sum / sum-of-squares reduction (accumulate in the
    # resident output block across the "arbitrary" grid axis).
    @pl.when(pl.program_id(0) == 0)
    def _():
        s_ref[...] = jnp.zeros_like(s_ref)
        q_ref[...] = jnp.zeros_like(q_ref)

    x = x_ref[...]
    s_ref[...] += jnp.sum(x, axis=0, keepdims=True)
    q_ref[...] += jnp.sum(x * x, axis=0, keepdims=True)


def _affine_act_kernel(x_ref, sc_ref, sh_ref, o_ref, *, act):
    y = x_ref[...] * sc_ref[...] + sh_ref[...]
    if act == "leaky":
        y = jnp.where(y >= 0.0, y, 0.2 * y)
    elif act == "relu":
        y = jnp.maximum(y, 0.0)
    elif act == "sigmoid":
        y = jax.nn.sigmoid(y)
    o_ref[...] = y


def _apply_act(y, act):
    if act == "leaky":
        return jnp.where(y >= 0.0, y, 0.2 * y)
    if act == "relu":
        return jnp.maximum(y, 0.0)
    if act == "sigmoid":
        return jax.nn.sigmoid(y)
    return y


def bn_act(y2d, out_shape, gamma, beta, act, bias=None):
    """y2d: [M, C] f32 conv output (no bias).  gamma=None -> no BatchNorm,
    only (optional bias) + activation (outermost layer)."""
    M, C = y2d.shape
    y2d = y2d.astype(jnp.float32)

    lane_ok = (C <= 128 and 128 % C == 0 and (M * C) % 128 == 0
               and M * C >= 16384)

    if not lane_ok:
        # Tiny / irregular layers: plain XLA is both faster and exact here.
        if gamma is not None:
            mean = jnp.mean(y2d, axis=0)
            var = jnp.var(y2d, axis=0)
            scale = gamma * jax.lax.rsqrt(var + EPS_BN)
            shift = beta - mean * scale
        else:
            scale = jnp.ones((C,), jnp.float32)
            shift = (bias.astype(jnp.float32) if bias is not None
                     else jnp.zeros((C,), jnp.float32))
        y = _apply_act(y2d * scale[None, :] + shift[None, :], act)
        return y.reshape(out_shape)

    reps = 128 // C
    R = (M * C) // 128
    xl = y2d.reshape(R, 128)                     # lane-dense view, no relayout
    tr = _pick_tile(R, (1024, 512, 256, 128, 64, 32, 16, 8)) or R

    if gamma is not None:
        s_l, q_l = pl.pallas_call(
            _stats_kernel,
            out_shape=(jax.ShapeDtypeStruct((1, 128), jnp.float32),
                       jax.ShapeDtypeStruct((1, 128), jnp.float32)),
            grid_spec=pltpu.PrefetchScalarGridSpec(
                num_scalar_prefetch=0,
                grid=(R // tr,),
                in_specs=[pl.BlockSpec((tr, 128), lambda i: (i, 0))],
                out_specs=[pl.BlockSpec((1, 128), lambda i: (0, 0)),
                           pl.BlockSpec((1, 128), lambda i: (0, 0))]),
            compiler_params=pltpu.CompilerParams(
                dimension_semantics=("arbitrary",)),
        )(xl)
        ch_sum = s_l.reshape(reps, C).sum(axis=0)
        ch_sq = q_l.reshape(reps, C).sum(axis=0)
        mean = ch_sum / M
        var = jnp.maximum(ch_sq / M - mean * mean, 0.0)   # biased (torch BN)
        scale = gamma * jax.lax.rsqrt(var + EPS_BN)
        shift = beta - mean * scale
    else:
        scale = jnp.ones((C,), jnp.float32)
        shift = (bias.astype(jnp.float32) if bias is not None
                 else jnp.zeros((C,), jnp.float32))

    sc_l = jnp.tile(scale, reps).reshape(1, 128)
    sh_l = jnp.tile(shift, reps).reshape(1, 128)

    out = pl.pallas_call(
        functools.partial(_affine_act_kernel, act=act),
        out_shape=jax.ShapeDtypeStruct((R, 128), jnp.float32),
        grid_spec=pltpu.PrefetchScalarGridSpec(
            num_scalar_prefetch=0,
            grid=(R // tr,),
            in_specs=[pl.BlockSpec((tr, 128), lambda i: (i, 0)),
                      pl.BlockSpec((1, 128), lambda i: (0, 0)),
                      pl.BlockSpec((1, 128), lambda i: (0, 0))],
            out_specs=pl.BlockSpec((tr, 128), lambda i: (i, 0))),
        compiler_params=pltpu.CompilerParams(dimension_semantics=("parallel",)),
    )(xl, sc_l, sh_l)
    return out.reshape(out_shape)


# ---------------------------------------------------------------------------
# Conv / ConvTranspose via im2col + matmul
# ---------------------------------------------------------------------------
def conv_down(x, w):
    """Conv2d(k=4, s=2, p=1), bias dropped (cancelled exactly by BatchNorm).
    x: [B,H,W,Cin], w: [Cout,Cin,4,4] torch layout."""
    B, H, W, Cin = x.shape
    Cout = w.shape[0]
    Ho, Wo = H // 2, W // 2
    xb = x.astype(jnp.bfloat16)
    xp = jnp.pad(xb, ((0, 0), (1, 1), (1, 1), (0, 0)))
    # tap-major / channel-minor patches; stack on a trailing axis (no big
    # major-axis transpose of the im2col tensor).
    taps = [xp[:, di:di + 2 * Ho:2, dj:dj + 2 * Wo:2, :]
            for di in range(4) for dj in range(4)]
    A = jnp.stack(taps, axis=3).reshape(B * Ho * Wo, 16 * Cin)
    W2 = jnp.transpose(w, (2, 3, 1, 0)).reshape(16 * Cin, Cout)
    y = matmul(A, W2.astype(jnp.bfloat16))
    return y, (B, Ho, Wo, Cout)


def conv_up(x, w):
    """ConvTranspose2d(k=4, s=2, p=1) decomposed into its 4 sub-pixel phases:
    four stride-1 2x2 convs (K = 4*Cin) whose outputs interleave into the
    2x-upsampled map.  Bias dropped (handled by bn_act when needed).
    x: [B,H,W,Cin], w: [Cin,Cout,4,4] torch layout."""
    B, H, W, Cin = x.shape
    Cout = w.shape[1]
    xb = x.astype(jnp.bfloat16)
    wb = w.astype(jnp.bfloat16)
    xp = jnp.pad(xb, ((0, 0), (1, 1), (1, 1), (0, 0)))
    phase = {}
    for r in (0, 1):
        for s in (0, 1):
            # output (2a+r, 2c+s) <- inputs at padded offsets (r+t, s+u),
            # kernel taps (3-r-2t, 3-s-2u), t,u in {0,1}.
            taps = [xp[:, r + t:r + t + H, s + u:s + u + W, :]
                    for t in (0, 1) for u in (0, 1)]
            A = jnp.stack(taps, axis=3).reshape(B * H * W, 4 * Cin)
            Wrs = jnp.stack([wb[:, :, 3 - r - 2 * t, 3 - s - 2 * u]
                             for t in (0, 1) for u in (0, 1)],
                            axis=0).reshape(4 * Cin, Cout)
            phase[(r, s)] = matmul(A, Wrs).reshape(B, H, W, Cout)
    row0 = jnp.stack([phase[(0, 0)], phase[(0, 1)]], axis=3)   # [B,H,W,2,C]
    row1 = jnp.stack([phase[(1, 0)], phase[(1, 1)]], axis=3)
    y = jnp.stack([row0, row1], axis=2)                        # [B,H,2,W,2,C]
    y = y.reshape(B, 2 * H, 2 * W, Cout)
    return y.reshape(B * 2 * H * 2 * W, Cout), (B, 2 * H, 2 * W, Cout)


def down_block(x, p):
    y2d, shape = conv_down(x, p["w"])
    return bn_act(y2d, shape, p["gamma"], p["beta"], act="leaky")


def up_block(x, p, outermost=False):
    y2d, shape = conv_up(x, p["w"])
    if outermost:
        # bias folded into the fused affine+sigmoid kernel
        return bn_act(y2d, shape, None, None, act="sigmoid", bias=p["b"])
    return bn_act(y2d, shape, p["gamma"], p["beta"], act="relu")


# ---------------------------------------------------------------------------
# Cross fusion (attention) module
# ---------------------------------------------------------------------------
def cross_fusion(audio_ms, visual, c7, p):
    # TODO(synk): CrossFusionModule source was not provided in the reference;
    # this is a representative single-layer cross-attention (audio tokens query
    # visual tokens, residual + LayerNorm), fusing the conv7-scale tokens with
    # the conv7 feature map -> ngf*16 channels.  All tensors here are tiny, so
    # it runs as one batched einsum path (no per-batch Pallas launches).
    B, D, L = audio_ms.shape
    Lv = visual.shape[1]
    a_tok = jnp.transpose(audio_ms, (0, 2, 1))                      # [B, L, D]
    q = (matmul(a_tok.reshape(B * L, D), p["wq"]) + p["bq"]).reshape(B, L, D)
    k = (matmul(visual.reshape(B * Lv, D), p["wk"]) + p["bk"]).reshape(B, Lv, D)
    v = (matmul(visual.reshape(B * Lv, D), p["wv"]) + p["bv"]).reshape(B, Lv, D)
    s = jnp.einsum("bld,bmd->blm", q, k) * (1.0 / math.sqrt(D))
    att = jnp.einsum("blm,bmd->bld", jax.nn.softmax(s, axis=-1), v)
    o = (matmul(att.reshape(B * L, D), p["wo"]) + p["bo"]).reshape(B, L, D)
    x = a_tok + o
    mu = jnp.mean(x, axis=-1, keepdims=True)
    var = jnp.var(x, axis=-1, keepdims=True)
    x = (x - mu) * jax.lax.rsqrt(var + 1e-5) * p["ln_g"] + p["ln_b"]
    _, H7, W7, _ = c7.shape
    x7 = x[:, L - H7 * W7:, :].reshape(B, H7, W7, D)
    return jnp.concatenate([x7, c7], axis=-1)                      # [B,H7,W7,2D]


# ---------------------------------------------------------------------------
# Full forward
# ---------------------------------------------------------------------------
def forward(x_nchw, visual_feat, params):
    x = jnp.transpose(x_nchw, (0, 2, 3, 1))      # NCHW -> NHWC
    c1 = down_block(x, params["d1"])
    c2 = down_block(c1, params["d2"])
    c3 = down_block(c2, params["d3"])
    c4 = down_block(c3, params["d4"])
    c5 = down_block(c4, params["d5"])
    c6 = down_block(c5, params["d6"])
    c7 = down_block(c6, params["d7"])

    def flat(t):  # matches torch .flatten(2) on NCHW
        Bb, Hh, Ww, Cc = t.shape
        return jnp.transpose(t, (0, 3, 1, 2)).reshape(Bb, Cc, Hh * Ww)

    audio_ms = jnp.concatenate([flat(c5), flat(c6), flat(c7)], axis=2)
    av = cross_fusion(audio_ms, visual_feat, c7, params["xattn"])

    u1 = up_block(av, params["u1"])
    u2 = up_block(jnp.concatenate([u1, c6], axis=-1), params["u2"])
    u3 = up_block(jnp.concatenate([u2, c5], axis=-1), params["u3"])
    u4 = up_block(jnp.concatenate([u3, c4], axis=-1), params["u4"])
    u5 = up_block(jnp.concatenate([u4, c3], axis=-1), params["u5"])
    u6 = up_block(jnp.concatenate([u5, c2], axis=-1), params["u6"])
    mask = up_block(jnp.concatenate([u6, c1], axis=-1), params["u7"],
                    outermost=True)
    return jnp.transpose(mask, (0, 3, 1, 2))     # NHWC -> NCHW


# ---------------------------------------------------------------------------
# Deterministic parameter init (synthetic weights, same shapes as the module).
# Conv biases for BatchNorm'd layers exist in the torch module but are
# mathematically cancelled by train-mode batch statistics, so they are unused.
# ---------------------------------------------------------------------------
def init_params(key, ngf=16, input_nc=2, output_nc=2):
    keys = iter(jax.random.split(key, 64))

    def nrm(shape, scale=0.05):
        return scale * jax.random.normal(next(keys), shape, jnp.float32)

    def down_p(cin, cout):
        return dict(w=nrm((cout, cin, 4, 4)), b=nrm((cout,)),
                    gamma=jnp.ones((cout,), jnp.float32),
                    beta=jnp.zeros((cout,), jnp.float32))

    def up_p(cin, cout, bn=True):
        d = dict(w=nrm((cin, cout, 4, 4)), b=nrm((cout,)))
        if bn:
            d["gamma"] = jnp.ones((cout,), jnp.float32)
            d["beta"] = jnp.zeros((cout,), jnp.float32)
        return d

    D = ngf * 8
    return dict(
        d1=down_p(input_nc, ngf), d2=down_p(ngf, ngf * 2),
        d3=down_p(ngf * 2, ngf * 4), d4=down_p(ngf * 4, ngf * 8),
        d5=down_p(ngf * 8, ngf * 8), d6=down_p(ngf * 8, ngf * 8),
        d7=down_p(ngf * 8, ngf * 8),
        u1=up_p(ngf * 16, ngf * 8), u2=up_p(ngf * 16, ngf * 8),
        u3=up_p(ngf * 16, ngf * 8), u4=up_p(ngf * 16, ngf * 4),
        u5=up_p(ngf * 8, ngf * 2), u6=up_p(ngf * 4, ngf),
        u7=up_p(ngf * 2, output_nc, bn=False),
        xattn=dict(wq=nrm((D, D)), bq=jnp.zeros((D,), jnp.float32),
                   wk=nrm((D, D)), bk=jnp.zeros((D,), jnp.float32),
                   wv=nrm((D, D)), bv=jnp.zeros((D,), jnp.float32),
                   wo=nrm((D, D)), bo=jnp.zeros((D,), jnp.float32),
                   ln_g=jnp.ones((D,), jnp.float32),
                   ln_b=jnp.zeros((D,), jnp.float32)),
    )


if __name__ == "__main__":
    ngf, input_nc, output_nc = 16, 2, 2
    B, H, W = 2, 128, 128        # 7 stride-2 downsamples -> 1x1 bottleneck
    Lv, D = 8, ngf * 8           # visual tokens / hidden dim

    key = jax.random.PRNGKey(0)
    pkey, xkey, vkey = jax.random.split(key, 3)
    params = init_params(pkey, ngf, input_nc, output_nc)
    x = jax.random.normal(xkey, (B, input_nc, H, W), jnp.float32)
    visual_feat = jax.random.normal(vkey, (B, Lv, D), jnp.float32)

    fwd = jax.jit(forward)
    out = fwd(x, visual_feat, params)
    out = jax.block_until_ready(out)
    assert out.shape == (B, output_nc, H, W), out.shape
    assert bool(jnp.all(jnp.isfinite(out)))
    print("KERNEL_OK")
</pallas_src>

<mosaic_0001>
module attributes {stable_mosaic.version = 11 : i64} {
  func.func @_stats_kernel(%arg0: i32, %arg1: memref<1024x128xf32, #tpu.memory_space<vmem>>, %arg2: memref<1x128xf32, #tpu.memory_space<vmem>>, %arg3: memref<1x128xf32, #tpu.memory_space<vmem>>) attributes {dimension_semantics = [#tpu.dimension_semantics<arbitrary>], iteration_bounds = array<i64: 1>, scalar_prefetch = 0 : i64, scratch_operands = 0 : i64, tpu.core_type = #tpu.core_type<tc>, window_params = [{transform_indices = @transform_0, window_bounds = array<i64: 1024, 128>}, {pipeline_mode = #tpu.pipeline_mode<synchronous>, transform_indices = @transform_1, window_bounds = array<i64: 1, 128>}, {pipeline_mode = #tpu.pipeline_mode<synchronous>, transform_indices = @transform_2, window_bounds = array<i64: 1, 128>}]} {
    %c0_i32 = arith.constant 0 : i32
    %0 = arith.cmpi eq, %arg0, %c0_i32 : i32
    %1 = arith.extui %0 : i1 to i32
    %c0_i32_0 = arith.constant 0 : i32
    %2 = arith.cmpi ne, %1, %c0_i32_0 : i32
    scf.if %2 {
      %cst_11 = arith.constant 0.000000e+00 : f32
      %15 = vector.broadcast %cst_11 : f32 to vector<1x128xf32>
      %c0_12 = arith.constant 0 : index
      %c0_13 = arith.constant 0 : index
      %16 = vector.load %arg2[%c0_12, %c0_13] : memref<1x128xf32, #tpu.memory_space<vmem>>, vector<1x128xf32>
      tpu.vector_store %arg2[%c0_12, %c0_13], %15 {strides = array<i32>} : memref<1x128xf32, #tpu.memory_space<vmem>>, vector<1x128xf32>,
      %cst_14 = arith.constant 0.000000e+00 : f32
      %17 = vector.broadcast %cst_14 : f32 to vector<1x128xf32>
      %c0_15 = arith.constant 0 : index
      %c0_16 = arith.constant 0 : index
      %18 = vector.load %arg3[%c0_15, %c0_16] : memref<1x128xf32, #tpu.memory_space<vmem>>, vector<1x128xf32>
      tpu.vector_store %arg3[%c0_15, %c0_16], %17 {strides = array<i32>} : memref<1x128xf32, #tpu.memory_space<vmem>>, vector<1x128xf32>,
    } else {
    }
    %c0 = arith.constant 0 : index
    %c0_1 = arith.constant 0 : index
    %3 = vector.load %arg1[%c0, %c0_1] : memref<1024x128xf32, #tpu.memory_space<vmem>>, vector<1024x128xf32>
    %c0_2 = arith.constant 0 : index
    %c0_3 = arith.constant 0 : index
    %4 = vector.load %arg2[%c0_2, %c0_3] : memref<1x128xf32, #tpu.memory_space<vmem>>, vector<1x128xf32>
    %cst = arith.constant dense<0.000000e+00> : vector<128xf32>
    %5 = vector.multi_reduction <add>, %3, %cst [0] : vector<1024x128xf32> to vector<128xf32>
    %6 = vector.shape_cast %5 : vector<128xf32> to vector<1x128xf32>
    %7 = arith.addf %4, %6 : vector<1x128xf32>
    %c0_4 = arith.constant 0 : index
    %c0_5 = arith.constant 0 : index
    %8 = vector.load %arg2[%c0_4, %c0_5] : memref<1x128xf32, #tpu.memory_space<vmem>>, vector<1x128xf32>
    tpu.vector_store %arg2[%c0_4, %c0_5], %7 {strides = array<i32>} : memref<1x128xf32, #tpu.memory_space<vmem>>, vector<1x128xf32>,
    %c0_6 = arith.constant 0 : index
    %c0_7 = arith.constant 0 : index
    %9 = vector.load %arg3[%c0_6, %c0_7] : memref<1x128xf32, #tpu.memory_space<vmem>>, vector<1x128xf32>
    %10 = arith.mulf %3, %3 : vector<1024x128xf32>
    %cst_8 = arith.constant dense<0.000000e+00> : vector<128xf32>
    %11 = vector.multi_reduction <add>, %10, %cst_8 [0] : vector<1024x128xf32> to vector<128xf32>
    %12 = vector.shape_cast %11 : vector<128xf32> to vector<1x128xf32>
    %13 = arith.addf %9, %12 : vector<1x128xf32>
    %c0_9 = arith.constant 0 : index
    %c0_10 = arith.constant 0 : index
    %14 = vector.load %arg3[%c0_9, %c0_10] : memref<1x128xf32, #tpu.memory_space<vmem>>, vector<1x128xf32>
    tpu.vector_store %arg3[%c0_9, %c0_10], %13 {strides = array<i32>} : memref<1x128xf32, #tpu.memory_space<vmem>>, vector<1x128xf32>,
    return
  }
  func.func @transform_0(%arg0: i32) -> (i32, i32) {
    %c0_i32 = arith.constant 0 : i32
    %c0_i32_0 = arith.constant 0 : i32
    return %arg0, %c0_i32 : i32, i32
  }
  func.func @transform_1(%arg0: i32) -> (i32, i32) {
    %c0_i32 = arith.constant 0 : i32
    %c0_i32_0 = arith.constant 0 : i32
    %c0_i32_1 = arith.constant 0 : i32
    return %c0_i32, %c0_i32_0 : i32, i32
  }
  func.func @transform_2(%arg0: i32) -> (i32, i32) {
    %c0_i32 = arith.constant 0 : i32
    %c0_i32_0 = arith.constant 0 : i32
    %c0_i32_1 = arith.constant 0 : i32
    return %c0_i32, %c0_i32_0 : i32, i32
  }
}

module attributes {stable_mosaic.version = 11 : i64} {
  func.func @_affine_act_kernel(%arg0: i32, %arg1: memref<1024x128xf32, #tpu.memory_space<vmem>>, %arg2: memref<1x128xf32, #tpu.memory_space<vmem>>, %arg3: memref<1x128xf32, #tpu.memory_space<vmem>>, %arg4: memref<1024x128xf32, #tpu.memory_space<vmem>>) attributes {dimension_semantics = [#tpu.dimension_semantics<parallel>], iteration_bounds = array<i64: 1>, scalar_prefetch = 0 : i64, scratch_operands = 0 : i64, tpu.core_type = #tpu.core_type<tc>, window_params = [{transform_indices = @transform_0, window_bounds = array<i64: 1024, 128>}, {pipeline_mode = #tpu.pipeline_mode<synchronous>, transform_indices = @transform_1, window_bounds = array<i64: 1, 128>}, {pipeline_mode = #tpu.pipeline_mode<synchronous>, transform_indices = @transform_2, window_bounds = array<i64: 1, 128>}, {transform_indices = @transform_3, window_bounds = array<i64: 1024, 128>}]} {
    %c0 = arith.constant 0 : index
    %c0_0 = arith.constant 0 : index
    %0 = vector.load %arg1[%c0, %c0_0] : memref<1024x128xf32, #tpu.memory_space<vmem>>, vector<1024x128xf32>
    %c0_1 = arith.constant 0 : index
    %c0_2 = arith.constant 0 : index
    %1 = vector.load %arg2[%c0_1, %c0_2] : memref<1x128xf32, #tpu.memory_space<vmem>>, vector<1x128xf32>
    %2 = vector.broadcast %1 : vector<1x128xf32> to vector<1024x128xf32>
    %3 = arith.mulf %0, %2 : vector<1024x128xf32>
    %c0_3 = arith.constant 0 : index
    %c0_4 = arith.constant 0 : index
    %4 = vector.load %arg3[%c0_3, %c0_4] : memref<1x128xf32, #tpu.memory_space<vmem>>, vector<1x128xf32>
    %5 = vector.broadcast %4 : vector<1x128xf32> to vector<1024x128xf32>
    %6 = arith.addf %3, %5 : vector<1024x128xf32>
    %cst = arith.constant 0.000000e+00 : f32
    %7 = vector.broadcast %cst : f32 to vector<1024x128xf32>
    %8 = arith.cmpf oge, %6, %7 : vector<1024x128xf32>
    %cst_5 = arith.constant 2.000000e-01 : f32
    %9 = vector.broadcast %cst_5 : f32 to vector<1024x128xf32>
    %10 = arith.mulf %9, %6 : vector<1024x128xf32>
    %11 = arith.select %8, %6, %10 : vector<1024x128xi1>, vector<1024x128xf32>
    %c0_6 = arith.constant 0 : index
    %c0_7 = arith.constant 0 : index
    %12 = vector.load %arg4[%c0_6, %c0_7] : memref<1024x128xf32, #tpu.memory_space<vmem>>, vector<1024x128xf32>
    tpu.vector_store %arg4[%c0_6, %c0_7], %11 {strides = array<i32>} : memref<1024x128xf32, #tpu.memory_space<vmem>>, vector<1024x128xf32>,
    return
  }
  func.func @transform_0(%arg0: i32) -> (i32, i32) {
    %c0_i32 = arith.constant 0 : i32
    %c0_i32_0 = arith.constant 0 : i32
    return %arg0, %c0_i32 : i32, i32
  }
  func.func @transform_1(%arg0: i32) -> (i32, i32) {
    %c0_i32 = arith.constant 0 : i32
    %c0_i32_0 = arith.constant 0 : i32
    %c0_i32_1 = arith.constant 0 : i32
    return %c0_i32, %c0_i32_0 : i32, i32
  }
  func.func @transform_2(%arg0: i32) -> (i32, i32) {
    %c0_i32 = arith.constant 0 : i32
    %c0_i32_0 = arith.constant 0 : i32
    %c0_i32_1 = arith.constant 0 : i32
    return %c0_i32, %c0_i32_0 : i32, i32
  }
  func.func @transform_3(%arg0: i32) -> (i32, i32) {
    %c0_i32 = arith.constant 0 : i32
    %c0_i32_0 = arith.constant 0 : i32
    return %arg0, %c0_i32 : i32, i32
  }
}

module attributes {stable_mosaic.version = 11 : i64} {
  func.func @_mm_kernel(%arg0: i32, %arg1: i32, %arg2: i32, %arg3: memref<512x256xbf16, #tpu.memory_space<vmem>>, %arg4: memref<256x128xbf16, #tpu.memory_space<vmem>>, %arg5: memref<512x128xf32, #tpu.memory_space<vmem>>, %arg6: memref<512x128xf32, #tpu.memory_space<vmem>>) attributes {dimension_semantics = [#tpu.dimension_semantics<parallel>, #tpu.dimension_semantics<parallel>, #tpu.dimension_semantics<arbitrary>], iteration_bounds = array<i64: 4, 1, 1>, scalar_prefetch = 0 : i64, scratch_operands = 1 : i64, tpu.core_type = #tpu.core_type<tc>, window_params = [{transform_indices = @transform_0, window_bounds = array<i64: 512, 256>}, {transform_indices = @transform_1, window_bounds = array<i64: 256, 128>}, {transform_indices = @transform_2, window_bounds = array<i64: 512, 128>}]} {
    %c0_i32 = arith.constant 0 : i32
    %0 = arith.cmpi eq, %arg2, %c0_i32 : i32
    %1 = arith.extui %0 : i1 to i32
    %c0_i32_0 = arith.constant 0 : i32
    %2 = arith.cmpi ne, %1, %c0_i32_0 : i32
    scf.if %2 {
      %cst_10 = arith.constant 0.000000e+00 : f32
      %12 = vector.broadcast %cst_10 : f32 to vector<512x128xf32>
      %c0_11 = arith.constant 0 : index
      %c0_12 = arith.constant 0 : index
      %13 = vector.load %arg6[%c0_11, %c0_12] : memref<512x128xf32, #tpu.memory_space<vmem>>, vector<512x128xf32>
      tpu.vector_store %arg6[%c0_11, %c0_12], %12 {strides = array<i32>} : memref<512x128xf32, #tpu.memory_space<vmem>>, vector<512x128xf32>,
    } else {
    }
    %c0 = arith.constant 0 : index
    %c0_1 = arith.constant 0 : index
    %3 = vector.load %arg6[%c0, %c0_1] : memref<512x128xf32, #tpu.memory_space<vmem>>, vector<512x128xf32>
    %c0_2 = arith.constant 0 : index
    %c0_3 = arith.constant 0 : index
    %4 = vector.load %arg3[%c0_2, %c0_3] : memref<512x256xbf16, #tpu.memory_space<vmem>>, vector<512x256xbf16>
    %c0_4 = arith.constant 0 : index
    %c0_5 = arith.constant 0 : index
    %5 = vector.load %arg4[%c0_4, %c0_5] : memref<256x128xbf16, #tpu.memory_space<vmem>>, vector<256x128xbf16>
    %cst = arith.constant dense<0.000000e+00> : vector<512x128xf32>
    %6 = tpu.matmul %4, %5, %cst {dimension_numbers = #tpu.dot_dimension_numbers<[1], [0], [0], [1], [0, 0, 1, 1], [], []>} : vector<512x256xbf16>, vector<256x128xbf16>, vector<512x128xf32> -> vector<512x128xf32>
    %7 = arith.addf %3, %6 : vector<512x128xf32>
    %c0_6 = arith.constant 0 : index
    %c0_7 = arith.constant 0 : index
    %8 = vector.load %arg6[%c0_6, %c0_7] : memref<512x128xf32, #tpu.memory_space<vmem>>, vector<512x128xf32>
    tpu.vector_store %arg6[%c0_6, %c0_7], %7 {strides = array<i32>} : memref<512x128xf32, #tpu.memory_space<vmem>>, vector<512x128xf32>,
    %c0_i32_8 = arith.constant 0 : i32
    %9 = arith.cmpi eq, %arg2, %c0_i32_8 : i32
    %10 = arith.extui %9 : i1 to i32
    %c0_i32_9 = arith.constant 0 : i32
    %11 = arith.cmpi ne, %10, %c0_i32_9 : i32
    scf.if %11 {
      %c0_10 = arith.constant 0 : index
      %c0_11 = arith.constant 0 : index
      %12 = vector.load %arg6[%c0_10, %c0_11] : memref<512x128xf32, #tpu.memory_space<vmem>>, vector<512x128xf32>
      %c0_12 = arith.constant 0 : index
      %c0_13 = arith.constant 0 : index
      %13 = vector.load %arg5[%c0_12, %c0_13] : memref<512x128xf32, #tpu.memory_space<vmem>>, vector<512x128xf32>
      tpu.vector_store %arg5[%c0_12, %c0_13], %12 {strides = array<i32>} : memref<512x128xf32, #tpu.memory_space<vmem>>, vector<512x128xf32>,
    } else {
    }
    return
  }
  func.func @transform_0(%arg0: i32, %arg1: i32, %arg2: i32) -> (i32, i32) {
    %c0_i32 = arith.constant 0 : i32
    return %arg0, %arg2 : i32, i32
  }
  func.func @transform_1(%arg0: i32, %arg1: i32, %arg2: i32) -> (i32, i32) {
    %c0_i32 = arith.constant 0 : i32
    return %arg2, %arg1 : i32, i32
  }
  func.func @transform_2(%arg0: i32, %arg1: i32, %arg2: i32) -> (i32, i32) {
    %c0_i32 = arith.constant 0 : i32
    return %arg0, %arg1 : i32, i32
  }
}

module attributes {stable_mosaic.version = 11 : i64} {
  func.func @_stats_kernel(%arg0: i32, %arg1: memref<512x128xf32, #tpu.memory_space<vmem>>, %arg2: memref<1x128xf32, #tpu.memory_space<vmem>>, %arg3: memref<1x128xf32, #tpu.memory_space<vmem>>) attributes {dimension_semantics = [#tpu.dimension_semantics<arbitrary>], iteration_bounds = array<i64: 1>, scalar_prefetch = 0 : i64, scratch_operands = 0 : i64, tpu.core_type = #tpu.core_type<tc>, window_params = [{transform_indices = @transform_0, window_bounds = array<i64: 512, 128>}, {pipeline_mode = #tpu.pipeline_mode<synchronous>, transform_indices = @transform_1, window_bounds = array<i64: 1, 128>}, {pipeline_mode = #tpu.pipeline_mode<synchronous>, transform_indices = @transform_2, window_bounds = array<i64: 1, 128>}]} {
    %c0_i32 = arith.constant 0 : i32
    %0 = arith.cmpi eq, %arg0, %c0_i32 : i32
    %1 = arith.extui %0 : i1 to i32
    %c0_i32_0 = arith.constant 0 : i32
    %2 = arith.cmpi ne, %1, %c0_i32_0 : i32
    scf.if %2 {
      %cst_11 = arith.constant 0.000000e+00 : f32
      %15 = vector.broadcast %cst_11 : f32 to vector<1x128xf32>
      %c0_12 = arith.constant 0 : index
      %c0_13 = arith.constant 0 : index
      %16 = vector.load %arg2[%c0_12, %c0_13] : memref<1x128xf32, #tpu.memory_space<vmem>>, vector<1x128xf32>
      tpu.vector_store %arg2[%c0_12, %c0_13], %15 {strides = array<i32>} : memref<1x128xf32, #tpu.memory_space<vmem>>, vector<1x128xf32>,
      %cst_14 = arith.constant 0.000000e+00 : f32
      %17 = vector.broadcast %cst_14 : f32 to vector<1x128xf32>
      %c0_15 = arith.constant 0 : index
      %c0_16 = arith.constant 0 : index
      %18 = vector.load %arg3[%c0_15, %c0_16] : memref<1x128xf32, #tpu.memory_space<vmem>>, vector<1x128xf32>
      tpu.vector_store %arg3[%c0_15, %c0_16], %17 {strides = array<i32>} : memref<1x128xf32, #tpu.memory_space<vmem>>, vector<1x128xf32>,
    } else {
    }
    %c0 = arith.constant 0 : index
    %c0_1 = arith.constant 0 : index
    %3 = vector.load %arg1[%c0, %c0_1] : memref<512x128xf32, #tpu.memory_space<vmem>>, vector<512x128xf32>
    %c0_2 = arith.constant 0 : index
    %c0_3 = arith.constant 0 : index
    %4 = vector.load %arg2[%c0_2, %c0_3] : memref<1x128xf32, #tpu.memory_space<vmem>>, vector<1x128xf32>
    %cst = arith.constant dense<0.000000e+00> : vector<128xf32>
    %5 = vector.multi_reduction <add>, %3, %cst [0] : vector<512x128xf32> to vector<128xf32>
    %6 = vector.shape_cast %5 : vector<128xf32> to vector<1x128xf32>
    %7 = arith.addf %4, %6 : vector<1x128xf32>
    %c0_4 = arith.constant 0 : index
    %c0_5 = arith.constant 0 : index
    %8 = vector.load %arg2[%c0_4, %c0_5] : memref<1x128xf32, #tpu.memory_space<vmem>>, vector<1x128xf32>
    tpu.vector_store %arg2[%c0_4, %c0_5], %7 {strides = array<i32>} : memref<1x128xf32, #tpu.memory_space<vmem>>, vector<1x128xf32>,
    %c0_6 = arith.constant 0 : index
    %c0_7 = arith.constant 0 : index
    %9 = vector.load %arg3[%c0_6, %c0_7] : memref<1x128xf32, #tpu.memory_space<vmem>>, vector<1x128xf32>
    %10 = arith.mulf %3, %3 : vector<512x128xf32>
    %cst_8 = arith.constant dense<0.000000e+00> : vector<128xf32>
    %11 = vector.multi_reduction <add>, %10, %cst_8 [0] : vector<512x128xf32> to vector<128xf32>
    %12 = vector.shape_cast %11 : vector<128xf32> to vector<1x128xf32>
    %13 = arith.addf %9, %12 : vector<1x128xf32>
    %c0_9 = arith.constant 0 : index
    %c0_10 = arith.constant 0 : index
    %14 = vector.load %arg3[%c0_9, %c0_10] : memref<1x128xf32, #tpu.memory_space<vmem>>, vector<1x128xf32>
    tpu.vector_store %arg3[%c0_9, %c0_10], %13 {strides = array<i32>} : memref<1x128xf32, #tpu.memory_space<vmem>>, vector<1x128xf32>,
    return
  }
  func.func @transform_0(%arg0: i32) -> (i32, i32) {
    %c0_i32 = arith.constant 0 : i32
    %c0_i32_0 = arith.constant 0 : i32
    return %arg0, %c0_i32 : i32, i32
  }
  func.func @transform_1(%arg0: i32) -> (i32, i32) {
    %c0_i32 = arith.constant 0 : i32
    %c0_i32_0 = arith.constant 0 : i32
    %c0_i32_1 = arith.constant 0 : i32
    return %c0_i32, %c0_i32_0 : i32, i32
  }
  func.func @transform_2(%arg0: i32) -> (i32, i32) {
    %c0_i32 = arith.constant 0 : i32
    %c0_i32_0 = arith.constant 0 : i32
    %c0_i32_1 = arith.constant 0 : i32
    return %c0_i32, %c0_i32_0 : i32, i32
  }
}

module attributes {stable_mosaic.version = 11 : i64} {
  func.func @_affine_act_kernel(%arg0: i32, %arg1: memref<512x128xf32, #tpu.memory_space<vmem>>, %arg2: memref<1x128xf32, #tpu.memory_space<vmem>>, %arg3: memref<1x128xf32, #tpu.memory_space<vmem>>, %arg4: memref<512x128xf32, #tpu.memory_space<vmem>>) attributes {dimension_semantics = [#tpu.dimension_semantics<parallel>], iteration_bounds = array<i64: 1>, scalar_prefetch = 0 : i64, scratch_operands = 0 : i64, tpu.core_type = #tpu.core_type<tc>, window_params = [{transform_indices = @transform_0, window_bounds = array<i64: 512, 128>}, {pipeline_mode = #tpu.pipeline_mode<synchronous>, transform_indices = @transform_1, window_bounds = array<i64: 1, 128>}, {pipeline_mode = #tpu.pipeline_mode<synchronous>, transform_indices = @transform_2, window_bounds = array<i64: 1, 128>}, {transform_indices = @transform_3, window_bounds = array<i64: 512, 128>}]} {
    %c0 = arith.constant 0 : index
    %c0_0 = arith.constant 0 : index
    %0 = vector.load %arg1[%c0, %c0_0] : memref<512x128xf32, #tpu.memory_space<vmem>>, vector<512x128xf32>
    %c0_1 = arith.constant 0 : index
    %c0_2 = arith.constant 0 : index
    %1 = vector.load %arg2[%c0_1, %c0_2] : memref<1x128xf32, #tpu.memory_space<vmem>>, vector<1x128xf32>
    %2 = vector.broadcast %1 : vector<1x128xf32> to vector<512x128xf32>
    %3 = arith.mulf %0, %2 : vector<512x128xf32>
    %c0_3 = arith.constant 0 : index
    %c0_4 = arith.constant 0 : index
    %4 = vector.load %arg3[%c0_3, %c0_4] : memref<1x128xf32, #tpu.memory_space<vmem>>, vector<1x128xf32>
    %5 = vector.broadcast %4 : vector<1x128xf32> to vector<512x128xf32>
    %6 = arith.addf %3, %5 : vector<512x128xf32>
    %cst = arith.constant 0.000000e+00 : f32
    %7 = vector.broadcast %cst : f32 to vector<512x128xf32>
    %8 = arith.cmpf oge, %6, %7 : vector<512x128xf32>
    %cst_5 = arith.constant 2.000000e-01 : f32
    %9 = vector.broadcast %cst_5 : f32 to vector<512x128xf32>
    %10 = arith.mulf %9, %6 : vector<512x128xf32>
    %11 = arith.select %8, %6, %10 : vector<512x128xi1>, vector<512x128xf32>
    %c0_6 = arith.constant 0 : index
    %c0_7 = arith.constant 0 : index
    %12 = vector.load %arg4[%c0_6, %c0_7] : memref<512x128xf32, #tpu.memory_space<vmem>>, vector<512x128xf32>
    tpu.vector_store %arg4[%c0_6, %c0_7], %11 {strides = array<i32>} : memref<512x128xf32, #tpu.memory_space<vmem>>, vector<512x128xf32>,
    return
  }
  func.func @transform_0(%arg0: i32) -> (i32, i32) {
    %c0_i32 = arith.constant 0 : i32
    %c0_i32_0 = arith.constant 0 : i32
    return %arg0, %c0_i32 : i32, i32
  }
  func.func @transform_1(%arg0: i32) -> (i32, i32) {
    %c0_i32 = arith.constant 0 : i32
    %c0_i32_0 = arith.constant 0 : i32
    %c0_i32_1 = arith.constant 0 : i32
    return %c0_i32, %c0_i32_0 : i32, i32
  }
  func.func @transform_2(%arg0: i32) -> (i32, i32) {
    %c0_i32 = arith.constant 0 : i32
    %c0_i32_0 = arith.constant 0 : i32
    %c0_i32_1 = arith.constant 0 : i32
    return %c0_i32, %c0_i32_0 : i32, i32
  }
  func.func @transform_3(%arg0: i32) -> (i32, i32) {
    %c0_i32 = arith.constant 0 : i32
    %c0_i32_0 = arith.constant 0 : i32
    return %arg0, %c0_i32 : i32, i32
  }
}

module attributes {stable_mosaic.version = 11 : i64} {
  func.func @_mm_kernel(%arg0: i32, %arg1: i32, %arg2: i32, %arg3: memref<512x512xbf16, #tpu.memory_space<vmem>>, %arg4: memref<512x128xbf16, #tpu.memory_space<vmem>>, %arg5: memref<512x128xf32, #tpu.memory_space<vmem>>, %arg6: memref<512x128xf32, #tpu.memory_space<vmem>>) attributes {dimension_semantics = [#tpu.dimension_semantics<parallel>, #tpu.dimension_semantics<parallel>, #tpu.dimension_semantics<arbitrary>], iteration_bounds = array<i64: 1, 1, 1>, scalar_prefetch = 0 : i64, scratch_operands = 1 : i64, tpu.core_type = #tpu.core_type<tc>, window_params = [{transform_indices = @transform_0, window_bounds = array<i64: 512, 512>}, {transform_indices = @transform_1, window_bounds = array<i64: 512, 128>}, {transform_indices = @transform_2, window_bounds = array<i64: 512, 128>}]} {
    %c0_i32 = arith.constant 0 : i32
    %0 = arith.cmpi eq, %arg2, %c0_i32 : i32
    %1 = arith.extui %0 : i1 to i32
    %c0_i32_0 = arith.constant 0 : i32
    %2 = arith.cmpi ne, %1, %c0_i32_0 : i32
    scf.if %2 {
      %cst_10 = arith.constant 0.000000e+00 : f32
      %12 = vector.broadcast %cst_10 : f32 to vector<512x128xf32>
      %c0_11 = arith.constant 0 : index
      %c0_12 = arith.constant 0 : index
      %13 = vector.load %arg6[%c0_11, %c0_12] : memref<512x128xf32, #tpu.memory_space<vmem>>, vector<512x128xf32>
      tpu.vector_store %arg6[%c0_11, %c0_12], %12 {strides = array<i32>} : memref<512x128xf32, #tpu.memory_space<vmem>>, vector<512x128xf32>,
    } else {
    }
    %c0 = arith.constant 0 : index
    %c0_1 = arith.constant 0 : index
    %3 = vector.load %arg6[%c0, %c0_1] : memref<512x128xf32, #tpu.memory_space<vmem>>, vector<512x128xf32>
    %c0_2 = arith.constant 0 : index
    %c0_3 = arith.constant 0 : index
    %4 = vector.load %arg3[%c0_2, %c0_3] : memref<512x512xbf16, #tpu.memory_space<vmem>>, vector<512x512xbf16>
    %c0_4 = arith.constant 0 : index
    %c0_5 = arith.constant 0 : index
    %5 = vector.load %arg4[%c0_4, %c0_5] : memref<512x128xbf16, #tpu.memory_space<vmem>>, vector<512x128xbf16>
    %cst = arith.constant dense<0.000000e+00> : vector<512x128xf32>
    %6 = tpu.matmul %4, %5, %cst {dimension_numbers = #tpu.dot_dimension_numbers<[1], [0], [0], [1], [0, 0, 1, 1], [], []>} : vector<512x512xbf16>, vector<512x128xbf16>, vector<512x128xf32> -> vector<512x128xf32>
    %7 = arith.addf %3, %6 : vector<512x128xf32>
    %c0_6 = arith.constant 0 : index
    %c0_7 = arith.constant 0 : index
    %8 = vector.load %arg6[%c0_6, %c0_7] : memref<512x128xf32, #tpu.memory_space<vmem>>, vector<512x128xf32>
    tpu.vector_store %arg6[%c0_6, %c0_7], %7 {strides = array<i32>} : memref<512x128xf32, #tpu.memory_space<vmem>>, vector<512x128xf32>,
    %c0_i32_8 = arith.constant 0 : i32
    %9 = arith.cmpi eq, %arg2, %c0_i32_8 : i32
    %10 = arith.extui %9 : i1 to i32
    %c0_i32_9 = arith.constant 0 : i32
    %11 = arith.cmpi ne, %10, %c0_i32_9 : i32
    scf.if %11 {
      %c0_10 = arith.constant 0 : index
      %c0_11 = arith.constant 0 : index
      %12 = vector.load %arg6[%c0_10, %c0_11] : memref<512x128xf32, #tpu.memory_space<vmem>>, vector<512x128xf32>
      %c0_12 = arith.constant 0 : index
      %c0_13 = arith.constant 0 : index
      %13 = vector.load %arg5[%c0_12, %c0_13] : memref<512x128xf32, #tpu.memory_space<vmem>>, vector<512x128xf32>
      tpu.vector_store %arg5[%c0_12, %c0_13], %12 {strides = array<i32>} : memref<512x128xf32, #tpu.memory_space<vmem>>, vector<512x128xf32>,
    } else {
    }
    return
  }
  func.func @transform_0(%arg0: i32, %arg1: i32, %arg2: i32) -> (i32, i32) {
    %c0_i32 = arith.constant 0 : i32
    return %arg0, %arg2 : i32, i32
  }
  func.func @transform_1(%arg0: i32, %arg1: i32, %arg2: i32) -> (i32, i32) {
    %c0_i32 = arith.constant 0 : i32
    return %arg2, %arg1 : i32, i32
  }
  func.func @transform_2(%arg0: i32, %arg1: i32, %arg2: i32) -> (i32, i32) {
    %c0_i32 = arith.constant 0 : i32
    return %arg0, %arg1 : i32, i32
  }
}

module attributes {stable_mosaic.version = 11 : i64} {
  func.func @_stats_kernel(%arg0: i32, %arg1: memref<256x128xf32, #tpu.memory_space<vmem>>, %arg2: memref<1x128xf32, #tpu.memory_space<vmem>>, %arg3: memref<1x128xf32, #tpu.memory_space<vmem>>) attributes {dimension_semantics = [#tpu.dimension_semantics<arbitrary>], iteration_bounds = array<i64: 1>, scalar_prefetch = 0 : i64, scratch_operands = 0 : i64, tpu.core_type = #tpu.core_type<tc>, window_params = [{transform_indices = @transform_0, window_bounds = array<i64: 256, 128>}, {pipeline_mode = #tpu.pipeline_mode<synchronous>, transform_indices = @transform_1, window_bounds = array<i64: 1, 128>}, {pipeline_mode = #tpu.pipeline_mode<synchronous>, transform_indices = @transform_2, window_bounds = array<i64: 1, 128>}]} {
    %c0_i32 = arith.constant 0 : i32
    %0 = arith.cmpi eq, %arg0, %c0_i32 : i32
    %1 = arith.extui %0 : i1 to i32
    %c0_i32_0 = arith.constant 0 : i32
    %2 = arith.cmpi ne, %1, %c0_i32_0 : i32
    scf.if %2 {
      %cst_11 = arith.constant 0.000000e+00 : f32
      %15 = vector.broadcast %cst_11 : f32 to vector<1x128xf32>
      %c0_12 = arith.constant 0 : index
      %c0_13 = arith.constant 0 : index
      %16 = vector.load %arg2[%c0_12, %c0_13] : memref<1x128xf32, #tpu.memory_space<vmem>>, vector<1x128xf32>
      tpu.vector_store %arg2[%c0_12, %c0_13], %15 {strides = array<i32>} : memref<1x128xf32, #tpu.memory_space<vmem>>, vector<1x128xf32>,
      %cst_14 = arith.constant 0.000000e+00 : f32
      %17 = vector.broadcast %cst_14 : f32 to vector<1x128xf32>
      %c0_15 = arith.constant 0 : index
      %c0_16 = arith.constant 0 : index
      %18 = vector.load %arg3[%c0_15, %c0_16] : memref<1x128xf32, #tpu.memory_space<vmem>>, vector<1x128xf32>
      tpu.vector_store %arg3[%c0_15, %c0_16], %17 {strides = array<i32>} : memref<1x128xf32, #tpu.memory_space<vmem>>, vector<1x128xf32>,
    } else {
    }
    %c0 = arith.constant 0 : index
    %c0_1 = arith.constant 0 : index
    %3 = vector.load %arg1[%c0, %c0_1] : memref<256x128xf32, #tpu.memory_space<vmem>>, vector<256x128xf32>
    %c0_2 = arith.constant 0 : index
    %c0_3 = arith.constant 0 : index
    %4 = vector.load %arg2[%c0_2, %c0_3] : memref<1x128xf32, #tpu.memory_space<vmem>>, vector<1x128xf32>
    %cst = arith.constant dense<0.000000e+00> : vector<128xf32>
    %5 = vector.multi_reduction <add>, %3, %cst [0] : vector<256x128xf32> to vector<128xf32>
    %6 = vector.shape_cast %5 : vector<128xf32> to vector<1x128xf32>
    %7 = arith.addf %4, %6 : vector<1x128xf32>
    %c0_4 = arith.constant 0 : index
    %c0_5 = arith.constant 0 : index
    %8 = vector.load %arg2[%c0_4, %c0_5] : memref<1x128xf32, #tpu.memory_space<vmem>>, vector<1x128xf32>
    tpu.vector_store %arg2[%c0_4, %c0_5], %7 {strides = array<i32>} : memref<1x128xf32, #tpu.memory_space<vmem>>, vector<1x128xf32>,
    %c0_6 = arith.constant 0 : index
    %c0_7 = arith.constant 0 : index
    %9 = vector.load %arg3[%c0_6, %c0_7] : memref<1x128xf32, #tpu.memory_space<vmem>>, vector<1x128xf32>
    %10 = arith.mulf %3, %3 : vector<256x128xf32>
    %cst_8 = arith.constant dense<0.000000e+00> : vector<128xf32>
    %11 = vector.multi_reduction <add>, %10, %cst_8 [0] : vector<256x128xf32> to vector<128xf32>
    %12 = vector.shape_cast %11 : vector<128xf32> to vector<1x128xf32>
    %13 = arith.addf %9, %12 : vector<1x128xf32>
    %c0_9 = arith.constant 0 : index
    %c0_10 = arith.constant 0 : index
    %14 = vector.load %arg3[%c0_9, %c0_10] : memref<1x128xf32, #tpu.memory_space<vmem>>, vector<1x128xf32>
    tpu.vector_store %arg3[%c0_9, %c0_10], %13 {strides = array<i32>} : memref<1x128xf32, #tpu.memory_space<vmem>>, vector<1x128xf32>,
    return
  }
  func.func @transform_0(%arg0: i32) -> (i32, i32) {
    %c0_i32 = arith.constant 0 : i32
    %c0_i32_0 = arith.constant 0 : i32
    return %arg0, %c0_i32 : i32, i32
  }
  func.func @transform_1(%arg0: i32) -> (i32, i32) {
    %c0_i32 = arith.constant 0 : i32
    %c0_i32_0 = arith.constant 0 : i32
    %c0_i32_1 = arith.constant 0 : i32
    return %c0_i32, %c0_i32_0 : i32, i32
  }
  func.func @transform_2(%arg0: i32) -> (i32, i32) {
    %c0_i32 = arith.constant 0 : i32
    %c0_i32_0 = arith.constant 0 : i32
    %c0_i32_1 = arith.constant 0 : i32
    return %c0_i32, %c0_i32_0 : i32, i32
  }
}

module attributes {stable_mosaic.version = 11 : i64} {
  func.func @_affine_act_kernel(%arg0: i32, %arg1: memref<256x128xf32, #tpu.memory_space<vmem>>, %arg2: memref<1x128xf32, #tpu.memory_space<vmem>>, %arg3: memref<1x128xf32, #tpu.memory_space<vmem>>, %arg4: memref<256x128xf32, #tpu.memory_space<vmem>>) attributes {dimension_semantics = [#tpu.dimension_semantics<parallel>], iteration_bounds = array<i64: 1>, scalar_prefetch = 0 : i64, scratch_operands = 0 : i64, tpu.core_type = #tpu.core_type<tc>, window_params = [{transform_indices = @transform_0, window_bounds = array<i64: 256, 128>}, {pipeline_mode = #tpu.pipeline_mode<synchronous>, transform_indices = @transform_1, window_bounds = array<i64: 1, 128>}, {pipeline_mode = #tpu.pipeline_mode<synchronous>, transform_indices = @transform_2, window_bounds = array<i64: 1, 128>}, {transform_indices = @transform_3, window_bounds = array<i64: 256, 128>}]} {
    %c0 = arith.constant 0 : index
    %c0_0 = arith.constant 0 : index
    %0 = vector.load %arg1[%c0, %c0_0] : memref<256x128xf32, #tpu.memory_space<vmem>>, vector<256x128xf32>
    %c0_1 = arith.constant 0 : index
    %c0_2 = arith.constant 0 : index
    %1 = vector.load %arg2[%c0_1, %c0_2] : memref<1x128xf32, #tpu.memory_space<vmem>>, vector<1x128xf32>
    %2 = vector.broadcast %1 : vector<1x128xf32> to vector<256x128xf32>
    %3 = arith.mulf %0, %2 : vector<256x128xf32>
    %c0_3 = arith.constant 0 : index
    %c0_4 = arith.constant 0 : index
    %4 = vector.load %arg3[%c0_3, %c0_4] : memref<1x128xf32, #tpu.memory_space<vmem>>, vector<1x128xf32>
    %5 = vector.broadcast %4 : vector<1x128xf32> to vector<256x128xf32>
    %6 = arith.addf %3, %5 : vector<256x128xf32>
    %cst = arith.constant 0.000000e+00 : f32
    %7 = vector.broadcast %cst : f32 to vector<256x128xf32>
    %8 = arith.cmpf oge, %6, %7 : vector<256x128xf32>
    %cst_5 = arith.constant 2.000000e-01 : f32
    %9 = vector.broadcast %cst_5 : f32 to vector<256x128xf32>
    %10 = arith.mulf %9, %6 : vector<256x128xf32>
    %11 = arith.select %8, %6, %10 : vector<256x128xi1>, vector<256x128xf32>
    %c0_6 = arith.constant 0 : index
    %c0_7 = arith.constant 0 : index
    %12 = vector.load %arg4[%c0_6, %c0_7] : memref<256x128xf32, #tpu.memory_space<vmem>>, vector<256x128xf32>
    tpu.vector_store %arg4[%c0_6, %c0_7], %11 {strides = array<i32>} : memref<256x128xf32, #tpu.memory_space<vmem>>, vector<256x128xf32>,
    return
  }
  func.func @transform_0(%arg0: i32) -> (i32, i32) {
    %c0_i32 = arith.constant 0 : i32
    %c0_i32_0 = arith.constant 0 : i32
    return %arg0, %c0_i32 : i32, i32
  }
  func.func @transform_1(%arg0: i32) -> (i32, i32) {
    %c0_i32 = arith.constant 0 : i32
    %c0_i32_0 = arith.constant 0 : i32
    %c0_i32_1 = arith.constant 0 : i32
    return %c0_i32, %c0_i32_0 : i32, i32
  }
  func.func @transform_2(%arg0: i32) -> (i32, i32) {
    %c0_i32 = arith.constant 0 : i32
    %c0_i32_0 = arith.constant 0 : i32
    %c0_i32_1 = arith.constant 0 : i32
    return %c0_i32, %c0_i32_0 : i32, i32
  }
  func.func @transform_3(%arg0: i32) -> (i32, i32) {
    %c0_i32 = arith.constant 0 : i32
    %c0_i32_0 = arith.constant 0 : i32
    return %arg0, %c0_i32 : i32, i32
  }
}

module attributes {stable_mosaic.version = 11 : i64} {
  func.func @_mm_kernel(%arg0: i32, %arg1: i32, %arg2: i32, %arg3: memref<128x1024xbf16, #tpu.memory_space<vmem>>, %arg4: memref<1024x128xbf16, #tpu.memory_space<vmem>>, %arg5: memref<128x128xf32, #tpu.memory_space<vmem>>, %arg6: memref<128x128xf32, #tpu.memory_space<vmem>>) attributes {dimension_semantics = [#tpu.dimension_semantics<parallel>, #tpu.dimension_semantics<parallel>, #tpu.dimension_semantics<arbitrary>], iteration_bounds = array<i64: 1, 1, 1>, scalar_prefetch = 0 : i64, scratch_operands = 1 : i64, tpu.core_type = #tpu.core_type<tc>, window_params = [{transform_indices = @transform_0, window_bounds = array<i64: 128, 1024>}, {transform_indices = @transform_1, window_bounds = array<i64: 1024, 128>}, {transform_indices = @transform_2, window_bounds = array<i64: 128, 128>}]} {
    %c0_i32 = arith.constant 0 : i32
    %0 = arith.cmpi eq, %arg2, %c0_i32 : i32
    %1 = arith.extui %0 : i1 to i32
    %c0_i32_0 = arith.constant 0 : i32
    %2 = arith.cmpi ne, %1, %c0_i32_0 : i32
    scf.if %2 {
      %cst_10 = arith.constant 0.000000e+00 : f32
      %12 = vector.broadcast %cst_10 : f32 to vector<128x128xf32>
      %c0_11 = arith.constant 0 : index
      %c0_12 = arith.constant 0 : index
      %13 = vector.load %arg6[%c0_11, %c0_12] : memref<128x128xf32, #tpu.memory_space<vmem>>, vector<128x128xf32>
      tpu.vector_store %arg6[%c0_11, %c0_12], %12 {strides = array<i32>} : memref<128x128xf32, #tpu.memory_space<vmem>>, vector<128x128xf32>,
    } else {
    }
    %c0 = arith.constant 0 : index
    %c0_1 = arith.constant 0 : index
    %3 = vector.load %arg6[%c0, %c0_1] : memref<128x128xf32, #tpu.memory_space<vmem>>, vector<128x128xf32>
    %c0_2 = arith.constant 0 : index
    %c0_3 = arith.constant 0 : index
    %4 = vector.load %arg3[%c0_2, %c0_3] : memref<128x1024xbf16, #tpu.memory_space<vmem>>, vector<128x1024xbf16>
    %c0_4 = arith.constant 0 : index
    %c0_5 = arith.constant 0 : index
    %5 = vector.load %arg4[%c0_4, %c0_5] : memref<1024x128xbf16, #tpu.memory_space<vmem>>, vector<1024x128xbf16>
    %cst = arith.constant dense<0.000000e+00> : vector<128x128xf32>
    %6 = tpu.matmul %4, %5, %cst {dimension_numbers = #tpu.dot_dimension_numbers<[1], [0], [0], [1], [0, 0, 1, 1], [], []>} : vector<128x1024xbf16>, vector<1024x128xbf16>, vector<128x128xf32> -> vector<128x128xf32>
    %7 = arith.addf %3, %6 : vector<128x128xf32>
    %c0_6 = arith.constant 0 : index
    %c0_7 = arith.constant 0 : index
    %8 = vector.load %arg6[%c0_6, %c0_7] : memref<128x128xf32, #tpu.memory_space<vmem>>, vector<128x128xf32>
    tpu.vector_store %arg6[%c0_6, %c0_7], %7 {strides = array<i32>} : memref<128x128xf32, #tpu.memory_space<vmem>>, vector<128x128xf32>,
    %c0_i32_8 = arith.constant 0 : i32
    %9 = arith.cmpi eq, %arg2, %c0_i32_8 : i32
    %10 = arith.extui %9 : i1 to i32
    %c0_i32_9 = arith.constant 0 : i32
    %11 = arith.cmpi ne, %10, %c0_i32_9 : i32
    scf.if %11 {
      %c0_10 = arith.constant 0 : index
      %c0_11 = arith.constant 0 : index
      %12 = vector.load %arg6[%c0_10, %c0_11] : memref<128x128xf32, #tpu.memory_space<vmem>>, vector<128x128xf32>
      %c0_12 = arith.constant 0 : index
      %c0_13 = arith.constant 0 : index
      %13 = vector.load %arg5[%c0_12, %c0_13] : memref<128x128xf32, #tpu.memory_space<vmem>>, vector<128x128xf32>
      tpu.vector_store %arg5[%c0_12, %c0_13], %12 {strides = array<i32>} : memref<128x128xf32, #tpu.memory_space<vmem>>, vector<128x128xf32>,
    } else {
    }
    return
  }
  func.func @transform_0(%arg0: i32, %arg1: i32, %arg2: i32) -> (i32, i32) {
    %c0_i32 = arith.constant 0 : i32
    return %arg0, %arg2 : i32, i32
  }
  func.func @transform_1(%arg0: i32, %arg1: i32, %arg2: i32) -> (i32, i32) {
    %c0_i32 = arith.constant 0 : i32
    return %arg2, %arg1 : i32, i32
  }
  func.func @transform_2(%arg0: i32, %arg1: i32, %arg2: i32) -> (i32, i32) {
    %c0_i32 = arith.constant 0 : i32
    return %arg0, %arg1 : i32, i32
  }
}

module attributes {stable_mosaic.version = 11 : i64} {
  func.func @_stats_kernel(%arg0: i32, %arg1: memref<128x128xf32, #tpu.memory_space<vmem>>, %arg2: memref<1x128xf32, #tpu.memory_space<vmem>>, %arg3: memref<1x128xf32, #tpu.memory_space<vmem>>) attributes {dimension_semantics = [#tpu.dimension_semantics<arbitrary>], iteration_bounds = array<i64: 1>, scalar_prefetch = 0 : i64, scratch_operands = 0 : i64, tpu.core_type = #tpu.core_type<tc>, window_params = [{transform_indices = @transform_0, window_bounds = array<i64: 128, 128>}, {pipeline_mode = #tpu.pipeline_mode<synchronous>, transform_indices = @transform_1, window_bounds = array<i64: 1, 128>}, {pipeline_mode = #tpu.pipeline_mode<synchronous>, transform_indices = @transform_2, window_bounds = array<i64: 1, 128>}]} {
    %c0_i32 = arith.constant 0 : i32
    %0 = arith.cmpi eq, %arg0, %c0_i32 : i32
    %1 = arith.extui %0 : i1 to i32
    %c0_i32_0 = arith.constant 0 : i32
    %2 = arith.cmpi ne, %1, %c0_i32_0 : i32
    scf.if %2 {
      %cst_11 = arith.constant 0.000000e+00 : f32
      %15 = vector.broadcast %cst_11 : f32 to vector<1x128xf32>
      %c0_12 = arith.constant 0 : index
      %c0_13 = arith.constant 0 : index
      %16 = vector.load %arg2[%c0_12, %c0_13] : memref<1x128xf32, #tpu.memory_space<vmem>>, vector<1x128xf32>
      tpu.vector_store %arg2[%c0_12, %c0_13], %15 {strides = array<i32>} : memref<1x128xf32, #tpu.memory_space<vmem>>, vector<1x128xf32>,
      %cst_14 = arith.constant 0.000000e+00 : f32
      %17 = vector.broadcast %cst_14 : f32 to vector<1x128xf32>
      %c0_15 = arith.constant 0 : index
      %c0_16 = arith.constant 0 : index
      %18 = vector.load %arg3[%c0_15, %c0_16] : memref<1x128xf32, #tpu.memory_space<vmem>>, vector<1x128xf32>
      tpu.vector_store %arg3[%c0_15, %c0_16], %17 {strides = array<i32>} : memref<1x128xf32, #tpu.memory_space<vmem>>, vector<1x128xf32>,
    } else {
    }
    %c0 = arith.constant 0 : index
    %c0_1 = arith.constant 0 : index
    %3 = vector.load %arg1[%c0, %c0_1] : memref<128x128xf32, #tpu.memory_space<vmem>>, vector<128x128xf32>
    %c0_2 = arith.constant 0 : index
    %c0_3 = arith.constant 0 : index
    %4 = vector.load %arg2[%c0_2, %c0_3] : memref<1x128xf32, #tpu.memory_space<vmem>>, vector<1x128xf32>
    %cst = arith.constant dense<0.000000e+00> : vector<128xf32>
    %5 = vector.multi_reduction <add>, %3, %cst [0] : vector<128x128xf32> to vector<128xf32>
    %6 = vector.shape_cast %5 : vector<128xf32> to vector<1x128xf32>
    %7 = arith.addf %4, %6 : vector<1x128xf32>
    %c0_4 = arith.constant 0 : index
    %c0_5 = arith.constant 0 : index
    %8 = vector.load %arg2[%c0_4, %c0_5] : memref<1x128xf32, #tpu.memory_space<vmem>>, vector<1x128xf32>
    tpu.vector_store %arg2[%c0_4, %c0_5], %7 {strides = array<i32>} : memref<1x128xf32, #tpu.memory_space<vmem>>, vector<1x128xf32>,
    %c0_6 = arith.constant 0 : index
    %c0_7 = arith.constant 0 : index
    %9 = vector.load %arg3[%c0_6, %c0_7] : memref<1x128xf32, #tpu.memory_space<vmem>>, vector<1x128xf32>
    %10 = arith.mulf %3, %3 : vector<128x128xf32>
    %cst_8 = arith.constant dense<0.000000e+00> : vector<128xf32>
    %11 = vector.multi_reduction <add>, %10, %cst_8 [0] : vector<128x128xf32> to vector<128xf32>
    %12 = vector.shape_cast %11 : vector<128xf32> to vector<1x128xf32>
    %13 = arith.addf %9, %12 : vector<1x128xf32>
    %c0_9 = arith.constant 0 : index
    %c0_10 = arith.constant 0 : index
    %14 = vector.load %arg3[%c0_9, %c0_10] : memref<1x128xf32, #tpu.memory_space<vmem>>, vector<1x128xf32>
    tpu.vector_store %arg3[%c0_9, %c0_10], %13 {strides = array<i32>} : memref<1x128xf32, #tpu.memory_space<vmem>>, vector<1x128xf32>,
    return
  }
  func.func @transform_0(%arg0: i32) -> (i32, i32) {
    %c0_i32 = arith.constant 0 : i32
    %c0_i32_0 = arith.constant 0 : i32
    return %arg0, %c0_i32 : i32, i32
  }
  func.func @transform_1(%arg0: i32) -> (i32, i32) {
    %c0_i32 = arith.constant 0 : i32
    %c0_i32_0 = arith.constant 0 : i32
    %c0_i32_1 = arith.constant 0 : i32
    return %c0_i32, %c0_i32_0 : i32, i32
  }
  func.func @transform_2(%arg0: i32) -> (i32, i32) {
    %c0_i32 = arith.constant 0 : i32
    %c0_i32_0 = arith.constant 0 : i32
    %c0_i32_1 = arith.constant 0 : i32
    return %c0_i32, %c0_i32_0 : i32, i32
  }
}

module attributes {stable_mosaic.version = 11 : i64} {
  func.func @_affine_act_kernel(%arg0: i32, %arg1: memref<128x128xf32, #tpu.memory_space<vmem>>, %arg2: memref<1x128xf32, #tpu.memory_space<vmem>>, %arg3: memref<1x128xf32, #tpu.memory_space<vmem>>, %arg4: memref<128x128xf32, #tpu.memory_space<vmem>>) attributes {dimension_semantics = [#tpu.dimension_semantics<parallel>], iteration_bounds = array<i64: 1>, scalar_prefetch = 0 : i64, scratch_operands = 0 : i64, tpu.core_type = #tpu.core_type<tc>, window_params = [{transform_indices = @transform_0, window_bounds = array<i64: 128, 128>}, {pipeline_mode = #tpu.pipeline_mode<synchronous>, transform_indices = @transform_1, window_bounds = array<i64: 1, 128>}, {pipeline_mode = #tpu.pipeline_mode<synchronous>, transform_indices = @transform_2, window_bounds = array<i64: 1, 128>}, {transform_indices = @transform_3, window_bounds = array<i64: 128, 128>}]} {
    %c0 = arith.constant 0 : index
    %c0_0 = arith.constant 0 : index
    %0 = vector.load %arg1[%c0, %c0_0] : memref<128x128xf32, #tpu.memory_space<vmem>>, vector<128x128xf32>
    %c0_1 = arith.constant 0 : index
    %c0_2 = arith.constant 0 : index
    %1 = vector.load %arg2[%c0_1, %c0_2] : memref<1x128xf32, #tpu.memory_space<vmem>>, vector<1x128xf32>
    %2 = vector.broadcast %1 : vector<1x128xf32> to vector<128x128xf32>
    %3 = arith.mulf %0, %2 : vector<128x128xf32>
    %c0_3 = arith.constant 0 : index
    %c0_4 = arith.constant 0 : index
    %4 = vector.load %arg3[%c0_3, %c0_4] : memref<1x128xf32, #tpu.memory_space<vmem>>, vector<1x128xf32>
    %5 = vector.broadcast %4 : vector<1x128xf32> to vector<128x128xf32>
    %6 = arith.addf %3, %5 : vector<128x128xf32>
    %cst = arith.constant 0.000000e+00 : f32
    %7 = vector.broadcast %cst : f32 to vector<128x128xf32>
    %8 = arith.cmpf oge, %6, %7 : vector<128x128xf32>
    %cst_5 = arith.constant 2.000000e-01 : f32
    %9 = vector.broadcast %cst_5 : f32 to vector<128x128xf32>
    %10 = arith.mulf %9, %6 : vector<128x128xf32>
    %11 = arith.select %8, %6, %10 : vector<128x128xi1>, vector<128x128xf32>
    %c0_6 = arith.constant 0 : index
    %c0_7 = arith.constant 0 : index
    %12 = vector.load %arg4[%c0_6, %c0_7] : memref<128x128xf32, #tpu.memory_space<vmem>>, vector<128x128xf32>
    tpu.vector_store %arg4[%c0_6, %c0_7], %11 {strides = array<i32>} : memref<128x128xf32, #tpu.memory_space<vmem>>, vector<128x128xf32>,
    return
  }
  func.func @transform_0(%arg0: i32) -> (i32, i32) {
    %c0_i32 = arith.constant 0 : i32
    %c0_i32_0 = arith.constant 0 : i32
    return %arg0, %c0_i32 : i32, i32
  }
  func.func @transform_1(%arg0: i32) -> (i32, i32) {
    %c0_i32 = arith.constant 0 : i32
    %c0_i32_0 = arith.constant 0 : i32
    %c0_i32_1 = arith.constant 0 : i32
    return %c0_i32, %c0_i32_0 : i32, i32
  }
  func.func @transform_2(%arg0: i32) -> (i32, i32) {
    %c0_i32 = arith.constant 0 : i32
    %c0_i32_0 = arith.constant 0 : i32
    %c0_i32_1 = arith.constant 0 : i32
    return %c0_i32, %c0_i32_0 : i32, i32
  }
  func.func @transform_3(%arg0: i32) -> (i32, i32) {
    %c0_i32 = arith.constant 0 : i32
    %c0_i32_0 = arith.constant 0 : i32
    return %arg0, %c0_i32 : i32, i32
  }
}

module attributes {stable_mosaic.version = 11 : i64} {
  func.func @_affine_act_kernel(%arg0: i32, %arg1: memref<128x128xf32, #tpu.memory_space<vmem>>, %arg2: memref<1x128xf32, #tpu.memory_space<vmem>>, %arg3: memref<1x128xf32, #tpu.memory_space<vmem>>, %arg4: memref<128x128xf32, #tpu.memory_space<vmem>>) attributes {dimension_semantics = [#tpu.dimension_semantics<parallel>], iteration_bounds = array<i64: 1>, scalar_prefetch = 0 : i64, scratch_operands = 0 : i64, tpu.core_type = #tpu.core_type<tc>, window_params = [{transform_indices = @transform_0, window_bounds = array<i64: 128, 128>}, {pipeline_mode = #tpu.pipeline_mode<synchronous>, transform_indices = @transform_1, window_bounds = array<i64: 1, 128>}, {pipeline_mode = #tpu.pipeline_mode<synchronous>, transform_indices = @transform_2, window_bounds = array<i64: 1, 128>}, {transform_indices = @transform_3, window_bounds = array<i64: 128, 128>}]} {
    %c0 = arith.constant 0 : index
    %c0_0 = arith.constant 0 : index
    %0 = vector.load %arg1[%c0, %c0_0] : memref<128x128xf32, #tpu.memory_space<vmem>>, vector<128x128xf32>
    %c0_1 = arith.constant 0 : index
    %c0_2 = arith.constant 0 : index
    %1 = vector.load %arg2[%c0_1, %c0_2] : memref<1x128xf32, #tpu.memory_space<vmem>>, vector<1x128xf32>
    %2 = vector.broadcast %1 : vector<1x128xf32> to vector<128x128xf32>
    %3 = arith.mulf %0, %2 : vector<128x128xf32>
    %c0_3 = arith.constant 0 : index
    %c0_4 = arith.constant 0 : index
    %4 = vector.load %arg3[%c0_3, %c0_4] : memref<1x128xf32, #tpu.memory_space<vmem>>, vector<1x128xf32>
    %5 = vector.broadcast %4 : vector<1x128xf32> to vector<128x128xf32>
    %6 = arith.addf %3, %5 : vector<128x128xf32>
    %cst = arith.constant 0.000000e+00 : f32
    %7 = vector.broadcast %cst : f32 to vector<128x128xf32>
    %8 = arith.maximumf %6, %7 : vector<128x128xf32>
    %c0_5 = arith.constant 0 : index
    %c0_6 = arith.constant 0 : index
    %9 = vector.load %arg4[%c0_5, %c0_6] : memref<128x128xf32, #tpu.memory_space<vmem>>, vector<128x128xf32>
    tpu.vector_store %arg4[%c0_5, %c0_6], %8 {strides = array<i32>} : memref<128x128xf32, #tpu.memory_space<vmem>>, vector<128x128xf32>,
    return
  }
  func.func @transform_0(%arg0: i32) -> (i32, i32) {
    %c0_i32 = arith.constant 0 : i32
    %c0_i32_0 = arith.constant 0 : i32
    return %arg0, %c0_i32 : i32, i32
  }
  func.func @transform_1(%arg0: i32) -> (i32, i32) {
    %c0_i32 = arith.constant 0 : i32
    %c0_i32_0 = arith.constant 0 : i32
    %c0_i32_1 = arith.constant 0 : i32
    return %c0_i32, %c0_i32_0 : i32, i32
  }
  func.func @transform_2(%arg0: i32) -> (i32, i32) {
    %c0_i32 = arith.constant 0 : i32
    %c0_i32_0 = arith.constant 0 : i32
    %c0_i32_1 = arith.constant 0 : i32
    return %c0_i32, %c0_i32_0 : i32, i32
  }
  func.func @transform_3(%arg0: i32) -> (i32, i32) {
    %c0_i32 = arith.constant 0 : i32
    %c0_i32_0 = arith.constant 0 : i32
    return %arg0, %c0_i32 : i32, i32
  }
}

module attributes {stable_mosaic.version = 11 : i64} {
  func.func @_affine_act_kernel(%arg0: i32, %arg1: memref<256x128xf32, #tpu.memory_space<vmem>>, %arg2: memref<1x128xf32, #tpu.memory_space<vmem>>, %arg3: memref<1x128xf32, #tpu.memory_space<vmem>>, %arg4: memref<256x128xf32, #tpu.memory_space<vmem>>) attributes {dimension_semantics = [#tpu.dimension_semantics<parallel>], iteration_bounds = array<i64: 1>, scalar_prefetch = 0 : i64, scratch_operands = 0 : i64, tpu.core_type = #tpu.core_type<tc>, window_params = [{transform_indices = @transform_0, window_bounds = array<i64: 256, 128>}, {pipeline_mode = #tpu.pipeline_mode<synchronous>, transform_indices = @transform_1, window_bounds = array<i64: 1, 128>}, {pipeline_mode = #tpu.pipeline_mode<synchronous>, transform_indices = @transform_2, window_bounds = array<i64: 1, 128>}, {transform_indices = @transform_3, window_bounds = array<i64: 256, 128>}]} {
    %c0 = arith.constant 0 : index
    %c0_0 = arith.constant 0 : index
    %0 = vector.load %arg1[%c0, %c0_0] : memref<256x128xf32, #tpu.memory_space<vmem>>, vector<256x128xf32>
    %c0_1 = arith.constant 0 : index
    %c0_2 = arith.constant 0 : index
    %1 = vector.load %arg2[%c0_1, %c0_2] : memref<1x128xf32, #tpu.memory_space<vmem>>, vector<1x128xf32>
    %2 = vector.broadcast %1 : vector<1x128xf32> to vector<256x128xf32>
    %3 = arith.mulf %0, %2 : vector<256x128xf32>
    %c0_3 = arith.constant 0 : index
    %c0_4 = arith.constant 0 : index
    %4 = vector.load %arg3[%c0_3, %c0_4] : memref<1x128xf32, #tpu.memory_space<vmem>>, vector<1x128xf32>
    %5 = vector.broadcast %4 : vector<1x128xf32> to vector<256x128xf32>
    %6 = arith.addf %3, %5 : vector<256x128xf32>
    %cst = arith.constant 0.000000e+00 : f32
    %7 = vector.broadcast %cst : f32 to vector<256x128xf32>
    %8 = arith.maximumf %6, %7 : vector<256x128xf32>
    %c0_5 = arith.constant 0 : index
    %c0_6 = arith.constant 0 : index
    %9 = vector.load %arg4[%c0_5, %c0_6] : memref<256x128xf32, #tpu.memory_space<vmem>>, vector<256x128xf32>
    tpu.vector_store %arg4[%c0_5, %c0_6], %8 {strides = array<i32>} : memref<256x128xf32, #tpu.memory_space<vmem>>, vector<256x128xf32>,
    return
  }
  func.func @transform_0(%arg0: i32) -> (i32, i32) {
    %c0_i32 = arith.constant 0 : i32
    %c0_i32_0 = arith.constant 0 : i32
    return %arg0, %c0_i32 : i32, i32
  }
  func.func @transform_1(%arg0: i32) -> (i32, i32) {
    %c0_i32 = arith.constant 0 : i32
    %c0_i32_0 = arith.constant 0 : i32
    %c0_i32_1 = arith.constant 0 : i32
    return %c0_i32, %c0_i32_0 : i32, i32
  }
  func.func @transform_2(%arg0: i32) -> (i32, i32) {
    %c0_i32 = arith.constant 0 : i32
    %c0_i32_0 = arith.constant 0 : i32
    %c0_i32_1 = arith.constant 0 : i32
    return %c0_i32, %c0_i32_0 : i32, i32
  }
  func.func @transform_3(%arg0: i32) -> (i32, i32) {
    %c0_i32 = arith.constant 0 : i32
    %c0_i32_0 = arith.constant 0 : i32
    return %arg0, %c0_i32 : i32, i32
  }
}

module attributes {stable_mosaic.version = 11 : i64} {
  func.func @_affine_act_kernel(%arg0: i32, %arg1: memref<512x128xf32, #tpu.memory_space<vmem>>, %arg2: memref<1x128xf32, #tpu.memory_space<vmem>>, %arg3: memref<1x128xf32, #tpu.memory_space<vmem>>, %arg4: memref<512x128xf32, #tpu.memory_space<vmem>>) attributes {dimension_semantics = [#tpu.dimension_semantics<parallel>], iteration_bounds = array<i64: 1>, scalar_prefetch = 0 : i64, scratch_operands = 0 : i64, tpu.core_type = #tpu.core_type<tc>, window_params = [{transform_indices = @transform_0, window_bounds = array<i64: 512, 128>}, {pipeline_mode = #tpu.pipeline_mode<synchronous>, transform_indices = @transform_1, window_bounds = array<i64: 1, 128>}, {pipeline_mode = #tpu.pipeline_mode<synchronous>, transform_indices = @transform_2, window_bounds = array<i64: 1, 128>}, {transform_indices = @transform_3, window_bounds = array<i64: 512, 128>}]} {
    %c0 = arith.constant 0 : index
    %c0_0 = arith.constant 0 : index
    %0 = vector.load %arg1[%c0, %c0_0] : memref<512x128xf32, #tpu.memory_space<vmem>>, vector<512x128xf32>
    %c0_1 = arith.constant 0 : index
    %c0_2 = arith.constant 0 : index
    %1 = vector.load %arg2[%c0_1, %c0_2] : memref<1x128xf32, #tpu.memory_space<vmem>>, vector<1x128xf32>
    %2 = vector.broadcast %1 : vector<1x128xf32> to vector<512x128xf32>
    %3 = arith.mulf %0, %2 : vector<512x128xf32>
    %c0_3 = arith.constant 0 : index
    %c0_4 = arith.constant 0 : index
    %4 = vector.load %arg3[%c0_3, %c0_4] : memref<1x128xf32, #tpu.memory_space<vmem>>, vector<1x128xf32>
    %5 = vector.broadcast %4 : vector<1x128xf32> to vector<512x128xf32>
    %6 = arith.addf %3, %5 : vector<512x128xf32>
    %cst = arith.constant 0.000000e+00 : f32
    %7 = vector.broadcast %cst : f32 to vector<512x128xf32>
    %8 = arith.maximumf %6, %7 : vector<512x128xf32>
    %c0_5 = arith.constant 0 : index
    %c0_6 = arith.constant 0 : index
    %9 = vector.load %arg4[%c0_5, %c0_6] : memref<512x128xf32, #tpu.memory_space<vmem>>, vector<512x128xf32>
    tpu.vector_store %arg4[%c0_5, %c0_6], %8 {strides = array<i32>} : memref<512x128xf32, #tpu.memory_space<vmem>>, vector<512x128xf32>,
    return
  }
  func.func @transform_0(%arg0: i32) -> (i32, i32) {
    %c0_i32 = arith.constant 0 : i32
    %c0_i32_0 = arith.constant 0 : i32
    return %arg0, %c0_i32 : i32, i32
  }
  func.func @transform_1(%arg0: i32) -> (i32, i32) {
    %c0_i32 = arith.constant 0 : i32
    %c0_i32_0 = arith.constant 0 : i32
    %c0_i32_1 = arith.constant 0 : i32
    return %c0_i32, %c0_i32_0 : i32, i32
  }
  func.func @transform_2(%arg0: i32) -> (i32, i32) {
    %c0_i32 = arith.constant 0 : i32
    %c0_i32_0 = arith.constant 0 : i32
    %c0_i32_1 = arith.constant 0 : i32
    return %c0_i32, %c0_i32_0 : i32, i32
  }
  func.func @transform_3(%arg0: i32) -> (i32, i32) {
    %c0_i32 = arith.constant 0 : i32
    %c0_i32_0 = arith.constant 0 : i32
    return %arg0, %c0_i32 : i32, i32
  }
}

module attributes {stable_mosaic.version = 11 : i64} {
  func.func @_affine_act_kernel(%arg0: i32, %arg1: memref<1024x128xf32, #tpu.memory_space<vmem>>, %arg2: memref<1x128xf32, #tpu.memory_space<vmem>>, %arg3: memref<1x128xf32, #tpu.memory_space<vmem>>, %arg4: memref<1024x128xf32, #tpu.memory_space<vmem>>) attributes {dimension_semantics = [#tpu.dimension_semantics<parallel>], iteration_bounds = array<i64: 1>, scalar_prefetch = 0 : i64, scratch_operands = 0 : i64, tpu.core_type = #tpu.core_type<tc>, window_params = [{transform_indices = @transform_0, window_bounds = array<i64: 1024, 128>}, {pipeline_mode = #tpu.pipeline_mode<synchronous>, transform_indices = @transform_1, window_bounds = array<i64: 1, 128>}, {pipeline_mode = #tpu.pipeline_mode<synchronous>, transform_indices = @transform_2, window_bounds = array<i64: 1, 128>}, {transform_indices = @transform_3, window_bounds = array<i64: 1024, 128>}]} {
    %c0 = arith.constant 0 : index
    %c0_0 = arith.constant 0 : index
    %0 = vector.load %arg1[%c0, %c0_0] : memref<1024x128xf32, #tpu.memory_space<vmem>>, vector<1024x128xf32>
    %c0_1 = arith.constant 0 : index
    %c0_2 = arith.constant 0 : index
    %1 = vector.load %arg2[%c0_1, %c0_2] : memref<1x128xf32, #tpu.memory_space<vmem>>, vector<1x128xf32>
    %2 = vector.broadcast %1 : vector<1x128xf32> to vector<1024x128xf32>
    %3 = arith.mulf %0, %2 : vector<1024x128xf32>
    %c0_3 = arith.constant 0 : index
    %c0_4 = arith.constant 0 : index
    %4 = vector.load %arg3[%c0_3, %c0_4] : memref<1x128xf32, #tpu.memory_space<vmem>>, vector<1x128xf32>
    %5 = vector.broadcast %4 : vector<1x128xf32> to vector<1024x128xf32>
    %6 = arith.addf %3, %5 : vector<1024x128xf32>
    %cst = arith.constant 0.000000e+00 : f32
    %7 = vector.broadcast %cst : f32 to vector<1024x128xf32>
    %8 = arith.maximumf %6, %7 : vector<1024x128xf32>
    %c0_5 = arith.constant 0 : index
    %c0_6 = arith.constant 0 : index
    %9 = vector.load %arg4[%c0_5, %c0_6] : memref<1024x128xf32, #tpu.memory_space<vmem>>, vector<1024x128xf32>
    tpu.vector_store %arg4[%c0_5, %c0_6], %8 {strides = array<i32>} : memref<1024x128xf32, #tpu.memory_space<vmem>>, vector<1024x128xf32>,
    return
  }
  func.func @transform_0(%arg0: i32) -> (i32, i32) {
    %c0_i32 = arith.constant 0 : i32
    %c0_i32_0 = arith.constant 0 : i32
    return %arg0, %c0_i32 : i32, i32
  }
  func.func @transform_1(%arg0: i32) -> (i32, i32) {
    %c0_i32 = arith.constant 0 : i32
    %c0_i32_0 = arith.constant 0 : i32
    %c0_i32_1 = arith.constant 0 : i32
    return %c0_i32, %c0_i32_0 : i32, i32
  }
  func.func @transform_2(%arg0: i32) -> (i32, i32) {
    %c0_i32 = arith.constant 0 : i32
    %c0_i32_0 = arith.constant 0 : i32
    %c0_i32_1 = arith.constant 0 : i32
    return %c0_i32, %c0_i32_0 : i32, i32
  }
  func.func @transform_3(%arg0: i32) -> (i32, i32) {
    %c0_i32 = arith.constant 0 : i32
    %c0_i32_0 = arith.constant 0 : i32
    return %arg0, %c0_i32 : i32, i32
  }
}

module attributes {stable_mosaic.version = 11 : i64} {
  func.func @_affine_act_kernel(%arg0: i32, %arg1: memref<512x128xf32, #tpu.memory_space<vmem>>, %arg2: memref<1x128xf32, #tpu.memory_space<vmem>>, %arg3: memref<1x128xf32, #tpu.memory_space<vmem>>, %arg4: memref<512x128xf32, #tpu.memory_space<vmem>>) attributes {dimension_semantics = [#tpu.dimension_semantics<parallel>], iteration_bounds = array<i64: 1>, scalar_prefetch = 0 : i64, scratch_operands = 0 : i64, tpu.core_type = #tpu.core_type<tc>, window_params = [{transform_indices = @transform_0, window_bounds = array<i64: 512, 128>}, {pipeline_mode = #tpu.pipeline_mode<synchronous>, transform_indices = @transform_1, window_bounds = array<i64: 1, 128>}, {pipeline_mode = #tpu.pipeline_mode<synchronous>, transform_indices = @transform_2, window_bounds = array<i64: 1, 128>}, {transform_indices = @transform_3, window_bounds = array<i64: 512, 128>}]} {
    %c0 = arith.constant 0 : index
    %c0_0 = arith.constant 0 : index
    %0 = vector.load %arg1[%c0, %c0_0] : memref<512x128xf32, #tpu.memory_space<vmem>>, vector<512x128xf32>
    %c0_1 = arith.constant 0 : index
    %c0_2 = arith.constant 0 : index
    %1 = vector.load %arg2[%c0_1, %c0_2] : memref<1x128xf32, #tpu.memory_space<vmem>>, vector<1x128xf32>
    %2 = vector.broadcast %1 : vector<1x128xf32> to vector<512x128xf32>
    %3 = arith.mulf %0, %2 : vector<512x128xf32>
    %c0_3 = arith.constant 0 : index
    %c0_4 = arith.constant 0 : index
    %4 = vector.load %arg3[%c0_3, %c0_4] : memref<1x128xf32, #tpu.memory_space<vmem>>, vector<1x128xf32>
    %5 = vector.broadcast %4 : vector<1x128xf32> to vector<512x128xf32>
    %6 = arith.addf %3, %5 : vector<512x128xf32>
    %7 = arith.negf %6 : vector<512x128xf32>
    %8 = math.exp %7 : vector<512x128xf32>
    %cst = arith.constant 1.000000e+00 : f32
    %9 = vector.broadcast %cst : f32 to vector<512x128xf32>
    %10 = arith.addf %9, %8 : vector<512x128xf32>
    %11 = arith.divf %9, %10 : vector<512x128xf32>
    %c0_5 = arith.constant 0 : index
    %c0_6 = arith.constant 0 : index
    %12 = vector.load %arg4[%c0_5, %c0_6] : memref<512x128xf32, #tpu.memory_space<vmem>>, vector<512x128xf32>
    tpu.vector_store %arg4[%c0_5, %c0_6], %11 {strides = array<i32>} : memref<512x128xf32, #tpu.memory_space<vmem>>, vector<512x128xf32>,
    return
  }
  func.func @transform_0(%arg0: i32) -> (i32, i32) {
    %c0_i32 = arith.constant 0 : i32
    %c0_i32_0 = arith.constant 0 : i32
    return %arg0, %c0_i32 : i32, i32
  }
  func.func @transform_1(%arg0: i32) -> (i32, i32) {
    %c0_i32 = arith.constant 0 : i32
    %c0_i32_0 = arith.constant 0 : i32
    %c0_i32_1 = arith.constant 0 : i32
    return %c0_i32, %c0_i32_0 : i32, i32
  }
  func.func @transform_2(%arg0: i32) -> (i32, i32) {
    %c0_i32 = arith.constant 0 : i32
    %c0_i32_0 = arith.constant 0 : i32
    %c0_i32_1 = arith.constant 0 : i32
    return %c0_i32, %c0_i32_0 : i32, i32
  }
  func.func @transform_3(%arg0: i32) -> (i32, i32) {
    %c0_i32 = arith.constant 0 : i32
    %c0_i32_0 = arith.constant 0 : i32
    return %arg0, %c0_i32 : i32, i32
  }
}

</mosaic_0001>

<bundles_post_ra>
// kernel: forward.32
= control target key start
LH: loop header
LB: loop body
LE: loop exit
PB: predicated region body
PF: predicated region fallthrough
CT: control target
= control target key end

     0   :  { %v553_v0 = vmov 0.0   ;;  %s971_s0 = inlined_call_operand.vmem [shape: f32[1024,128], index: 0, kind: input, shape index: {}]   ;;  %s972_s1 = inlined_call_operand.vmem [shape: f32[1,128], index: 1, kind: output, shape index: {0}]   ;;  %s973_s2 = inlined_call_operand.vmem [shape: f32[1,128], index: 2, kind: output, shape index: {1}]  }
   0x1   :  { %14 = vst [vmem:[%s972_s1] sm:$0x1] %v553_v0  ;;  %15 = vst [vmem:[%s973_s2] sm:$0x1] %v553_v0  ;;  %v16_v1 = vld [vmem:[%s971_s0] sm:$0xff]  ;;  %v17_v2 = vld [vmem:[%s971_s0 + $0x8] sm:$0xff] }
   0x2   :  { %v18_v3 = vld [vmem:[%s971_s0 + $0x10] sm:$0xff]  ;;  %v19_v4 = vld [vmem:[%s971_s0 + $0x18] sm:$0xff]  ;;  %v145_v5 = vadd.f32 %v17_v2, %v16_v1  ;;  %v281_v6 = vmul.f32 %v16_v1, %v16_v1  ;;  %v282_v7 = vmul.f32 %v17_v2, %v17_v2  ;;  %v20_v9 = vld [vmem:[%s971_s0 + $0x20] sm:$0xff] }
   0x3   :  { %v283_v8 = vmul.f32 %v18_v3, %v18_v3  ;;  %v284_v11 = vmul.f32 %v19_v4, %v19_v4  ;;  %v21_v13 = vld [vmem:[%s971_s0 + $0x28] sm:$0xff]  ;;  %v285_v15 = vmul.f32 %v20_v9, %v20_v9  ;;  %v22_v17 = vld [vmem:[%s971_s0 + $0x30] sm:$0xff]  ;;  %v23_v21 = vld [vmem:[%s971_s0 + $0x38] sm:$0xff] }
   0x4   :  { %v146_v10 = vadd.f32 %v145_v5, %v18_v3  ;;  %v409_v12 = vadd.f32 %v282_v7, %v281_v6  ;;  %v286_v19 = vmul.f32 %v21_v13, %v21_v13  ;;  %v287_v23 = vmul.f32 %v22_v17, %v22_v17  ;;  %v24_v25 = vld [vmem:[%s971_s0 + $0x40] sm:$0xff]  ;;  %v25_v29 = vld [vmem:[%s971_s0 + $0x48] sm:$0xff]  ;;  %v26_v33 = vld [vmem:[%s971_s0 + $0x50] sm:$0xff] }
   0x5   :  { %v288_v27 = vmul.f32 %v23_v21, %v23_v21  ;;  %v289_v31 = vmul.f32 %v24_v25, %v24_v25  ;;  %v290_v35 = vmul.f32 %v25_v29, %v25_v29  ;;  %v27_v37 = vld [vmem:[%s971_s0 + $0x58] sm:$0xff]  ;;  %v291_v39 = vmul.f32 %v26_v33, %v26_v33  ;;  %v28_v41 = vld [vmem:[%s971_s0 + $0x60] sm:$0xff]  ;;  %v29_v45 = vld [vmem:[%s971_s0 + $0x68] sm:$0xff] }
   0x6   :  { %v147_v14 = vadd.f32 %v146_v10, %v19_v4  ;;  %v410_v16 = vadd.f32 %v409_v12, %v283_v8  ;;  %v292_v43 = vmul.f32 %v27_v37, %v27_v37  ;;  %v293_v47 = vmul.f32 %v28_v41, %v28_v41  ;;  %v30_v49 = vld [vmem:[%s971_s0 + $0x70] sm:$0xff]  ;;  %v31_v53 = vld [vmem:[%s971_s0 + $0x78] sm:$0xff]  ;;  %v32_v57 = vld [vmem:[%s971_s0 + $0x80] sm:$0xff] }
   0x7   :  { %v294_v51 = vmul.f32 %v29_v45, %v29_v45  ;;  %v295_v55 = vmul.f32 %v30_v49, %v30_v49  ;;  %v296_v59 = vmul.f32 %v31_v53, %v31_v53  ;;  %v33_v61 = vld [vmem:[%s971_s0 + $0x88] sm:$0xff]  ;;  %v297_v63 = vmul.f32 %v32_v57, %v32_v57  ;;  %v34_v1 = vld [vmem:[%s971_s0 + $0x90] sm:$0xff]  ;;  %v35_v5 = vld [vmem:[%s971_s0 + $0x98] sm:$0xff] }
   0x8   :  { %v148_v18 = vadd.f32 %v147_v14, %v20_v9  ;;  %v411_v20 = vadd.f32 %v410_v16, %v284_v11  ;;  %v298_v3 = vmul.f32 %v33_v61, %v33_v61  ;;  %v299_v7 = vmul.f32 %v34_v1, %v34_v1  ;;  %v36_v9 = vld [vmem:[%s971_s0 + $0xa0] sm:$0xff] }
   0x9   :  { %v300_v11 = vmul.f32 %v35_v5, %v35_v5 }
   0xa   :  { %v149_v22 = vadd.f32 %v148_v18, %v21_v13  ;;  %v412_v24 = vadd.f32 %v411_v20, %v285_v15  ;;  %v37_v13 = vld [vmem:[%s971_s0 + $0xa8] sm:$0xff]  ;;  %v301_v15 = vmul.f32 %v36_v9, %v36_v9 }
   0xc   :  { %v150_v26 = vadd.f32 %v149_v22, %v22_v17  ;;  %v413_v28 = vadd.f32 %v412_v24, %v286_v19  ;;  %v38_v17 = vld [vmem:[%s971_s0 + $0xb0] sm:$0xff]  ;;  %v302_v19 = vmul.f32 %v37_v13, %v37_v13 }
   0xe   :  { %v151_v30 = vadd.f32 %v150_v26, %v23_v21  ;;  %v414_v32 = vadd.f32 %v413_v28, %v287_v23  ;;  %v39_v21 = vld [vmem:[%s971_s0 + $0xb8] sm:$0xff]  ;;  %v303_v23 = vmul.f32 %v38_v17, %v38_v17 }
  0x10   :  { %v152_v34 = vadd.f32 %v151_v30, %v24_v25  ;;  %v415_v36 = vadd.f32 %v414_v32, %v288_v27  ;;  %v40_v25 = vld [vmem:[%s971_s0 + $0xc0] sm:$0xff]  ;;  %v304_v27 = vmul.f32 %v39_v21, %v39_v21 }
  0x12   :  { %v153_v38 = vadd.f32 %v152_v34, %v25_v29  ;;  %v416_v40 = vadd.f32 %v415_v36, %v289_v31  ;;  %v41_v29 = vld [vmem:[%s971_s0 + $0xc8] sm:$0xff]  ;;  %v305_v31 = vmul.f32 %v40_v25, %v40_v25 }
  0x14   :  { %v154_v42 = vadd.f32 %v153_v38, %v26_v33  ;;  %v417_v44 = vadd.f32 %v416_v40, %v290_v35  ;;  %v42_v33 = vld [vmem:[%s971_s0 + $0xd0] sm:$0xff]  ;;  %v306_v35 = vmul.f32 %v41_v29, %v41_v29 }
  0x16   :  { %v155_v46 = vadd.f32 %v154_v42, %v27_v37  ;;  %v418_v48 = vadd.f32 %v417_v44, %v291_v39  ;;  %v43_v37 = vld [vmem:[%s971_s0 + $0xd8] sm:$0xff]  ;;  %v307_v39 = vmul.f32 %v42_v33, %v42_v33 }
  0x18   :  { %v156_v50 = vadd.f32 %v155_v46, %v28_v41  ;;  %v419_v52 = vadd.f32 %v418_v48, %v292_v43  ;;  %v44_v41 = vld [vmem:[%s971_s0 + $0xe0] sm:$0xff]  ;;  %v308_v43 = vmul.f32 %v43_v37, %v43_v37 }
  0x1a   :  { %v157_v54 = vadd.f32 %v156_v50, %v29_v45  ;;  %v420_v56 = vadd.f32 %v419_v52, %v293_v47  ;;  %v45_v45 = vld [vmem:[%s971_s0 + $0xe8] sm:$0xff]  ;;  %v309_v47 = vmul.f32 %v44_v41, %v44_v41 }
  0x1c   :  { %v158_v58 = vadd.f32 %v157_v54, %v30_v49  ;;  %v421_v60 = vadd.f32 %v420_v56, %v294_v51  ;;  %v46_v49 = vld [vmem:[%s971_s0 + $0xf0] sm:$0xff]  ;;  %v310_v51 = vmul.f32 %v45_v45, %v45_v45 }
  0x1e   :  { %v159_v62 = vadd.f32 %v158_v58, %v31_v53  ;;  %v422_v0 = vadd.f32 %v421_v60, %v295_v55  ;;  %v47_v53 = vld [vmem:[%s971_s0 + $0xf8] sm:$0xff]  ;;  %v311_v55 = vmul.f32 %v46_v49, %v46_v49 }
  0x20   :  { %v160_v2 = vadd.f32 %v159_v62, %v32_v57  ;;  %v423_v4 = vadd.f32 %v422_v0, %v296_v59  ;;  %v48_v57 = vld [vmem:[%s971_s0 + $0x100] sm:$0xff]  ;;  %v312_v59 = vmul.f32 %v47_v53, %v47_v53 }
  0x22   :  { %v161_v6 = vadd.f32 %v160_v2, %v33_v61  ;;  %v424_v8 = vadd.f32 %v423_v4, %v297_v63  ;;  %v49_v61 = vld [vmem:[%s971_s0 + $0x108] sm:$0xff]  ;;  %v313_v63 = vmul.f32 %v48_v57, %v48_v57 }
  0x24   :  { %v162_v10 = vadd.f32 %v161_v6, %v34_v1  ;;  %v425_v12 = vadd.f32 %v424_v8, %v298_v3  ;;  %v50_v1 = vld [vmem:[%s971_s0 + $0x110] sm:$0xff]  ;;  %v314_v3 = vmul.f32 %v49_v61, %v49_v61 }
  0x26   :  { %v163_v14 = vadd.f32 %v162_v10, %v35_v5  ;;  %v426_v16 = vadd.f32 %v425_v12, %v299_v7  ;;  %v51_v5 = vld [vmem:[%s971_s0 + $0x118] sm:$0xff]  ;;  %v315_v7 = vmul.f32 %v50_v1, %v50_v1 }
  0x28   :  { %v164_v18 = vadd.f32 %v163_v14, %v36_v9  ;;  %v427_v20 = vadd.f32 %v426_v16, %v300_v11  ;;  %v52_v9 = vld [vmem:[%s971_s0 + $0x120] sm:$0xff]  ;;  %v316_v11 = vmul.f32 %v51_v5, %v51_v5 }
  0x2a   :  { %v165_v22 = vadd.f32 %v164_v18, %v37_v13  ;;  %v428_v24 = vadd.f32 %v427_v20, %v301_v15  ;;  %v53_v13 = vld [vmem:[%s971_s0 + $0x128] sm:$0xff]  ;;  %v317_v15 = vmul.f32 %v52_v9, %v52_v9 }
  0x2c   :  { %v166_v26 = vadd.f32 %v165_v22, %v38_v17  ;;  %v429_v28 = vadd.f32 %v428_v24, %v302_v19  ;;  %v54_v17 = vld [vmem:[%s971_s0 + $0x130] sm:$0xff]  ;;  %v318_v19 = vmul.f32 %v53_v13, %v53_v13 }
  0x2e   :  { %v167_v30 = vadd.f32 %v166_v26, %v39_v21  ;;  %v430_v32 = vadd.f32 %v429_v28, %v303_v23  ;;  %v55_v21 = vld [vmem:[%s971_s0 + $0x138] sm:$0xff]  ;;  %v319_v23 = vmul.f32 %v54_v17, %v54_v17 }
  0x30   :  { %v168_v34 = vadd.f32 %v167_v30, %v40_v25  ;;  %v431_v36 = vadd.f32 %v430_v32, %v304_v27  ;;  %v56_v25 = vld [vmem:[%s971_s0 + $0x140] sm:$0xff]  ;;  %v320_v27 = vmul.f32 %v55_v21, %v55_v21 }
  0x32   :  { %v169_v38 = vadd.f32 %v168_v34, %v41_v29  ;;  %v432_v40 = vadd.f32 %v431_v36, %v305_v31  ;;  %v57_v29 = vld [vmem:[%s971_s0 + $0x148] sm:$0xff]  ;;  %v321_v31 = vmul.f32 %v56_v25, %v56_v25 }
  0x34   :  { %v170_v42 = vadd.f32 %v169_v38, %v42_v33  ;;  %v433_v44 = vadd.f32 %v432_v40, %v306_v35  ;;  %v58_v33 = vld [vmem:[%s971_s0 + $0x150] sm:$0xff]  ;;  %v322_v35 = vmul.f32 %v57_v29, %v57_v29 }
  0x36   :  { %v171_v46 = vadd.f32 %v170_v42, %v43_v37  ;;  %v434_v48 = vadd.f32 %v433_v44, %v307_v39  ;;  %v59_v37 = vld [vmem:[%s971_s0 + $0x158] sm:$0xff]  ;;  %v323_v39 = vmul.f32 %v58_v33, %v58_v33 }
  0x38   :  { %v172_v50 = vadd.f32 %v171_v46, %v44_v41  ;;  %v435_v52 = vadd.f32 %v434_v48, %v308_v43  ;;  %v60_v41 = vld [vmem:[%s971_s0 + $0x160] sm:$0xff]  ;;  %v324_v43 = vmul.f32 %v59_v37, %v59_v37 }
  0x3a   :  { %v173_v54 = vadd.f32 %v172_v50, %v45_v45  ;;  %v436_v56 = vadd.f32 %v435_v52, %v309_v47  ;;  %v61_v45 = vld [vmem:[%s971_s0 + $0x168] sm:$0xff]  ;;  %v325_v47 = vmul.f32 %v60_v41, %v60_v41 }
  0x3c   :  { %v174_v58 = vadd.f32 %v173_v54, %v46_v49  ;;  %v437_v60 = vadd.f32 %v436_v56, %v310_v51  ;;  %v62_v49 = vld [vmem:[%s971_s0 + $0x170] sm:$0xff]  ;;  %v326_v51 = vmul.f32 %v61_v45, %v61_v45 }
  0x3e   :  { %v175_v62 = vadd.f32 %v174_v58, %v47_v53  ;;  %v438_v0 = vadd.f32 %v437_v60, %v311_v55  ;;  %v63_v53 = vld [vmem:[%s971_s0 + $0x178] sm:$0xff]  ;;  %v327_v55 = vmul.f32 %v62_v49, %v62_v49 }
  0x40   :  { %v176_v2 = vadd.f32 %v175_v62, %v48_v57  ;;  %v439_v4 = vadd.f32 %v438_v0, %v312_v59  ;;  %v64_v57 = vld [vmem:[%s971_s0 + $0x180] sm:$0xff]  ;;  %v328_v59 = vmul.f32 %v63_v53, %v63_v53 }
  0x42   :  { %v177_v6 = vadd.f32 %v176_v2, %v49_v61  ;;  %v440_v8 = vadd.f32 %v439_v4, %v313_v63  ;;  %v65_v61 = vld [vmem:[%s971_s0 + $0x188] sm:$0xff]  ;;  %v329_v63 = vmul.f32 %v64_v57, %v64_v57 }
  0x44   :  { %v178_v10 = vadd.f32 %v177_v6, %v50_v1  ;;  %v441_v12 = vadd.f32 %v440_v8, %v314_v3  ;;  %v66_v1 = vld [vmem:[%s971_s0 + $0x190] sm:$0xff]  ;;  %v330_v3 = vmul.f32 %v65_v61, %v65_v61 }
  0x46   :  { %v179_v14 = vadd.f32 %v178_v10, %v51_v5  ;;  %v442_v16 = vadd.f32 %v441_v12, %v315_v7  ;;  %v67_v5 = vld [vmem:[%s971_s0 + $0x198] sm:$0xff]  ;;  %v331_v7 = vmul.f32 %v66_v1, %v66_v1 }
  0x48   :  { %v180_v18 = vadd.f32 %v179_v14, %v52_v9  ;;  %v443_v20 = vadd.f32 %v442_v16, %v316_v11  ;;  %v68_v9 = vld [vmem:[%s971_s0 + $0x1a0] sm:$0xff]  ;;  %v332_v11 = vmul.f32 %v67_v5, %v67_v5 }
  0x4a   :  { %v181_v22 = vadd.f32 %v180_v18, %v53_v13  ;;  %v444_v24 = vadd.f32 %v443_v20, %v317_v15  ;;  %v69_v13 = vld [vmem:[%s971_s0 + $0x1a8] sm:$0xff]  ;;  %v333_v15 = vmul.f32 %v68_v9, %v68_v9 }
  0x4c   :  { %v182_v26 = vadd.f32 %v181_v22, %v54_v17  ;;  %v445_v28 = vadd.f32 %v444_v24, %v318_v19  ;;  %v70_v17 = vld [vmem:[%s971_s0 + $0x1b0] sm:$0xff]  ;;  %v334_v19 = vmul.f32 %v69_v13, %v69_v13 }
  0x4e   :  { %v183_v30 = vadd.f32 %v182_v26, %v55_v21  ;;  %v446_v32 = vadd.f32 %v445_v28, %v319_v23  ;;  %v71_v21 = vld [vmem:[%s971_s0 + $0x1b8] sm:$0xff]  ;;  %v335_v23 = vmul.f32 %v70_v17, %v70_v17 }
  0x50   :  { %v184_v34 = vadd.f32 %v183_v30, %v56_v25  ;;  %v447_v36 = vadd.f32 %v446_v32, %v320_v27  ;;  %v72_v25 = vld [vmem:[%s971_s0 + $0x1c0] sm:$0xff]  ;;  %v336_v27 = vmul.f32 %v71_v21, %v71_v21 }
  0x52   :  { %v185_v38 = vadd.f32 %v184_v34, %v57_v29  ;;  %v448_v40 = vadd.f32 %v447_v36, %v321_v31  ;;  %v73_v29 = vld [vmem:[%s971_s0 + $0x1c8] sm:$0xff]  ;;  %v337_v31 = vmul.f32 %v72_v25, %v72_v25 }
  0x54   :  { %v186_v42 = vadd.f32 %v185_v38, %v58_v33  ;;  %v449_v44 = vadd.f32 %v448_v40, %v322_v35  ;;  %v74_v33 = vld [vmem:[%s971_s0 + $0x1d0] sm:$0xff]  ;;  %v338_v35 = vmul.f32 %v73_v29, %v73_v29 }
  0x56   :  { %v187_v46 = vadd.f32 %v186_v42, %v59_v37  ;;  %v450_v48 = vadd.f32 %v449_v44, %v323_v39  ;;  %v75_v37 = vld [vmem:[%s971_s0 + $0x1d8] sm:$0xff]  ;;  %v339_v39 = vmul.f32 %v74_v33, %v74_v33 }
  0x58   :  { %v188_v50 = vadd.f32 %v187_v46, %v60_v41  ;;  %v451_v52 = vadd.f32 %v450_v48, %v324_v43  ;;  %v76_v41 = vld [vmem:[%s971_s0 + $0x1e0] sm:$0xff]  ;;  %v340_v43 = vmul.f32 %v75_v37, %v75_v37 }
  0x5a   :  { %v189_v54 = vadd.f32 %v188_v50, %v61_v45  ;;  %v452_v56 = vadd.f32 %v451_v52, %v325_v47  ;;  %v77_v45 = vld [vmem:[%s971_s0 + $0x1e8] sm:$0xff]  ;;  %v341_v47 = vmul.f32 %v76_v41, %v76_v41 }
  0x5c   :  { %v190_v58 = vadd.f32 %v189_v54, %v62_v49  ;;  %v453_v60 = vadd.f32 %v452_v56, %v326_v51  ;;  %v78_v49 = vld [vmem:[%s971_s0 + $0x1f0] sm:$0xff]  ;;  %v342_v51 = vmul.f32 %v77_v45, %v77_v45 }
  0x5e   :  { %v191_v62 = vadd.f32 %v190_v58, %v63_v53  ;;  %v454_v0 = vadd.f32 %v453_v60, %v327_v55  ;;  %v79_v53 = vld [vmem:[%s971_s0 + $0x1f8] sm:$0xff]  ;;  %v343_v55 = vmul.f32 %v78_v49, %v78_v49 }
  0x60   :  { %v192_v2 = vadd.f32 %v191_v62, %v64_v57  ;;  %v455_v4 = vadd.f32 %v454_v0, %v328_v59  ;;  %v80_v57 = vld [vmem:[%s971_s0 + $0x200] sm:$0xff]  ;;  %v344_v59 = vmul.f32 %v79_v53, %v79_v53 }
  0x62   :  { %v193_v6 = vadd.f32 %v192_v2, %v65_v61  ;;  %v456_v8 = vadd.f32 %v455_v4, %v329_v63  ;;  %v81_v61 = vld [vmem:[%s971_s0 + $0x208] sm:$0xff]  ;;  %v345_v63 = vmul.f32 %v80_v57, %v80_v57 }
  0x64   :  { %v194_v10 = vadd.f32 %v193_v6, %v66_v1  ;;  %v457_v12 = vadd.f32 %v456_v8, %v330_v3  ;;  %v82_v1 = vld [vmem:[%s971_s0 + $0x210] sm:$0xff]  ;;  %v346_v3 = vmul.f32 %v81_v61, %v81_v61 }
  0x66   :  { %v195_v14 = vadd.f32 %v194_v10, %v67_v5  ;;  %v458_v16 = vadd.f32 %v457_v12, %v331_v7  ;;  %v83_v5 = vld [vmem:[%s971_s0 + $0x218] sm:$0xff]  ;;  %v347_v7 = vmul.f32 %v82_v1, %v82_v1 }
  0x68   :  { %v196_v18 = vadd.f32 %v195_v14, %v68_v9  ;;  %v459_v20 = vadd.f32 %v458_v16, %v332_v11  ;;  %v84_v9 = vld [vmem:[%s971_s0 + $0x220] sm:$0xff]  ;;  %v348_v11 = vmul.f32 %v83_v5, %v83_v5 }
  0x6a   :  { %v197_v22 = vadd.f32 %v196_v18, %v69_v13  ;;  %v460_v24 = vadd.f32 %v459_v20, %v333_v15  ;;  %v85_v13 = vld [vmem:[%s971_s0 + $0x228] sm:$0xff]  ;;  %v349_v15 = vmul.f32 %v84_v9, %v84_v9 }
  0x6c   :  { %v198_v26 = vadd.f32 %v197_v22, %v70_v17  ;;  %v461_v28 = vadd.f32 %v460_v24, %v334_v19  ;;  %v86_v17 = vld [vmem:[%s971_s0 + $0x230] sm:$0xff]  ;;  %v350_v19 = vmul.f32 %v85_v13, %v85_v13 }
  0x6e   :  { %v199_v30 = vadd.f32 %v198_v26, %v71_v21  ;;  %v462_v32 = vadd.f32 %v461_v28, %v335_v23  ;;  %v87_v21 = vld [vmem:[%s971_s0 + $0x238] sm:$0xff]  ;;  %v351_v23 = vmul.f32 %v86_v17, %v86_v17 }
  0x70   :  { %v200_v34 = vadd.f32 %v199_v30, %v72_v25  ;;  %v463_v36 = vadd.f32 %v462_v32, %v336_v27  ;;  %v88_v25 = vld [vmem:[%s971_s0 + $0x240] sm:$0xff]  ;;  %v352_v27 = vmul.f32 %v87_v21, %v87_v21 }
  0x72   :  { %v201_v38 = vadd.f32 %v200_v34, %v73_v29  ;;  %v464_v40 = vadd.f32 %v463_v36, %v337_v31  ;;  %v89_v29 = vld [vmem:[%s971_s0 + $0x248] sm:$0xff]  ;;  %v353_v31 = vmul.f32 %v88_v25, %v88_v25 }
  0x74   :  { %v202_v42 = vadd.f32 %v201_v38, %v74_v33  ;;  %v465_v44 = vadd.f32 %v464_v40, %v338_v35  ;;  %v90_v33 = vld [vmem:[%s971_s0 + $0x250] sm:$0xff]  ;;  %v354_v35 = vmul.f32 %v89_v29, %v89_v29 }
  0x76   :  { %v203_v46 = vadd.f32 %v202_v42, %v75_v37  ;;  %v466_v48 = vadd.f32 %v465_v44, %v339_v39  ;;  %v91_v37 = vld [vmem:[%s971_s0 + $0x258] sm:$0xff]  ;;  %v355_v39 = vmul.f32 %v90_v33, %v90_v33 }
  0x78   :  { %v204_v50 = vadd.f32 %v203_v46, %v76_v41  ;;  %v467_v52 = vadd.f32 %v466_v48, %v340_v43  ;;  %v92_v41 = vld [vmem:[%s971_s0 + $0x260] sm:$0xff]  ;;  %v356_v43 = vmul.f32 %v91_v37, %v91_v37 }
  0x7a   :  { %v205_v54 = vadd.f32 %v204_v50, %v77_v45  ;;  %v468_v56 = vadd.f32 %v467_v52, %v341_v47  ;;  %v93_v45 = vld [vmem:[%s971_s0 + $0x268] sm:$0xff]  ;;  %v357_v47 = vmul.f32 %v92_v41, %v92_v41 }
  0x7c   :  { %v206_v58 = vadd.f32 %v205_v54, %v78_v49  ;;  %v469_v60 = vadd.f32 %v468_v56, %v342_v51  ;;  %v94_v49 = vld [vmem:[%s971_s0 + $0x270] sm:$0xff]  ;;  %v358_v51 = vmul.f32 %v93_v45, %v93_v45 }
  0x7e   :  { %v207_v62 = vadd.f32 %v206_v58, %v79_v53  ;;  %v470_v0 = vadd.f32 %v469_v60, %v343_v55  ;;  %v95_v53 = vld [vmem:[%s971_s0 + $0x278] sm:$0xff]  ;;  %v359_v55 = vmul.f32 %v94_v49, %v94_v49 }
  0x80   :  { %v208_v2 = vadd.f32 %v207_v62, %v80_v57  ;;  %v471_v4 = vadd.f32 %v470_v0, %v344_v59  ;;  %v96_v57 = vld [vmem:[%s971_s0 + $0x280] sm:$0xff]  ;;  %v360_v59 = vmul.f32 %v95_v53, %v95_v53 }
  0x82   :  { %v209_v6 = vadd.f32 %v208_v2, %v81_v61  ;;  %v472_v8 = vadd.f32 %v471_v4, %v345_v63  ;;  %v97_v61 = vld [vmem:[%s971_s0 + $0x288] sm:$0xff]  ;;  %v361_v63 = vmul.f32 %v96_v57, %v96_v57 }
  0x84   :  { %v210_v10 = vadd.f32 %v209_v6, %v82_v1  ;;  %v473_v12 = vadd.f32 %v472_v8, %v346_v3  ;;  %v98_v1 = vld [vmem:[%s971_s0 + $0x290] sm:$0xff]  ;;  %v362_v3 = vmul.f32 %v97_v61, %v97_v61 }
  0x86   :  { %v211_v14 = vadd.f32 %v210_v10, %v83_v5  ;;  %v474_v16 = vadd.f32 %v473_v12, %v347_v7  ;;  %v99_v5 = vld [vmem:[%s971_s0 + $0x298] sm:$0xff]  ;;  %v363_v7 = vmul.f32 %v98_v1, %v98_v1 }
  0x88   :  { %v212_v18 = vadd.f32 %v211_v14, %v84_v9  ;;  %v475_v20 = vadd.f32 %v474_v16, %v348_v11  ;;  %v100_v9 = vld [vmem:[%s971_s0 + $0x2a0] sm:$0xff]  ;;  %v364_v11 = vmul.f32 %v99_v5, %v99_v5 }
  0x8a   :  { %v213_v22 = vadd.f32 %v212_v18, %v85_v13  ;;  %v476_v24 = vadd.f32 %v475_v20, %v349_v15  ;;  %v101_v13 = vld [vmem:[%s971_s0 + $0x2a8] sm:$0xff]  ;;  %v365_v15 = vmul.f32 %v100_v9, %v100_v9 }
  0x8c   :  { %v214_v26 = vadd.f32 %v213_v22, %v86_v17  ;;  %v477_v28 = vadd.f32 %v476_v24, %v350_v19  ;;  %v102_v17 = vld [vmem:[%s971_s0 + $0x2b0] sm:$0xff]  ;;  %v366_v19 = vmul.f32 %v101_v13, %v101_v13 }
  0x8e   :  { %v215_v30 = vadd.f32 %v214_v26, %v87_v21  ;;  %v478_v32 = vadd.f32 %v477_v28, %v351_v23  ;;  %v103_v21 = vld [vmem:[%s971_s0 + $0x2b8] sm:$0xff]  ;;  %v367_v23 = vmul.f32 %v102_v17, %v102_v17 }
  0x90   :  { %v216_v34 = vadd.f32 %v215_v30, %v88_v25  ;;  %v479_v36 = vadd.f32 %v478_v32, %v352_v27  ;;  %v104_v25 = vld [vmem:[%s971_s0 + $0x2c0] sm:$0xff]  ;;  %v368_v27 = vmul.f32 %v103_v21, %v103_v21 }
  0x92   :  { %v217_v38 = vadd.f32 %v216_v34, %v89_v29  ;;  %v480_v40 = vadd.f32 %v479_v36, %v353_v31  ;;  %v105_v29 = vld [vmem:[%s971_s0 + $0x2c8] sm:$0xff]  ;;  %v369_v31 = vmul.f32 %v104_v25, %v104_v25 }
  0x94   :  { %v218_v42 = vadd.f32 %v217_v38, %v90_v33  ;;  %v481_v44 = vadd.f32 %v480_v40, %v354_v35  ;;  %v106_v33 = vld [vmem:[%s971_s0 + $0x2d0] sm:$0xff]  ;;  %v370_v35 = vmul.f32 %v105_v29, %v105_v29 }
  0x96   :  { %v219_v46 = vadd.f32 %v218_v42, %v91_v37  ;;  %v482_v48 = vadd.f32 %v481_v44, %v355_v39  ;;  %v107_v37 = vld [vmem:[%s971_s0 + $0x2d8] sm:$0xff]  ;;  %v371_v39 = vmul.f32 %v106_v33, %v106_v33 }
  0x98   :  { %v220_v50 = vadd.f32 %v219_v46, %v92_v41  ;;  %v483_v52 = vadd.f32 %v482_v48, %v356_v43  ;;  %v108_v41 = vld [vmem:[%s971_s0 + $0x2e0] sm:$0xff]  ;;  %v372_v43 = vmul.f32 %v107_v37, %v107_v37 }
  0x9a   :  { %v221_v54 = vadd.f32 %v220_v50, %v93_v45  ;;  %v484_v56 = vadd.f32 %v483_v52, %v357_v47  ;;  %v109_v45 = vld [vmem:[%s971_s0 + $0x2e8] sm:$0xff]  ;;  %v373_v47 = vmul.f32 %v108_v41, %v108_v41 }
  0x9c   :  { %v222_v58 = vadd.f32 %v221_v54, %v94_v49  ;;  %v485_v60 = vadd.f32 %v484_v56, %v358_v51  ;;  %v110_v49 = vld [vmem:[%s971_s0 + $0x2f0] sm:$0xff]  ;;  %v374_v51 = vmul.f32 %v109_v45, %v109_v45 }
  0x9e   :  { %v223_v62 = vadd.f32 %v222_v58, %v95_v53  ;;  %v486_v0 = vadd.f32 %v485_v60, %v359_v55  ;;  %v111_v53 = vld [vmem:[%s971_s0 + $0x2f8] sm:$0xff]  ;;  %v375_v55 = vmul.f32 %v110_v49, %v110_v49 }
  0xa0   :  { %v224_v2 = vadd.f32 %v223_v62, %v96_v57  ;;  %v487_v4 = vadd.f32 %v486_v0, %v360_v59  ;;  %v112_v57 = vld [vmem:[%s971_s0 + $0x300] sm:$0xff]  ;;  %v376_v59 = vmul.f32 %v111_v53, %v111_v53 }
  0xa2   :  { %v225_v6 = vadd.f32 %v224_v2, %v97_v61  ;;  %v488_v8 = vadd.f32 %v487_v4, %v361_v63  ;;  %v113_v61 = vld [vmem:[%s971_s0 + $0x308] sm:$0xff]  ;;  %v377_v63 = vmul.f32 %v112_v57, %v112_v57 }
  0xa4   :  { %v226_v10 = vadd.f32 %v225_v6, %v98_v1  ;;  %v489_v12 = vadd.f32 %v488_v8, %v362_v3  ;;  %v114_v1 = vld [vmem:[%s971_s0 + $0x310] sm:$0xff]  ;;  %v378_v3 = vmul.f32 %v113_v61, %v113_v61 }
  0xa6   :  { %v227_v14 = vadd.f32 %v226_v10, %v99_v5  ;;  %v490_v16 = vadd.f32 %v489_v12, %v363_v7  ;;  %v115_v5 = vld [vmem:[%s971_s0 + $0x318] sm:$0xff]  ;;  %v379_v7 = vmul.f32 %v114_v1, %v114_v1 }
  0xa8   :  { %v228_v18 = vadd.f32 %v227_v14, %v100_v9  ;;  %v491_v20 = vadd.f32 %v490_v16, %v364_v11  ;;  %v116_v9 = vld [vmem:[%s971_s0 + $0x320] sm:$0xff]  ;;  %v380_v11 = vmul.f32 %v115_v5, %v115_v5 }
  0xaa   :  { %v229_v22 = vadd.f32 %v228_v18, %v101_v13  ;;  %v492_v24 = vadd.f32 %v491_v20, %v365_v15  ;;  %v117_v13 = vld [vmem:[%s971_s0 + $0x328] sm:$0xff]  ;;  %v381_v15 = vmul.f32 %v116_v9, %v116_v9 }
  0xac   :  { %v230_v26 = vadd.f32 %v229_v22, %v102_v17  ;;  %v493_v28 = vadd.f32 %v492_v24, %v366_v19  ;;  %v118_v17 = vld [vmem:[%s971_s0 + $0x330] sm:$0xff]  ;;  %v382_v19 = vmul.f32 %v117_v13, %v117_v13 }
  0xae   :  { %v231_v30 = vadd.f32 %v230_v26, %v103_v21  ;;  %v494_v32 = vadd.f32 %v493_v28, %v367_v23  ;;  %v119_v21 = vld [vmem:[%s971_s0 + $0x338] sm:$0xff]  ;;  %v383_v23 = vmul.f32 %v118_v17, %v118_v17 }
  0xb0   :  { %v232_v34 = vadd.f32 %v231_v30, %v104_v25  ;;  %v495_v36 = vadd.f32 %v494_v32, %v368_v27  ;;  %v120_v25 = vld [vmem:[%s971_s0 + $0x340] sm:$0xff]  ;;  %v384_v27 = vmul.f32 %v119_v21, %v119_v21 }
  0xb2   :  { %v233_v38 = vadd.f32 %v232_v34, %v105_v29  ;;  %v496_v40 = vadd.f32 %v495_v36, %v369_v31  ;;  %v121_v29 = vld [vmem:[%s971_s0 + $0x348] sm:$0xff]  ;;  %v385_v31 = vmul.f32 %v120_v25, %v120_v25 }
  0xb4   :  { %v234_v42 = vadd.f32 %v233_v38, %v106_v33  ;;  %v497_v44 = vadd.f32 %v496_v40, %v370_v35  ;;  %v122_v33 = vld [vmem:[%s971_s0 + $0x350] sm:$0xff]  ;;  %v386_v35 = vmul.f32 %v121_v29, %v121_v29 }
  0xb6   :  { %v235_v46 = vadd.f32 %v234_v42, %v107_v37  ;;  %v498_v48 = vadd.f32 %v497_v44, %v371_v39  ;;  %v123_v37 = vld [vmem:[%s971_s0 + $0x358] sm:$0xff]  ;;  %v387_v39 = vmul.f32 %v122_v33, %v122_v33 }
  0xb8   :  { %v236_v50 = vadd.f32 %v235_v46, %v108_v41  ;;  %v499_v52 = vadd.f32 %v498_v48, %v372_v43  ;;  %v124_v41 = vld [vmem:[%s971_s0 + $0x360] sm:$0xff]  ;;  %v388_v43 = vmul.f32 %v123_v37, %v123_v37 }
  0xba   :  { %v237_v54 = vadd.f32 %v236_v50, %v109_v45  ;;  %v500_v56 = vadd.f32 %v499_v52, %v373_v47  ;;  %v125_v45 = vld [vmem:[%s971_s0 + $0x368] sm:$0xff]  ;;  %v389_v47 = vmul.f32 %v124_v41, %v124_v41 }
  0xbc   :  { %v238_v58 = vadd.f32 %v237_v54, %v110_v49  ;;  %v501_v60 = vadd.f32 %v500_v56, %v374_v51  ;;  %v126_v49 = vld [vmem:[%s971_s0 + $0x370] sm:$0xff]  ;;  %v390_v51 = vmul.f32 %v125_v45, %v125_v45 }
  0xbe   :  { %v239_v62 = vadd.f32 %v238_v58, %v111_v53  ;;  %v502_v0 = vadd.f32 %v501_v60, %v375_v55  ;;  %v127_v53 = vld [vmem:[%s971_s0 + $0x378] sm:$0xff]  ;;  %v391_v55 = vmul.f32 %v126_v49, %v126_v49 }
  0xc0   :  { %v240_v2 = vadd.f32 %v239_v62, %v112_v57  ;;  %v503_v4 = vadd.f32 %v502_v0, %v376_v59  ;;  %v128_v57 = vld [vmem:[%s971_s0 + $0x380] sm:$0xff]  ;;  %v392_v59 = vmul.f32 %v127_v53, %v127_v53 }
  0xc2   :  { %v241_v6 = vadd.f32 %v240_v2, %v113_v61  ;;  %v504_v8 = vadd.f32 %v503_v4, %v377_v63  ;;  %v129_v61 = vld [vmem:[%s971_s0 + $0x388] sm:$0xff]  ;;  %v393_v63 = vmul.f32 %v128_v57, %v128_v57 }
  0xc4   :  { %v242_v10 = vadd.f32 %v241_v6, %v114_v1  ;;  %v505_v12 = vadd.f32 %v504_v8, %v378_v3  ;;  %v130_v1 = vld [vmem:[%s971_s0 + $0x390] sm:$0xff]  ;;  %v394_v3 = vmul.f32 %v129_v61, %v129_v61 }
  0xc6   :  { %v243_v14 = vadd.f32 %v242_v10, %v115_v5  ;;  %v506_v16 = vadd.f32 %v505_v12, %v379_v7  ;;  %v131_v5 = vld [vmem:[%s971_s0 + $0x398] sm:$0xff]  ;;  %v395_v7 = vmul.f32 %v130_v1, %v130_v1 }
  0xc8   :  { %v244_v18 = vadd.f32 %v243_v14, %v116_v9  ;;  %v507_v20 = vadd.f32 %v506_v16, %v380_v11  ;;  %v132_v9 = vld [vmem:[%s971_s0 + $0x3a0] sm:$0xff]  ;;  %v396_v11 = vmul.f32 %v131_v5, %v131_v5 }
  0xca   :  { %v245_v22 = vadd.f32 %v244_v18, %v117_v13  ;;  %v508_v24 = vadd.f32 %v507_v20, %v381_v15  ;;  %v133_v13 = vld [vmem:[%s971_s0 + $0x3a8] sm:$0xff]  ;;  %v397_v15 = vmul.f32 %v132_v9, %v132_v9 }
  0xcc   :  { %v246_v26 = vadd.f32 %v245_v22, %v118_v17  ;;  %v509_v28 = vadd.f32 %v508_v24, %v382_v19  ;;  %v134_v17 = vld [vmem:[%s971_s0 + $0x3b0] sm:$0xff]  ;;  %v398_v19 = vmul.f32 %v133_v13, %v133_v13 }
  0xce   :  { %v247_v30 = vadd.f32 %v246_v26, %v119_v21  ;;  %v510_v32 = vadd.f32 %v509_v28, %v383_v23  ;;  %v135_v21 = vld [vmem:[%s971_s0 + $0x3b8] sm:$0xff]  ;;  %v399_v23 = vmul.f32 %v134_v17, %v134_v17 }
  0xd0   :  { %v248_v34 = vadd.f32 %v247_v30, %v120_v25  ;;  %v511_v36 = vadd.f32 %v510_v32, %v384_v27  ;;  %v136_v25 = vld [vmem:[%s971_s0 + $0x3c0] sm:$0xff]  ;;  %v400_v27 = vmul.f32 %v135_v21, %v135_v21 }
  0xd2   :  { %v249_v38 = vadd.f32 %v248_v34, %v121_v29  ;;  %v512_v40 = vadd.f32 %v511_v36, %v385_v31  ;;  %v137_v29 = vld [vmem:[%s971_s0 + $0x3c8] sm:$0xff]  ;;  %v401_v31 = vmul.f32 %v136_v25, %v136_v25 }
  0xd4   :  { %v250_v42 = vadd.f32 %v249_v38, %v122_v33  ;;  %v513_v44 = vadd.f32 %v512_v40, %v386_v35  ;;  %v138_v33 = vld [vmem:[%s971_s0 + $0x3d0] sm:$0xff]  ;;  %v402_v35 = vmul.f32 %v137_v29, %v137_v29 }
  0xd6   :  { %v251_v46 = vadd.f32 %v250_v42, %v123_v37  ;;  %v514_v48 = vadd.f32 %v513_v44, %v387_v39  ;;  %v139_v37 = vld [vmem:[%s971_s0 + $0x3d8] sm:$0xff]  ;;  %v403_v39 = vmul.f32 %v138_v33, %v138_v33 }
  0xd8   :  { %v252_v50 = vadd.f32 %v251_v46, %v124_v41  ;;  %v515_v52 = vadd.f32 %v514_v48, %v388_v43  ;;  %v140_v41 = vld [vmem:[%s971_s0 + $0x3e0] sm:$0xff]  ;;  %v404_v43 = vmul.f32 %v139_v37, %v139_v37 }
  0xda   :  { %v253_v54 = vadd.f32 %v252_v50, %v125_v45  ;;  %v516_v56 = vadd.f32 %v515_v52, %v389_v47  ;;  %v141_v45 = vld [vmem:[%s971_s0 + $0x3e8] sm:$0xff]  ;;  %v405_v47 = vmul.f32 %v140_v41, %v140_v41 }
  0xdc   :  { %v254_v58 = vadd.f32 %v253_v54, %v126_v49  ;;  %v517_v60 = vadd.f32 %v516_v56, %v390_v51  ;;  %v142_v49 = vld [vmem:[%s971_s0 + $0x3f0] sm:$0xff]  ;;  %v406_v51 = vmul.f32 %v141_v45, %v141_v45 }
  0xde   :  { %v255_v62 = vadd.f32 %v254_v58, %v127_v53  ;;  %v518_v0 = vadd.f32 %v517_v60, %v391_v55  ;;  %v143_v53 = vld [vmem:[%s971_s0 + $0x3f8] sm:$0xff]  ;;  %v407_v55 = vmul.f32 %v142_v49, %v142_v49 }
  0xdf   :  { %v408_v58 = vmul.f32 %v143_v53, %v143_v53 }
  0xe0   :  { %v256_v2 = vadd.f32 %v255_v62, %v128_v57  ;;  %v519_v4 = vadd.f32 %v518_v0, %v392_v59 }
  0xe2   :  { %v257_v6 = vadd.f32 %v256_v2, %v129_v61  ;;  %v520_v8 = vadd.f32 %v519_v4, %v393_v63 }
  0xe4   :  { %v258_v10 = vadd.f32 %v257_v6, %v130_v1  ;;  %v521_v12 = vadd.f32 %v520_v8, %v394_v3 }
  0xe6   :  { %v259_v14 = vadd.f32 %v258_v10, %v131_v5  ;;  %v522_v16 = vadd.f32 %v521_v12, %v395_v7  ;;  %v144_v7 = vld [vmem:[%s972_s1] sm:$0x1] }
  0xe7   :  { %v280_v12 = vld [vmem:[%s973_s2] sm:$0x1] }
  0xe8   :  { %v260_v18 = vadd.f32 %v259_v14, %v132_v9  ;;  %v523_v20 = vadd.f32 %v522_v16, %v396_v11 }
  0xea   :  { %v261_v22 = vadd.f32 %v260_v18, %v133_v13  ;;  %v524_v24 = vadd.f32 %v523_v20, %v397_v15 }
  0xec   :  { %v262_v26 = vadd.f32 %v261_v22, %v134_v17  ;;  %v525_v28 = vadd.f32 %v524_v24, %v398_v19 }
  0xee   :  { %v263_v30 = vadd.f32 %v262_v26, %v135_v21  ;;  %v526_v32 = vadd.f32 %v525_v28, %v399_v23 }
  0xf0   :  { %v264_v34 = vadd.f32 %v263_v30, %v136_v25  ;;  %v527_v36 = vadd.f32 %v526_v32, %v400_v27 }
  0xf2   :  { %v265_v38 = vadd.f32 %v264_v34, %v137_v29  ;;  %v528_v40 = vadd.f32 %v527_v36, %v401_v31 }
  0xf4   :  { %v266_v42 = vadd.f32 %v265_v38, %v138_v33  ;;  %v529_v44 = vadd.f32 %v528_v40, %v402_v35 }
  0xf6   :  { %v267_v46 = vadd.f32 %v266_v42, %v139_v37  ;;  %v530_v48 = vadd.f32 %v529_v44, %v403_v39 }
  0xf8   :  { %v268_v50 = vadd.f32 %v267_v46, %v140_v41  ;;  %v531_v52 = vadd.f32 %v530_v48, %v404_v43 }
  0xfa   :  { %v269_v54 = vadd.f32 %v268_v50, %v141_v45  ;;  %v532_v56 = vadd.f32 %v531_v52, %v405_v47 }
  0xfc   :  { %v270_v57 = vadd.f32 %v269_v54, %v142_v49  ;;  %v533_v59 = vadd.f32 %v532_v56, %v406_v51 }
  0xfe   :  { %v271_v60 = vadd.f32 %v270_v57, %v143_v53  ;;  %v534_v61 = vadd.f32 %v533_v59, %v407_v55 }
 0x100   :  { %v272_v62 = vrot.slane %v271_v60, 4  ;;  %v535_v63 = vadd.f32 %v534_v61, %v408_v58 }
 0x102   :  { %v273_v0 = vadd.f32 %v272_v62, %v271_v60  ;;  %v536_v1 = vrot.slane %v535_v63, 4 }
 0x104   :  { %v274_v2 = vrot.slane %v273_v0, 2  ;;  %v537_v3 = vadd.f32 %v536_v1, %v535_v63 }
 0x106   :  { %v275_v4 = vadd.f32 %v274_v2, %v273_v0  ;;  %v538_v5 = vrot.slane %v537_v3, 2 }
 0x108   :  { %v276_v6 = vrot.slane %v275_v4, 1  ;;  %v539_v8 = vadd.f32 %v538_v5, %v537_v3 }
 0x10a   :  { %v277_v9 = vadd.f32 %v276_v6, %v275_v4  ;;  %v540_v10 = vrot.slane %v539_v8, 1 }
 0x10c   :  { %v278_v11 = vadd.f32 %v277_v9, %v144_v7  ;;  %v541_v13 = vadd.f32 %v540_v10, %v539_v8 }
 0x10e   :  { %279 = vst [vmem:[%s972_s1] sm:$0x1] %v278_v11  ;;  %v542_v14 = vadd.f32 %v541_v13, %v280_v12 }
 0x110   :  { %543 = vst [vmem:[%s973_s2] sm:$0x1] %v542_v14 }

// kernel: tile.74
= control target key start
LH: loop header
LB: loop body
LE: loop exit
PB: predicated region body
PF: predicated region fallthrough
CT: control target
= control target key end

     0   :  { %s22_s0 = inlined_call_operand.vmem [shape: f32[16], index: 0, kind: input, shape index: {}]   ;;  %s23_s1 = inlined_call_operand.vmem [shape: f32[8,16], index: 1, kind: output, shape index: {}]  }
   0x1   :  { %v4_v0 = vld [vmem:[%s22_s0] ss:$0 sm:$0xff] }
   0x2   :  { %5 = vst [vmem:[%s23_s1] sm:$0xff] %v4_v0 }

// kernel: tile.75
= control target key start
LH: loop header
LB: loop body
LE: loop exit
PB: predicated region body
PF: predicated region fallthrough
CT: control target
= control target key end

     0   :  { %s69_s10 = smov 112   ;;  %s70_s11 = smov 80   ;;  %vm3_vm0 = vcmask 130048   ;;  %vm9_vm1 = vcmask 1048448   ;;  %vm15_vm2 = vcmask 917248   ;;  %vm21_vm3 = vcmask 786048   ;;  %s113_s0 = inlined_call_operand.vmem [shape: f32[8,16], index: 0, kind: input, shape index: {}]   ;;  %s114_s1 = inlined_call_operand.vmem [shape: f32[1,128], index: 1, kind: output, shape index: {}]  }
   0x1   :  { %v55_v0 = vld [vmem:[%s113_s0 + $0x7] sm:$0x1]   ;;  %v57_v1 = vld [vmem:[%s113_s0 + $0x5] sm:$0x1]   ;;  %v56_v2 = vld [vmem:[%s113_s0 + $0x6] sm:$0x1]  }
   0x2   :  { %7 = vrot.lane.b32.xlu0 %v55_v0, %s69_s10  ;;  %19 = vrot.lane.b32.xlu1 %v57_v1, %s70_s11  ;;  %v58_v3 = vld [vmem:[%s113_s0 + $0x4] sm:$0x1]   ;;  %v2_v4 = vld [vmem:[%s113_s0] sm:$0x1]   ;;  %s71_s18 = smov 96   ;;  %s72_s19 = smov 64  }
   0x3   :  { %4 = vst.msk [vmem:[#allocation0] sm:$0x1] %vm3_vm0, %v2_v4   ;;  %v59_v5 = vld [vmem:[%s113_s0 + $0x3] sm:$0x1]   ;;  %v60_v6 = vld [vmem:[%s113_s0 + $0x2] sm:$0x1]  }
   0x4   :  { %s73_s24 = smov 48   ;;  %s74_s25 = smov 32   ;;  %v61_v7 = vld [vmem:[%s113_s0 + $0x1] sm:$0x1]   ;;  %vm27_vm4 = vcmask 654848   ;;  %vm33_vm5 = vcmask 523648  }
   0x5   :  { %s75_s0 = smov 16   ;;  %vm39_vm6 = vcmask 392448   ;;  %vm45_vm7 = vcmask 261248  }
   0x6   :  { %13 = vrot.lane.b32.xlu0 %v56_v2, %s71_s18  ;;  %25 = vrot.lane.b32.xlu1 %v58_v3, %s72_s19 }
   0xa   :  { %31 = vrot.lane.b32.xlu0 %v59_v5, %s73_s24  ;;  %37 = vrot.lane.b32.xlu1 %v60_v6, %s74_s25 }
   0xe   :  { %43 = vrot.lane.b32.xlu0 %v61_v7, %s75_s0 }
  0x74   :  { %v8_v8 = vpop.permute.xlu0 %7   ;;  %v20_v9 = vpop.permute.xlu1 %19  }
  0x75   :  { %10 = vst.msk [vmem:[#allocation0] sm:$0x1] %vm9_vm1, %v8_v8  }
  0x78   :  { %v14_v10 = vpop.permute.xlu0 %13   ;;  %v26_v11 = vpop.permute.xlu1 %25  }
  0x79   :  { %16 = vst.msk [vmem:[#allocation0] sm:$0x1] %vm15_vm2, %v14_v10  }
  0x7a   :  { %22 = vst.msk [vmem:[#allocation0] sm:$0x1] %vm21_vm3, %v20_v9  }
  0x7b   :  { %28 = vst.msk [vmem:[#allocation0] sm:$0x1] %vm27_vm4, %v26_v11  }
  0x7c   :  { %v32_v12 = vpop.permute.xlu0 %31   ;;  %v38_v13 = vpop.permute.xlu1 %37  }
  0x7d   :  { %34 = vst.msk [vmem:[#allocation0] sm:$0x1] %vm33_vm5, %v32_v12  }
  0x7e   :  { %40 = vst.msk [vmem:[#allocation0] sm:$0x1] %vm39_vm6, %v38_v13  }
  0x80   :  { %v44_v14 = vpop.permute.xlu0 %43  }
  0x81   :  { %46 = vst.msk [vmem:[#allocation0] sm:$0x1] %vm45_vm7, %v44_v14  }
  0x88   :  { %v51_v15 = vld [vmem:[#allocation0] sm:$0x1] }
  0x89   :  { %54 = vst [vmem:[%s114_s1] sm:$0x1] %v51_v15 }

// kernel: forward.33
= control target key start
LH: loop header
LB: loop body
LE: loop exit
PB: predicated region body
PF: predicated region fallthrough
CT: control target
= control target key end

     0   :  { %s2010_s0 = inlined_call_operand.vmem [shape: f32[1024,128], index: 0, kind: input, shape index: {}]   ;;  %s2011_s1 = inlined_call_operand.vmem [shape: f32[1,128], index: 1, kind: input, shape index: {}]   ;;  %s2012_s2 = inlined_call_operand.vmem [shape: f32[1,128], index: 2, kind: input, shape index: {}]   ;;  %s2013_s3 = inlined_call_operand.vmem [shape: f32[1024,128], index: 3, kind: output, shape index: {}]  }
   0x1   :  { %v14_v0 = vld [vmem:[%s2010_s0] sm:$0xff]  ;;  %v15_v4 = vld [vmem:[%s2010_s0 + $0x8] sm:$0xff]  ;;  %v16_v5 = vld [vmem:[%s2010_s0 + $0x10] sm:$0xff] }
   0x2   :  { %v958_v1 = vld [vmem:[%s2011_s1] ss:$0 sm:$0xff]  ;;  %v17_v6 = vld [vmem:[%s2010_s0 + $0x18] sm:$0xff]  ;;  %v19_v11 = vld [vmem:[%s2010_s0 + $0x28] sm:$0xff] }
   0x3   :  { %v963_v2 = vld [vmem:[%s2012_s2] ss:$0 sm:$0xff]  ;;  %v149_v3 = vmul.f32 %v958_v1, %v14_v0  ;;  %v150_v7 = vmul.f32 %v958_v1, %v15_v4  ;;  %v151_v8 = vmul.f32 %v958_v1, %v16_v5  ;;  %v152_v9 = vmul.f32 %v958_v1, %v17_v6  ;;  %v20_v12 = vld [vmem:[%s2010_s0 + $0x30] sm:$0xff]  ;;  %v21_v17 = vld [vmem:[%s2010_s0 + $0x38] sm:$0xff] }
   0x4   :  { %v18_v10 = vld [vmem:[%s2010_s0 + $0x20] sm:$0xff]  ;;  %v154_v15 = vmul.f32 %v958_v1, %v19_v11  ;;  %v155_v16 = vmul.f32 %v958_v1, %v20_v12  ;;  %v156_v21 = vmul.f32 %v958_v1, %v21_v17  ;;  %v23_v30 = vld [vmem:[%s2010_s0 + $0x48] sm:$0xff]  ;;  %v24_v31 = vld [vmem:[%s2010_s0 + $0x50] sm:$0xff] }
   0x5   :  { %v284_v13 = vadd.f32 %v963_v2, %v149_v3  ;;  %v153_v14 = vmul.f32 %v958_v1, %v18_v10  ;;  %v285_v18 = vadd.f32 %v963_v2, %v150_v7  ;;  %v286_v19 = vadd.f32 %v963_v2, %v151_v8  ;;  %v22_v25 = vld [vmem:[%s2010_s0 + $0x40] sm:$0xff]  ;;  %v25_v43 = vld [vmem:[%s2010_s0 + $0x58] sm:$0xff]  ;;  %v27_v45 = vld [vmem:[%s2010_s0 + $0x68] sm:$0xff] }
   0x6   :  { %v287_v20 = vadd.f32 %v963_v2, %v152_v9  ;;  %v289_v24 = vadd.f32 %v963_v2, %v154_v15  ;;  %v290_v37 = vadd.f32 %v963_v2, %v155_v16  ;;  %v291_v38 = vadd.f32 %v963_v2, %v156_v21  ;;  %v26_v44 = vld [vmem:[%s2010_s0 + $0x60] sm:$0xff]  ;;  %v28_v56 = vld [vmem:[%s2010_s0 + $0x70] sm:$0xff]  ;;  %v29_v4 = vld [vmem:[%s2010_s0 + $0x78] sm:$0xff] }
   0x7   :  { %vm412_vm0 = vcmp.ge.f32.partialorder %v284_v13, 0.0  ;;  %v540_v22 = vmul.f32 0.2, %v284_v13  ;;  %v288_v23 = vadd.f32 %v963_v2, %v153_v14  ;;  %vm413_vm1 = vcmp.ge.f32.partialorder %v285_v18, 0.0  ;;  %v30_v5 = vld [vmem:[%s2010_s0 + $0x80] sm:$0xff]  ;;  %v31_v9 = vld [vmem:[%s2010_s0 + $0x88] sm:$0xff] }
   0x8   :  { %v541_v26 = vmul.f32 0.2, %v285_v18  ;;  %vm414_vm2 = vcmp.ge.f32.partialorder %v286_v19, 0.0  ;;  %v542_v27 = vmul.f32 0.2, %v286_v19  ;;  %vm415_vm3 = vcmp.ge.f32.partialorder %v287_v20, 0.0 }
   0x9   :  { %v668_v28 = vsel %vm412_vm0, %v284_v13, %v540_v22  ;;  %v543_v29 = vmul.f32 0.2, %v287_v20  ;;  %vm416_vm4 = vcmp.ge.f32.partialorder %v288_v23, 0.0  ;;  %v544_v34 = vmul.f32 0.2, %v288_v23  ;;  %v32_v10 = vld [vmem:[%s2010_s0 + $0x90] sm:$0xff] }
   0xa   :  { %796 = vst [vmem:[%s2013_s3] sm:$0xff] %v668_v28  ;;  %v669_v32 = vsel %vm413_vm1, %v285_v18, %v541_v26  ;;  %v670_v33 = vsel %vm414_vm2, %v286_v19, %v542_v27  ;;  %vm417_vm5 = vcmp.ge.f32.partialorder %v289_v24, 0.0  ;;  %v545_v36 = vmul.f32 0.2, %v289_v24  ;;  %v33_v17 = vld [vmem:[%s2010_s0 + $0x98] sm:$0xff]  ;;  %v34_v18 = vld [vmem:[%s2010_s0 + $0xa0] sm:$0xff] }
   0xb   :  { %797 = vst [vmem:[%s2013_s3 + $0x8] sm:$0xff] %v669_v32  ;;  %798 = vst [vmem:[%s2013_s3 + $0x10] sm:$0xff] %v670_v33  ;;  %v671_v35 = vsel %vm415_vm3, %v287_v20, %v543_v29  ;;  %v672_v39 = vsel %vm416_vm4, %v288_v23, %v544_v34  ;;  %v157_v40 = vmul.f32 %v958_v1, %v22_v25  ;;  %vm418_vm6 = vcmp.ge.f32.partialorder %v290_v37, 0.0  ;;  %v35_v32 = vld [vmem:[%s2010_s0 + $0xa8] sm:$0xff]  ;;  %v36_v33 = vld [vmem:[%s2010_s0 + $0xb0] sm:$0xff] }
   0xc   :  { %799 = vst [vmem:[%s2013_s3 + $0x18] sm:$0xff] %v671_v35  ;;  %v158_v41 = vmul.f32 %v958_v1, %v23_v30  ;;  %v159_v42 = vmul.f32 %v958_v1, %v24_v31  ;;  %800 = vst [vmem:[%s2013_s3 + $0x20] sm:$0xff] %v672_v39  ;;  %v673_v46 = vsel %vm417_vm5, %v289_v24, %v545_v36  ;;  %v546_v47 = vmul.f32 0.2, %v290_v37 }
   0xd   :  { %vm419_vm7 = vcmp.ge.f32.partialorder %v291_v38, 0.0  ;;  %801 = vst [vmem:[%s2013_s3 + $0x28] sm:$0xff] %v673_v46  ;;  %v547_v48 = vmul.f32 0.2, %v291_v38  ;;  %v292_v49 = vadd.f32 %v963_v2, %v157_v40  ;;  %v160_v53 = vmul.f32 %v958_v1, %v25_v43  ;;  %v37_v40 = vld [vmem:[%s2010_s0 + $0xb8] sm:$0xff]  ;;  %v39_v46 = vld [vmem:[%s2010_s0 + $0xc8] sm:$0xff] }
   0xe   :  { %v293_v50 = vadd.f32 %v963_v2, %v158_v41  ;;  %v294_v51 = vadd.f32 %v963_v2, %v159_v42  ;;  %v674_v52 = vsel %vm418_vm6, %v290_v37, %v546_v47  ;;  %v161_v54 = vmul.f32 %v958_v1, %v26_v44  ;;  %v40_v47 = vld [vmem:[%s2010_s0 + $0xd0] sm:$0xff] }
   0xf   :  { %v162_v55 = vmul.f32 %v958_v1, %v27_v45  ;;  %802 = vst [vmem:[%s2013_s3 + $0x30] sm:$0xff] %v674_v52  ;;  %v675_v57 = vsel %vm419_vm7, %v291_v38, %v547_v48  ;;  %vm420_vm8 = vcmp.ge.f32.partialorder %v292_v49, 0.0  ;;  %v548_v58 = vmul.f32 0.2, %v292_v49  ;;  %v38_v45 = vld [vmem:[%s2010_s0 + $0xc0] sm:$0xff] }
  0x10   :  { %vm421_vm9 = vcmp.ge.f32.partialorder %v293_v50, 0.0  ;;  %803 = vst [vmem:[%s2013_s3 + $0x38] sm:$0xff] %v675_v57  ;;  %v549_v59 = vmul.f32 0.2, %v293_v50  ;;  %vm422_vm10 = vcmp.ge.f32.partialorder %v294_v51, 0.0  ;;  %v295_v61 = vadd.f32 %v963_v2, %v160_v53 }
  0x11   :  { %v550_v60 = vmul.f32 0.2, %v294_v51  ;;  %v676_v62 = vsel %vm420_vm8, %v292_v49, %v548_v58  ;;  %v296_v63 = vadd.f32 %v963_v2, %v161_v54  ;;  %v297_v0 = vadd.f32 %v963_v2, %v162_v55  ;;  %v41_v58 = vld [vmem:[%s2010_s0 + $0xd8] sm:$0xff] }
  0x12   :  { %v163_v3 = vmul.f32 %v958_v1, %v28_v56  ;;  %804 = vst [vmem:[%s2013_s3 + $0x40] sm:$0xff] %v676_v62  ;;  %v677_v6 = vsel %vm421_vm9, %v293_v50, %v549_v59  ;;  %vm423_vm11 = vcmp.ge.f32.partialorder %v295_v61, 0.0  ;;  %v551_v8 = vmul.f32 0.2, %v295_v61  ;;  %v42_v59 = vld [vmem:[%s2010_s0 + $0xe0] sm:$0xff] }
  0x13   :  { %v678_v7 = vsel %vm422_vm10, %v294_v51, %v550_v60  ;;  %805 = vst [vmem:[%s2013_s3 + $0x48] sm:$0xff] %v677_v6  ;;  %vm424_vm12 = vcmp.ge.f32.partialorder %v296_v63, 0.0  ;;  %v552_v11 = vmul.f32 0.2, %v296_v63  ;;  %vm425_vm13 = vcmp.ge.f32.partialorder %v297_v0, 0.0 }
  0x14   :  { %806 = vst [vmem:[%s2013_s3 + $0x50] sm:$0xff] %v678_v7  ;;  %v553_v12 = vmul.f32 0.2, %v297_v0  ;;  %v679_v13 = vsel %vm423_vm11, %v295_v61, %v551_v8  ;;  %v298_v14 = vadd.f32 %v963_v2, %v163_v3  ;;  %v164_v15 = vmul.f32 %v958_v1, %v29_v4 }
  0x15   :  { %v165_v16 = vmul.f32 %v958_v1, %v30_v5  ;;  %807 = vst [vmem:[%s2013_s3 + $0x58] sm:$0xff] %v679_v13  ;;  %v680_v19 = vsel %vm424_vm12, %v296_v63, %v552_v11  ;;  %v166_v21 = vmul.f32 %v958_v1, %v31_v9  ;;  %v167_v22 = vmul.f32 %v958_v1, %v32_v10  ;;  %v43_v10 = vld [vmem:[%s2010_s0 + $0xe8] sm:$0xff]  ;;  %v44_v11 = vld [vmem:[%s2010_s0 + $0xf0] sm:$0xff] }
  0x16   :  { %v681_v20 = vsel %vm425_vm13, %v297_v0, %v553_v12  ;;  %808 = vst [vmem:[%s2013_s3 + $0x60] sm:$0xff] %v680_v19  ;;  %vm426_vm14 = vcmp.ge.f32.partialorder %v298_v14, 0.0  ;;  %v554_v23 = vmul.f32 0.2, %v298_v14  ;;  %v299_v24 = vadd.f32 %v963_v2, %v164_v15 }
  0x17   :  { %809 = vst [vmem:[%s2013_s3 + $0x68] sm:$0xff] %v681_v20  ;;  %v300_v25 = vadd.f32 %v963_v2, %v165_v16  ;;  %v301_v26 = vadd.f32 %v963_v2, %v166_v21  ;;  %v302_v27 = vadd.f32 %v963_v2, %v167_v22  ;;  %v168_v28 = vmul.f32 %v958_v1, %v33_v17 }
  0x18   :  { %v169_v29 = vmul.f32 %v958_v1, %v34_v18  ;;  %v682_v30 = vsel %vm426_vm14, %v298_v14, %v554_v23  ;;  %vm427_vm15 = vcmp.ge.f32.partialorder %v299_v24, 0.0  ;;  %v555_v31 = vmul.f32 0.2, %v299_v24  ;;  %v45_v18 = vld [vmem:[%s2010_s0 + $0xf8] sm:$0xff]  ;;  %v46_v23 = vld [vmem:[%s2010_s0 + $0x100] sm:$0xff] }
  0x19   :  { %vm428_vm0 = vcmp.ge.f32.partialorder %v300_v25, 0.0  ;;  %810 = vst [vmem:[%s2013_s3 + $0x70] sm:$0xff] %v682_v30  ;;  %v556_v34 = vmul.f32 0.2, %v300_v25  ;;  %vm429_vm1 = vcmp.ge.f32.partialorder %v301_v26, 0.0  ;;  %vm430_vm2 = vcmp.ge.f32.partialorder %v302_v27, 0.0 }
  0x1a   :  { %v557_v35 = vmul.f32 0.2, %v301_v26  ;;  %v683_v36 = vsel %vm427_vm15, %v299_v24, %v555_v31  ;;  %v558_v37 = vmul.f32 0.2, %v302_v27  ;;  %v303_v38 = vadd.f32 %v963_v2, %v168_v28  ;;  %v47_v24 = vld [vmem:[%s2010_s0 + $0x108] sm:$0xff] }
  0x1b   :  { %v304_v39 = vadd.f32 %v963_v2, %v169_v29  ;;  %811 = vst [vmem:[%s2013_s3 + $0x78] sm:$0xff] %v683_v36  ;;  %v684_v41 = vsel %vm428_vm0, %v300_v25, %v556_v34  ;;  %v170_v43 = vmul.f32 %v958_v1, %v35_v32  ;;  %v171_v44 = vmul.f32 %v958_v1, %v36_v33  ;;  %v48_v25 = vld [vmem:[%s2010_s0 + $0x110] sm:$0xff]  ;;  %v49_v36 = vld [vmem:[%s2010_s0 + $0x118] sm:$0xff] }
  0x1c   :  { %v685_v42 = vsel %vm429_vm1, %v301_v26, %v557_v35  ;;  %812 = vst [vmem:[%s2013_s3 + $0x80] sm:$0xff] %v684_v41  ;;  %v686_v48 = vsel %vm430_vm2, %v302_v27, %v558_v37  ;;  %vm431_vm3 = vcmp.ge.f32.partialorder %v303_v38, 0.0  ;;  %v559_v49 = vmul.f32 0.2, %v303_v38  ;;  %v50_v37 = vld [vmem:[%s2010_s0 + $0x120] sm:$0xff] }
  0x1d   :  { %813 = vst [vmem:[%s2013_s3 + $0x88] sm:$0xff] %v685_v42  ;;  %vm432_vm4 = vcmp.ge.f32.partialorder %v304_v39, 0.0  ;;  %814 = vst [vmem:[%s2013_s3 + $0x90] sm:$0xff] %v686_v48  ;;  %v560_v50 = vmul.f32 0.2, %v304_v39  ;;  %v305_v51 = vadd.f32 %v963_v2, %v170_v43  ;;  %v306_v52 = vadd.f32 %v963_v2, %v171_v44 }
  0x1e   :  { %v172_v53 = vmul.f32 %v958_v1, %v37_v40  ;;  %v687_v54 = vsel %vm431_vm3, %v303_v38, %v559_v49  ;;  %v173_v55 = vmul.f32 %v958_v1, %v38_v45  ;;  %v174_v56 = vmul.f32 %v958_v1, %v39_v46 }
  0x1f   :  { %v175_v57 = vmul.f32 %v958_v1, %v40_v47  ;;  %815 = vst [vmem:[%s2013_s3 + $0x98] sm:$0xff] %v687_v54  ;;  %v688_v60 = vsel %vm432_vm4, %v304_v39, %v560_v50  ;;  %vm433_vm5 = vcmp.ge.f32.partialorder %v305_v51, 0.0  ;;  %v561_v61 = vmul.f32 0.2, %v305_v51  ;;  %v51_v50 = vld [vmem:[%s2010_s0 + $0x128] sm:$0xff] }
  0x20   :  { %vm434_vm6 = vcmp.ge.f32.partialorder %v306_v52, 0.0  ;;  %816 = vst [vmem:[%s2013_s3 + $0xa0] sm:$0xff] %v688_v60  ;;  %v562_v62 = vmul.f32 0.2, %v306_v52  ;;  %v307_v63 = vadd.f32 %v963_v2, %v172_v53  ;;  %v308_v0 = vadd.f32 %v963_v2, %v173_v55 }
  0x21   :  { %v309_v3 = vadd.f32 %v963_v2, %v174_v56  ;;  %v689_v4 = vsel %vm433_vm5, %v305_v51, %v561_v61  ;;  %v310_v5 = vadd.f32 %v963_v2, %v175_v57  ;;  %v176_v6 = vmul.f32 %v958_v1, %v41_v58  ;;  %v52_v51 = vld [vmem:[%s2010_s0 + $0x130] sm:$0xff]  ;;  %v53_v58 = vld [vmem:[%s2010_s0 + $0x138] sm:$0xff] }
  0x22   :  { %v177_v7 = vmul.f32 %v958_v1, %v42_v59  ;;  %817 = vst [vmem:[%s2013_s3 + $0xa8] sm:$0xff] %v689_v4  ;;  %v690_v8 = vsel %vm434_vm6, %v306_v52, %v562_v62  ;;  %vm435_vm7 = vcmp.ge.f32.partialorder %v307_v63, 0.0  ;;  %v563_v9 = vmul.f32 0.2, %v307_v63 }
  0x23   :  { %vm436_vm8 = vcmp.ge.f32.partialorder %v308_v0, 0.0  ;;  %818 = vst [vmem:[%s2013_s3 + $0xb0] sm:$0xff] %v690_v8  ;;  %v564_v12 = vmul.f32 0.2, %v308_v0  ;;  %vm437_vm9 = vcmp.ge.f32.partialorder %v309_v3, 0.0  ;;  %vm438_vm10 = vcmp.ge.f32.partialorder %v310_v5, 0.0 }
  0x24   :  { %v565_v13 = vmul.f32 0.2, %v309_v3  ;;  %v691_v14 = vsel %vm435_vm7, %v307_v63, %v563_v9  ;;  %v566_v15 = vmul.f32 0.2, %v310_v5  ;;  %v311_v16 = vadd.f32 %v963_v2, %v176_v6  ;;  %v54_v63 = vld [vmem:[%s2010_s0 + $0x140] sm:$0xff] }
  0x25   :  { %v312_v17 = vadd.f32 %v963_v2, %v177_v7  ;;  %819 = vst [vmem:[%s2013_s3 + $0xb8] sm:$0xff] %v691_v14  ;;  %v692_v19 = vsel %vm436_vm8, %v308_v0, %v564_v12  ;;  %v178_v21 = vmul.f32 %v958_v1, %v43_v10  ;;  %v179_v22 = vmul.f32 %v958_v1, %v44_v11  ;;  %v55_v0 = vld [vmem:[%s2010_s0 + $0x148] sm:$0xff]  ;;  %v57_v14 = vld [vmem:[%s2010_s0 + $0x158] sm:$0xff] }
  0x26   :  { %v693_v20 = vsel %vm437_vm9, %v309_v3, %v565_v13  ;;  %820 = vst [vmem:[%s2013_s3 + $0xc0] sm:$0xff] %v692_v19  ;;  %v694_v26 = vsel %vm438_vm10, %v310_v5, %v566_v15  ;;  %vm439_vm11 = vcmp.ge.f32.partialorder %v311_v16, 0.0  ;;  %v567_v27 = vmul.f32 0.2, %v311_v16  ;;  %v56_v3 = vld [vmem:[%s2010_s0 + $0x150] sm:$0xff]  ;;  %v58_v15 = vld [vmem:[%s2010_s0 + $0x160] sm:$0xff] }
  0x27   :  { %821 = vst [vmem:[%s2013_s3 + $0xc8] sm:$0xff] %v693_v20  ;;  %vm440_vm12 = vcmp.ge.f32.partialorder %v312_v17, 0.0  ;;  %822 = vst [vmem:[%s2013_s3 + $0xd0] sm:$0xff] %v694_v26  ;;  %v568_v28 = vmul.f32 0.2, %v312_v17  ;;  %v313_v29 = vadd.f32 %v963_v2, %v178_v21  ;;  %v314_v30 = vadd.f32 %v963_v2, %v179_v22 }
  0x28   :  { %v180_v31 = vmul.f32 %v958_v1, %v45_v18  ;;  %v695_v32 = vsel %vm439_vm11, %v311_v16, %v567_v27  ;;  %v181_v33 = vmul.f32 %v958_v1, %v46_v23  ;;  %v182_v34 = vmul.f32 %v958_v1, %v47_v24 }
  0x29   :  { %v183_v35 = vmul.f32 %v958_v1, %v48_v25  ;;  %823 = vst [vmem:[%s2013_s3 + $0xd8] sm:$0xff] %v695_v32  ;;  %v696_v38 = vsel %vm440_vm12, %v312_v17, %v568_v28  ;;  %vm441_vm13 = vcmp.ge.f32.partialorder %v313_v29, 0.0  ;;  %v569_v39 = vmul.f32 0.2, %v313_v29  ;;  %v59_v28 = vld [vmem:[%s2010_s0 + $0x168] sm:$0xff] }
  0x2a   :  { %vm442_vm14 = vcmp.ge.f32.partialorder %v314_v30, 0.0  ;;  %824 = vst [vmem:[%s2013_s3 + $0xe0] sm:$0xff] %v696_v38  ;;  %v570_v40 = vmul.f32 0.2, %v314_v30  ;;  %v315_v41 = vadd.f32 %v963_v2, %v180_v31  ;;  %v316_v42 = vadd.f32 %v963_v2, %v181_v33 }
  0x2b   :  { %v317_v43 = vadd.f32 %v963_v2, %v182_v34  ;;  %v697_v44 = vsel %vm441_vm13, %v313_v29, %v569_v39  ;;  %v318_v45 = vadd.f32 %v963_v2, %v183_v35  ;;  %v184_v46 = vmul.f32 %v958_v1, %v49_v36  ;;  %v60_v29 = vld [vmem:[%s2010_s0 + $0x170] sm:$0xff]  ;;  %v61_v36 = vld [vmem:[%s2010_s0 + $0x178] sm:$0xff] }
  0x2c   :  { %v185_v47 = vmul.f32 %v958_v1, %v50_v37  ;;  %825 = vst [vmem:[%s2013_s3 + $0xe8] sm:$0xff] %v697_v44  ;;  %v698_v48 = vsel %vm442_vm14, %v314_v30, %v570_v40  ;;  %vm443_vm15 = vcmp.ge.f32.partialorder %v315_v41, 0.0  ;;  %v571_v49 = vmul.f32 0.2, %v315_v41 }
  0x2d   :  { %vm444_vm0 = vcmp.ge.f32.partialorder %v316_v42, 0.0  ;;  %826 = vst [vmem:[%s2013_s3 + $0xf0] sm:$0xff] %v698_v48  ;;  %v572_v52 = vmul.f32 0.2, %v316_v42  ;;  %vm445_vm1 = vcmp.ge.f32.partialorder %v317_v43, 0.0  ;;  %vm446_vm2 = vcmp.ge.f32.partialorder %v318_v45, 0.0 }
  0x2e   :  { %v573_v53 = vmul.f32 0.2, %v317_v43  ;;  %v699_v54 = vsel %vm443_vm15, %v315_v41, %v571_v49  ;;  %v574_v55 = vmul.f32 0.2, %v318_v45  ;;  %v319_v56 = vadd.f32 %v963_v2, %v184_v46  ;;  %v62_v41 = vld [vmem:[%s2010_s0 + $0x180] sm:$0xff] }
  0x2f   :  { %v320_v57 = vadd.f32 %v963_v2, %v185_v47  ;;  %827 = vst [vmem:[%s2013_s3 + $0xf8] sm:$0xff] %v699_v54  ;;  %v700_v59 = vsel %vm444_vm0, %v316_v42, %v572_v52  ;;  %v186_v61 = vmul.f32 %v958_v1, %v51_v50  ;;  %v187_v62 = vmul.f32 %v958_v1, %v52_v51  ;;  %v63_v42 = vld [vmem:[%s2010_s0 + $0x188] sm:$0xff]  ;;  %v65_v54 = vld [vmem:[%s2010_s0 + $0x198] sm:$0xff] }
  0x30   :  { %v701_v60 = vsel %vm445_vm1, %v317_v43, %v573_v53  ;;  %828 = vst [vmem:[%s2013_s3 + $0x100] sm:$0xff] %v700_v59  ;;  %v702_v4 = vsel %vm446_vm2, %v318_v45, %v574_v55  ;;  %vm447_vm3 = vcmp.ge.f32.partialorder %v319_v56, 0.0  ;;  %v575_v5 = vmul.f32 0.2, %v319_v56  ;;  %v64_v43 = vld [vmem:[%s2010_s0 + $0x190] sm:$0xff]  ;;  %v66_v55 = vld [vmem:[%s2010_s0 + $0x1a0] sm:$0xff] }
  0x31   :  { %829 = vst [vmem:[%s2013_s3 + $0x108] sm:$0xff] %v701_v60  ;;  %vm448_vm4 = vcmp.ge.f32.partialorder %v320_v57, 0.0  ;;  %830 = vst [vmem:[%s2013_s3 + $0x110] sm:$0xff] %v702_v4  ;;  %v576_v6 = vmul.f32 0.2, %v320_v57  ;;  %v321_v7 = vadd.f32 %v963_v2, %v186_v61  ;;  %v322_v8 = vadd.f32 %v963_v2, %v187_v62 }
  0x32   :  { %v188_v9 = vmul.f32 %v958_v1, %v53_v58  ;;  %v703_v10 = vsel %vm447_vm3, %v319_v56, %v575_v5  ;;  %v189_v11 = vmul.f32 %v958_v1, %v54_v63  ;;  %v190_v12 = vmul.f32 %v958_v1, %v55_v0 }
  0x33   :  { %v191_v13 = vmul.f32 %v958_v1, %v56_v3  ;;  %831 = vst [vmem:[%s2013_s3 + $0x118] sm:$0xff] %v703_v10  ;;  %v704_v16 = vsel %vm448_vm4, %v320_v57, %v576_v6  ;;  %vm449_vm5 = vcmp.ge.f32.partialorder %v321_v7, 0.0  ;;  %v577_v17 = vmul.f32 0.2, %v321_v7  ;;  %v67_v6 = vld [vmem:[%s2010_s0 + $0x1a8] sm:$0xff] }
  0x34   :  { %vm450_vm6 = vcmp.ge.f32.partialorder %v322_v8, 0.0  ;;  %832 = vst [vmem:[%s2013_s3 + $0x120] sm:$0xff] %v704_v16  ;;  %v578_v18 = vmul.f32 0.2, %v322_v8  ;;  %v323_v19 = vadd.f32 %v963_v2, %v188_v9  ;;  %v324_v20 = vadd.f32 %v963_v2, %v189_v11 }
  0x35   :  { %v325_v21 = vadd.f32 %v963_v2, %v190_v12  ;;  %v705_v22 = vsel %vm449_vm5, %v321_v7, %v577_v17  ;;  %v326_v23 = vadd.f32 %v963_v2, %v191_v13  ;;  %v192_v24 = vmul.f32 %v958_v1, %v57_v14  ;;  %v68_v7 = vld [vmem:[%s2010_s0 + $0x1b0] sm:$0xff]  ;;  %v69_v14 = vld [vmem:[%s2010_s0 + $0x1b8] sm:$0xff] }
  0x36   :  { %v193_v25 = vmul.f32 %v958_v1, %v58_v15  ;;  %833 = vst [vmem:[%s2013_s3 + $0x128] sm:$0xff] %v705_v22  ;;  %v706_v26 = vsel %vm450_vm6, %v322_v8, %v578_v18  ;;  %vm451_vm7 = vcmp.ge.f32.partialorder %v323_v19, 0.0  ;;  %v579_v27 = vmul.f32 0.2, %v323_v19 }
  0x37   :  { %vm452_vm8 = vcmp.ge.f32.partialorder %v324_v20, 0.0  ;;  %834 = vst [vmem:[%s2013_s3 + $0x130] sm:$0xff] %v706_v26  ;;  %v580_v30 = vmul.f32 0.2, %v324_v20  ;;  %vm453_vm9 = vcmp.ge.f32.partialorder %v325_v21, 0.0  ;;  %vm454_vm10 = vcmp.ge.f32.partialorder %v326_v23, 0.0 }
  0x38   :  { %v581_v31 = vmul.f32 0.2, %v325_v21  ;;  %v707_v32 = vsel %vm451_vm7, %v323_v19, %v579_v27  ;;  %v582_v33 = vmul.f32 0.2, %v326_v23  ;;  %v327_v34 = vadd.f32 %v963_v2, %v192_v24  ;;  %v70_v19 = vld [vmem:[%s2010_s0 + $0x1c0] sm:$0xff] }
  0x39   :  { %v328_v35 = vadd.f32 %v963_v2, %v193_v25  ;;  %835 = vst [vmem:[%s2013_s3 + $0x138] sm:$0xff] %v707_v32  ;;  %v708_v37 = vsel %vm452_vm8, %v324_v20, %v580_v30  ;;  %v194_v39 = vmul.f32 %v958_v1, %v59_v28  ;;  %v195_v40 = vmul.f32 %v958_v1, %v60_v29  ;;  %v71_v20 = vld [vmem:[%s2010_s0 + $0x1c8] sm:$0xff]  ;;  %v73_v32 = vld [vmem:[%s2010_s0 + $0x1d8] sm:$0xff] }
  0x3a   :  { %v709_v38 = vsel %vm453_vm9, %v325_v21, %v581_v31  ;;  %836 = vst [vmem:[%s2013_s3 + $0x140] sm:$0xff] %v708_v37  ;;  %v710_v44 = vsel %vm454_vm10, %v326_v23, %v582_v33  ;;  %vm455_vm11 = vcmp.ge.f32.partialorder %v327_v34, 0.0  ;;  %v583_v45 = vmul.f32 0.2, %v327_v34  ;;  %v72_v21 = vld [vmem:[%s2010_s0 + $0x1d0] sm:$0xff]  ;;  %v74_v33 = vld [vmem:[%s2010_s0 + $0x1e0] sm:$0xff] }
  0x3b   :  { %837 = vst [vmem:[%s2013_s3 + $0x148] sm:$0xff] %v709_v38  ;;  %vm456_vm12 = vcmp.ge.f32.partialorder %v328_v35, 0.0  ;;  %838 = vst [vmem:[%s2013_s3 + $0x150] sm:$0xff] %v710_v44  ;;  %v584_v46 = vmul.f32 0.2, %v328_v35  ;;  %v329_v47 = vadd.f32 %v963_v2, %v194_v39  ;;  %v330_v48 = vadd.f32 %v963_v2, %v195_v40 }
  0x3c   :  { %v196_v49 = vmul.f32 %v958_v1, %v61_v36  ;;  %v711_v50 = vsel %vm455_vm11, %v327_v34, %v583_v45  ;;  %v197_v51 = vmul.f32 %v958_v1, %v62_v41  ;;  %v198_v52 = vmul.f32 %v958_v1, %v63_v42 }
  0x3d   :  { %v199_v53 = vmul.f32 %v958_v1, %v64_v43  ;;  %839 = vst [vmem:[%s2013_s3 + $0x158] sm:$0xff] %v711_v50  ;;  %v712_v56 = vsel %vm456_vm12, %v328_v35, %v584_v46  ;;  %vm457_vm13 = vcmp.ge.f32.partialorder %v329_v47, 0.0  ;;  %v585_v57 = vmul.f32 0.2, %v329_v47  ;;  %v75_v46 = vld [vmem:[%s2010_s0 + $0x1e8] sm:$0xff] }
  0x3e   :  { %vm458_vm14 = vcmp.ge.f32.partialorder %v330_v48, 0.0  ;;  %840 = vst [vmem:[%s2013_s3 + $0x160] sm:$0xff] %v712_v56  ;;  %v586_v58 = vmul.f32 0.2, %v330_v48  ;;  %v331_v59 = vadd.f32 %v963_v2, %v196_v49  ;;  %v332_v60 = vadd.f32 %v963_v2, %v197_v51 }
  0x3f   :  { %v333_v61 = vadd.f32 %v963_v2, %v198_v52  ;;  %v713_v62 = vsel %vm457_vm13, %v329_v47, %v585_v57  ;;  %v334_v63 = vadd.f32 %v963_v2, %v199_v53  ;;  %v200_v0 = vmul.f32 %v958_v1, %v65_v54  ;;  %v76_v47 = vld [vmem:[%s2010_s0 + $0x1f0] sm:$0xff]  ;;  %v77_v54 = vld [vmem:[%s2010_s0 + $0x1f8] sm:$0xff] }
  0x40   :  { %v201_v3 = vmul.f32 %v958_v1, %v66_v55  ;;  %841 = vst [vmem:[%s2013_s3 + $0x168] sm:$0xff] %v713_v62  ;;  %v714_v4 = vsel %vm458_vm14, %v330_v48, %v586_v58  ;;  %vm459_vm15 = vcmp.ge.f32.partialorder %v331_v59, 0.0  ;;  %v587_v5 = vmul.f32 0.2, %v331_v59 }
  0x41   :  { %vm460_vm0 = vcmp.ge.f32.partialorder %v332_v60, 0.0  ;;  %842 = vst [vmem:[%s2013_s3 + $0x170] sm:$0xff] %v714_v4  ;;  %v588_v8 = vmul.f32 0.2, %v332_v60  ;;  %vm461_vm1 = vcmp.ge.f32.partialorder %v333_v61, 0.0  ;;  %vm462_vm2 = vcmp.ge.f32.partialorder %v334_v63, 0.0 }
  0x42   :  { %v589_v9 = vmul.f32 0.2, %v333_v61  ;;  %v715_v10 = vsel %vm459_vm15, %v331_v59, %v587_v5  ;;  %v590_v11 = vmul.f32 0.2, %v334_v63  ;;  %v335_v12 = vadd.f32 %v963_v2, %v200_v0  ;;  %v78_v59 = vld [vmem:[%s2010_s0 + $0x200] sm:$0xff] }
  0x43   :  { %v336_v13 = vadd.f32 %v963_v2, %v201_v3  ;;  %843 = vst [vmem:[%s2013_s3 + $0x178] sm:$0xff] %v715_v10  ;;  %v716_v15 = vsel %vm460_vm0, %v332_v60, %v588_v8  ;;  %v202_v17 = vmul.f32 %v958_v1, %v67_v6  ;;  %v203_v18 = vmul.f32 %v958_v1, %v68_v7  ;;  %v79_v60 = vld [vmem:[%s2010_s0 + $0x208] sm:$0xff]  ;;  %v81_v10 = vld [vmem:[%s2010_s0 + $0x218] sm:$0xff] }
  0x44   :  { %v717_v16 = vsel %vm461_vm1, %v333_v61, %v589_v9  ;;  %844 = vst [vmem:[%s2013_s3 + $0x180] sm:$0xff] %v716_v15  ;;  %v718_v22 = vsel %vm462_vm2, %v334_v63, %v590_v11  ;;  %vm463_vm3 = vcmp.ge.f32.partialorder %v335_v12, 0.0  ;;  %v591_v23 = vmul.f32 0.2, %v335_v12  ;;  %v80_v61 = vld [vmem:[%s2010_s0 + $0x210] sm:$0xff]  ;;  %v82_v11 = vld [vmem:[%s2010_s0 + $0x220] sm:$0xff] }
  0x45   :  { %845 = vst [vmem:[%s2013_s3 + $0x188] sm:$0xff] %v717_v16  ;;  %vm464_vm4 = vcmp.ge.f32.partialorder %v336_v13, 0.0  ;;  %846 = vst [vmem:[%s2013_s3 + $0x190] sm:$0xff] %v718_v22  ;;  %v592_v24 = vmul.f32 0.2, %v336_v13  ;;  %v337_v25 = vadd.f32 %v963_v2, %v202_v17  ;;  %v338_v26 = vadd.f32 %v963_v2, %v203_v18 }
  0x46   :  { %v204_v27 = vmul.f32 %v958_v1, %v69_v14  ;;  %v719_v28 = vsel %vm463_vm3, %v335_v12, %v591_v23  ;;  %v205_v29 = vmul.f32 %v958_v1, %v70_v19  ;;  %v206_v30 = vmul.f32 %v958_v1, %v71_v20 }
  0x47   :  { %v207_v31 = vmul.f32 %v958_v1, %v72_v21  ;;  %847 = vst [vmem:[%s2013_s3 + $0x198] sm:$0xff] %v719_v28  ;;  %v720_v34 = vsel %vm464_vm4, %v336_v13, %v592_v24  ;;  %vm465_vm5 = vcmp.ge.f32.partialorder %v337_v25, 0.0  ;;  %v593_v35 = vmul.f32 0.2, %v337_v25  ;;  %v83_v24 = vld [vmem:[%s2010_s0 + $0x228] sm:$0xff] }
  0x48   :  { %vm466_vm6 = vcmp.ge.f32.partialorder %v338_v26, 0.0  ;;  %848 = vst [vmem:[%s2013_s3 + $0x1a0] sm:$0xff] %v720_v34  ;;  %v594_v36 = vmul.f32 0.2, %v338_v26  ;;  %v339_v37 = vadd.f32 %v963_v2, %v204_v27  ;;  %v340_v38 = vadd.f32 %v963_v2, %v205_v29 }
  0x49   :  { %v341_v39 = vadd.f32 %v963_v2, %v206_v30  ;;  %v721_v40 = vsel %vm465_vm5, %v337_v25, %v593_v35  ;;  %v342_v41 = vadd.f32 %v963_v2, %v207_v31  ;;  %v208_v42 = vmul.f32 %v958_v1, %v73_v32  ;;  %v84_v25 = vld [vmem:[%s2010_s0 + $0x230] sm:$0xff]  ;;  %v85_v32 = vld [vmem:[%s2010_s0 + $0x238] sm:$0xff] }
  0x4a   :  { %v209_v43 = vmul.f32 %v958_v1, %v74_v33  ;;  %849 = vst [vmem:[%s2013_s3 + $0x1a8] sm:$0xff] %v721_v40  ;;  %v722_v44 = vsel %vm466_vm6, %v338_v26, %v594_v36  ;;  %vm467_vm7 = vcmp.ge.f32.partialorder %v339_v37, 0.0  ;;  %v595_v45 = vmul.f32 0.2, %v339_v37 }
  0x4b   :  { %vm468_vm8 = vcmp.ge.f32.partialorder %v340_v38, 0.0  ;;  %850 = vst [vmem:[%s2013_s3 + $0x1b0] sm:$0xff] %v722_v44  ;;  %v596_v48 = vmul.f32 0.2, %v340_v38  ;;  %vm469_vm9 = vcmp.ge.f32.partialorder %v341_v39, 0.0  ;;  %vm470_vm10 = vcmp.ge.f32.partialorder %v342_v41, 0.0 }
  0x4c   :  { %v597_v49 = vmul.f32 0.2, %v341_v39  ;;  %v723_v50 = vsel %vm467_vm7, %v339_v37, %v595_v45  ;;  %v598_v51 = vmul.f32 0.2, %v342_v41  ;;  %v343_v52 = vadd.f32 %v963_v2, %v208_v42  ;;  %v86_v37 = vld [vmem:[%s2010_s0 + $0x240] sm:$0xff] }
  0x4d   :  { %v344_v53 = vadd.f32 %v963_v2, %v209_v43  ;;  %851 = vst [vmem:[%s2013_s3 + $0x1b8] sm:$0xff] %v723_v50  ;;  %v724_v55 = vsel %vm468_vm8, %v340_v38, %v596_v48  ;;  %v210_v57 = vmul.f32 %v958_v1, %v75_v46  ;;  %v211_v58 = vmul.f32 %v958_v1, %v76_v47  ;;  %v87_v38 = vld [vmem:[%s2010_s0 + $0x248] sm:$0xff]  ;;  %v89_v50 = vld [vmem:[%s2010_s0 + $0x258] sm:$0xff] }
  0x4e   :  { %v725_v56 = vsel %vm469_vm9, %v341_v39, %v597_v49  ;;  %852 = vst [vmem:[%s2013_s3 + $0x1c0] sm:$0xff] %v724_v55  ;;  %v726_v62 = vsel %vm470_vm10, %v342_v41, %v598_v51  ;;  %vm471_vm11 = vcmp.ge.f32.partialorder %v343_v52, 0.0  ;;  %v599_v63 = vmul.f32 0.2, %v343_v52  ;;  %v88_v39 = vld [vmem:[%s2010_s0 + $0x250] sm:$0xff]  ;;  %v90_v51 = vld [vmem:[%s2010_s0 + $0x260] sm:$0xff] }
  0x4f   :  { %853 = vst [vmem:[%s2013_s3 + $0x1c8] sm:$0xff] %v725_v56  ;;  %vm472_vm12 = vcmp.ge.f32.partialorder %v344_v53, 0.0  ;;  %854 = vst [vmem:[%s2013_s3 + $0x1d0] sm:$0xff] %v726_v62  ;;  %v600_v0 = vmul.f32 0.2, %v344_v53  ;;  %v345_v3 = vadd.f32 %v963_v2, %v210_v57  ;;  %v346_v4 = vadd.f32 %v963_v2, %v211_v58 }
  0x50   :  { %v212_v5 = vmul.f32 %v958_v1, %v77_v54  ;;  %v727_v6 = vsel %vm471_vm11, %v343_v52, %v599_v63  ;;  %v213_v7 = vmul.f32 %v958_v1, %v78_v59  ;;  %v214_v8 = vmul.f32 %v958_v1, %v79_v60 }
  0x51   :  { %v215_v9 = vmul.f32 %v958_v1, %v80_v61  ;;  %855 = vst [vmem:[%s2013_s3 + $0x1d8] sm:$0xff] %v727_v6  ;;  %v728_v12 = vsel %vm472_vm12, %v344_v53, %v600_v0  ;;  %vm473_vm13 = vcmp.ge.f32.partialorder %v345_v3, 0.0  ;;  %v601_v13 = vmul.f32 0.2, %v345_v3  ;;  %v91_v0 = vld [vmem:[%s2010_s0 + $0x268] sm:$0xff] }
  0x52   :  { %vm474_vm14 = vcmp.ge.f32.partialorder %v346_v4, 0.0  ;;  %856 = vst [vmem:[%s2013_s3 + $0x1e0] sm:$0xff] %v728_v12  ;;  %v602_v14 = vmul.f32 0.2, %v346_v4  ;;  %v347_v15 = vadd.f32 %v963_v2, %v212_v5  ;;  %v348_v16 = vadd.f32 %v963_v2, %v213_v7  ;;  %v1575_v6 = vld [vmem:[%s2012_s2] ss:$0 sm:$0xff] }
  0x53   :  { %v349_v17 = vadd.f32 %v963_v2, %v214_v8  ;;  %v729_v18 = vsel %vm473_vm13, %v345_v3, %v601_v13  ;;  %v350_v19 = vadd.f32 %v963_v2, %v215_v9  ;;  %v216_v20 = vmul.f32 %v958_v1, %v81_v10  ;;  %v93_v9 = vld [vmem:[%s2010_s0 + $0x278] sm:$0xff]  ;;  %v1588_v12 = vld [vmem:[%s2011_s1] ss:$0 sm:$0xff] }
  0x54   :  { %v217_v21 = vmul.f32 %v958_v1, %v82_v11  ;;  %857 = vst [vmem:[%s2013_s3 + $0x1e8] sm:$0xff] %v729_v18  ;;  %v730_v22 = vsel %vm474_vm14, %v346_v4, %v602_v14  ;;  %vm475_vm15 = vcmp.ge.f32.partialorder %v347_v15, 0.0  ;;  %v603_v23 = vmul.f32 0.2, %v347_v15 }
  0x55   :  { %vm476_vm0 = vcmp.ge.f32.partialorder %v348_v16, 0.0  ;;  %858 = vst [vmem:[%s2013_s3 + $0x1f0] sm:$0xff] %v730_v22  ;;  %v604_v26 = vmul.f32 0.2, %v348_v16  ;;  %vm477_vm1 = vcmp.ge.f32.partialorder %v349_v17, 0.0  ;;  %vm478_vm2 = vcmp.ge.f32.partialorder %v350_v19, 0.0 }
  0x56   :  { %v605_v27 = vmul.f32 0.2, %v349_v17  ;;  %v731_v28 = vsel %vm475_vm15, %v347_v15, %v603_v23  ;;  %v606_v29 = vmul.f32 0.2, %v350_v19  ;;  %v351_v30 = vadd.f32 %v963_v2, %v216_v20  ;;  %v94_v15 = vld [vmem:[%s2010_s0 + $0x280] sm:$0xff] }
  0x57   :  { %v352_v31 = vadd.f32 %v963_v2, %v217_v21  ;;  %859 = vst [vmem:[%s2013_s3 + $0x1f8] sm:$0xff] %v731_v28  ;;  %v732_v33 = vsel %vm476_vm0, %v348_v16, %v604_v26  ;;  %v218_v35 = vmul.f32 %v958_v1, %v83_v24  ;;  %v219_v36 = vmul.f32 %v958_v1, %v84_v25  ;;  %v95_v16 = vld [vmem:[%s2010_s0 + $0x288] sm:$0xff]  ;;  %v97_v28 = vld [vmem:[%s2010_s0 + $0x298] sm:$0xff] }
  0x58   :  { %v733_v34 = vsel %vm477_vm1, %v349_v17, %v605_v27  ;;  %860 = vst [vmem:[%s2013_s3 + $0x200] sm:$0xff] %v732_v33  ;;  %v734_v40 = vsel %vm478_vm2, %v350_v19, %v606_v29  ;;  %vm479_vm3 = vcmp.ge.f32.partialorder %v351_v30, 0.0  ;;  %v607_v41 = vmul.f32 0.2, %v351_v30  ;;  %v96_v17 = vld [vmem:[%s2010_s0 + $0x290] sm:$0xff]  ;;  %v98_v29 = vld [vmem:[%s2010_s0 + $0x2a0] sm:$0xff] }
  0x59   :  { %861 = vst [vmem:[%s2013_s3 + $0x208] sm:$0xff] %v733_v34  ;;  %vm480_vm4 = vcmp.ge.f32.partialorder %v352_v31, 0.0  ;;  %862 = vst [vmem:[%s2013_s3 + $0x210] sm:$0xff] %v734_v40  ;;  %v608_v42 = vmul.f32 0.2, %v352_v31  ;;  %v353_v43 = vadd.f32 %v963_v2, %v218_v35  ;;  %v354_v44 = vadd.f32 %v963_v2, %v219_v36 }
  0x5a   :  { %v220_v45 = vmul.f32 %v958_v1, %v85_v32  ;;  %v735_v46 = vsel %vm479_vm3, %v351_v30, %v607_v41  ;;  %v221_v47 = vmul.f32 %v958_v1, %v86_v37  ;;  %v222_v48 = vmul.f32 %v958_v1, %v87_v38 }
  0x5b   :  { %v223_v49 = vmul.f32 %v958_v1, %v88_v39  ;;  %863 = vst [vmem:[%s2013_s3 + $0x218] sm:$0xff] %v735_v46  ;;  %v736_v52 = vsel %vm480_vm4, %v352_v31, %v608_v42  ;;  %vm481_vm5 = vcmp.ge.f32.partialorder %v353_v43, 0.0  ;;  %v609_v53 = vmul.f32 0.2, %v353_v43  ;;  %v99_v42 = vld [vmem:[%s2010_s0 + $0x2a8] sm:$0xff] }
  0x5c   :  { %vm482_vm6 = vcmp.ge.f32.partialorder %v354_v44, 0.0  ;;  %864 = vst [vmem:[%s2013_s3 + $0x220] sm:$0xff] %v736_v52  ;;  %v610_v54 = vmul.f32 0.2, %v354_v44  ;;  %v355_v55 = vadd.f32 %v963_v2, %v220_v45  ;;  %v356_v56 = vadd.f32 %v963_v2, %v221_v47 }
  0x5d   :  { %v357_v57 = vadd.f32 %v963_v2, %v222_v48  ;;  %v737_v58 = vsel %vm481_vm5, %v353_v43, %v609_v53  ;;  %v358_v59 = vadd.f32 %v963_v2, %v223_v49  ;;  %v224_v60 = vmul.f32 %v958_v1, %v89_v50  ;;  %v92_v2 = vld [vmem:[%s2010_s0 + $0x270] sm:$0xff]  ;;  %v101_v50 = vld [vmem:[%s2010_s0 + $0x2b8] sm:$0xff] }
  0x5e   :  { %v225_v61 = vmul.f32 %v958_v1, %v90_v51  ;;  %865 = vst [vmem:[%s2013_s3 + $0x228] sm:$0xff] %v737_v58  ;;  %v738_v62 = vsel %vm482_vm6, %v354_v44, %v610_v54  ;;  %vm483_vm7 = vcmp.ge.f32.partialorder %v355_v55, 0.0  ;;  %v611_v63 = vmul.f32 0.2, %v355_v55  ;;  %v100_v43 = vld [vmem:[%s2010_s0 + $0x2b0] sm:$0xff] }
  0x5f   :  { %vm484_vm8 = vcmp.ge.f32.partialorder %v356_v56, 0.0  ;;  %866 = vst [vmem:[%s2013_s3 + $0x230] sm:$0xff] %v738_v62  ;;  %v612_v1 = vmul.f32 0.2, %v356_v56  ;;  %vm485_vm9 = vcmp.ge.f32.partialorder %v357_v57, 0.0  ;;  %vm486_vm10 = vcmp.ge.f32.partialorder %v358_v59, 0.0 }
  0x60   :  { %v613_v3 = vmul.f32 0.2, %v357_v57  ;;  %v739_v4 = vsel %vm483_vm7, %v355_v55, %v611_v63  ;;  %v614_v5 = vmul.f32 0.2, %v358_v59  ;;  %v359_v7 = vadd.f32 %v1575_v6, %v224_v60  ;;  %v102_v55 = vld [vmem:[%s2010_s0 + $0x2c0] sm:$0xff] }
  0x61   :  { %v360_v8 = vadd.f32 %v1575_v6, %v225_v61  ;;  %867 = vst [vmem:[%s2013_s3 + $0x238] sm:$0xff] %v739_v4  ;;  %v740_v10 = vsel %vm484_vm8, %v356_v56, %v612_v1  ;;  %v226_v13 = vmul.f32 %v1588_v12, %v91_v0  ;;  %v227_v14 = vmul.f32 %v1588_v12, %v92_v2  ;;  %v103_v56 = vld [vmem:[%s2010_s0 + $0x2c8] sm:$0xff]  ;;  %v105_v4 = vld [vmem:[%s2010_s0 + $0x2d8] sm:$0xff] }
  0x62   :  { %v741_v11 = vsel %vm485_vm9, %v357_v57, %v613_v3  ;;  %868 = vst [vmem:[%s2013_s3 + $0x240] sm:$0xff] %v740_v10  ;;  %v742_v18 = vsel %vm486_vm10, %v358_v59, %v614_v5  ;;  %vm487_vm11 = vcmp.ge.f32.partialorder %v359_v7, 0.0  ;;  %v615_v19 = vmul.f32 0.2, %v359_v7  ;;  %v104_v57 = vld [vmem:[%s2010_s0 + $0x2d0] sm:$0xff]  ;;  %v106_v5 = vld [vmem:[%s2010_s0 + $0x2e0] sm:$0xff] }
  0x63   :  { %869 = vst [vmem:[%s2013_s3 + $0x248] sm:$0xff] %v741_v11  ;;  %vm488_vm12 = vcmp.ge.f32.partialorder %v360_v8, 0.0  ;;  %870 = vst [vmem:[%s2013_s3 + $0x250] sm:$0xff] %v742_v18  ;;  %v616_v20 = vmul.f32 0.2, %v360_v8  ;;  %v361_v21 = vadd.f32 %v1575_v6, %v226_v13  ;;  %v362_v22 = vadd.f32 %v1575_v6, %v227_v14 }
  0x64   :  { %v228_v23 = vmul.f32 %v1588_v12, %v93_v9  ;;  %v743_v24 = vsel %vm487_vm11, %v359_v7, %v615_v19  ;;  %v229_v25 = vmul.f32 %v1588_v12, %v94_v15  ;;  %v230_v26 = vmul.f32 %v1588_v12, %v95_v16 }
  0x65   :  { %v231_v27 = vmul.f32 %v1588_v12, %v96_v17  ;;  %871 = vst [vmem:[%s2013_s3 + $0x258] sm:$0xff] %v743_v24  ;;  %v744_v30 = vsel %vm488_vm12, %v360_v8, %v616_v20  ;;  %vm489_vm13 = vcmp.ge.f32.partialorder %v361_v21, 0.0  ;;  %v617_v31 = vmul.f32 0.2, %v361_v21  ;;  %v107_v20 = vld [vmem:[%s2010_s0 + $0x2e8] sm:$0xff] }
  0x66   :  { %vm490_vm14 = vcmp.ge.f32.partialorder %v362_v22, 0.0  ;;  %872 = vst [vmem:[%s2013_s3 + $0x260] sm:$0xff] %v744_v30  ;;  %v618_v32 = vmul.f32 0.2, %v362_v22  ;;  %v363_v33 = vadd.f32 %v1575_v6, %v228_v23  ;;  %v364_v34 = vadd.f32 %v1575_v6, %v229_v25 }
  0x67   :  { %v365_v35 = vadd.f32 %v1575_v6, %v230_v26  ;;  %v745_v36 = vsel %vm489_vm13, %v361_v21, %v617_v31  ;;  %v366_v37 = vadd.f32 %v1575_v6, %v231_v27  ;;  %v232_v38 = vmul.f32 %v1588_v12, %v97_v28  ;;  %v108_v21 = vld [vmem:[%s2010_s0 + $0x2f0] sm:$0xff]  ;;  %v109_v28 = vld [vmem:[%s2010_s0 + $0x2f8] sm:$0xff] }
  0x68   :  { %v233_v39 = vmul.f32 %v1588_v12, %v98_v29  ;;  %873 = vst [vmem:[%s2013_s3 + $0x268] sm:$0xff] %v745_v36  ;;  %v746_v40 = vsel %vm490_vm14, %v362_v22, %v618_v32  ;;  %vm491_vm15 = vcmp.ge.f32.partialorder %v363_v33, 0.0  ;;  %v619_v41 = vmul.f32 0.2, %v363_v33 }
  0x69   :  { %vm492_vm0 = vcmp.ge.f32.partialorder %v364_v34, 0.0  ;;  %874 = vst [vmem:[%s2013_s3 + $0x270] sm:$0xff] %v746_v40  ;;  %v620_v44 = vmul.f32 0.2, %v364_v34  ;;  %vm493_vm1 = vcmp.ge.f32.partialorder %v365_v35, 0.0  ;;  %vm494_vm2 = vcmp.ge.f32.partialorder %v366_v37, 0.0 }
  0x6a   :  { %v621_v45 = vmul.f32 0.2, %v365_v35  ;;  %v747_v46 = vsel %vm491_vm15, %v363_v33, %v619_v41  ;;  %v622_v47 = vmul.f32 0.2, %v366_v37  ;;  %v367_v48 = vadd.f32 %v1575_v6, %v232_v38  ;;  %v110_v33 = vld [vmem:[%s2010_s0 + $0x300] sm:$0xff] }
  0x6b   :  { %v368_v49 = vadd.f32 %v1575_v6, %v233_v39  ;;  %875 = vst [vmem:[%s2013_s3 + $0x278] sm:$0xff] %v747_v46  ;;  %v748_v51 = vsel %vm492_vm0, %v364_v34, %v620_v44  ;;  %v234_v53 = vmul.f32 %v1588_v12, %v99_v42  ;;  %v235_v54 = vmul.f32 %v1588_v12, %v100_v43  ;;  %v111_v34 = vld [vmem:[%s2010_s0 + $0x308] sm:$0xff]  ;;  %v113_v46 = vld [vmem:[%s2010_s0 + $0x318] sm:$0xff] }
  0x6c   :  { %v749_v52 = vsel %vm493_vm1, %v365_v35, %v621_v45  ;;  %876 = vst [vmem:[%s2013_s3 + $0x280] sm:$0xff] %v748_v51  ;;  %v750_v58 = vsel %vm494_vm2, %v366_v37, %v622_v47  ;;  %vm495_vm3 = vcmp.ge.f32.partialorder %v367_v48, 0.0  ;;  %v623_v59 = vmul.f32 0.2, %v367_v48  ;;  %v112_v35 = vld [vmem:[%s2010_s0 + $0x310] sm:$0xff]  ;;  %v114_v47 = vld [vmem:[%s2010_s0 + $0x320] sm:$0xff] }
  0x6d   :  { %877 = vst [vmem:[%s2013_s3 + $0x288] sm:$0xff] %v749_v52  ;;  %vm496_vm4 = vcmp.ge.f32.partialorder %v368_v49, 0.0  ;;  %878 = vst [vmem:[%s2013_s3 + $0x290] sm:$0xff] %v750_v58  ;;  %v624_v60 = vmul.f32 0.2, %v368_v49  ;;  %v369_v61 = vadd.f32 %v1575_v6, %v234_v53  ;;  %v370_v62 = vadd.f32 %v1575_v6, %v235_v54 }
  0x6e   :  { %v236_v63 = vmul.f32 %v1588_v12, %v101_v50  ;;  %v751_v0 = vsel %vm495_vm3, %v367_v48, %v623_v59  ;;  %v237_v2 = vmul.f32 %v1588_v12, %v102_v55  ;;  %v238_v1 = vmul.f32 %v1588_v12, %v103_v56 }
  0x6f   :  { %v239_v3 = vmul.f32 %v1588_v12, %v104_v57  ;;  %879 = vst [vmem:[%s2013_s3 + $0x298] sm:$0xff] %v751_v0  ;;  %v752_v7 = vsel %vm496_vm4, %v368_v49, %v624_v60  ;;  %vm497_vm5 = vcmp.ge.f32.partialorder %v369_v61, 0.0  ;;  %v625_v8 = vmul.f32 0.2, %v369_v61  ;;  %v115_v60 = vld [vmem:[%s2010_s0 + $0x328] sm:$0xff] }
  0x70   :  { %vm498_vm6 = vcmp.ge.f32.partialorder %v370_v62, 0.0  ;;  %880 = vst [vmem:[%s2013_s3 + $0x2a0] sm:$0xff] %v752_v7  ;;  %v626_v9 = vmul.f32 0.2, %v370_v62  ;;  %v371_v10 = vadd.f32 %v1575_v6, %v236_v63  ;;  %v372_v11 = vadd.f32 %v1575_v6, %v237_v2 }
  0x71   :  { %v373_v13 = vadd.f32 %v1575_v6, %v238_v1  ;;  %v753_v14 = vsel %vm497_vm5, %v369_v61, %v625_v8  ;;  %v374_v15 = vadd.f32 %v1575_v6, %v239_v3  ;;  %v240_v16 = vmul.f32 %v1588_v12, %v105_v4  ;;  %v116_v61 = vld [vmem:[%s2010_s0 + $0x330] sm:$0xff]  ;;  %v117_v4 = vld [vmem:[%s2010_s0 + $0x338] sm:$0xff] }
  0x72   :  { %v241_v17 = vmul.f32 %v1588_v12, %v106_v5  ;;  %881 = vst [vmem:[%s2013_s3 + $0x2a8] sm:$0xff] %v753_v14  ;;  %v754_v18 = vsel %vm498_vm6, %v370_v62, %v626_v9  ;;  %vm499_vm7 = vcmp.ge.f32.partialorder %v371_v10, 0.0  ;;  %v627_v19 = vmul.f32 0.2, %v371_v10 }
  0x73   :  { %vm500_vm8 = vcmp.ge.f32.partialorder %v372_v11, 0.0  ;;  %882 = vst [vmem:[%s2013_s3 + $0x2b0] sm:$0xff] %v754_v18  ;;  %v628_v22 = vmul.f32 0.2, %v372_v11  ;;  %vm501_vm9 = vcmp.ge.f32.partialorder %v373_v13, 0.0  ;;  %vm502_vm10 = vcmp.ge.f32.partialorder %v374_v15, 0.0 }
  0x74   :  { %v629_v23 = vmul.f32 0.2, %v373_v13  ;;  %v755_v24 = vsel %vm499_vm7, %v371_v10, %v627_v19  ;;  %v630_v25 = vmul.f32 0.2, %v374_v15  ;;  %v375_v26 = vadd.f32 %v1575_v6, %v240_v16  ;;  %v118_v10 = vld [vmem:[%s2010_s0 + $0x340] sm:$0xff] }
  0x75   :  { %v376_v27 = vadd.f32 %v1575_v6, %v241_v17  ;;  %883 = vst [vmem:[%s2013_s3 + $0x2b8] sm:$0xff] %v755_v24  ;;  %v756_v29 = vsel %vm500_vm8, %v372_v11, %v628_v22  ;;  %v242_v31 = vmul.f32 %v1588_v12, %v107_v20  ;;  %v243_v32 = vmul.f32 %v1588_v12, %v108_v21  ;;  %v119_v11 = vld [vmem:[%s2010_s0 + $0x348] sm:$0xff]  ;;  %v121_v24 = vld [vmem:[%s2010_s0 + $0x358] sm:$0xff] }
  0x76   :  { %v757_v30 = vsel %vm501_vm9, %v373_v13, %v629_v23  ;;  %884 = vst [vmem:[%s2013_s3 + $0x2c0] sm:$0xff] %v756_v29  ;;  %v758_v36 = vsel %vm502_vm10, %v374_v15, %v630_v25  ;;  %vm503_vm11 = vcmp.ge.f32.partialorder %v375_v26, 0.0  ;;  %v631_v37 = vmul.f32 0.2, %v375_v26  ;;  %v120_v13 = vld [vmem:[%s2010_s0 + $0x350] sm:$0xff]  ;;  %v122_v25 = vld [vmem:[%s2010_s0 + $0x360] sm:$0xff] }
  0x77   :  { %885 = vst [vmem:[%s2013_s3 + $0x2c8] sm:$0xff] %v757_v30  ;;  %vm504_vm12 = vcmp.ge.f32.partialorder %v376_v27, 0.0  ;;  %886 = vst [vmem:[%s2013_s3 + $0x2d0] sm:$0xff] %v758_v36  ;;  %v632_v38 = vmul.f32 0.2, %v376_v27  ;;  %v377_v39 = vadd.f32 %v1575_v6, %v242_v31  ;;  %v378_v40 = vadd.f32 %v1575_v6, %v243_v32 }
  0x78   :  { %v244_v41 = vmul.f32 %v1588_v12, %v109_v28  ;;  %v759_v42 = vsel %vm503_vm11, %v375_v26, %v631_v37  ;;  %v245_v43 = vmul.f32 %v1588_v12, %v110_v33  ;;  %v246_v44 = vmul.f32 %v1588_v12, %v111_v34 }
  0x79   :  { %v247_v45 = vmul.f32 %v1588_v12, %v112_v35  ;;  %887 = vst [vmem:[%s2013_s3 + $0x2d8] sm:$0xff] %v759_v42  ;;  %v760_v48 = vsel %vm504_vm12, %v376_v27, %v632_v38  ;;  %vm505_vm13 = vcmp.ge.f32.partialorder %v377_v39, 0.0  ;;  %v633_v49 = vmul.f32 0.2, %v377_v39  ;;  %v123_v38 = vld [vmem:[%s2010_s0 + $0x368] sm:$0xff] }
  0x7a   :  { %vm506_vm14 = vcmp.ge.f32.partialorder %v378_v40, 0.0  ;;  %888 = vst [vmem:[%s2013_s3 + $0x2e0] sm:$0xff] %v760_v48  ;;  %v634_v50 = vmul.f32 0.2, %v378_v40  ;;  %v379_v51 = vadd.f32 %v1575_v6, %v244_v41  ;;  %v380_v52 = vadd.f32 %v1575_v6, %v245_v43 }
  0x7b   :  { %v381_v53 = vadd.f32 %v1575_v6, %v246_v44  ;;  %v761_v54 = vsel %vm505_vm13, %v377_v39, %v633_v49  ;;  %v382_v55 = vadd.f32 %v1575_v6, %v247_v45  ;;  %v248_v56 = vmul.f32 %v1588_v12, %v113_v46  ;;  %v124_v39 = vld [vmem:[%s2010_s0 + $0x370] sm:$0xff]  ;;  %v125_v46 = vld [vmem:[%s2010_s0 + $0x378] sm:$0xff] }
  0x7c   :  { %v249_v57 = vmul.f32 %v1588_v12, %v114_v47  ;;  %889 = vst [vmem:[%s2013_s3 + $0x2e8] sm:$0xff] %v761_v54  ;;  %v762_v58 = vsel %vm506_vm14, %v378_v40, %v634_v50  ;;  %vm507_vm15 = vcmp.ge.f32.partialorder %v379_v51, 0.0  ;;  %v635_v59 = vmul.f32 0.2, %v379_v51 }
  0x7d   :  { %vm508_vm0 = vcmp.ge.f32.partialorder %v380_v52, 0.0  ;;  %890 = vst [vmem:[%s2013_s3 + $0x2f0] sm:$0xff] %v762_v58  ;;  %v636_v62 = vmul.f32 0.2, %v380_v52  ;;  %vm509_vm1 = vcmp.ge.f32.partialorder %v381_v53, 0.0  ;;  %vm510_vm2 = vcmp.ge.f32.partialorder %v382_v55, 0.0 }
  0x7e   :  { %v637_v63 = vmul.f32 0.2, %v381_v53  ;;  %v763_v0 = vsel %vm507_vm15, %v379_v51, %v635_v59  ;;  %v638_v2 = vmul.f32 0.2, %v382_v55  ;;  %v383_v1 = vadd.f32 %v1575_v6, %v248_v56  ;;  %v126_v51 = vld [vmem:[%s2010_s0 + $0x380] sm:$0xff] }
  0x7f   :  { %v384_v3 = vadd.f32 %v1575_v6, %v249_v57  ;;  %891 = vst [vmem:[%s2013_s3 + $0x2f8] sm:$0xff] %v763_v0  ;;  %v764_v5 = vsel %vm508_vm0, %v380_v52, %v636_v62  ;;  %v250_v8 = vmul.f32 %v1588_v12, %v115_v60  ;;  %v251_v9 = vmul.f32 %v1588_v12, %v116_v61  ;;  %v127_v52 = vld [vmem:[%s2010_s0 + $0x388] sm:$0xff]  ;;  %v129_v0 = vld [vmem:[%s2010_s0 + $0x398] sm:$0xff] }
  0x80   :  { %v765_v7 = vsel %vm509_vm1, %v381_v53, %v637_v63  ;;  %892 = vst [vmem:[%s2013_s3 + $0x300] sm:$0xff] %v764_v5  ;;  %v766_v14 = vsel %vm510_vm2, %v382_v55, %v638_v2  ;;  %vm511_vm3 = vcmp.ge.f32.partialorder %v383_v1, 0.0  ;;  %v639_v15 = vmul.f32 0.2, %v383_v1  ;;  %v128_v53 = vld [vmem:[%s2010_s0 + $0x390] sm:$0xff]  ;;  %v130_v2 = vld [vmem:[%s2010_s0 + $0x3a0] sm:$0xff] }
  0x81   :  { %893 = vst [vmem:[%s2013_s3 + $0x308] sm:$0xff] %v765_v7  ;;  %vm512_vm4 = vcmp.ge.f32.partialorder %v384_v3, 0.0  ;;  %894 = vst [vmem:[%s2013_s3 + $0x310] sm:$0xff] %v766_v14  ;;  %v640_v16 = vmul.f32 0.2, %v384_v3  ;;  %v385_v17 = vadd.f32 %v1575_v6, %v250_v8  ;;  %v386_v18 = vadd.f32 %v1575_v6, %v251_v9 }
  0x82   :  { %v252_v19 = vmul.f32 %v1588_v12, %v117_v4  ;;  %v767_v20 = vsel %vm511_vm3, %v383_v1, %v639_v15  ;;  %v253_v21 = vmul.f32 %v1588_v12, %v118_v10  ;;  %v254_v22 = vmul.f32 %v1588_v12, %v119_v11 }
  0x83   :  { %v255_v23 = vmul.f32 %v1588_v12, %v120_v13  ;;  %895 = vst [vmem:[%s2013_s3 + $0x318] sm:$0xff] %v767_v20  ;;  %v768_v26 = vsel %vm512_vm4, %v384_v3, %v640_v16  ;;  %vm513_vm5 = vcmp.ge.f32.partialorder %v385_v17, 0.0  ;;  %v641_v27 = vmul.f32 0.2, %v385_v17  ;;  %v131_v16 = vld [vmem:[%s2010_s0 + $0x3a8] sm:$0xff] }
  0x84   :  { %vm514_vm6 = vcmp.ge.f32.partialorder %v386_v18, 0.0  ;;  %896 = vst [vmem:[%s2013_s3 + $0x320] sm:$0xff] %v768_v26  ;;  %v642_v28 = vmul.f32 0.2, %v386_v18  ;;  %v387_v29 = vadd.f32 %v1575_v6, %v252_v19  ;;  %v388_v30 = vadd.f32 %v1575_v6, %v253_v21 }
  0x85   :  { %v389_v31 = vadd.f32 %v1575_v6, %v254_v22  ;;  %v769_v32 = vsel %vm513_vm5, %v385_v17, %v641_v27  ;;  %v390_v33 = vadd.f32 %v1575_v6, %v255_v23  ;;  %v256_v34 = vmul.f32 %v1588_v12, %v121_v24  ;;  %v132_v17 = vld [vmem:[%s2010_s0 + $0x3b0] sm:$0xff]  ;;  %v133_v24 = vld [vmem:[%s2010_s0 + $0x3b8] sm:$0xff] }
  0x86   :  { %v257_v35 = vmul.f32 %v1588_v12, %v122_v25  ;;  %897 = vst [vmem:[%s2013_s3 + $0x328] sm:$0xff] %v769_v32  ;;  %v770_v36 = vsel %vm514_vm6, %v386_v18, %v642_v28  ;;  %vm515_vm7 = vcmp.ge.f32.partialorder %v387_v29, 0.0  ;;  %v643_v37 = vmul.f32 0.2, %v387_v29 }
  0x87   :  { %vm516_vm8 = vcmp.ge.f32.partialorder %v388_v30, 0.0  ;;  %898 = vst [vmem:[%s2013_s3 + $0x330] sm:$0xff] %v770_v36  ;;  %v644_v40 = vmul.f32 0.2, %v388_v30  ;;  %vm517_vm9 = vcmp.ge.f32.partialorder %v389_v31, 0.0  ;;  %vm518_vm10 = vcmp.ge.f32.partialorder %v390_v33, 0.0 }
  0x88   :  { %v645_v41 = vmul.f32 0.2, %v389_v31  ;;  %v771_v42 = vsel %vm515_vm7, %v387_v29, %v643_v37  ;;  %v646_v43 = vmul.f32 0.2, %v390_v33  ;;  %v391_v44 = vadd.f32 %v1575_v6, %v256_v34  ;;  %v134_v29 = vld [vmem:[%s2010_s0 + $0x3c0] sm:$0xff] }
  0x89   :  { %v392_v45 = vadd.f32 %v1575_v6, %v257_v35  ;;  %899 = vst [vmem:[%s2013_s3 + $0x338] sm:$0xff] %v771_v42  ;;  %v772_v47 = vsel %vm516_vm8, %v388_v30, %v644_v40  ;;  %v258_v49 = vmul.f32 %v1588_v12, %v123_v38  ;;  %v259_v50 = vmul.f32 %v1588_v12, %v124_v39  ;;  %v135_v30 = vld [vmem:[%s2010_s0 + $0x3c8] sm:$0xff]  ;;  %v137_v42 = vld [vmem:[%s2010_s0 + $0x3d8] sm:$0xff] }
  0x8a   :  { %v773_v48 = vsel %vm517_vm9, %v389_v31, %v645_v41  ;;  %900 = vst [vmem:[%s2013_s3 + $0x340] sm:$0xff] %v772_v47  ;;  %v774_v54 = vsel %vm518_vm10, %v390_v33, %v646_v43  ;;  %vm519_vm11 = vcmp.ge.f32.partialorder %v391_v44, 0.0  ;;  %v647_v55 = vmul.f32 0.2, %v391_v44  ;;  %v136_v31 = vld [vmem:[%s2010_s0 + $0x3d0] sm:$0xff]  ;;  %v138_v43 = vld [vmem:[%s2010_s0 + $0x3e0] sm:$0xff] }
  0x8b   :  { %901 = vst [vmem:[%s2013_s3 + $0x348] sm:$0xff] %v773_v48  ;;  %vm520_vm12 = vcmp.ge.f32.partialorder %v392_v45, 0.0  ;;  %902 = vst [vmem:[%s2013_s3 + $0x350] sm:$0xff] %v774_v54  ;;  %v648_v56 = vmul.f32 0.2, %v392_v45  ;;  %v393_v57 = vadd.f32 %v1575_v6, %v258_v49  ;;  %v394_v58 = vadd.f32 %v1575_v6, %v259_v50 }
  0x8c   :  { %v260_v59 = vmul.f32 %v1588_v12, %v125_v46  ;;  %v775_v60 = vsel %vm519_vm11, %v391_v44, %v647_v55  ;;  %v261_v61 = vmul.f32 %v1588_v12, %v126_v51  ;;  %v262_v62 = vmul.f32 %v1588_v12, %v127_v52 }
  0x8d   :  { %v263_v63 = vmul.f32 %v1588_v12, %v128_v53  ;;  %903 = vst [vmem:[%s2013_s3 + $0x358] sm:$0xff] %v775_v60  ;;  %v776_v1 = vsel %vm520_vm12, %v392_v45, %v648_v56  ;;  %vm521_vm13 = vcmp.ge.f32.partialorder %v393_v57, 0.0  ;;  %v649_v3 = vmul.f32 0.2, %v393_v57  ;;  %v139_v56 = vld [vmem:[%s2010_s0 + $0x3e8] sm:$0xff] }
  0x8e   :  { %vm522_vm14 = vcmp.ge.f32.partialorder %v394_v58, 0.0  ;;  %904 = vst [vmem:[%s2013_s3 + $0x360] sm:$0xff] %v776_v1  ;;  %v650_v4 = vmul.f32 0.2, %v394_v58  ;;  %v395_v5 = vadd.f32 %v1575_v6, %v260_v59  ;;  %v396_v7 = vadd.f32 %v1575_v6, %v261_v61 }
  0x8f   :  { %v397_v8 = vadd.f32 %v1575_v6, %v262_v62  ;;  %v777_v9 = vsel %vm521_vm13, %v393_v57, %v649_v3  ;;  %v398_v10 = vadd.f32 %v1575_v6, %v263_v63  ;;  %v264_v11 = vmul.f32 %v1588_v12, %v129_v0  ;;  %v140_v57 = vld [vmem:[%s2010_s0 + $0x3f0] sm:$0xff]  ;;  %v141_v0 = vld [vmem:[%s2010_s0 + $0x3f8] sm:$0xff] }
  0x90   :  { %v265_v13 = vmul.f32 %v1588_v12, %v130_v2  ;;  %905 = vst [vmem:[%s2013_s3 + $0x368] sm:$0xff] %v777_v9  ;;  %v778_v14 = vsel %vm522_vm14, %v394_v58, %v650_v4  ;;  %vm523_vm15 = vcmp.ge.f32.partialorder %v395_v5, 0.0  ;;  %v651_v15 = vmul.f32 0.2, %v395_v5 }
  0x91   :  { %vm524_vm0 = vcmp.ge.f32.partialorder %v396_v7, 0.0  ;;  %906 = vst [vmem:[%s2013_s3 + $0x370] sm:$0xff] %v778_v14  ;;  %v652_v18 = vmul.f32 0.2, %v396_v7  ;;  %vm525_vm1 = vcmp.ge.f32.partialorder %v397_v8, 0.0  ;;  %vm526_vm2 = vcmp.ge.f32.partialorder %v398_v10, 0.0 }
  0x92   :  { %v653_v19 = vmul.f32 0.2, %v397_v8  ;;  %v779_v20 = vsel %vm523_vm15, %v395_v5, %v651_v15  ;;  %v654_v21 = vmul.f32 0.2, %v398_v10  ;;  %v399_v22 = vadd.f32 %v1575_v6, %v264_v11 }
  0x93   :  { %v400_v23 = vadd.f32 %v1575_v6, %v265_v13  ;;  %907 = vst [vmem:[%s2013_s3 + $0x378] sm:$0xff] %v779_v20  ;;  %v780_v25 = vsel %vm524_vm0, %v396_v7, %v652_v18  ;;  %v266_v27 = vmul.f32 %v1588_v12, %v131_v16  ;;  %v267_v28 = vmul.f32 %v1588_v12, %v132_v17 }
  0x94   :  { %v781_v26 = vsel %vm525_vm1, %v397_v8, %v653_v19  ;;  %908 = vst [vmem:[%s2013_s3 + $0x380] sm:$0xff] %v780_v25  ;;  %v782_v32 = vsel %vm526_vm2, %v398_v10, %v654_v21  ;;  %vm527_vm3 = vcmp.ge.f32.partialorder %v399_v22, 0.0  ;;  %v655_v33 = vmul.f32 0.2, %v399_v22 }
  0x95   :  { %909 = vst [vmem:[%s2013_s3 + $0x388] sm:$0xff] %v781_v26  ;;  %vm528_vm4 = vcmp.ge.f32.partialorder %v400_v23, 0.0  ;;  %910 = vst [vmem:[%s2013_s3 + $0x390] sm:$0xff] %v782_v32  ;;  %v656_v34 = vmul.f32 0.2, %v400_v23  ;;  %v401_v35 = vadd.f32 %v1575_v6, %v266_v27  ;;  %v402_v36 = vadd.f32 %v1575_v6, %v267_v28 }
  0x96   :  { %v268_v37 = vmul.f32 %v1588_v12, %v133_v24  ;;  %v783_v38 = vsel %vm527_vm3, %v399_v22, %v655_v33  ;;  %v269_v39 = vmul.f32 %v1588_v12, %v134_v29  ;;  %v270_v40 = vmul.f32 %v1588_v12, %v135_v30 }
  0x97   :  { %v271_v41 = vmul.f32 %v1588_v12, %v136_v31  ;;  %911 = vst [vmem:[%s2013_s3 + $0x398] sm:$0xff] %v783_v38  ;;  %v784_v44 = vsel %vm528_vm4, %v400_v23, %v656_v34  ;;  %vm529_vm5 = vcmp.ge.f32.partialorder %v401_v35, 0.0  ;;  %v657_v45 = vmul.f32 0.2, %v401_v35 }
  0x98   :  { %vm530_vm6 = vcmp.ge.f32.partialorder %v402_v36, 0.0  ;;  %912 = vst [vmem:[%s2013_s3 + $0x3a0] sm:$0xff] %v784_v44  ;;  %v658_v46 = vmul.f32 0.2, %v402_v36  ;;  %v403_v47 = vadd.f32 %v1575_v6, %v268_v37  ;;  %v404_v48 = vadd.f32 %v1575_v6, %v269_v39 }
  0x99   :  { %v405_v49 = vadd.f32 %v1575_v6, %v270_v40  ;;  %v785_v50 = vsel %vm529_vm5, %v401_v35, %v657_v45  ;;  %v406_v51 = vadd.f32 %v1575_v6, %v271_v41  ;;  %v272_v52 = vmul.f32 %v1588_v12, %v137_v42 }
  0x9a   :  { %v273_v53 = vmul.f32 %v1588_v12, %v138_v43  ;;  %913 = vst [vmem:[%s2013_s3 + $0x3a8] sm:$0xff] %v785_v50  ;;  %v786_v54 = vsel %vm530_vm6, %v402_v36, %v658_v46  ;;  %vm531_vm7 = vcmp.ge.f32.partialorder %v403_v47, 0.0  ;;  %v659_v55 = vmul.f32 0.2, %v403_v47 }
  0x9b   :  { %vm532_vm8 = vcmp.ge.f32.partialorder %v404_v48, 0.0  ;;  %914 = vst [vmem:[%s2013_s3 + $0x3b0] sm:$0xff] %v786_v54  ;;  %v660_v58 = vmul.f32 0.2, %v404_v48  ;;  %vm533_vm9 = vcmp.ge.f32.partialorder %v405_v49, 0.0  ;;  %vm534_vm10 = vcmp.ge.f32.partialorder %v406_v51, 0.0 }
  0x9c   :  { %v661_v59 = vmul.f32 0.2, %v405_v49  ;;  %v787_v60 = vsel %vm531_vm7, %v403_v47, %v659_v55  ;;  %v662_v61 = vmul.f32 0.2, %v406_v51  ;;  %v407_v62 = vadd.f32 %v1575_v6, %v272_v52 }
  0x9d   :  { %v408_v63 = vadd.f32 %v1575_v6, %v273_v53  ;;  %915 = vst [vmem:[%s2013_s3 + $0x3b8] sm:$0xff] %v787_v60  ;;  %v788_v2 = vsel %vm532_vm8, %v404_v48, %v660_v58  ;;  %v274_v3 = vmul.f32 %v1588_v12, %v139_v56  ;;  %v275_v4 = vmul.f32 %v1588_v12, %v140_v57 }
  0x9e   :  { %v789_v1 = vsel %vm533_vm9, %v405_v49, %v661_v59  ;;  %916 = vst [vmem:[%s2013_s3 + $0x3c0] sm:$0xff] %v788_v2  ;;  %v790_v5 = vsel %vm534_vm10, %v406_v51, %v662_v61  ;;  %vm535_vm11 = vcmp.ge.f32.partialorder %v407_v62, 0.0  ;;  %v663_v7 = vmul.f32 0.2, %v407_v62 }
  0x9f   :  { %917 = vst [vmem:[%s2013_s3 + $0x3c8] sm:$0xff] %v789_v1  ;;  %vm536_vm12 = vcmp.ge.f32.partialorder %v408_v63, 0.0  ;;  %918 = vst [vmem:[%s2013_s3 + $0x3d0] sm:$0xff] %v790_v5  ;;  %v664_v8 = vmul.f32 0.2, %v408_v63  ;;  %v409_v9 = vadd.f32 %v1575_v6, %v274_v3  ;;  %v410_v10 = vadd.f32 %v1575_v6, %v275_v4 }
  0xa0   :  { %v276_v11 = vmul.f32 %v1588_v12, %v141_v0  ;;  %v791_v13 = vsel %vm535_vm11, %v407_v62, %v663_v7 }
  0xa1   :  { %919 = vst [vmem:[%s2013_s3 + $0x3d8] sm:$0xff] %v791_v13  ;;  %v792_v14 = vsel %vm536_vm12, %v408_v63, %v664_v8  ;;  %vm537_vm13 = vcmp.ge.f32.partialorder %v409_v9, 0.0  ;;  %v665_v15 = vmul.f32 0.2, %v409_v9  ;;  %vm538_vm14 = vcmp.ge.f32.partialorder %v410_v10, 0.0 }
  0xa2   :  { %920 = vst [vmem:[%s2013_s3 + $0x3e0] sm:$0xff] %v792_v14  ;;  %v666_v16 = vmul.f32 0.2, %v410_v10  ;;  %v411_v17 = vadd.f32 %v1575_v6, %v276_v11 }
  0xa3   :  { %v793_v18 = vsel %vm537_vm13, %v409_v9, %v665_v15 }
  0xa4   :  { %921 = vst [vmem:[%s2013_s3 + $0x3e8] sm:$0xff] %v793_v18  ;;  %v794_v12 = vsel %vm538_vm14, %v410_v10, %v666_v16  ;;  %vm539_vm15 = vcmp.ge.f32.partialorder %v411_v17, 0.0  ;;  %v667_v19 = vmul.f32 0.2, %v411_v17 }
  0xa5   :  { %922 = vst [vmem:[%s2013_s3 + $0x3f0] sm:$0xff] %v794_v12 }
  0xa6   :  { %v795_v20 = vsel %vm539_vm15, %v411_v17, %v667_v19 }
  0xa7   :  { %923 = vst [vmem:[%s2013_s3 + $0x3f8] sm:$0xff] %v795_v20 }

// kernel: forward.34
= control target key start
LH: loop header
LB: loop body
LE: loop exit
PB: predicated region body
PF: predicated region fallthrough
CT: control target
= control target key end

     0   :  { %s1824_s9 = smov 0   ;;  %s1826_s10 = smov 0   ;;  %s2076_s0 = inlined_call_operand.vmem [shape: bf16[2048,256], index: 0, kind: input, shape index: {}]   ;;  %s2077_s1 = inlined_call_operand.vmem [shape: bf16[256,128], index: 1, kind: input, shape index: {}]   ;;  %s2078_s2 = inlined_call_operand.vmem [shape: f32[2048,128], index: 2, kind: output, shape index: {}]  }
   0x1   :  { %s1828_s11 = smov 0  }
   0x2 LB: > { %s31_s12 = sadd.s32 1, %s1802_s10  ;;  %p1526_p0 = scmp.ge.s32.totalorder %s1806_s11, 1  ;;  %s1806_s11 = sphi %s1828_s11, %s12_s11   ;;  %s1802_s10 = sphi %s1826_s10, %s2080_s10   ;;  %s1798_s9 = sphi %s1824_s9, %s2079_s9  }
   0x3   : > { %p33_p1 = scmp.ge.s32.totalorder %s31_s12, 4  ;;  %p158_p2 = scmp.lt.s32.totalorder %s1806_s11, 5 }
   0x5   : > { %s2082_s12 = smov (%p33_p1, %s31_s12), 0  ;;  %p159_p3 = pnand %p1526_p0, %p158_p2 }
   0x6   : > { %s1527_s15 = sshll.u32 (!%p159_p3), %s1798_s9, 6 }
   0x7   : > { %162 = sbr.rel (%p159_p3) target bundleno = 396 (0x18c), region = 28  ;;  %p198_p4 = scmp.lt.s32.totalorder (!%p159_p3), %s1527_s15, 255 }
   0xc   : > { %v1672_v0 = vld [vmem:[%s2077_s1 + $0x38] sm:$0xff]   ;;  %v1808_v1 = vmov 0   ;;  %v1673_v2 = vld [vmem:[%s2077_s1 + $0x30] sm:$0xff]   ;;  %v1674_v3 = vld [vmem:[%s2077_s1 + $0x28] sm:$0xff]   ;;  %s2084_s15 = smov (!%p198_p4, %s1527_s15), 255 }
   0xd   : > { %871 = vmatprep.subr.bf16.mxu0 %v1808_v1  ;;  %1615 = vmatprep.subr.bf16.mxu1 %v1808_v1  ;;  %v1675_v4 = vld [vmem:[%s2077_s1 + $0x20] sm:$0xff]   ;;  %s1614_s22 = sshll.u32 %s2084_s15, 3  ;;  %v1676_v5 = vld [vmem:[%s2077_s1 + $0x18] sm:$0xff]   ;;  %v1677_v7 = vld [vmem:[%s2077_s1 + $0x10] sm:$0xff]  }
   0xe   : > { %872 = vmatpush1.bf16.msra.mxu0 %v1672_v0  ;;  %1631 = vmatpush1.bf16.msra.mxu1 %v1672_v0  ;;  %s1873_s27 = scalar_lea.vmem %s2076_s0, %s1614_s22  ;;  %v1678_v9 = vld [vmem:[%s2077_s1 + $0x8] sm:$0xff]   ;;  %v1679_v10 = vld [vmem:[%s2077_s1] sm:$0xff]   ;;  %v1680_v11 = vld [vmem:[%s2077_s1 + $0x78] sm:$0xff]   ;;  %s2001_s30 = scalar_lea.vmem %s2078_s2, %s1614_s22 }
   0xf   : > { %873 = vmatprep.subr.bf16.mxu0 %v1808_v1  ;;  %1616 = vmatprep.subr.bf16.mxu1 %v1808_v1  ;;  %v1690_v6 = vld [vmem:[%s1873_s27 + $0x4] ss:$8 sps:$4 sm:$0xff]   ;;  %v1681_v12 = vld [vmem:[%s2077_s1 + $0x70] sm:$0xff]   ;;  %v1684_v15 = vld [vmem:[%s2077_s1 + $0x58] sm:$0xff]  }
  0x10   : > { %v1693_v8 = vld [vmem:[%s1873_s27 + $0x104] ss:$8 sps:$4 sm:$0xff]   ;;  %903 = vmatprep.mubr.bf16.mxu0 %v1690_v6  ;;  %v1685_v16 = vld [vmem:[%s2077_s1 + $0x50] sm:$0xff]   ;;  %v1688_v19 = vld [vmem:[%s1873_s27] ss:$8 sps:$4 sm:$0xff]  }
  0x11   : > { %1031 = vmatprep.mubr.bf16.mxu1 %v1693_v8  ;;  %v1682_v13 = vld [vmem:[%s2077_s1 + $0x68] sm:$0xff]   ;;  %v1683_v14 = vld [vmem:[%s2077_s1 + $0x60] sm:$0xff]   ;;  %v1694_v21 = vld [vmem:[%s1873_s27 + $0x14] ss:$8 sps:$4 sm:$0xff]  }
  0x12   : > { %874 = vmatpush1.bf16.msra.mxu0 %v1673_v2  ;;  %1632 = vmatpush1.bf16.msra.mxu1 %v1673_v2  ;;  %v1686_v17 = vld [vmem:[%s2077_s1 + $0x48] sm:$0xff]   ;;  %v1687_v18 = vld [vmem:[%s2077_s1 + $0x40] sm:$0xff]   ;;  %v1696_v22 = vld [vmem:[%s1873_s27 + $0x114] ss:$8 sps:$4 sm:$0xff]  }
  0x13   : > { %875 = vmatprep.subr.bf16.mxu0 %v1808_v1  ;;  %1617 = vmatprep.subr.bf16.mxu1 %v1808_v1  ;;  %v1691_v20 = vld [vmem:[%s1873_s27 + $0x100] ss:$8 sps:$4 sm:$0xff]   ;;  %v1698_v23 = vld [vmem:[%s1873_s27 + $0x10] ss:$8 sps:$4 sm:$0xff]   ;;  %v1700_v25 = vld [vmem:[%s1873_s27 + $0x24] ss:$8 sps:$4 sm:$0xff]  }
  0x14   : > { %v1699_v24 = vld [vmem:[%s1873_s27 + $0x110] ss:$8 sps:$4 sm:$0xff]   ;;  %v1702_v26 = vld [vmem:[%s1873_s27 + $0x124] ss:$8 sps:$4 sm:$0xff]   ;;  %v1704_v27 = vld [vmem:[%s1873_s27 + $0x20] ss:$8 sps:$4 sm:$0xff]  }
  0x15   : > { %v1705_v28 = vld [vmem:[%s1873_s27 + $0x120] ss:$8 sps:$4 sm:$0xff]   ;;  %v1706_v29 = vld [vmem:[%s1873_s27 + $0x34] ss:$8 sps:$4 sm:$0xff]   ;;  %v1710_v31 = vld [vmem:[%s1873_s27 + $0x30] ss:$8 sps:$4 sm:$0xff]  }
  0x16   : > { %876 = vmatpush1.bf16.msra.mxu0 %v1674_v3  ;;  %1633 = vmatpush1.bf16.msra.mxu1 %v1674_v3  ;;  %v1708_v30 = vld [vmem:[%s1873_s27 + $0x134] ss:$8 sps:$4 sm:$0xff]   ;;  %v1711_v32 = vld [vmem:[%s1873_s27 + $0x130] ss:$8 sps:$4 sm:$0xff]   ;;  %v1712_v33 = vld [vmem:[%s1873_s27 + $0x44] ss:$8 sps:$4 sm:$0xff]  }
  0x17   : > { %877 = vmatprep.subr.bf16.mxu0 %v1808_v1  ;;  %1618 = vmatprep.subr.bf16.mxu1 %v1808_v1  ;;  %v1714_v34 = vld [vmem:[%s1873_s27 + $0x144] ss:$8 sps:$4 sm:$0xff]   ;;  %v1716_v35 = vld [vmem:[%s1873_s27 + $0x40] ss:$8 sps:$4 sm:$0xff]   ;;  %v1718_v37 = vld [vmem:[%s1873_s27 + $0x54] ss:$8 sps:$4 sm:$0xff]  }
  0x18   : > { %v1717_v36 = vld [vmem:[%s1873_s27 + $0x140] ss:$8 sps:$4 sm:$0xff]   ;;  %v1720_v38 = vld [vmem:[%s1873_s27 + $0x154] ss:$8 sps:$4 sm:$0xff]   ;;  %v1722_v39 = vld [vmem:[%s1873_s27 + $0x50] ss:$8 sps:$4 sm:$0xff]  }
  0x19   : > { %v1723_v40 = vld [vmem:[%s1873_s27 + $0x150] ss:$8 sps:$4 sm:$0xff]   ;;  %v1724_v41 = vld [vmem:[%s1873_s27 + $0x64] ss:$8 sps:$4 sm:$0xff]   ;;  %v1728_v43 = vld [vmem:[%s1873_s27 + $0x60] ss:$8 sps:$4 sm:$0xff]  }
  0x1a   : > { %878 = vmatpush1.bf16.msra.mxu0 %v1675_v4  ;;  %1634 = vmatpush1.bf16.msra.mxu1 %v1675_v4  ;;  %v1726_v42 = vld [vmem:[%s1873_s27 + $0x164] ss:$8 sps:$4 sm:$0xff]   ;;  %v1729_v44 = vld [vmem:[%s1873_s27 + $0x160] ss:$8 sps:$4 sm:$0xff]   ;;  %v1730_v45 = vld [vmem:[%s1873_s27 + $0x74] ss:$8 sps:$4 sm:$0xff]  }
  0x1b   : > { %879 = vmatprep.subr.bf16.mxu0 %v1808_v1  ;;  %1619 = vmatprep.subr.bf16.mxu1 %v1808_v1  ;;  %v1732_v46 = vld [vmem:[%s1873_s27 + $0x174] ss:$8 sps:$4 sm:$0xff]   ;;  %v1734_v47 = vld [vmem:[%s1873_s27 + $0x70] ss:$8 sps:$4 sm:$0xff]   ;;  %v1736_v49 = vld [vmem:[%s1873_s27 + $0x84] ss:$8 sps:$4 sm:$0xff]  }
  0x1c   : > { %v1735_v48 = vld [vmem:[%s1873_s27 + $0x170] ss:$8 sps:$4 sm:$0xff]   ;;  %v1738_v50 = vld [vmem:[%s1873_s27 + $0x184] ss:$8 sps:$4 sm:$0xff]   ;;  %v1740_v51 = vld [vmem:[%s1873_s27 + $0x80] ss:$8 sps:$4 sm:$0xff]  }
  0x1d   : > { %v1741_v52 = vld [vmem:[%s1873_s27 + $0x180] ss:$8 sps:$4 sm:$0xff]   ;;  %v1742_v53 = vld [vmem:[%s1873_s27 + $0x94] ss:$8 sps:$4 sm:$0xff]   ;;  %v1746_v55 = vld [vmem:[%s1873_s27 + $0x90] ss:$8 sps:$4 sm:$0xff]  }
  0x1e   : > { %880 = vmatpush1.bf16.msra.mxu0 %v1676_v5  ;;  %1635 = vmatpush1.bf16.msra.mxu1 %v1676_v5  ;;  %v1744_v54 = vld [vmem:[%s1873_s27 + $0x194] ss:$8 sps:$4 sm:$0xff]   ;;  %v1747_v56 = vld [vmem:[%s1873_s27 + $0x190] ss:$8 sps:$4 sm:$0xff]   ;;  %v1748_v57 = vld [vmem:[%s1873_s27 + $0xa4] ss:$8 sps:$4 sm:$0xff]  }
  0x1f   : > { %881 = vmatprep.subr.bf16.mxu0 %v1808_v1  ;;  %1620 = vmatprep.subr.bf16.mxu1 %v1808_v1  ;;  %v1750_v58 = vld [vmem:[%s1873_s27 + $0x1a4] ss:$8 sps:$4 sm:$0xff]   ;;  %v1752_v59 = vld [vmem:[%s1873_s27 + $0xa0] ss:$8 sps:$4 sm:$0xff]   ;;  %v1754_v61 = vld [vmem:[%s1873_s27 + $0xb4] ss:$8 sps:$4 sm:$0xff]  }
  0x20   : > { %v1753_v60 = vld [vmem:[%s1873_s27 + $0x1a0] ss:$8 sps:$4 sm:$0xff]   ;;  %v1756_v62 = vld [vmem:[%s1873_s27 + $0x1b4] ss:$8 sps:$4 sm:$0xff]   ;;  %v1758_v63 = vld [vmem:[%s1873_s27 + $0xb0] ss:$8 sps:$4 sm:$0xff]  }
  0x21   : > { %v1759_v0 = vld [vmem:[%s1873_s27 + $0x1b0] ss:$8 sps:$4 sm:$0xff]   ;;  %v1762_v2 = vld [vmem:[%s1873_s27 + $0x1c4] ss:$8 sps:$4 sm:$0xff]   ;;  %v1764_v3 = vld [vmem:[%s1873_s27 + $0xc0] ss:$8 sps:$4 sm:$0xff]  }
  0x22   : > { %882 = vmatpush1.bf16.msra.mxu0 %v1677_v7  ;;  %1636 = vmatpush1.bf16.msra.mxu1 %v1677_v7  ;;  %v1765_v4 = vld [vmem:[%s1873_s27 + $0x1c0] ss:$8 sps:$4 sm:$0xff]   ;;  %v1766_v5 = vld [vmem:[%s1873_s27 + $0xd4] ss:$8 sps:$4 sm:$0xff]   ;;  %v1770_v7 = vld [vmem:[%s1873_s27 + $0xd0] ss:$8 sps:$4 sm:$0xff]  }
  0x23   : > { %883 = vmatprep.subr.bf16.mxu0 %v1808_v1  ;;  %1621 = vmatprep.subr.bf16.mxu1 %v1808_v1  ;;  %v1768_v6 = vld [vmem:[%s1873_s27 + $0x1d4] ss:$8 sps:$4 sm:$0xff]   ;;  %v1771_v8 = vld [vmem:[%s1873_s27 + $0x1d0] ss:$8 sps:$4 sm:$0xff]  }
  0x26   : > { %884 = vmatpush1.bf16.msra.mxu0 %v1678_v9  ;;  %1637 = vmatpush1.bf16.msra.mxu1 %v1678_v9  ;;  %v1772_v9 = vld [vmem:[%s1873_s27 + $0xe4] ss:$8 sps:$4 sm:$0xff]  }
  0x27   : > { %885 = vmatprep.subr.bf16.mxu0 %v1808_v1  ;;  %1622 = vmatprep.subr.bf16.mxu1 %v1808_v1 }
  0x2a   : > { %886 = vmatpush1.bf16.msra.mxu0 %v1679_v10  ;;  %1638 = vmatpush1.bf16.msra.mxu1 %v1679_v10  ;;  %v1774_v10 = vld [vmem:[%s1873_s27 + $0x1e4] ss:$8 sps:$4 sm:$0xff]  }
  0x2b   : > { %887 = vmatprep.subr.bf16.mxu0 %v1808_v1  ;;  %1623 = vmatprep.subr.bf16.mxu1 %v1808_v1 }
  0x2e   : > { %888 = vmatpush2.bf16.msra.mxu0 %v1680_v11  ;;  %1639 = vmatpush2.bf16.msra.mxu1 %v1680_v11  ;;  %v1776_v11 = vld [vmem:[%s1873_s27 + $0xe0] ss:$8 sps:$4 sm:$0xff]  }
  0x2f   : > { %889 = vmatprep.subr.bf16.mxu0 %v1808_v1  ;;  %1624 = vmatprep.subr.bf16.mxu1 %v1808_v1 }
  0x32   : > { %890 = vmatpush2.bf16.msra.mxu0 %v1681_v12  ;;  %1640 = vmatpush2.bf16.msra.mxu1 %v1681_v12  ;;  %v1777_v12 = vld [vmem:[%s1873_s27 + $0x1e0] ss:$8 sps:$4 sm:$0xff]  }
  0x33   : > { %891 = vmatprep.subr.bf16.mxu0 %v1808_v1  ;;  %1625 = vmatprep.subr.bf16.mxu1 %v1808_v1 }
  0x36   : > { %892 = vmatpush2.bf16.msra.mxu0 %v1682_v13  ;;  %1641 = vmatpush2.bf16.msra.mxu1 %v1682_v13  ;;  %v1778_v13 = vld [vmem:[%s1873_s27 + $0xf4] ss:$8 sps:$4 sm:$0xff]  }
  0x37   : > { %893 = vmatprep.subr.bf16.mxu0 %v1808_v1  ;;  %1626 = vmatprep.subr.bf16.mxu1 %v1808_v1 }
  0x3a   : > { %894 = vmatpush2.bf16.msra.mxu0 %v1683_v14  ;;  %1642 = vmatpush2.bf16.msra.mxu1 %v1683_v14  ;;  %v1780_v14 = vld [vmem:[%s1873_s27 + $0x1f4] ss:$8 sps:$4 sm:$0xff]  }
  0x3b   : > { %895 = vmatprep.subr.bf16.mxu0 %v1808_v1  ;;  %1627 = vmatprep.subr.bf16.mxu1 %v1808_v1 }
  0x3e   : > { %896 = vmatpush2.bf16.msra.mxu0 %v1684_v15  ;;  %1643 = vmatpush2.bf16.msra.mxu1 %v1684_v15  ;;  %v1782_v15 = vld [vmem:[%s1873_s27 + $0xf0] ss:$8 sps:$4 sm:$0xff]  }
  0x3f   : > { %897 = vmatprep.subr.bf16.mxu0 %v1808_v1  ;;  %1628 = vmatprep.subr.bf16.mxu1 %v1808_v1 }
  0x42   : > { %898 = vmatpush2.bf16.msra.mxu0 %v1685_v16  ;;  %1644 = vmatpush2.bf16.msra.mxu1 %v1685_v16  ;;  %v1783_v16 = vld [vmem:[%s1873_s27 + $0x1f0] ss:$8 sps:$4 sm:$0xff]  }
  0x43   : > { %899 = vmatprep.subr.bf16.mxu0 %v1808_v1  ;;  %1629 = vmatprep.subr.bf16.mxu1 %v1808_v1 }
  0x46   : > { %900 = vmatpush2.bf16.msra.mxu0 %v1686_v17  ;;  %1645 = vmatpush2.bf16.msra.mxu1 %v1686_v17 }
  0x47   : > { %901 = vmatprep.subr.bf16.mxu0 %v1808_v1  ;;  %1630 = vmatprep.subr.bf16.mxu1 %v1808_v1  ;;  %v1760_v1 = vld [vmem:[%s1873_s27 + $0xc4] ss:$8 sps:$4 sm:$0xff]  }
  0x4a   : > { %902 = vmatpush2.bf16.msra.mxu0 %v1687_v18  ;;  %1646 = vmatpush2.bf16.msra.mxu1 %v1687_v18 }
  0x4d   : > { %904 = vmatmul.mubr.bf16.vlgmr.msra.gmra.mxu0 %v1688_v19  ;;  %1032 = vmatmul.mubr.bf16.vlgmr.msra.gmra.mxu1 %v1691_v20 }
  0x4e   : > { %911 = vmatprep.mubr.bf16.mxu0 %v1694_v21  ;;  %1039 = vmatprep.mubr.bf16.mxu1 %v1696_v22 }
  0x55   : > { %912 = vmatmul.mubr.bf16.gmra.mxu0 %v1698_v23  ;;  %1040 = vmatmul.mubr.bf16.gmra.mxu1 %v1699_v24 }
  0x56   : > { %919 = vmatprep.mubr.bf16.mxu0 %v1700_v25  ;;  %1047 = vmatprep.mubr.bf16.mxu1 %v1702_v26 }
  0x5d   : > { %920 = vmatmul.mubr.bf16.gmra.mxu0 %v1704_v27  ;;  %1048 = vmatmul.mubr.bf16.gmra.mxu1 %v1705_v28 }
  0x5e   : > { %927 = vmatprep.mubr.bf16.mxu0 %v1706_v29  ;;  %1055 = vmatprep.mubr.bf16.mxu1 %v1708_v30 }
  0x65   : > { %928 = vmatmul.mubr.bf16.gmra.mxu0 %v1710_v31  ;;  %1056 = vmatmul.mubr.bf16.gmra.mxu1 %v1711_v32 }
  0x66   : > { %935 = vmatprep.mubr.bf16.mxu0 %v1712_v33  ;;  %1063 = vmatprep.mubr.bf16.mxu1 %v1714_v34 }
  0x6d   : > { %936 = vmatmul.mubr.bf16.gmra.mxu0 %v1716_v35  ;;  %1064 = vmatmul.mubr.bf16.gmra.mxu1 %v1717_v36 }
  0x6e   : > { %943 = vmatprep.mubr.bf16.mxu0 %v1718_v37  ;;  %1071 = vmatprep.mubr.bf16.mxu1 %v1720_v38 }
  0x75   : > { %944 = vmatmul.mubr.bf16.gmra.mxu0 %v1722_v39  ;;  %1072 = vmatmul.mubr.bf16.gmra.mxu1 %v1723_v40 }
  0x76   : > { %951 = vmatprep.mubr.bf16.mxu0 %v1724_v41  ;;  %1079 = vmatprep.mubr.bf16.mxu1 %v1726_v42 }
  0x7d   : > { %952 = vmatmul.mubr.bf16.gmra.mxu0 %v1728_v43  ;;  %1080 = vmatmul.mubr.bf16.gmra.mxu1 %v1729_v44 }
  0x7e   : > { %959 = vmatprep.mubr.bf16.mxu0 %v1730_v45  ;;  %1087 = vmatprep.mubr.bf16.mxu1 %v1732_v46 }
  0x85   : > { %960 = vmatmul.mubr.bf16.gmra.mxu0 %v1734_v47  ;;  %1088 = vmatmul.mubr.bf16.gmra.mxu1 %v1735_v48 }
  0x86   : > { %967 = vmatprep.mubr.bf16.mxu0 %v1736_v49  ;;  %1095 = vmatprep.mubr.bf16.mxu1 %v1738_v50 }
  0x8d   : > { %968 = vmatmul.mubr.bf16.gmra.mxu0 %v1740_v51  ;;  %1096 = vmatmul.mubr.bf16.gmra.mxu1 %v1741_v52 }
  0x8e   : > { %975 = vmatprep.mubr.bf16.mxu0 %v1742_v53  ;;  %1103 = vmatprep.mubr.bf16.mxu1 %v1744_v54 }
  0x95   : > { %976 = vmatmul.mubr.bf16.gmra.mxu0 %v1746_v55  ;;  %1104 = vmatmul.mubr.bf16.gmra.mxu1 %v1747_v56 }
  0x96   : > { %983 = vmatprep.mubr.bf16.mxu0 %v1748_v57  ;;  %1111 = vmatprep.mubr.bf16.mxu1 %v1750_v58 }
  0x9d   : > { %984 = vmatmul.mubr.bf16.gmra.mxu0 %v1752_v59  ;;  %1112 = vmatmul.mubr.bf16.gmra.mxu1 %v1753_v60 }
  0x9e   : > { %991 = vmatprep.mubr.bf16.mxu0 %v1754_v61  ;;  %1119 = vmatprep.mubr.bf16.mxu1 %v1756_v62 }
  0xa5   : > { %992 = vmatmul.mubr.bf16.gmra.mxu0 %v1758_v63  ;;  %1120 = vmatmul.mubr.bf16.gmra.mxu1 %v1759_v0 }
  0xa6   : > { %999 = vmatprep.mubr.bf16.mxu0 %v1760_v1  ;;  %1127 = vmatprep.mubr.bf16.mxu1 %v1762_v2 }
  0xad   : > { %1000 = vmatmul.mubr.bf16.gmra.mxu0 %v1764_v3  ;;  %1128 = vmatmul.mubr.bf16.gmra.mxu1 %v1765_v4 }
  0xae   : > { %1007 = vmatprep.mubr.bf16.mxu0 %v1766_v5  ;;  %1135 = vmatprep.mubr.bf16.mxu1 %v1768_v6 }
  0xb5   : > { %1008 = vmatmul.mubr.bf16.gmra.mxu0 %v1770_v7  ;;  %1136 = vmatmul.mubr.bf16.gmra.mxu1 %v1771_v8 }
  0xb6   : > { %1015 = vmatprep.mubr.bf16.mxu0 %v1772_v9  ;;  %1143 = vmatprep.mubr.bf16.mxu1 %v1774_v10 }
  0xbd   : > { %1016 = vmatmul.mubr.bf16.gmra.mxu0 %v1776_v11  ;;  %1144 = vmatmul.mubr.bf16.gmra.mxu1 %v1777_v12 }
  0xbe   : > { %1023 = vmatprep.mubr.bf16.mxu0 %v1778_v13  ;;  %1151 = vmatprep.mubr.bf16.mxu1 %v1780_v14 }
  0xc5   : > { %1024 = vmatmul.mubr.bf16.gmra.mxu0 %v1782_v15  ;;  %1152 = vmatmul.mubr.bf16.gmra.mxu1 %v1783_v16 }
 0x10d   : > { %v905_v17 = vpop.f32.mrf.mxu0  ;;  %v1033_v18 = vpop.f32.mrf.mxu1 }
 0x10e   : > { %1355 = vst [vmem:[%s2001_s30] sm:$0xff] %v905_v17  ;;  %1387 = vst [vmem:[%s2001_s30 + $0x100] sm:$0xff] %v1033_v18 }
 0x10f   : > { %v907_v19 = vpop.f32.mrf.mxu0  ;;  %v1035_v20 = vpop.f32.mrf.mxu1 }
 0x111   : > { %v908_v21 = vpop.f32.mrf.mxu0  ;;  %v1036_v22 = vpop.f32.mrf.mxu1 }
 0x112   : > { %1356 = vst [vmem:[%s2001_s30 + $0x8] sm:$0xff] %v908_v21  ;;  %1388 = vst [vmem:[%s2001_s30 + $0x108] sm:$0xff] %v1036_v22 }
 0x113   : > { %v910_v23 = vpop.f32.mrf.mxu0  ;;  %v1038_v24 = vpop.f32.mrf.mxu1 }
 0x115   : > { %v913_v25 = vpop.f32.mrf.mxu0  ;;  %v1041_v26 = vpop.f32.mrf.mxu1 }
 0x116   : > { %1357 = vst [vmem:[%s2001_s30 + $0x10] sm:$0xff] %v913_v25  ;;  %1389 = vst [vmem:[%s2001_s30 + $0x110] sm:$0xff] %v1041_v26 }
 0x117   : > { %v915_v27 = vpop.f32.mrf.mxu0  ;;  %v1043_v28 = vpop.f32.mrf.mxu1 }
 0x119   : > { %v916_v29 = vpop.f32.mrf.mxu0  ;;  %v1044_v30 = vpop.f32.mrf.mxu1 }
 0x11a   : > { %1358 = vst [vmem:[%s2001_s30 + $0x18] sm:$0xff] %v916_v29  ;;  %1390 = vst [vmem:[%s2001_s30 + $0x118] sm:$0xff] %v1044_v30 }
 0x11b   : > { %v918_v31 = vpop.f32.mrf.mxu0  ;;  %v1046_v32 = vpop.f32.mrf.mxu1 }
 0x11d   : > { %v921_v33 = vpop.f32.mrf.mxu0  ;;  %v1049_v34 = vpop.f32.mrf.mxu1 }
 0x11e   : > { %1359 = vst [vmem:[%s2001_s30 + $0x20] sm:$0xff] %v921_v33  ;;  %1391 = vst [vmem:[%s2001_s30 + $0x120] sm:$0xff] %v1049_v34 }
 0x11f   : > { %v923_v35 = vpop.f32.mrf.mxu0  ;;  %v1051_v36 = vpop.f32.mrf.mxu1 }
 0x121   : > { %v924_v37 = vpop.f32.mrf.mxu0  ;;  %v1052_v38 = vpop.f32.mrf.mxu1 }
 0x122   : > { %1360 = vst [vmem:[%s2001_s30 + $0x28] sm:$0xff] %v924_v37  ;;  %1392 = vst [vmem:[%s2001_s30 + $0x128] sm:$0xff] %v1052_v38 }
 0x123   : > { %v926_v39 = vpop.f32.mrf.mxu0  ;;  %v1054_v40 = vpop.f32.mrf.mxu1 }
 0x125   : > { %v929_v41 = vpop.f32.mrf.mxu0  ;;  %v1057_v42 = vpop.f32.mrf.mxu1 }
 0x126   : > { %1361 = vst [vmem:[%s2001_s30 + $0x30] sm:$0xff] %v929_v41  ;;  %1393 = vst [vmem:[%s2001_s30 + $0x130] sm:$0xff] %v1057_v42 }
 0x127   : > { %v931_v43 = vpop.f32.mrf.mxu0  ;;  %v1059_v44 = vpop.f32.mrf.mxu1 }
 0x129   : > { %v932_v45 = vpop.f32.mrf.mxu0  ;;  %v1060_v46 = vpop.f32.mrf.mxu1 }
 0x12a   : > { %1362 = vst [vmem:[%s2001_s30 + $0x38] sm:$0xff] %v932_v45  ;;  %1394 = vst [vmem:[%s2001_s30 + $0x138] sm:$0xff] %v1060_v46 }
 0x12b   : > { %v934_v47 = vpop.f32.mrf.mxu0  ;;  %v1062_v48 = vpop.f32.mrf.mxu1 }
 0x12d   : > { %v937_v49 = vpop.f32.mrf.mxu0  ;;  %v1065_v50 = vpop.f32.mrf.mxu1 }
 0x12e   : > { %1363 = vst [vmem:[%s2001_s30 + $0x40] sm:$0xff] %v937_v49  ;;  %1395 = vst [vmem:[%s2001_s30 + $0x140] sm:$0xff] %v1065_v50 }
 0x12f   : > { %v939_v51 = vpop.f32.mrf.mxu0  ;;  %v1067_v52 = vpop.f32.mrf.mxu1 }
 0x131   : > { %v940_v53 = vpop.f32.mrf.mxu0  ;;  %v1068_v54 = vpop.f32.mrf.mxu1 }
 0x132   : > { %1364 = vst [vmem:[%s2001_s30 + $0x48] sm:$0xff] %v940_v53  ;;  %1396 = vst [vmem:[%s2001_s30 + $0x148] sm:$0xff] %v1068_v54 }
 0x133   : > { %v942_v55 = vpop.f32.mrf.mxu0  ;;  %v1070_v56 = vpop.f32.mrf.mxu1 }
 0x135   : > { %v945_v57 = vpop.f32.mrf.mxu0  ;;  %v1073_v58 = vpop.f32.mrf.mxu1 }
 0x136   : > { %1365 = vst [vmem:[%s2001_s30 + $0x50] sm:$0xff] %v945_v57  ;;  %1397 = vst [vmem:[%s2001_s30 + $0x150] sm:$0xff] %v1073_v58 }
 0x137   : > { %v947_v59 = vpop.f32.mrf.mxu0  ;;  %v1075_v60 = vpop.f32.mrf.mxu1 }
 0x139   : > { %v948_v61 = vpop.f32.mrf.mxu0  ;;  %v1076_v62 = vpop.f32.mrf.mxu1 }
 0x13a   : > { %1366 = vst [vmem:[%s2001_s30 + $0x58] sm:$0xff] %v948_v61  ;;  %1398 = vst [vmem:[%s2001_s30 + $0x158] sm:$0xff] %v1076_v62 }
 0x13b   : > { %v950_v63 = vpop.f32.mrf.mxu0  ;;  %v1078_v0 = vpop.f32.mrf.mxu1 }
 0x13d   : > { %v953_v1 = vpop.f32.mrf.mxu0  ;;  %v1081_v2 = vpop.f32.mrf.mxu1 }
 0x13e   : > { %1367 = vst [vmem:[%s2001_s30 + $0x60] sm:$0xff] %v953_v1  ;;  %1399 = vst [vmem:[%s2001_s30 + $0x160] sm:$0xff] %v1081_v2 }
 0x13f   : > { %v955_v3 = vpop.f32.mrf.mxu0  ;;  %v1083_v4 = vpop.f32.mrf.mxu1 }
 0x141   : > { %v956_v5 = vpop.f32.mrf.mxu0  ;;  %v1084_v6 = vpop.f32.mrf.mxu1 }
 0x142   : > { %1368 = vst [vmem:[%s2001_s30 + $0x68] sm:$0xff] %v956_v5  ;;  %1400 = vst [vmem:[%s2001_s30 + $0x168] sm:$0xff] %v1084_v6 }
 0x143   : > { %v958_v7 = vpop.f32.mrf.mxu0  ;;  %v1086_v8 = vpop.f32.mrf.mxu1 }
 0x145   : > { %v961_v9 = vpop.f32.mrf.mxu0  ;;  %v1089_v10 = vpop.f32.mrf.mxu1 }
 0x146   : > { %1369 = vst [vmem:[%s2001_s30 + $0x70] sm:$0xff] %v961_v9  ;;  %1401 = vst [vmem:[%s2001_s30 + $0x170] sm:$0xff] %v1089_v10 }
 0x147   : > { %v963_v11 = vpop.f32.mrf.mxu0  ;;  %v1091_v12 = vpop.f32.mrf.mxu1 }
 0x149   : > { %v964_v13 = vpop.f32.mrf.mxu0  ;;  %v1092_v14 = vpop.f32.mrf.mxu1 }
 0x14a   : > { %1370 = vst [vmem:[%s2001_s30 + $0x78] sm:$0xff] %v964_v13  ;;  %1402 = vst [vmem:[%s2001_s30 + $0x178] sm:$0xff] %v1092_v14 }
 0x14b   : > { %v966_v15 = vpop.f32.mrf.mxu0  ;;  %v1094_v16 = vpop.f32.mrf.mxu1 }
 0x14d   : > { %v969_v17 = vpop.f32.mrf.mxu0  ;;  %v1097_v18 = vpop.f32.mrf.mxu1 }
 0x14e   : > { %1371 = vst [vmem:[%s2001_s30 + $0x80] sm:$0xff] %v969_v17  ;;  %1403 = vst [vmem:[%s2001_s30 + $0x180] sm:$0xff] %v1097_v18 }
 0x14f   : > { %v971_v19 = vpop.f32.mrf.mxu0  ;;  %v1099_v20 = vpop.f32.mrf.mxu1 }
 0x151   : > { %v972_v21 = vpop.f32.mrf.mxu0  ;;  %v1100_v22 = vpop.f32.mrf.mxu1 }
 0x152   : > { %1372 = vst [vmem:[%s2001_s30 + $0x88] sm:$0xff] %v972_v21  ;;  %1404 = vst [vmem:[%s2001_s30 + $0x188] sm:$0xff] %v1100_v22 }
 0x153   : > { %v974_v23 = vpop.f32.mrf.mxu0  ;;  %v1102_v24 = vpop.f32.mrf.mxu1 }
 0x155   : > { %v977_v25 = vpop.f32.mrf.mxu0  ;;  %v1105_v26 = vpop.f32.mrf.mxu1 }
 0x156   : > { %1373 = vst [vmem:[%s2001_s30 + $0x90] sm:$0xff] %v977_v25  ;;  %1405 = vst [vmem:[%s2001_s30 + $0x190] sm:$0xff] %v1105_v26 }
 0x157   : > { %v979_v27 = vpop.f32.mrf.mxu0  ;;  %v1107_v28 = vpop.f32.mrf.mxu1 }
 0x159   : > { %v980_v29 = vpop.f32.mrf.mxu0  ;;  %v1108_v30 = vpop.f32.mrf.mxu1 }
 0x15a   : > { %1374 = vst [vmem:[%s2001_s30 + $0x98] sm:$0xff] %v980_v29  ;;  %1406 = vst [vmem:[%s2001_s30 + $0x198] sm:$0xff] %v1108_v30 }
 0x15b   : > { %v982_v31 = vpop.f32.mrf.mxu0  ;;  %v1110_v32 = vpop.f32.mrf.mxu1 }
 0x15d   : > { %v985_v33 = vpop.f32.mrf.mxu0  ;;  %v1113_v34 = vpop.f32.mrf.mxu1 }
 0x15e   : > { %1375 = vst [vmem:[%s2001_s30 + $0xa0] sm:$0xff] %v985_v33  ;;  %1407 = vst [vmem:[%s2001_s30 + $0x1a0] sm:$0xff] %v1113_v34 }
 0x15f   : > { %v987_v35 = vpop.f32.mrf.mxu0  ;;  %v1115_v36 = vpop.f32.mrf.mxu1 }
 0x161   : > { %v988_v37 = vpop.f32.mrf.mxu0  ;;  %v1116_v38 = vpop.f32.mrf.mxu1 }
 0x162   : > { %1376 = vst [vmem:[%s2001_s30 + $0xa8] sm:$0xff] %v988_v37  ;;  %1408 = vst [vmem:[%s2001_s30 + $0x1a8] sm:$0xff] %v1116_v38 }
 0x163   : > { %v990_v39 = vpop.f32.mrf.mxu0  ;;  %v1118_v40 = vpop.f32.mrf.mxu1 }
 0x165   : > { %v993_v41 = vpop.f32.mrf.mxu0  ;;  %v1121_v42 = vpop.f32.mrf.mxu1 }
 0x166   : > { %1377 = vst [vmem:[%s2001_s30 + $0xb0] sm:$0xff] %v993_v41  ;;  %1409 = vst [vmem:[%s2001_s30 + $0x1b0] sm:$0xff] %v1121_v42 }
 0x167   : > { %v995_v43 = vpop.f32.mrf.mxu0  ;;  %v1123_v44 = vpop.f32.mrf.mxu1 }
 0x169   : > { %v996_v45 = vpop.f32.mrf.mxu0  ;;  %v1124_v46 = vpop.f32.mrf.mxu1 }
 0x16a   : > { %1378 = vst [vmem:[%s2001_s30 + $0xb8] sm:$0xff] %v996_v45  ;;  %1410 = vst [vmem:[%s2001_s30 + $0x1b8] sm:$0xff] %v1124_v46 }
 0x16b   : > { %v998_v47 = vpop.f32.mrf.mxu0  ;;  %v1126_v48 = vpop.f32.mrf.mxu1 }
 0x16d   : > { %v1001_v49 = vpop.f32.mrf.mxu0  ;;  %v1129_v50 = vpop.f32.mrf.mxu1 }
 0x16e   : > { %1379 = vst [vmem:[%s2001_s30 + $0xc0] sm:$0xff] %v1001_v49  ;;  %1411 = vst [vmem:[%s2001_s30 + $0x1c0] sm:$0xff] %v1129_v50 }
 0x16f   : > { %v1003_v51 = vpop.f32.mrf.mxu0  ;;  %v1131_v52 = vpop.f32.mrf.mxu1 }
 0x171   : > { %v1004_v53 = vpop.f32.mrf.mxu0  ;;  %v1132_v54 = vpop.f32.mrf.mxu1 }
 0x172   : > { %1380 = vst [vmem:[%s2001_s30 + $0xc8] sm:$0xff] %v1004_v53  ;;  %1412 = vst [vmem:[%s2001_s30 + $0x1c8] sm:$0xff] %v1132_v54 }
 0x173   : > { %v1006_v55 = vpop.f32.mrf.mxu0  ;;  %v1134_v56 = vpop.f32.mrf.mxu1 }
 0x175   : > { %v1009_v57 = vpop.f32.mrf.mxu0  ;;  %v1137_v58 = vpop.f32.mrf.mxu1 }
 0x176   : > { %1381 = vst [vmem:[%s2001_s30 + $0xd0] sm:$0xff] %v1009_v57  ;;  %1413 = vst [vmem:[%s2001_s30 + $0x1d0] sm:$0xff] %v1137_v58 }
 0x177   : > { %v1011_v59 = vpop.f32.mrf.mxu0  ;;  %v1139_v60 = vpop.f32.mrf.mxu1 }
 0x179   : > { %v1012_v61 = vpop.f32.mrf.mxu0  ;;  %v1140_v62 = vpop.f32.mrf.mxu1 }
 0x17a   : > { %1382 = vst [vmem:[%s2001_s30 + $0xd8] sm:$0xff] %v1012_v61  ;;  %1414 = vst [vmem:[%s2001_s30 + $0x1d8] sm:$0xff] %v1140_v62 }
 0x17b   : > { %v1014_v63 = vpop.f32.mrf.mxu0  ;;  %v1142_v0 = vpop.f32.mrf.mxu1 }
 0x17d   : > { %v1017_v1 = vpop.f32.mrf.mxu0  ;;  %v1145_v2 = vpop.f32.mrf.mxu1 }
 0x17e   : > { %1383 = vst [vmem:[%s2001_s30 + $0xe0] sm:$0xff] %v1017_v1  ;;  %1415 = vst [vmem:[%s2001_s30 + $0x1e0] sm:$0xff] %v1145_v2 }
 0x17f   : > { %v1019_v3 = vpop.f32.mrf.mxu0  ;;  %v1147_v4 = vpop.f32.mrf.mxu1 }
 0x181   : > { %v1020_v5 = vpop.f32.mrf.mxu0  ;;  %v1148_v6 = vpop.f32.mrf.mxu1 }
 0x182   : > { %1384 = vst [vmem:[%s2001_s30 + $0xe8] sm:$0xff] %v1020_v5  ;;  %1416 = vst [vmem:[%s2001_s30 + $0x1e8] sm:$0xff] %v1148_v6 }
 0x183   : > { %v1022_v7 = vpop.f32.mrf.mxu0  ;;  %v1150_v8 = vpop.f32.mrf.mxu1 }
 0x185   : > { %v1025_v9 = vpop.f32.mrf.mxu0  ;;  %v1153_v10 = vpop.f32.mrf.mxu1 }
 0x186   : > { %1385 = vst [vmem:[%s2001_s30 + $0xf0] sm:$0xff] %v1025_v9  ;;  %1417 = vst [vmem:[%s2001_s30 + $0x1f0] sm:$0xff] %v1153_v10 }
 0x187   : > { %v1027_v11 = vpop.f32.mrf.mxu0  ;;  %v1155_v12 = vpop.f32.mrf.mxu1 }
 0x189   : > { %v1028_v13 = vpop.f32.mrf.mxu0  ;;  %v1156_v14 = vpop.f32.mrf.mxu1 }
 0x18a   : > { %1386 = vst [vmem:[%s2001_s30 + $0xf8] sm:$0xff] %v1028_v13  ;;  %1418 = vst [vmem:[%s2001_s30 + $0x1f8] sm:$0xff] %v1156_v14 }
 0x18b   : > { %v1030_v15 = vpop.f32.mrf.mxu0  ;;  %v1158_v16 = vpop.f32.mrf.mxu1 }
 0x18c PF: > { %s12_s11 = sadd.s32 1, %s1806_s11   ;;  %s2079_s9 = smov %s1802_s10 }
 0x18d   : > { %p9_p5 = scmp.ge.s32.totalorder %s12_s11, 6   ;;  %s2080_s10 = smov %s2082_s12 }
 0x18f   :  { %11 = sbr.rel (!%p9_p5) target bundleno = 2 (0x2), region = 69 }

// kernel: forward.35
= control target key start
LH: loop header
LB: loop body
LE: loop exit
PB: predicated region body
PF: predicated region fallthrough
CT: control target
= control target key end

     0   :  { %v297_v0 = vmov 0.0   ;;  %s523_s0 = inlined_call_operand.vmem [shape: f32[512,128], index: 0, kind: input, shape index: {}]   ;;  %s524_s1 = inlined_call_operand.vmem [shape: f32[1,128], index: 1, kind: output, shape index: {0}]   ;;  %s525_s2 = inlined_call_operand.vmem [shape: f32[1,128], index: 2, kind: output, shape index: {1}]  }
   0x1   :  { %14 = vst [vmem:[%s524_s1] sm:$0x1] %v297_v0  ;;  %15 = vst [vmem:[%s525_s2] sm:$0x1] %v297_v0  ;;  %v16_v1 = vld [vmem:[%s523_s0] sm:$0xff]  ;;  %v17_v2 = vld [vmem:[%s523_s0 + $0x8] sm:$0xff] }
   0x2   :  { %v18_v3 = vld [vmem:[%s523_s0 + $0x10] sm:$0xff]  ;;  %v19_v4 = vld [vmem:[%s523_s0 + $0x18] sm:$0xff]  ;;  %v81_v5 = vadd.f32 %v17_v2, %v16_v1  ;;  %v153_v6 = vmul.f32 %v16_v1, %v16_v1  ;;  %v154_v7 = vmul.f32 %v17_v2, %v17_v2  ;;  %v20_v9 = vld [vmem:[%s523_s0 + $0x20] sm:$0xff] }
   0x3   :  { %v155_v8 = vmul.f32 %v18_v3, %v18_v3  ;;  %v156_v11 = vmul.f32 %v19_v4, %v19_v4  ;;  %v21_v13 = vld [vmem:[%s523_s0 + $0x28] sm:$0xff]  ;;  %v157_v15 = vmul.f32 %v20_v9, %v20_v9  ;;  %v22_v17 = vld [vmem:[%s523_s0 + $0x30] sm:$0xff]  ;;  %v23_v21 = vld [vmem:[%s523_s0 + $0x38] sm:$0xff] }
   0x4   :  { %v82_v10 = vadd.f32 %v81_v5, %v18_v3  ;;  %v217_v12 = vadd.f32 %v154_v7, %v153_v6  ;;  %v158_v19 = vmul.f32 %v21_v13, %v21_v13  ;;  %v159_v23 = vmul.f32 %v22_v17, %v22_v17  ;;  %v24_v25 = vld [vmem:[%s523_s0 + $0x40] sm:$0xff]  ;;  %v25_v29 = vld [vmem:[%s523_s0 + $0x48] sm:$0xff]  ;;  %v26_v33 = vld [vmem:[%s523_s0 + $0x50] sm:$0xff] }
   0x5   :  { %v160_v27 = vmul.f32 %v23_v21, %v23_v21  ;;  %v161_v31 = vmul.f32 %v24_v25, %v24_v25  ;;  %v162_v35 = vmul.f32 %v25_v29, %v25_v29  ;;  %v27_v37 = vld [vmem:[%s523_s0 + $0x58] sm:$0xff]  ;;  %v163_v39 = vmul.f32 %v26_v33, %v26_v33  ;;  %v28_v41 = vld [vmem:[%s523_s0 + $0x60] sm:$0xff]  ;;  %v29_v45 = vld [vmem:[%s523_s0 + $0x68] sm:$0xff] }
   0x6   :  { %v83_v14 = vadd.f32 %v82_v10, %v19_v4  ;;  %v218_v16 = vadd.f32 %v217_v12, %v155_v8  ;;  %v164_v43 = vmul.f32 %v27_v37, %v27_v37  ;;  %v165_v47 = vmul.f32 %v28_v41, %v28_v41  ;;  %v30_v49 = vld [vmem:[%s523_s0 + $0x70] sm:$0xff]  ;;  %v31_v53 = vld [vmem:[%s523_s0 + $0x78] sm:$0xff]  ;;  %v32_v57 = vld [vmem:[%s523_s0 + $0x80] sm:$0xff] }
   0x7   :  { %v166_v51 = vmul.f32 %v29_v45, %v29_v45  ;;  %v167_v55 = vmul.f32 %v30_v49, %v30_v49  ;;  %v168_v59 = vmul.f32 %v31_v53, %v31_v53  ;;  %v33_v61 = vld [vmem:[%s523_s0 + $0x88] sm:$0xff]  ;;  %v169_v63 = vmul.f32 %v32_v57, %v32_v57  ;;  %v34_v1 = vld [vmem:[%s523_s0 + $0x90] sm:$0xff]  ;;  %v35_v5 = vld [vmem:[%s523_s0 + $0x98] sm:$0xff] }
   0x8   :  { %v84_v18 = vadd.f32 %v83_v14, %v20_v9  ;;  %v219_v20 = vadd.f32 %v218_v16, %v156_v11  ;;  %v170_v3 = vmul.f32 %v33_v61, %v33_v61  ;;  %v171_v7 = vmul.f32 %v34_v1, %v34_v1  ;;  %v36_v9 = vld [vmem:[%s523_s0 + $0xa0] sm:$0xff] }
   0x9   :  { %v172_v11 = vmul.f32 %v35_v5, %v35_v5 }
   0xa   :  { %v85_v22 = vadd.f32 %v84_v18, %v21_v13  ;;  %v220_v24 = vadd.f32 %v219_v20, %v157_v15  ;;  %v37_v13 = vld [vmem:[%s523_s0 + $0xa8] sm:$0xff]  ;;  %v173_v15 = vmul.f32 %v36_v9, %v36_v9 }
   0xc   :  { %v86_v26 = vadd.f32 %v85_v22, %v22_v17  ;;  %v221_v28 = vadd.f32 %v220_v24, %v158_v19  ;;  %v38_v17 = vld [vmem:[%s523_s0 + $0xb0] sm:$0xff]  ;;  %v174_v19 = vmul.f32 %v37_v13, %v37_v13 }
   0xe   :  { %v87_v30 = vadd.f32 %v86_v26, %v23_v21  ;;  %v222_v32 = vadd.f32 %v221_v28, %v159_v23  ;;  %v39_v21 = vld [vmem:[%s523_s0 + $0xb8] sm:$0xff]  ;;  %v175_v23 = vmul.f32 %v38_v17, %v38_v17 }
  0x10   :  { %v88_v34 = vadd.f32 %v87_v30, %v24_v25  ;;  %v223_v36 = vadd.f32 %v222_v32, %v160_v27  ;;  %v40_v25 = vld [vmem:[%s523_s0 + $0xc0] sm:$0xff]  ;;  %v176_v27 = vmul.f32 %v39_v21, %v39_v21 }
  0x12   :  { %v89_v38 = vadd.f32 %v88_v34, %v25_v29  ;;  %v224_v40 = vadd.f32 %v223_v36, %v161_v31  ;;  %v41_v29 = vld [vmem:[%s523_s0 + $0xc8] sm:$0xff]  ;;  %v177_v31 = vmul.f32 %v40_v25, %v40_v25 }
  0x14   :  { %v90_v42 = vadd.f32 %v89_v38, %v26_v33  ;;  %v225_v44 = vadd.f32 %v224_v40, %v162_v35  ;;  %v42_v33 = vld [vmem:[%s523_s0 + $0xd0] sm:$0xff]  ;;  %v178_v35 = vmul.f32 %v41_v29, %v41_v29 }
  0x16   :  { %v91_v46 = vadd.f32 %v90_v42, %v27_v37  ;;  %v226_v48 = vadd.f32 %v225_v44, %v163_v39  ;;  %v43_v37 = vld [vmem:[%s523_s0 + $0xd8] sm:$0xff]  ;;  %v179_v39 = vmul.f32 %v42_v33, %v42_v33 }
  0x18   :  { %v92_v50 = vadd.f32 %v91_v46, %v28_v41  ;;  %v227_v52 = vadd.f32 %v226_v48, %v164_v43  ;;  %v44_v41 = vld [vmem:[%s523_s0 + $0xe0] sm:$0xff]  ;;  %v180_v43 = vmul.f32 %v43_v37, %v43_v37 }
  0x1a   :  { %v93_v54 = vadd.f32 %v92_v50, %v29_v45  ;;  %v228_v56 = vadd.f32 %v227_v52, %v165_v47  ;;  %v45_v45 = vld [vmem:[%s523_s0 + $0xe8] sm:$0xff]  ;;  %v181_v47 = vmul.f32 %v44_v41, %v44_v41 }
  0x1c   :  { %v94_v58 = vadd.f32 %v93_v54, %v30_v49  ;;  %v229_v60 = vadd.f32 %v228_v56, %v166_v51  ;;  %v46_v49 = vld [vmem:[%s523_s0 + $0xf0] sm:$0xff]  ;;  %v182_v51 = vmul.f32 %v45_v45, %v45_v45 }
  0x1e   :  { %v95_v62 = vadd.f32 %v94_v58, %v31_v53  ;;  %v230_v0 = vadd.f32 %v229_v60, %v167_v55  ;;  %v47_v53 = vld [vmem:[%s523_s0 + $0xf8] sm:$0xff]  ;;  %v183_v55 = vmul.f32 %v46_v49, %v46_v49 }
  0x20   :  { %v96_v2 = vadd.f32 %v95_v62, %v32_v57  ;;  %v231_v4 = vadd.f32 %v230_v0, %v168_v59  ;;  %v48_v57 = vld [vmem:[%s523_s0 + $0x100] sm:$0xff]  ;;  %v184_v59 = vmul.f32 %v47_v53, %v47_v53 }
  0x22   :  { %v97_v6 = vadd.f32 %v96_v2, %v33_v61  ;;  %v232_v8 = vadd.f32 %v231_v4, %v169_v63  ;;  %v49_v61 = vld [vmem:[%s523_s0 + $0x108] sm:$0xff]  ;;  %v185_v63 = vmul.f32 %v48_v57, %v48_v57 }
  0x24   :  { %v98_v10 = vadd.f32 %v97_v6, %v34_v1  ;;  %v233_v12 = vadd.f32 %v232_v8, %v170_v3  ;;  %v50_v1 = vld [vmem:[%s523_s0 + $0x110] sm:$0xff]  ;;  %v186_v3 = vmul.f32 %v49_v61, %v49_v61 }
  0x26   :  { %v99_v14 = vadd.f32 %v98_v10, %v35_v5  ;;  %v234_v16 = vadd.f32 %v233_v12, %v171_v7  ;;  %v51_v5 = vld [vmem:[%s523_s0 + $0x118] sm:$0xff]  ;;  %v187_v7 = vmul.f32 %v50_v1, %v50_v1 }
  0x28   :  { %v100_v18 = vadd.f32 %v99_v14, %v36_v9  ;;  %v235_v20 = vadd.f32 %v234_v16, %v172_v11  ;;  %v52_v9 = vld [vmem:[%s523_s0 + $0x120] sm:$0xff]  ;;  %v188_v11 = vmul.f32 %v51_v5, %v51_v5 }
  0x2a   :  { %v101_v22 = vadd.f32 %v100_v18, %v37_v13  ;;  %v236_v24 = vadd.f32 %v235_v20, %v173_v15  ;;  %v53_v13 = vld [vmem:[%s523_s0 + $0x128] sm:$0xff]  ;;  %v189_v15 = vmul.f32 %v52_v9, %v52_v9 }
  0x2c   :  { %v102_v26 = vadd.f32 %v101_v22, %v38_v17  ;;  %v237_v28 = vadd.f32 %v236_v24, %v174_v19  ;;  %v54_v17 = vld [vmem:[%s523_s0 + $0x130] sm:$0xff]  ;;  %v190_v19 = vmul.f32 %v53_v13, %v53_v13 }
  0x2e   :  { %v103_v30 = vadd.f32 %v102_v26, %v39_v21  ;;  %v238_v32 = vadd.f32 %v237_v28, %v175_v23  ;;  %v55_v21 = vld [vmem:[%s523_s0 + $0x138] sm:$0xff]  ;;  %v191_v23 = vmul.f32 %v54_v17, %v54_v17 }
  0x30   :  { %v104_v34 = vadd.f32 %v103_v30, %v40_v25  ;;  %v239_v36 = vadd.f32 %v238_v32, %v176_v27  ;;  %v56_v25 = vld [vmem:[%s523_s0 + $0x140] sm:$0xff]  ;;  %v192_v27 = vmul.f32 %v55_v21, %v55_v21 }
  0x32   :  { %v105_v38 = vadd.f32 %v104_v34, %v41_v29  ;;  %v240_v40 = vadd.f32 %v239_v36, %v177_v31  ;;  %v57_v29 = vld [vmem:[%s523_s0 + $0x148] sm:$0xff]  ;;  %v193_v31 = vmul.f32 %v56_v25, %v56_v25 }
  0x34   :  { %v106_v42 = vadd.f32 %v105_v38, %v42_v33  ;;  %v241_v44 = vadd.f32 %v240_v40, %v178_v35  ;;  %v58_v33 = vld [vmem:[%s523_s0 + $0x150] sm:$0xff]  ;;  %v194_v35 = vmul.f32 %v57_v29, %v57_v29 }
  0x36   :  { %v107_v46 = vadd.f32 %v106_v42, %v43_v37  ;;  %v242_v48 = vadd.f32 %v241_v44, %v179_v39  ;;  %v59_v37 = vld [vmem:[%s523_s0 + $0x158] sm:$0xff]  ;;  %v195_v39 = vmul.f32 %v58_v33, %v58_v33 }
  0x38   :  { %v108_v50 = vadd.f32 %v107_v46, %v44_v41  ;;  %v243_v52 = vadd.f32 %v242_v48, %v180_v43  ;;  %v60_v41 = vld [vmem:[%s523_s0 + $0x160] sm:$0xff]  ;;  %v196_v43 = vmul.f32 %v59_v37, %v59_v37 }
  0x3a   :  { %v109_v54 = vadd.f32 %v108_v50, %v45_v45  ;;  %v244_v56 = vadd.f32 %v243_v52, %v181_v47  ;;  %v61_v45 = vld [vmem:[%s523_s0 + $0x168] sm:$0xff]  ;;  %v197_v47 = vmul.f32 %v60_v41, %v60_v41 }
  0x3c   :  { %v110_v58 = vadd.f32 %v109_v54, %v46_v49  ;;  %v245_v60 = vadd.f32 %v244_v56, %v182_v51  ;;  %v62_v49 = vld [vmem:[%s523_s0 + $0x170] sm:$0xff]  ;;  %v198_v51 = vmul.f32 %v61_v45, %v61_v45 }
  0x3e   :  { %v111_v62 = vadd.f32 %v110_v58, %v47_v53  ;;  %v246_v0 = vadd.f32 %v245_v60, %v183_v55  ;;  %v63_v53 = vld [vmem:[%s523_s0 + $0x178] sm:$0xff]  ;;  %v199_v55 = vmul.f32 %v62_v49, %v62_v49 }
  0x40   :  { %v112_v2 = vadd.f32 %v111_v62, %v48_v57  ;;  %v247_v4 = vadd.f32 %v246_v0, %v184_v59  ;;  %v64_v57 = vld [vmem:[%s523_s0 + $0x180] sm:$0xff]  ;;  %v200_v59 = vmul.f32 %v63_v53, %v63_v53 }
  0x42   :  { %v113_v6 = vadd.f32 %v112_v2, %v49_v61  ;;  %v248_v8 = vadd.f32 %v247_v4, %v185_v63  ;;  %v65_v61 = vld [vmem:[%s523_s0 + $0x188] sm:$0xff]  ;;  %v201_v63 = vmul.f32 %v64_v57, %v64_v57 }
  0x44   :  { %v114_v10 = vadd.f32 %v113_v6, %v50_v1  ;;  %v249_v12 = vadd.f32 %v248_v8, %v186_v3  ;;  %v66_v1 = vld [vmem:[%s523_s0 + $0x190] sm:$0xff]  ;;  %v202_v3 = vmul.f32 %v65_v61, %v65_v61 }
  0x46   :  { %v115_v14 = vadd.f32 %v114_v10, %v51_v5  ;;  %v250_v16 = vadd.f32 %v249_v12, %v187_v7  ;;  %v67_v5 = vld [vmem:[%s523_s0 + $0x198] sm:$0xff]  ;;  %v203_v7 = vmul.f32 %v66_v1, %v66_v1 }
  0x48   :  { %v116_v18 = vadd.f32 %v115_v14, %v52_v9  ;;  %v251_v20 = vadd.f32 %v250_v16, %v188_v11  ;;  %v68_v9 = vld [vmem:[%s523_s0 + $0x1a0] sm:$0xff]  ;;  %v204_v11 = vmul.f32 %v67_v5, %v67_v5 }
  0x4a   :  { %v117_v22 = vadd.f32 %v116_v18, %v53_v13  ;;  %v252_v24 = vadd.f32 %v251_v20, %v189_v15  ;;  %v69_v13 = vld [vmem:[%s523_s0 + $0x1a8] sm:$0xff]  ;;  %v205_v15 = vmul.f32 %v68_v9, %v68_v9 }
  0x4c   :  { %v118_v26 = vadd.f32 %v117_v22, %v54_v17  ;;  %v253_v28 = vadd.f32 %v252_v24, %v190_v19  ;;  %v70_v17 = vld [vmem:[%s523_s0 + $0x1b0] sm:$0xff]  ;;  %v206_v19 = vmul.f32 %v69_v13, %v69_v13 }
  0x4e   :  { %v119_v30 = vadd.f32 %v118_v26, %v55_v21  ;;  %v254_v32 = vadd.f32 %v253_v28, %v191_v23  ;;  %v71_v21 = vld [vmem:[%s523_s0 + $0x1b8] sm:$0xff]  ;;  %v207_v23 = vmul.f32 %v70_v17, %v70_v17 }
  0x50   :  { %v120_v34 = vadd.f32 %v119_v30, %v56_v25  ;;  %v255_v36 = vadd.f32 %v254_v32, %v192_v27  ;;  %v72_v25 = vld [vmem:[%s523_s0 + $0x1c0] sm:$0xff]  ;;  %v208_v27 = vmul.f32 %v71_v21, %v71_v21 }
  0x52   :  { %v121_v38 = vadd.f32 %v120_v34, %v57_v29  ;;  %v256_v40 = vadd.f32 %v255_v36, %v193_v31  ;;  %v73_v29 = vld [vmem:[%s523_s0 + $0x1c8] sm:$0xff]  ;;  %v209_v31 = vmul.f32 %v72_v25, %v72_v25 }
  0x54   :  { %v122_v42 = vadd.f32 %v121_v38, %v58_v33  ;;  %v257_v44 = vadd.f32 %v256_v40, %v194_v35  ;;  %v74_v33 = vld [vmem:[%s523_s0 + $0x1d0] sm:$0xff]  ;;  %v210_v35 = vmul.f32 %v73_v29, %v73_v29 }
  0x56   :  { %v123_v46 = vadd.f32 %v122_v42, %v59_v37  ;;  %v258_v48 = vadd.f32 %v257_v44, %v195_v39  ;;  %v75_v37 = vld [vmem:[%s523_s0 + $0x1d8] sm:$0xff]  ;;  %v211_v39 = vmul.f32 %v74_v33, %v74_v33 }
  0x58   :  { %v124_v50 = vadd.f32 %v123_v46, %v60_v41  ;;  %v259_v52 = vadd.f32 %v258_v48, %v196_v43  ;;  %v76_v41 = vld [vmem:[%s523_s0 + $0x1e0] sm:$0xff]  ;;  %v212_v43 = vmul.f32 %v75_v37, %v75_v37 }
  0x5a   :  { %v125_v54 = vadd.f32 %v124_v50, %v61_v45  ;;  %v260_v56 = vadd.f32 %v259_v52, %v197_v47  ;;  %v77_v45 = vld [vmem:[%s523_s0 + $0x1e8] sm:$0xff]  ;;  %v213_v47 = vmul.f32 %v76_v41, %v76_v41 }
  0x5c   :  { %v126_v58 = vadd.f32 %v125_v54, %v62_v49  ;;  %v261_v60 = vadd.f32 %v260_v56, %v198_v51  ;;  %v78_v49 = vld [vmem:[%s523_s0 + $0x1f0] sm:$0xff]  ;;  %v214_v51 = vmul.f32 %v77_v45, %v77_v45 }
  0x5e   :  { %v127_v62 = vadd.f32 %v126_v58, %v63_v53  ;;  %v262_v0 = vadd.f32 %v261_v60, %v199_v55  ;;  %v79_v53 = vld [vmem:[%s523_s0 + $0x1f8] sm:$0xff]  ;;  %v215_v55 = vmul.f32 %v78_v49, %v78_v49 }
  0x5f   :  { %v216_v58 = vmul.f32 %v79_v53, %v79_v53 }
  0x60   :  { %v128_v2 = vadd.f32 %v127_v62, %v64_v57  ;;  %v263_v4 = vadd.f32 %v262_v0, %v200_v59 }
  0x62   :  { %v129_v6 = vadd.f32 %v128_v2, %v65_v61  ;;  %v264_v8 = vadd.f32 %v263_v4, %v201_v63 }
  0x64   :  { %v130_v10 = vadd.f32 %v129_v6, %v66_v1  ;;  %v265_v12 = vadd.f32 %v264_v8, %v202_v3 }
  0x66   :  { %v131_v14 = vadd.f32 %v130_v10, %v67_v5  ;;  %v266_v16 = vadd.f32 %v265_v12, %v203_v7  ;;  %v80_v7 = vld [vmem:[%s524_s1] sm:$0x1] }
  0x67   :  { %v152_v12 = vld [vmem:[%s525_s2] sm:$0x1] }
  0x68   :  { %v132_v18 = vadd.f32 %v131_v14, %v68_v9  ;;  %v267_v20 = vadd.f32 %v266_v16, %v204_v11 }
  0x6a   :  { %v133_v22 = vadd.f32 %v132_v18, %v69_v13  ;;  %v268_v24 = vadd.f32 %v267_v20, %v205_v15 }
  0x6c   :  { %v134_v26 = vadd.f32 %v133_v22, %v70_v17  ;;  %v269_v28 = vadd.f32 %v268_v24, %v206_v19 }
  0x6e   :  { %v135_v30 = vadd.f32 %v134_v26, %v71_v21  ;;  %v270_v32 = vadd.f32 %v269_v28, %v207_v23 }
  0x70   :  { %v136_v34 = vadd.f32 %v135_v30, %v72_v25  ;;  %v271_v36 = vadd.f32 %v270_v32, %v208_v27 }
  0x72   :  { %v137_v38 = vadd.f32 %v136_v34, %v73_v29  ;;  %v272_v40 = vadd.f32 %v271_v36, %v209_v31 }
  0x74   :  { %v138_v42 = vadd.f32 %v137_v38, %v74_v33  ;;  %v273_v44 = vadd.f32 %v272_v40, %v210_v35 }
  0x76   :  { %v139_v46 = vadd.f32 %v138_v42, %v75_v37  ;;  %v274_v48 = vadd.f32 %v273_v44, %v211_v39 }
  0x78   :  { %v140_v50 = vadd.f32 %v139_v46, %v76_v41  ;;  %v275_v52 = vadd.f32 %v274_v48, %v212_v43 }
  0x7a   :  { %v141_v54 = vadd.f32 %v140_v50, %v77_v45  ;;  %v276_v56 = vadd.f32 %v275_v52, %v213_v47 }
  0x7c   :  { %v142_v57 = vadd.f32 %v141_v54, %v78_v49  ;;  %v277_v59 = vadd.f32 %v276_v56, %v214_v51 }
  0x7e   :  { %v143_v60 = vadd.f32 %v142_v57, %v79_v53  ;;  %v278_v61 = vadd.f32 %v277_v59, %v215_v55 }
  0x80   :  { %v144_v62 = vrot.slane %v143_v60, 4  ;;  %v279_v63 = vadd.f32 %v278_v61, %v216_v58 }
  0x82   :  { %v145_v0 = vadd.f32 %v144_v62, %v143_v60  ;;  %v280_v1 = vrot.slane %v279_v63, 4 }
  0x84   :  { %v146_v2 = vrot.slane %v145_v0, 2  ;;  %v281_v3 = vadd.f32 %v280_v1, %v279_v63 }
  0x86   :  { %v147_v4 = vadd.f32 %v146_v2, %v145_v0  ;;  %v282_v5 = vrot.slane %v281_v3, 2 }
  0x88   :  { %v148_v6 = vrot.slane %v147_v4, 1  ;;  %v283_v8 = vadd.f32 %v282_v5, %v281_v3 }
  0x8a   :  { %v149_v9 = vadd.f32 %v148_v6, %v147_v4  ;;  %v284_v10 = vrot.slane %v283_v8, 1 }
  0x8c   :  { %v150_v11 = vadd.f32 %v149_v9, %v80_v7  ;;  %v285_v13 = vadd.f32 %v284_v10, %v283_v8 }
  0x8e   :  { %151 = vst [vmem:[%s524_s1] sm:$0x1] %v150_v11  ;;  %v286_v14 = vadd.f32 %v285_v13, %v152_v12 }
  0x90   :  { %287 = vst [vmem:[%s525_s2] sm:$0x1] %v286_v14 }

// kernel: tile.84
= control target key start
LH: loop header
LB: loop body
LE: loop exit
PB: predicated region body
PF: predicated region fallthrough
CT: control target
= control target key end

     0   :  { %s22_s0 = inlined_call_operand.vmem [shape: f32[32], index: 0, kind: input, shape index: {}]   ;;  %s23_s1 = inlined_call_operand.vmem [shape: f32[4,32], index: 1, kind: output, shape index: {}]  }
   0x1   :  { %v4_v0 = vld [vmem:[%s22_s0] ss:$0 sm:$0xff] }
   0x2   :  { %5 = vst [vmem:[%s23_s1] sm:$0xf] %v4_v0 }

// kernel: tile.85
= control target key start
LH: loop header
LB: loop body
LE: loop exit
PB: predicated region body
PF: predicated region fallthrough
CT: control target
= control target key end

     0   :  { %vm8_vm0 = vcmask 261120   ;;  %s40_s8 = smov 32   ;;  %s41_s9 = smov 64   ;;  %vm14_vm1 = vcmask 1048320   ;;  %vm20_vm2 = vcmask 785920   ;;  %vm26_vm3 = vcmask 523520   ;;  %s58_s0 = inlined_call_operand.vmem [shape: f32[4,32], index: 0, kind: input, shape index: {}]   ;;  %s59_s1 = inlined_call_operand.vmem [shape: f32[1,128], index: 1, kind: output, shape index: {}]  }
   0x1   :  { %v5_v0 = vld [vmem:[%s58_s0] sm:$0xf]  ;;  %s39_s0 = smov 96  }
   0x2   :  { %6 = vst [vmem:[#allocation1] sm:$0xf] %v5_v0 }
   0x9   :  { %v11_v1 = vld [vmem:[#allocation1 + $0x3] sm:$0x1]   ;;  %v23_v2 = vld [vmem:[#allocation1 + $0x1] sm:$0x1]   ;;  %v7_v3 = vld [vmem:[#allocation1] sm:$0x1]  }
   0xa   :  { %12 = vrot.lane.b32.xlu0 %v11_v1, %s39_s0  ;;  %24 = vrot.lane.b32.xlu1 %v23_v2, %s40_s8  ;;  %v17_v4 = vld [vmem:[#allocation1 + $0x2] sm:$0x1]   ;;  %9 = vst.msk [vmem:[#allocation0] sm:$0x1] %vm8_vm0, %v7_v3  }
   0xe   :  { %18 = vrot.lane.b32.xlu0 %v17_v4, %s41_s9 }
  0x7c   :  { %v13_v5 = vpop.permute.xlu0 %12   ;;  %v25_v6 = vpop.permute.xlu1 %24  }
  0x7d   :  { %15 = vst.msk [vmem:[#allocation0] sm:$0x1] %vm14_vm1, %v13_v5  }
  0x80   :  { %v19_v7 = vpop.permute.xlu0 %18  }
  0x81   :  { %21 = vst.msk [vmem:[#allocation0] sm:$0x1] %vm20_vm2, %v19_v7  }
  0x82   :  { %27 = vst.msk [vmem:[#allocation0] sm:$0x1] %vm26_vm3, %v25_v6  }
  0x89   :  { %v32_v8 = vld [vmem:[#allocation0] sm:$0x1] }
  0x8a   :  { %35 = vst [vmem:[%s59_s1] sm:$0x1] %v32_v8 }

// kernel: forward.36
= control target key start
LH: loop header
LB: loop body
LE: loop exit
PB: predicated region body
PF: predicated region fallthrough
CT: control target
= control target key end

     0   :  { %s1030_s0 = inlined_call_operand.vmem [shape: f32[512,128], index: 0, kind: input, shape index: {}]   ;;  %s1031_s1 = inlined_call_operand.vmem [shape: f32[1,128], index: 1, kind: input, shape index: {}]   ;;  %s1032_s2 = inlined_call_operand.vmem [shape: f32[1,128], index: 2, kind: input, shape index: {}]   ;;  %s1033_s3 = inlined_call_operand.vmem [shape: f32[512,128], index: 3, kind: output, shape index: {}]  }
   0x1   :  { %v14_v0 = vld [vmem:[%s1030_s0] sm:$0xff]  ;;  %v15_v4 = vld [vmem:[%s1030_s0 + $0x8] sm:$0xff]  ;;  %v16_v5 = vld [vmem:[%s1030_s0 + $0x10] sm:$0xff] }
   0x2   :  { %v508_v1 = vld [vmem:[%s1031_s1] ss:$0 sm:$0xff]  ;;  %v17_v6 = vld [vmem:[%s1030_s0 + $0x18] sm:$0xff]  ;;  %v19_v11 = vld [vmem:[%s1030_s0 + $0x28] sm:$0xff] }
   0x3   :  { %v513_v2 = vld [vmem:[%s1032_s2] ss:$0 sm:$0xff]  ;;  %v85_v3 = vmul.f32 %v508_v1, %v14_v0  ;;  %v86_v7 = vmul.f32 %v508_v1, %v15_v4  ;;  %v87_v8 = vmul.f32 %v508_v1, %v16_v5  ;;  %v88_v9 = vmul.f32 %v508_v1, %v17_v6  ;;  %v20_v12 = vld [vmem:[%s1030_s0 + $0x30] sm:$0xff]  ;;  %v21_v17 = vld [vmem:[%s1030_s0 + $0x38] sm:$0xff] }
   0x4   :  { %v18_v10 = vld [vmem:[%s1030_s0 + $0x20] sm:$0xff]  ;;  %v90_v15 = vmul.f32 %v508_v1, %v19_v11  ;;  %v91_v16 = vmul.f32 %v508_v1, %v20_v12  ;;  %v92_v21 = vmul.f32 %v508_v1, %v21_v17  ;;  %v23_v30 = vld [vmem:[%s1030_s0 + $0x48] sm:$0xff]  ;;  %v24_v31 = vld [vmem:[%s1030_s0 + $0x50] sm:$0xff] }
   0x5   :  { %v156_v13 = vadd.f32 %v513_v2, %v85_v3  ;;  %v89_v14 = vmul.f32 %v508_v1, %v18_v10  ;;  %v157_v18 = vadd.f32 %v513_v2, %v86_v7  ;;  %v158_v19 = vadd.f32 %v513_v2, %v87_v8  ;;  %v22_v25 = vld [vmem:[%s1030_s0 + $0x40] sm:$0xff]  ;;  %v25_v43 = vld [vmem:[%s1030_s0 + $0x58] sm:$0xff]  ;;  %v27_v45 = vld [vmem:[%s1030_s0 + $0x68] sm:$0xff] }
   0x6   :  { %v159_v20 = vadd.f32 %v513_v2, %v88_v9  ;;  %v161_v24 = vadd.f32 %v513_v2, %v90_v15  ;;  %v162_v37 = vadd.f32 %v513_v2, %v91_v16  ;;  %v163_v38 = vadd.f32 %v513_v2, %v92_v21  ;;  %v26_v44 = vld [vmem:[%s1030_s0 + $0x60] sm:$0xff]  ;;  %v28_v56 = vld [vmem:[%s1030_s0 + $0x70] sm:$0xff]  ;;  %v29_v4 = vld [vmem:[%s1030_s0 + $0x78] sm:$0xff] }
   0x7   :  { %vm220_vm0 = vcmp.ge.f32.partialorder %v156_v13, 0.0  ;;  %v284_v22 = vmul.f32 0.2, %v156_v13  ;;  %v160_v23 = vadd.f32 %v513_v2, %v89_v14  ;;  %vm221_vm1 = vcmp.ge.f32.partialorder %v157_v18, 0.0  ;;  %v30_v5 = vld [vmem:[%s1030_s0 + $0x80] sm:$0xff]  ;;  %v31_v9 = vld [vmem:[%s1030_s0 + $0x88] sm:$0xff] }
   0x8   :  { %v285_v26 = vmul.f32 0.2, %v157_v18  ;;  %vm222_vm2 = vcmp.ge.f32.partialorder %v158_v19, 0.0  ;;  %v286_v27 = vmul.f32 0.2, %v158_v19  ;;  %vm223_vm3 = vcmp.ge.f32.partialorder %v159_v20, 0.0 }
   0x9   :  { %v348_v28 = vsel %vm220_vm0, %v156_v13, %v284_v22  ;;  %v287_v29 = vmul.f32 0.2, %v159_v20  ;;  %vm224_vm4 = vcmp.ge.f32.partialorder %v160_v23, 0.0  ;;  %v288_v34 = vmul.f32 0.2, %v160_v23  ;;  %v32_v10 = vld [vmem:[%s1030_s0 + $0x90] sm:$0xff] }
   0xa   :  { %412 = vst [vmem:[%s1033_s3] sm:$0xff] %v348_v28  ;;  %v349_v32 = vsel %vm221_vm1, %v157_v18, %v285_v26  ;;  %v350_v33 = vsel %vm222_vm2, %v158_v19, %v286_v27  ;;  %vm225_vm5 = vcmp.ge.f32.partialorder %v161_v24, 0.0  ;;  %v289_v36 = vmul.f32 0.2, %v161_v24  ;;  %v33_v17 = vld [vmem:[%s1030_s0 + $0x98] sm:$0xff]  ;;  %v34_v18 = vld [vmem:[%s1030_s0 + $0xa0] sm:$0xff] }
   0xb   :  { %413 = vst [vmem:[%s1033_s3 + $0x8] sm:$0xff] %v349_v32  ;;  %414 = vst [vmem:[%s1033_s3 + $0x10] sm:$0xff] %v350_v33  ;;  %v351_v35 = vsel %vm223_vm3, %v159_v20, %v287_v29  ;;  %v352_v39 = vsel %vm224_vm4, %v160_v23, %v288_v34  ;;  %v93_v40 = vmul.f32 %v508_v1, %v22_v25  ;;  %vm226_vm6 = vcmp.ge.f32.partialorder %v162_v37, 0.0  ;;  %v35_v32 = vld [vmem:[%s1030_s0 + $0xa8] sm:$0xff]  ;;  %v36_v33 = vld [vmem:[%s1030_s0 + $0xb0] sm:$0xff] }
   0xc   :  { %415 = vst [vmem:[%s1033_s3 + $0x18] sm:$0xff] %v351_v35  ;;  %v94_v41 = vmul.f32 %v508_v1, %v23_v30  ;;  %v95_v42 = vmul.f32 %v508_v1, %v24_v31  ;;  %416 = vst [vmem:[%s1033_s3 + $0x20] sm:$0xff] %v352_v39  ;;  %v353_v46 = vsel %vm225_vm5, %v161_v24, %v289_v36  ;;  %v290_v47 = vmul.f32 0.2, %v162_v37 }
   0xd   :  { %vm227_vm7 = vcmp.ge.f32.partialorder %v163_v38, 0.0  ;;  %417 = vst [vmem:[%s1033_s3 + $0x28] sm:$0xff] %v353_v46  ;;  %v291_v48 = vmul.f32 0.2, %v163_v38  ;;  %v164_v49 = vadd.f32 %v513_v2, %v93_v40  ;;  %v96_v53 = vmul.f32 %v508_v1, %v25_v43  ;;  %v37_v40 = vld [vmem:[%s1030_s0 + $0xb8] sm:$0xff]  ;;  %v39_v46 = vld [vmem:[%s1030_s0 + $0xc8] sm:$0xff] }
   0xe   :  { %v165_v50 = vadd.f32 %v513_v2, %v94_v41  ;;  %v166_v51 = vadd.f32 %v513_v2, %v95_v42  ;;  %v354_v52 = vsel %vm226_vm6, %v162_v37, %v290_v47  ;;  %v97_v54 = vmul.f32 %v508_v1, %v26_v44  ;;  %v40_v47 = vld [vmem:[%s1030_s0 + $0xd0] sm:$0xff] }
   0xf   :  { %v98_v55 = vmul.f32 %v508_v1, %v27_v45  ;;  %418 = vst [vmem:[%s1033_s3 + $0x30] sm:$0xff] %v354_v52  ;;  %v355_v57 = vsel %vm227_vm7, %v163_v38, %v291_v48  ;;  %vm228_vm8 = vcmp.ge.f32.partialorder %v164_v49, 0.0  ;;  %v292_v58 = vmul.f32 0.2, %v164_v49  ;;  %v38_v45 = vld [vmem:[%s1030_s0 + $0xc0] sm:$0xff] }
  0x10   :  { %vm229_vm9 = vcmp.ge.f32.partialorder %v165_v50, 0.0  ;;  %419 = vst [vmem:[%s1033_s3 + $0x38] sm:$0xff] %v355_v57  ;;  %v293_v59 = vmul.f32 0.2, %v165_v50  ;;  %vm230_vm10 = vcmp.ge.f32.partialorder %v166_v51, 0.0  ;;  %v167_v61 = vadd.f32 %v513_v2, %v96_v53 }
  0x11   :  { %v294_v60 = vmul.f32 0.2, %v166_v51  ;;  %v356_v62 = vsel %vm228_vm8, %v164_v49, %v292_v58  ;;  %v168_v63 = vadd.f32 %v513_v2, %v97_v54  ;;  %v169_v0 = vadd.f32 %v513_v2, %v98_v55  ;;  %v41_v58 = vld [vmem:[%s1030_s0 + $0xd8] sm:$0xff] }
  0x12   :  { %v99_v3 = vmul.f32 %v508_v1, %v28_v56  ;;  %420 = vst [vmem:[%s1033_s3 + $0x40] sm:$0xff] %v356_v62  ;;  %v357_v6 = vsel %vm229_vm9, %v165_v50, %v293_v59  ;;  %vm231_vm11 = vcmp.ge.f32.partialorder %v167_v61, 0.0  ;;  %v295_v8 = vmul.f32 0.2, %v167_v61  ;;  %v42_v59 = vld [vmem:[%s1030_s0 + $0xe0] sm:$0xff] }
  0x13   :  { %v358_v7 = vsel %vm230_vm10, %v166_v51, %v294_v60  ;;  %421 = vst [vmem:[%s1033_s3 + $0x48] sm:$0xff] %v357_v6  ;;  %vm232_vm12 = vcmp.ge.f32.partialorder %v168_v63, 0.0  ;;  %v296_v11 = vmul.f32 0.2, %v168_v63  ;;  %vm233_vm13 = vcmp.ge.f32.partialorder %v169_v0, 0.0 }
  0x14   :  { %422 = vst [vmem:[%s1033_s3 + $0x50] sm:$0xff] %v358_v7  ;;  %v297_v12 = vmul.f32 0.2, %v169_v0  ;;  %v359_v13 = vsel %vm231_vm11, %v167_v61, %v295_v8  ;;  %v170_v14 = vadd.f32 %v513_v2, %v99_v3  ;;  %v100_v15 = vmul.f32 %v508_v1, %v29_v4 }
  0x15   :  { %v101_v16 = vmul.f32 %v508_v1, %v30_v5  ;;  %423 = vst [vmem:[%s1033_s3 + $0x58] sm:$0xff] %v359_v13  ;;  %v360_v19 = vsel %vm232_vm12, %v168_v63, %v296_v11  ;;  %v102_v21 = vmul.f32 %v508_v1, %v31_v9  ;;  %v103_v22 = vmul.f32 %v508_v1, %v32_v10  ;;  %v43_v10 = vld [vmem:[%s1030_s0 + $0xe8] sm:$0xff]  ;;  %v44_v11 = vld [vmem:[%s1030_s0 + $0xf0] sm:$0xff] }
  0x16   :  { %v361_v20 = vsel %vm233_vm13, %v169_v0, %v297_v12  ;;  %424 = vst [vmem:[%s1033_s3 + $0x60] sm:$0xff] %v360_v19  ;;  %vm234_vm14 = vcmp.ge.f32.partialorder %v170_v14, 0.0  ;;  %v298_v23 = vmul.f32 0.2, %v170_v14  ;;  %v171_v24 = vadd.f32 %v513_v2, %v100_v15 }
  0x17   :  { %425 = vst [vmem:[%s1033_s3 + $0x68] sm:$0xff] %v361_v20  ;;  %v172_v25 = vadd.f32 %v513_v2, %v101_v16  ;;  %v173_v26 = vadd.f32 %v513_v2, %v102_v21  ;;  %v174_v27 = vadd.f32 %v513_v2, %v103_v22  ;;  %v104_v28 = vmul.f32 %v508_v1, %v33_v17 }
  0x18   :  { %v105_v29 = vmul.f32 %v508_v1, %v34_v18  ;;  %v362_v30 = vsel %vm234_vm14, %v170_v14, %v298_v23  ;;  %vm235_vm15 = vcmp.ge.f32.partialorder %v171_v24, 0.0  ;;  %v299_v31 = vmul.f32 0.2, %v171_v24  ;;  %v45_v18 = vld [vmem:[%s1030_s0 + $0xf8] sm:$0xff]  ;;  %v46_v23 = vld [vmem:[%s1030_s0 + $0x100] sm:$0xff] }
  0x19   :  { %vm236_vm0 = vcmp.ge.f32.partialorder %v172_v25, 0.0  ;;  %426 = vst [vmem:[%s1033_s3 + $0x70] sm:$0xff] %v362_v30  ;;  %v300_v34 = vmul.f32 0.2, %v172_v25  ;;  %vm237_vm1 = vcmp.ge.f32.partialorder %v173_v26, 0.0  ;;  %vm238_vm2 = vcmp.ge.f32.partialorder %v174_v27, 0.0 }
  0x1a   :  { %v301_v35 = vmul.f32 0.2, %v173_v26  ;;  %v363_v36 = vsel %vm235_vm15, %v171_v24, %v299_v31  ;;  %v302_v37 = vmul.f32 0.2, %v174_v27  ;;  %v175_v38 = vadd.f32 %v513_v2, %v104_v28  ;;  %v47_v24 = vld [vmem:[%s1030_s0 + $0x108] sm:$0xff] }
  0x1b   :  { %v176_v39 = vadd.f32 %v513_v2, %v105_v29  ;;  %427 = vst [vmem:[%s1033_s3 + $0x78] sm:$0xff] %v363_v36  ;;  %v364_v41 = vsel %vm236_vm0, %v172_v25, %v300_v34  ;;  %v106_v43 = vmul.f32 %v508_v1, %v35_v32  ;;  %v107_v44 = vmul.f32 %v508_v1, %v36_v33  ;;  %v48_v25 = vld [vmem:[%s1030_s0 + $0x110] sm:$0xff]  ;;  %v49_v36 = vld [vmem:[%s1030_s0 + $0x118] sm:$0xff] }
  0x1c   :  { %v365_v42 = vsel %vm237_vm1, %v173_v26, %v301_v35  ;;  %428 = vst [vmem:[%s1033_s3 + $0x80] sm:$0xff] %v364_v41  ;;  %v366_v48 = vsel %vm238_vm2, %v174_v27, %v302_v37  ;;  %vm239_vm3 = vcmp.ge.f32.partialorder %v175_v38, 0.0  ;;  %v303_v49 = vmul.f32 0.2, %v175_v38  ;;  %v50_v37 = vld [vmem:[%s1030_s0 + $0x120] sm:$0xff] }
  0x1d   :  { %429 = vst [vmem:[%s1033_s3 + $0x88] sm:$0xff] %v365_v42  ;;  %vm240_vm4 = vcmp.ge.f32.partialorder %v176_v39, 0.0  ;;  %430 = vst [vmem:[%s1033_s3 + $0x90] sm:$0xff] %v366_v48  ;;  %v304_v50 = vmul.f32 0.2, %v176_v39  ;;  %v177_v51 = vadd.f32 %v513_v2, %v106_v43  ;;  %v178_v52 = vadd.f32 %v513_v2, %v107_v44 }
  0x1e   :  { %v108_v53 = vmul.f32 %v508_v1, %v37_v40  ;;  %v367_v54 = vsel %vm239_vm3, %v175_v38, %v303_v49  ;;  %v109_v55 = vmul.f32 %v508_v1, %v38_v45  ;;  %v110_v56 = vmul.f32 %v508_v1, %v39_v46 }
  0x1f   :  { %v111_v57 = vmul.f32 %v508_v1, %v40_v47  ;;  %431 = vst [vmem:[%s1033_s3 + $0x98] sm:$0xff] %v367_v54  ;;  %v368_v60 = vsel %vm240_vm4, %v176_v39, %v304_v50  ;;  %vm241_vm5 = vcmp.ge.f32.partialorder %v177_v51, 0.0  ;;  %v305_v61 = vmul.f32 0.2, %v177_v51  ;;  %v51_v50 = vld [vmem:[%s1030_s0 + $0x128] sm:$0xff] }
  0x20   :  { %vm242_vm6 = vcmp.ge.f32.partialorder %v178_v52, 0.0  ;;  %432 = vst [vmem:[%s1033_s3 + $0xa0] sm:$0xff] %v368_v60  ;;  %v306_v62 = vmul.f32 0.2, %v178_v52  ;;  %v179_v63 = vadd.f32 %v513_v2, %v108_v53  ;;  %v180_v0 = vadd.f32 %v513_v2, %v109_v55 }
  0x21   :  { %v181_v3 = vadd.f32 %v513_v2, %v110_v56  ;;  %v369_v4 = vsel %vm241_vm5, %v177_v51, %v305_v61  ;;  %v182_v5 = vadd.f32 %v513_v2, %v111_v57  ;;  %v112_v6 = vmul.f32 %v508_v1, %v41_v58  ;;  %v52_v51 = vld [vmem:[%s1030_s0 + $0x130] sm:$0xff]  ;;  %v53_v58 = vld [vmem:[%s1030_s0 + $0x138] sm:$0xff] }
  0x22   :  { %v113_v7 = vmul.f32 %v508_v1, %v42_v59  ;;  %433 = vst [vmem:[%s1033_s3 + $0xa8] sm:$0xff] %v369_v4  ;;  %v370_v8 = vsel %vm242_vm6, %v178_v52, %v306_v62  ;;  %vm243_vm7 = vcmp.ge.f32.partialorder %v179_v63, 0.0  ;;  %v307_v9 = vmul.f32 0.2, %v179_v63 }
  0x23   :  { %vm244_vm8 = vcmp.ge.f32.partialorder %v180_v0, 0.0  ;;  %434 = vst [vmem:[%s1033_s3 + $0xb0] sm:$0xff] %v370_v8  ;;  %v308_v12 = vmul.f32 0.2, %v180_v0  ;;  %vm245_vm9 = vcmp.ge.f32.partialorder %v181_v3, 0.0  ;;  %vm246_vm10 = vcmp.ge.f32.partialorder %v182_v5, 0.0 }
  0x24   :  { %v309_v13 = vmul.f32 0.2, %v181_v3  ;;  %v371_v14 = vsel %vm243_vm7, %v179_v63, %v307_v9  ;;  %v310_v15 = vmul.f32 0.2, %v182_v5  ;;  %v183_v16 = vadd.f32 %v513_v2, %v112_v6  ;;  %v54_v63 = vld [vmem:[%s1030_s0 + $0x140] sm:$0xff] }
  0x25   :  { %v184_v17 = vadd.f32 %v513_v2, %v113_v7  ;;  %435 = vst [vmem:[%s1033_s3 + $0xb8] sm:$0xff] %v371_v14  ;;  %v372_v19 = vsel %vm244_vm8, %v180_v0, %v308_v12  ;;  %v114_v21 = vmul.f32 %v508_v1, %v43_v10  ;;  %v115_v22 = vmul.f32 %v508_v1, %v44_v11  ;;  %v55_v0 = vld [vmem:[%s1030_s0 + $0x148] sm:$0xff]  ;;  %v57_v14 = vld [vmem:[%s1030_s0 + $0x158] sm:$0xff] }
  0x26   :  { %v373_v20 = vsel %vm245_vm9, %v181_v3, %v309_v13  ;;  %436 = vst [vmem:[%s1033_s3 + $0xc0] sm:$0xff] %v372_v19  ;;  %v374_v26 = vsel %vm246_vm10, %v182_v5, %v310_v15  ;;  %vm247_vm11 = vcmp.ge.f32.partialorder %v183_v16, 0.0  ;;  %v311_v27 = vmul.f32 0.2, %v183_v16  ;;  %v56_v3 = vld [vmem:[%s1030_s0 + $0x150] sm:$0xff]  ;;  %v58_v15 = vld [vmem:[%s1030_s0 + $0x160] sm:$0xff] }
  0x27   :  { %437 = vst [vmem:[%s1033_s3 + $0xc8] sm:$0xff] %v373_v20  ;;  %vm248_vm12 = vcmp.ge.f32.partialorder %v184_v17, 0.0  ;;  %438 = vst [vmem:[%s1033_s3 + $0xd0] sm:$0xff] %v374_v26  ;;  %v312_v28 = vmul.f32 0.2, %v184_v17  ;;  %v185_v29 = vadd.f32 %v513_v2, %v114_v21  ;;  %v186_v30 = vadd.f32 %v513_v2, %v115_v22 }
  0x28   :  { %v116_v31 = vmul.f32 %v508_v1, %v45_v18  ;;  %v375_v32 = vsel %vm247_vm11, %v183_v16, %v311_v27  ;;  %v117_v33 = vmul.f32 %v508_v1, %v46_v23  ;;  %v118_v34 = vmul.f32 %v508_v1, %v47_v24 }
  0x29   :  { %v119_v35 = vmul.f32 %v508_v1, %v48_v25  ;;  %439 = vst [vmem:[%s1033_s3 + $0xd8] sm:$0xff] %v375_v32  ;;  %v376_v38 = vsel %vm248_vm12, %v184_v17, %v312_v28  ;;  %vm249_vm13 = vcmp.ge.f32.partialorder %v185_v29, 0.0  ;;  %v313_v39 = vmul.f32 0.2, %v185_v29  ;;  %v59_v28 = vld [vmem:[%s1030_s0 + $0x168] sm:$0xff] }
  0x2a   :  { %vm250_vm14 = vcmp.ge.f32.partialorder %v186_v30, 0.0  ;;  %440 = vst [vmem:[%s1033_s3 + $0xe0] sm:$0xff] %v376_v38  ;;  %v314_v40 = vmul.f32 0.2, %v186_v30  ;;  %v187_v41 = vadd.f32 %v513_v2, %v116_v31  ;;  %v188_v42 = vadd.f32 %v513_v2, %v117_v33 }
  0x2b   :  { %v189_v43 = vadd.f32 %v513_v2, %v118_v34  ;;  %v377_v44 = vsel %vm249_vm13, %v185_v29, %v313_v39  ;;  %v190_v45 = vadd.f32 %v513_v2, %v119_v35  ;;  %v120_v46 = vmul.f32 %v508_v1, %v49_v36  ;;  %v60_v29 = vld [vmem:[%s1030_s0 + $0x170] sm:$0xff]  ;;  %v61_v36 = vld [vmem:[%s1030_s0 + $0x178] sm:$0xff] }
  0x2c   :  { %v121_v47 = vmul.f32 %v508_v1, %v50_v37  ;;  %441 = vst [vmem:[%s1033_s3 + $0xe8] sm:$0xff] %v377_v44  ;;  %v378_v48 = vsel %vm250_vm14, %v186_v30, %v314_v40  ;;  %vm251_vm15 = vcmp.ge.f32.partialorder %v187_v41, 0.0  ;;  %v315_v49 = vmul.f32 0.2, %v187_v41 }
  0x2d   :  { %vm252_vm0 = vcmp.ge.f32.partialorder %v188_v42, 0.0  ;;  %442 = vst [vmem:[%s1033_s3 + $0xf0] sm:$0xff] %v378_v48  ;;  %v316_v52 = vmul.f32 0.2, %v188_v42  ;;  %vm253_vm1 = vcmp.ge.f32.partialorder %v189_v43, 0.0  ;;  %vm254_vm2 = vcmp.ge.f32.partialorder %v190_v45, 0.0 }
  0x2e   :  { %v317_v53 = vmul.f32 0.2, %v189_v43  ;;  %v379_v54 = vsel %vm251_vm15, %v187_v41, %v315_v49  ;;  %v318_v55 = vmul.f32 0.2, %v190_v45  ;;  %v191_v56 = vadd.f32 %v513_v2, %v120_v46  ;;  %v62_v41 = vld [vmem:[%s1030_s0 + $0x180] sm:$0xff] }
  0x2f   :  { %v192_v57 = vadd.f32 %v513_v2, %v121_v47  ;;  %443 = vst [vmem:[%s1033_s3 + $0xf8] sm:$0xff] %v379_v54  ;;  %v380_v59 = vsel %vm252_vm0, %v188_v42, %v316_v52  ;;  %v122_v61 = vmul.f32 %v508_v1, %v51_v50  ;;  %v123_v62 = vmul.f32 %v508_v1, %v52_v51  ;;  %v63_v42 = vld [vmem:[%s1030_s0 + $0x188] sm:$0xff]  ;;  %v65_v54 = vld [vmem:[%s1030_s0 + $0x198] sm:$0xff] }
  0x30   :  { %v381_v60 = vsel %vm253_vm1, %v189_v43, %v317_v53  ;;  %444 = vst [vmem:[%s1033_s3 + $0x100] sm:$0xff] %v380_v59  ;;  %v382_v4 = vsel %vm254_vm2, %v190_v45, %v318_v55  ;;  %vm255_vm3 = vcmp.ge.f32.partialorder %v191_v56, 0.0  ;;  %v319_v5 = vmul.f32 0.2, %v191_v56  ;;  %v64_v43 = vld [vmem:[%s1030_s0 + $0x190] sm:$0xff]  ;;  %v66_v55 = vld [vmem:[%s1030_s0 + $0x1a0] sm:$0xff] }
  0x31   :  { %445 = vst [vmem:[%s1033_s3 + $0x108] sm:$0xff] %v381_v60  ;;  %vm256_vm4 = vcmp.ge.f32.partialorder %v192_v57, 0.0  ;;  %446 = vst [vmem:[%s1033_s3 + $0x110] sm:$0xff] %v382_v4  ;;  %v320_v6 = vmul.f32 0.2, %v192_v57  ;;  %v193_v7 = vadd.f32 %v513_v2, %v122_v61  ;;  %v194_v8 = vadd.f32 %v513_v2, %v123_v62 }
  0x32   :  { %v124_v9 = vmul.f32 %v508_v1, %v53_v58  ;;  %v383_v10 = vsel %vm255_vm3, %v191_v56, %v319_v5  ;;  %v125_v11 = vmul.f32 %v508_v1, %v54_v63  ;;  %v126_v12 = vmul.f32 %v508_v1, %v55_v0 }
  0x33   :  { %v127_v13 = vmul.f32 %v508_v1, %v56_v3  ;;  %447 = vst [vmem:[%s1033_s3 + $0x118] sm:$0xff] %v383_v10  ;;  %v384_v16 = vsel %vm256_vm4, %v192_v57, %v320_v6  ;;  %vm257_vm5 = vcmp.ge.f32.partialorder %v193_v7, 0.0  ;;  %v321_v17 = vmul.f32 0.2, %v193_v7  ;;  %v67_v6 = vld [vmem:[%s1030_s0 + $0x1a8] sm:$0xff] }
  0x34   :  { %vm258_vm6 = vcmp.ge.f32.partialorder %v194_v8, 0.0  ;;  %448 = vst [vmem:[%s1033_s3 + $0x120] sm:$0xff] %v384_v16  ;;  %v322_v18 = vmul.f32 0.2, %v194_v8  ;;  %v195_v19 = vadd.f32 %v513_v2, %v124_v9  ;;  %v196_v20 = vadd.f32 %v513_v2, %v125_v11 }
  0x35   :  { %v197_v21 = vadd.f32 %v513_v2, %v126_v12  ;;  %v385_v22 = vsel %vm257_vm5, %v193_v7, %v321_v17  ;;  %v198_v23 = vadd.f32 %v513_v2, %v127_v13  ;;  %v128_v24 = vmul.f32 %v508_v1, %v57_v14  ;;  %v68_v7 = vld [vmem:[%s1030_s0 + $0x1b0] sm:$0xff]  ;;  %v69_v14 = vld [vmem:[%s1030_s0 + $0x1b8] sm:$0xff] }
  0x36   :  { %v129_v25 = vmul.f32 %v508_v1, %v58_v15  ;;  %449 = vst [vmem:[%s1033_s3 + $0x128] sm:$0xff] %v385_v22  ;;  %v386_v26 = vsel %vm258_vm6, %v194_v8, %v322_v18  ;;  %vm259_vm7 = vcmp.ge.f32.partialorder %v195_v19, 0.0  ;;  %v323_v27 = vmul.f32 0.2, %v195_v19 }
  0x37   :  { %vm260_vm8 = vcmp.ge.f32.partialorder %v196_v20, 0.0  ;;  %450 = vst [vmem:[%s1033_s3 + $0x130] sm:$0xff] %v386_v26  ;;  %v324_v30 = vmul.f32 0.2, %v196_v20  ;;  %vm261_vm9 = vcmp.ge.f32.partialorder %v197_v21, 0.0  ;;  %vm262_vm10 = vcmp.ge.f32.partialorder %v198_v23, 0.0 }
  0x38   :  { %v325_v31 = vmul.f32 0.2, %v197_v21  ;;  %v387_v32 = vsel %vm259_vm7, %v195_v19, %v323_v27  ;;  %v326_v33 = vmul.f32 0.2, %v198_v23  ;;  %v199_v34 = vadd.f32 %v513_v2, %v128_v24  ;;  %v70_v19 = vld [vmem:[%s1030_s0 + $0x1c0] sm:$0xff] }
  0x39   :  { %v200_v35 = vadd.f32 %v513_v2, %v129_v25  ;;  %451 = vst [vmem:[%s1033_s3 + $0x138] sm:$0xff] %v387_v32  ;;  %v388_v37 = vsel %vm260_vm8, %v196_v20, %v324_v30  ;;  %v130_v39 = vmul.f32 %v508_v1, %v59_v28  ;;  %v131_v40 = vmul.f32 %v508_v1, %v60_v29  ;;  %v71_v20 = vld [vmem:[%s1030_s0 + $0x1c8] sm:$0xff]  ;;  %v73_v32 = vld [vmem:[%s1030_s0 + $0x1d8] sm:$0xff] }
  0x3a   :  { %v389_v38 = vsel %vm261_vm9, %v197_v21, %v325_v31  ;;  %452 = vst [vmem:[%s1033_s3 + $0x140] sm:$0xff] %v388_v37  ;;  %v390_v44 = vsel %vm262_vm10, %v198_v23, %v326_v33  ;;  %vm263_vm11 = vcmp.ge.f32.partialorder %v199_v34, 0.0  ;;  %v327_v45 = vmul.f32 0.2, %v199_v34  ;;  %v72_v21 = vld [vmem:[%s1030_s0 + $0x1d0] sm:$0xff]  ;;  %v74_v33 = vld [vmem:[%s1030_s0 + $0x1e0] sm:$0xff] }
  0x3b   :  { %453 = vst [vmem:[%s1033_s3 + $0x148] sm:$0xff] %v389_v38  ;;  %vm264_vm12 = vcmp.ge.f32.partialorder %v200_v35, 0.0  ;;  %454 = vst [vmem:[%s1033_s3 + $0x150] sm:$0xff] %v390_v44  ;;  %v328_v46 = vmul.f32 0.2, %v200_v35  ;;  %v201_v47 = vadd.f32 %v513_v2, %v130_v39  ;;  %v202_v48 = vadd.f32 %v513_v2, %v131_v40 }
  0x3c   :  { %v132_v49 = vmul.f32 %v508_v1, %v61_v36  ;;  %v391_v50 = vsel %vm263_vm11, %v199_v34, %v327_v45  ;;  %v133_v51 = vmul.f32 %v508_v1, %v62_v41  ;;  %v134_v52 = vmul.f32 %v508_v1, %v63_v42 }
  0x3d   :  { %v135_v53 = vmul.f32 %v508_v1, %v64_v43  ;;  %455 = vst [vmem:[%s1033_s3 + $0x158] sm:$0xff] %v391_v50  ;;  %v392_v56 = vsel %vm264_vm12, %v200_v35, %v328_v46  ;;  %vm265_vm13 = vcmp.ge.f32.partialorder %v201_v47, 0.0  ;;  %v329_v57 = vmul.f32 0.2, %v201_v47  ;;  %v75_v46 = vld [vmem:[%s1030_s0 + $0x1e8] sm:$0xff] }
  0x3e   :  { %vm266_vm14 = vcmp.ge.f32.partialorder %v202_v48, 0.0  ;;  %456 = vst [vmem:[%s1033_s3 + $0x160] sm:$0xff] %v392_v56  ;;  %v330_v58 = vmul.f32 0.2, %v202_v48  ;;  %v203_v59 = vadd.f32 %v513_v2, %v132_v49  ;;  %v204_v60 = vadd.f32 %v513_v2, %v133_v51 }
  0x3f   :  { %v205_v61 = vadd.f32 %v513_v2, %v134_v52  ;;  %v393_v62 = vsel %vm265_vm13, %v201_v47, %v329_v57  ;;  %v206_v63 = vadd.f32 %v513_v2, %v135_v53  ;;  %v136_v0 = vmul.f32 %v508_v1, %v65_v54  ;;  %v76_v47 = vld [vmem:[%s1030_s0 + $0x1f0] sm:$0xff]  ;;  %v77_v54 = vld [vmem:[%s1030_s0 + $0x1f8] sm:$0xff] }
  0x40   :  { %v137_v3 = vmul.f32 %v508_v1, %v66_v55  ;;  %457 = vst [vmem:[%s1033_s3 + $0x168] sm:$0xff] %v393_v62  ;;  %v394_v4 = vsel %vm266_vm14, %v202_v48, %v330_v58  ;;  %vm267_vm15 = vcmp.ge.f32.partialorder %v203_v59, 0.0  ;;  %v331_v5 = vmul.f32 0.2, %v203_v59 }
  0x41   :  { %vm268_vm0 = vcmp.ge.f32.partialorder %v204_v60, 0.0  ;;  %458 = vst [vmem:[%s1033_s3 + $0x170] sm:$0xff] %v394_v4  ;;  %v332_v8 = vmul.f32 0.2, %v204_v60  ;;  %vm269_vm1 = vcmp.ge.f32.partialorder %v205_v61, 0.0  ;;  %vm270_vm2 = vcmp.ge.f32.partialorder %v206_v63, 0.0 }
  0x42   :  { %v333_v9 = vmul.f32 0.2, %v205_v61  ;;  %v395_v10 = vsel %vm267_vm15, %v203_v59, %v331_v5  ;;  %v334_v11 = vmul.f32 0.2, %v206_v63  ;;  %v207_v12 = vadd.f32 %v513_v2, %v136_v0 }
  0x43   :  { %v208_v13 = vadd.f32 %v513_v2, %v137_v3  ;;  %459 = vst [vmem:[%s1033_s3 + $0x178] sm:$0xff] %v395_v10  ;;  %v396_v15 = vsel %vm268_vm0, %v204_v60, %v332_v8  ;;  %v138_v17 = vmul.f32 %v508_v1, %v67_v6  ;;  %v139_v18 = vmul.f32 %v508_v1, %v68_v7 }
  0x44   :  { %v397_v16 = vsel %vm269_vm1, %v205_v61, %v333_v9  ;;  %460 = vst [vmem:[%s1033_s3 + $0x180] sm:$0xff] %v396_v15  ;;  %v398_v22 = vsel %vm270_vm2, %v206_v63, %v334_v11  ;;  %vm271_vm3 = vcmp.ge.f32.partialorder %v207_v12, 0.0  ;;  %v335_v23 = vmul.f32 0.2, %v207_v12 }
  0x45   :  { %461 = vst [vmem:[%s1033_s3 + $0x188] sm:$0xff] %v397_v16  ;;  %vm272_vm4 = vcmp.ge.f32.partialorder %v208_v13, 0.0  ;;  %462 = vst [vmem:[%s1033_s3 + $0x190] sm:$0xff] %v398_v22  ;;  %v336_v24 = vmul.f32 0.2, %v208_v13  ;;  %v209_v25 = vadd.f32 %v513_v2, %v138_v17  ;;  %v210_v26 = vadd.f32 %v513_v2, %v139_v18 }
  0x46   :  { %v140_v27 = vmul.f32 %v508_v1, %v69_v14  ;;  %v399_v28 = vsel %vm271_vm3, %v207_v12, %v335_v23  ;;  %v141_v29 = vmul.f32 %v508_v1, %v70_v19  ;;  %v142_v30 = vmul.f32 %v508_v1, %v71_v20 }
  0x47   :  { %v143_v31 = vmul.f32 %v508_v1, %v72_v21  ;;  %463 = vst [vmem:[%s1033_s3 + $0x198] sm:$0xff] %v399_v28  ;;  %v400_v34 = vsel %vm272_vm4, %v208_v13, %v336_v24  ;;  %vm273_vm5 = vcmp.ge.f32.partialorder %v209_v25, 0.0  ;;  %v337_v35 = vmul.f32 0.2, %v209_v25 }
  0x48   :  { %vm274_vm6 = vcmp.ge.f32.partialorder %v210_v26, 0.0  ;;  %464 = vst [vmem:[%s1033_s3 + $0x1a0] sm:$0xff] %v400_v34  ;;  %v338_v36 = vmul.f32 0.2, %v210_v26  ;;  %v211_v37 = vadd.f32 %v513_v2, %v140_v27  ;;  %v212_v38 = vadd.f32 %v513_v2, %v141_v29 }
  0x49   :  { %v213_v39 = vadd.f32 %v513_v2, %v142_v30  ;;  %v401_v40 = vsel %vm273_vm5, %v209_v25, %v337_v35  ;;  %v214_v41 = vadd.f32 %v513_v2, %v143_v31  ;;  %v144_v42 = vmul.f32 %v508_v1, %v73_v32 }
  0x4a   :  { %v145_v43 = vmul.f32 %v508_v1, %v74_v33  ;;  %465 = vst [vmem:[%s1033_s3 + $0x1a8] sm:$0xff] %v401_v40  ;;  %v402_v44 = vsel %vm274_vm6, %v210_v26, %v338_v36  ;;  %vm275_vm7 = vcmp.ge.f32.partialorder %v211_v37, 0.0  ;;  %v339_v45 = vmul.f32 0.2, %v211_v37 }
  0x4b   :  { %vm276_vm8 = vcmp.ge.f32.partialorder %v212_v38, 0.0  ;;  %466 = vst [vmem:[%s1033_s3 + $0x1b0] sm:$0xff] %v402_v44  ;;  %v340_v48 = vmul.f32 0.2, %v212_v38  ;;  %vm277_vm9 = vcmp.ge.f32.partialorder %v213_v39, 0.0  ;;  %vm278_vm10 = vcmp.ge.f32.partialorder %v214_v41, 0.0 }
  0x4c   :  { %v341_v49 = vmul.f32 0.2, %v213_v39  ;;  %v403_v50 = vsel %vm275_vm7, %v211_v37, %v339_v45  ;;  %v342_v51 = vmul.f32 0.2, %v214_v41  ;;  %v215_v52 = vadd.f32 %v513_v2, %v144_v42 }
  0x4d   :  { %v216_v53 = vadd.f32 %v513_v2, %v145_v43  ;;  %467 = vst [vmem:[%s1033_s3 + $0x1b8] sm:$0xff] %v403_v50  ;;  %v404_v55 = vsel %vm276_vm8, %v212_v38, %v340_v48  ;;  %v146_v57 = vmul.f32 %v508_v1, %v75_v46  ;;  %v147_v58 = vmul.f32 %v508_v1, %v76_v47 }
  0x4e   :  { %v405_v56 = vsel %vm277_vm9, %v213_v39, %v341_v49  ;;  %468 = vst [vmem:[%s1033_s3 + $0x1c0] sm:$0xff] %v404_v55  ;;  %v406_v59 = vsel %vm278_vm10, %v214_v41, %v342_v51  ;;  %vm279_vm11 = vcmp.ge.f32.partialorder %v215_v52, 0.0  ;;  %v343_v60 = vmul.f32 0.2, %v215_v52 }
  0x4f   :  { %469 = vst [vmem:[%s1033_s3 + $0x1c8] sm:$0xff] %v405_v56  ;;  %vm280_vm12 = vcmp.ge.f32.partialorder %v216_v53, 0.0  ;;  %470 = vst [vmem:[%s1033_s3 + $0x1d0] sm:$0xff] %v406_v59  ;;  %v344_v61 = vmul.f32 0.2, %v216_v53  ;;  %v217_v62 = vadd.f32 %v513_v2, %v146_v57  ;;  %v218_v63 = vadd.f32 %v513_v2, %v147_v58 }
  0x50   :  { %v148_v0 = vmul.f32 %v508_v1, %v77_v54  ;;  %v407_v3 = vsel %vm279_vm11, %v215_v52, %v343_v60 }
  0x51   :  { %471 = vst [vmem:[%s1033_s3 + $0x1d8] sm:$0xff] %v407_v3  ;;  %v408_v4 = vsel %vm280_vm12, %v216_v53, %v344_v61  ;;  %vm281_vm13 = vcmp.ge.f32.partialorder %v217_v62, 0.0  ;;  %v345_v5 = vmul.f32 0.2, %v217_v62  ;;  %vm282_vm14 = vcmp.ge.f32.partialorder %v218_v63, 0.0 }
  0x52   :  { %472 = vst [vmem:[%s1033_s3 + $0x1e0] sm:$0xff] %v408_v4  ;;  %v346_v6 = vmul.f32 0.2, %v218_v63  ;;  %v219_v7 = vadd.f32 %v513_v2, %v148_v0 }
  0x53   :  { %v409_v8 = vsel %vm281_vm13, %v217_v62, %v345_v5 }
  0x54   :  { %473 = vst [vmem:[%s1033_s3 + $0x1e8] sm:$0xff] %v409_v8  ;;  %v410_v1 = vsel %vm282_vm14, %v218_v63, %v346_v6  ;;  %vm283_vm15 = vcmp.ge.f32.partialorder %v219_v7, 0.0  ;;  %v347_v9 = vmul.f32 0.2, %v219_v7 }
  0x55   :  { %474 = vst [vmem:[%s1033_s3 + $0x1f0] sm:$0xff] %v410_v1 }
  0x56   :  { %v411_v10 = vsel %vm283_vm15, %v219_v7, %v347_v9 }
  0x57   :  { %475 = vst [vmem:[%s1033_s3 + $0x1f8] sm:$0xff] %v411_v10 }

// kernel: forward.37
= control target key start
LH: loop header
LB: loop body
LE: loop exit
PB: predicated region body
PF: predicated region fallthrough
CT: control target
= control target key end

     0   :  { %v2394_v0 = vmov 0   ;;  %s3114_s1 = inlined_call_operand.vmem [shape: bf16[512,128], index: 1, kind: input, shape index: {}]   ;;  %s3115_s0 = inlined_call_operand.vmem [shape: bf16[512,512], index: 0, kind: input, shape index: {}]   ;;  %s3116_s2 = inlined_call_operand.vmem [shape: f32[512,128], index: 2, kind: output, shape index: {}]  }
   0x1   :  { %1168 = vmatprep.subr.bf16.mxu0 %v2394_v0  ;;  %1457 = vmatprep.subr.bf16.mxu1 %v2394_v0  ;;  %v2170_v1 = vld [vmem:[%s3114_s1 + $0x38] sm:$0xff]   ;;  %v2172_v3 = vld [vmem:[%s3114_s1 + $0x30] sm:$0xff]   ;;  %v2174_v5 = vld [vmem:[%s3114_s1 + $0x28] sm:$0xff]  }
   0x2   :  { %v2171_v2 = vld [vmem:[%s3114_s1 + $0xb8] sm:$0xff]   ;;  %1169 = vmatpush1.bf16.msra.mxu0 %v2170_v1  ;;  %v2173_v4 = vld [vmem:[%s3114_s1 + $0xb0] sm:$0xff]   ;;  %v2175_v6 = vld [vmem:[%s3114_s1 + $0xa8] sm:$0xff]  }
   0x3   :  { %1458 = vmatpush1.bf16.msra.mxu1 %v2171_v2  ;;  %1170 = vmatprep.subr.bf16.mxu0 %v2394_v0  ;;  %v2176_v7 = vld [vmem:[%s3114_s1 + $0x20] sm:$0xff]   ;;  %v2178_v9 = vld [vmem:[%s3114_s1 + $0x18] sm:$0xff]   ;;  %v2180_v11 = vld [vmem:[%s3114_s1 + $0x10] sm:$0xff]  }
   0x4   :  { %1459 = vmatprep.subr.bf16.mxu1 %v2394_v0  ;;  %v2177_v8 = vld [vmem:[%s3114_s1 + $0xa0] sm:$0xff]   ;;  %v2179_v10 = vld [vmem:[%s3114_s1 + $0x98] sm:$0xff]   ;;  %v2181_v12 = vld [vmem:[%s3114_s1 + $0x90] sm:$0xff]  }
   0x5   :  { %v2182_v13 = vld [vmem:[%s3114_s1 + $0x8] sm:$0xff]   ;;  %v2184_v15 = vld [vmem:[%s3114_s1] sm:$0xff]   ;;  %v2186_v17 = vld [vmem:[%s3114_s1 + $0x78] sm:$0xff]  }
   0x6   :  { %1171 = vmatpush1.bf16.msra.mxu0 %v2172_v3  ;;  %v2183_v14 = vld [vmem:[%s3114_s1 + $0x88] sm:$0xff]   ;;  %v2185_v16 = vld [vmem:[%s3114_s1 + $0x80] sm:$0xff]   ;;  %v2187_v18 = vld [vmem:[%s3114_s1 + $0xf8] sm:$0xff]  }
   0x7   :  { %1460 = vmatpush1.bf16.msra.mxu1 %v2173_v4  ;;  %1172 = vmatprep.subr.bf16.mxu0 %v2394_v0  ;;  %v2204_v19 = vld [vmem:[%s3115_s0 + $0x4] ss:$16 sps:$4 sm:$0xff]   ;;  %v2207_v21 = vld [vmem:[%s3115_s0 + $0xc] ss:$16 sps:$4 sm:$0xff]   ;;  %v2202_v35 = vld [vmem:[%s3115_s0] ss:$16 sps:$4 sm:$0xff]  }
   0x8   :  { %1461 = vmatprep.subr.bf16.mxu1 %v2394_v0  ;;  %v2188_v20 = vld [vmem:[%s3114_s1 + $0x70] sm:$0xff]   ;;  %1200 = vmatprep.mubr.bf16.mxu0 %v2204_v19  ;;  %v2190_v23 = vld [vmem:[%s3114_s1 + $0x68] sm:$0xff]   ;;  %v2192_v25 = vld [vmem:[%s3114_s1 + $0x60] sm:$0xff]  }
   0x9   :  { %v2189_v22 = vld [vmem:[%s3114_s1 + $0xf0] sm:$0xff]   ;;  %1489 = vmatprep.mubr.bf16.mxu1 %v2207_v21  ;;  %v2191_v24 = vld [vmem:[%s3114_s1 + $0xe8] sm:$0xff]   ;;  %v2193_v26 = vld [vmem:[%s3114_s1 + $0xe0] sm:$0xff]  }
   0xa   :  { %1173 = vmatpush1.bf16.msra.mxu0 %v2174_v5  ;;  %v2194_v27 = vld [vmem:[%s3114_s1 + $0x58] sm:$0xff]   ;;  %v2196_v29 = vld [vmem:[%s3114_s1 + $0x50] sm:$0xff]   ;;  %v2198_v31 = vld [vmem:[%s3114_s1 + $0x48] sm:$0xff]  }
   0xb   :  { %1462 = vmatpush1.bf16.msra.mxu1 %v2175_v6  ;;  %1174 = vmatprep.subr.bf16.mxu0 %v2394_v0  ;;  %v2195_v28 = vld [vmem:[%s3114_s1 + $0xd8] sm:$0xff]   ;;  %v2197_v30 = vld [vmem:[%s3114_s1 + $0xd0] sm:$0xff]   ;;  %v2199_v32 = vld [vmem:[%s3114_s1 + $0xc8] sm:$0xff]  }
   0xc   :  { %1463 = vmatprep.subr.bf16.mxu1 %v2394_v0  ;;  %v2200_v33 = vld [vmem:[%s3114_s1 + $0x40] sm:$0xff]   ;;  %v2205_v36 = vld [vmem:[%s3115_s0 + $0x8] ss:$16 sps:$4 sm:$0xff]   ;;  %v2210_v38 = vld [vmem:[%s3115_s0 + $0x2c] ss:$16 sps:$4 sm:$0xff]  }
   0xd   :  { %v2201_v34 = vld [vmem:[%s3114_s1 + $0xc0] sm:$0xff]   ;;  %v2213_v40 = vld [vmem:[%s3115_s0 + $0x28] ss:$16 sps:$4 sm:$0xff]   ;;  %v2216_v42 = vld [vmem:[%s3115_s0 + $0x4c] ss:$16 sps:$4 sm:$0xff]  }
   0xe   :  { %1175 = vmatpush1.bf16.msra.mxu0 %v2176_v7  ;;  %v2208_v37 = vld [vmem:[%s3115_s0 + $0x24] ss:$16 sps:$4 sm:$0xff]   ;;  %v2212_v39 = vld [vmem:[%s3115_s0 + $0x20] ss:$16 sps:$4 sm:$0xff]   ;;  %v2219_v44 = vld [vmem:[%s3115_s0 + $0x48] ss:$16 sps:$4 sm:$0xff]  }
   0xf   :  { %1464 = vmatpush1.bf16.msra.mxu1 %v2177_v8  ;;  %1176 = vmatprep.subr.bf16.mxu0 %v2394_v0  ;;  %v2214_v41 = vld [vmem:[%s3115_s0 + $0x44] ss:$16 sps:$4 sm:$0xff]   ;;  %v2218_v43 = vld [vmem:[%s3115_s0 + $0x40] ss:$16 sps:$4 sm:$0xff]   ;;  %v2222_v46 = vld [vmem:[%s3115_s0 + $0x6c] ss:$16 sps:$4 sm:$0xff]  }
  0x10   :  { %1465 = vmatprep.subr.bf16.mxu1 %v2394_v0  ;;  %v2220_v45 = vld [vmem:[%s3115_s0 + $0x64] ss:$16 sps:$4 sm:$0xff]   ;;  %v2224_v47 = vld [vmem:[%s3115_s0 + $0x60] ss:$16 sps:$4 sm:$0xff]   ;;  %v2225_v48 = vld [vmem:[%s3115_s0 + $0x68] ss:$16 sps:$4 sm:$0xff]  }
  0x11   :  { %v2226_v49 = vld [vmem:[%s3115_s0 + $0x84] ss:$16 sps:$4 sm:$0xff]   ;;  %v2228_v50 = vld [vmem:[%s3115_s0 + $0x8c] ss:$16 sps:$4 sm:$0xff]   ;;  %v2230_v51 = vld [vmem:[%s3115_s0 + $0x80] ss:$16 sps:$4 sm:$0xff]  }
  0x12   :  { %1177 = vmatpush1.bf16.msra.mxu0 %v2178_v9  ;;  %v2231_v52 = vld [vmem:[%s3115_s0 + $0x88] ss:$16 sps:$4 sm:$0xff]   ;;  %v2232_v53 = vld [vmem:[%s3115_s0 + $0xa4] ss:$16 sps:$4 sm:$0xff]   ;;  %v2234_v54 = vld [vmem:[%s3115_s0 + $0xac] ss:$16 sps:$4 sm:$0xff]  }
  0x13   :  { %1466 = vmatpush1.bf16.msra.mxu1 %v2179_v10  ;;  %1178 = vmatprep.subr.bf16.mxu0 %v2394_v0  ;;  %v2236_v55 = vld [vmem:[%s3115_s0 + $0xa0] ss:$16 sps:$4 sm:$0xff]   ;;  %v2237_v56 = vld [vmem:[%s3115_s0 + $0xa8] ss:$16 sps:$4 sm:$0xff]   ;;  %v2238_v57 = vld [vmem:[%s3115_s0 + $0xc4] ss:$16 sps:$4 sm:$0xff]  }
  0x14   :  { %1467 = vmatprep.subr.bf16.mxu1 %v2394_v0  ;;  %v2240_v58 = vld [vmem:[%s3115_s0 + $0xcc] ss:$16 sps:$4 sm:$0xff]   ;;  %v2242_v59 = vld [vmem:[%s3115_s0 + $0xc0] ss:$16 sps:$4 sm:$0xff]   ;;  %v2243_v60 = vld [vmem:[%s3115_s0 + $0xc8] ss:$16 sps:$4 sm:$0xff]  }
  0x15   :  { %v2244_v61 = vld [vmem:[%s3115_s0 + $0xe4] ss:$16 sps:$4 sm:$0xff]   ;;  %v2246_v62 = vld [vmem:[%s3115_s0 + $0xec] ss:$16 sps:$4 sm:$0xff]   ;;  %v2248_v63 = vld [vmem:[%s3115_s0 + $0xe0] ss:$16 sps:$4 sm:$0xff]  }
  0x16   :  { %1179 = vmatpush1.bf16.msra.mxu0 %v2180_v11  ;;  %v2250_v1 = vld [vmem:[%s3115_s0 + $0x104] ss:$16 sps:$4 sm:$0xff]   ;;  %v2252_v2 = vld [vmem:[%s3115_s0 + $0x10c] ss:$16 sps:$4 sm:$0xff]   ;;  %v2254_v3 = vld [vmem:[%s3115_s0 + $0x100] ss:$16 sps:$4 sm:$0xff]  }
  0x17   :  { %1468 = vmatpush1.bf16.msra.mxu1 %v2181_v12  ;;  %1180 = vmatprep.subr.bf16.mxu0 %v2394_v0  ;;  %v2255_v4 = vld [vmem:[%s3115_s0 + $0x108] ss:$16 sps:$4 sm:$0xff]   ;;  %v2256_v5 = vld [vmem:[%s3115_s0 + $0x124] ss:$16 sps:$4 sm:$0xff]   ;;  %v2258_v6 = vld [vmem:[%s3115_s0 + $0x12c] ss:$16 sps:$4 sm:$0xff]  }
  0x18   :  { %1469 = vmatprep.subr.bf16.mxu1 %v2394_v0  ;;  %v2260_v7 = vld [vmem:[%s3115_s0 + $0x120] ss:$16 sps:$4 sm:$0xff]   ;;  %v2261_v8 = vld [vmem:[%s3115_s0 + $0x128] ss:$16 sps:$4 sm:$0xff]   ;;  %v2262_v9 = vld [vmem:[%s3115_s0 + $0x144] ss:$16 sps:$4 sm:$0xff]  }
  0x19   :  { %v2264_v10 = vld [vmem:[%s3115_s0 + $0x14c] ss:$16 sps:$4 sm:$0xff]   ;;  %v2266_v11 = vld [vmem:[%s3115_s0 + $0x140] ss:$16 sps:$4 sm:$0xff]   ;;  %v2267_v12 = vld [vmem:[%s3115_s0 + $0x148] ss:$16 sps:$4 sm:$0xff]  }
  0x1a   :  { %1181 = vmatpush1.bf16.msra.mxu0 %v2182_v13  ;;  %v2268_v13 = vld [vmem:[%s3115_s0 + $0x164] ss:$16 sps:$4 sm:$0xff]   ;;  %v2278_v19 = vld [vmem:[%s3115_s0 + $0x180] ss:$16 sps:$4 sm:$0xff]  }
  0x1b   :  { %1470 = vmatpush1.bf16.msra.mxu1 %v2183_v14  ;;  %1182 = vmatprep.subr.bf16.mxu0 %v2394_v0  ;;  %v2270_v14 = vld [vmem:[%s3115_s0 + $0x16c] ss:$16 sps:$4 sm:$0xff]   ;;  %v2280_v21 = vld [vmem:[%s3115_s0 + $0x1a4] ss:$16 sps:$4 sm:$0xff]  }
  0x1c   :  { %1471 = vmatprep.subr.bf16.mxu1 %v2394_v0 }
  0x1e   :  { %1183 = vmatpush1.bf16.msra.mxu0 %v2184_v15  ;;  %v2272_v15 = vld [vmem:[%s3115_s0 + $0x160] ss:$16 sps:$4 sm:$0xff]  }
  0x1f   :  { %1472 = vmatpush1.bf16.msra.mxu1 %v2185_v16  ;;  %1184 = vmatprep.subr.bf16.mxu0 %v2394_v0  ;;  %v2273_v16 = vld [vmem:[%s3115_s0 + $0x168] ss:$16 sps:$4 sm:$0xff]  }
  0x20   :  { %1473 = vmatprep.subr.bf16.mxu1 %v2394_v0 }
  0x22   :  { %1185 = vmatpush2.bf16.msra.mxu0 %v2186_v17  ;;  %v2274_v17 = vld [vmem:[%s3115_s0 + $0x184] ss:$16 sps:$4 sm:$0xff]  }
  0x23   :  { %1474 = vmatpush2.bf16.msra.mxu1 %v2187_v18  ;;  %1186 = vmatprep.subr.bf16.mxu0 %v2394_v0  ;;  %v2276_v18 = vld [vmem:[%s3115_s0 + $0x18c] ss:$16 sps:$4 sm:$0xff]  }
  0x24   :  { %1475 = vmatprep.subr.bf16.mxu1 %v2394_v0 }
  0x26   :  { %1187 = vmatpush2.bf16.msra.mxu0 %v2188_v20  ;;  %v2279_v20 = vld [vmem:[%s3115_s0 + $0x188] ss:$16 sps:$4 sm:$0xff]  }
  0x27   :  { %1476 = vmatpush2.bf16.msra.mxu1 %v2189_v22  ;;  %1188 = vmatprep.subr.bf16.mxu0 %v2394_v0  ;;  %v2282_v22 = vld [vmem:[%s3115_s0 + $0x1ac] ss:$16 sps:$4 sm:$0xff]  }
  0x28   :  { %1477 = vmatprep.subr.bf16.mxu1 %v2394_v0 }
  0x2a   :  { %1189 = vmatpush2.bf16.msra.mxu0 %v2190_v23  ;;  %v2284_v23 = vld [vmem:[%s3115_s0 + $0x1a0] ss:$16 sps:$4 sm:$0xff]  }
  0x2b   :  { %1478 = vmatpush2.bf16.msra.mxu1 %v2191_v24  ;;  %1190 = vmatprep.subr.bf16.mxu0 %v2394_v0  ;;  %v2285_v24 = vld [vmem:[%s3115_s0 + $0x1a8] ss:$16 sps:$4 sm:$0xff]  }
  0x2c   :  { %1479 = vmatprep.subr.bf16.mxu1 %v2394_v0 }
  0x2e   :  { %1191 = vmatpush2.bf16.msra.mxu0 %v2192_v25  ;;  %v2286_v25 = vld [vmem:[%s3115_s0 + $0x1c4] ss:$16 sps:$4 sm:$0xff]  }
  0x2f   :  { %1480 = vmatpush2.bf16.msra.mxu1 %v2193_v26  ;;  %1192 = vmatprep.subr.bf16.mxu0 %v2394_v0  ;;  %v2288_v26 = vld [vmem:[%s3115_s0 + $0x1cc] ss:$16 sps:$4 sm:$0xff]  }
  0x30   :  { %1481 = vmatprep.subr.bf16.mxu1 %v2394_v0 }
  0x32   :  { %1193 = vmatpush2.bf16.msra.mxu0 %v2194_v27  ;;  %v2290_v27 = vld [vmem:[%s3115_s0 + $0x1c0] ss:$16 sps:$4 sm:$0xff]  }
  0x33   :  { %1482 = vmatpush2.bf16.msra.mxu1 %v2195_v28  ;;  %1194 = vmatprep.subr.bf16.mxu0 %v2394_v0  ;;  %v2291_v28 = vld [vmem:[%s3115_s0 + $0x1c8] ss:$16 sps:$4 sm:$0xff]  }
  0x34   :  { %1483 = vmatprep.subr.bf16.mxu1 %v2394_v0 }
  0x36   :  { %1195 = vmatpush2.bf16.msra.mxu0 %v2196_v29  ;;  %v2292_v29 = vld [vmem:[%s3115_s0 + $0x1e4] ss:$16 sps:$4 sm:$0xff]  }
  0x37   :  { %1484 = vmatpush2.bf16.msra.mxu1 %v2197_v30  ;;  %1196 = vmatprep.subr.bf16.mxu0 %v2394_v0  ;;  %v2294_v30 = vld [vmem:[%s3115_s0 + $0x1ec] ss:$16 sps:$4 sm:$0xff]  }
  0x38   :  { %1485 = vmatprep.subr.bf16.mxu1 %v2394_v0 }
  0x3a   :  { %1197 = vmatpush2.bf16.msra.mxu0 %v2198_v31  ;;  %v2296_v31 = vld [vmem:[%s3115_s0 + $0x1e0] ss:$16 sps:$4 sm:$0xff]  }
  0x3b   :  { %1486 = vmatpush2.bf16.msra.mxu1 %v2199_v32  ;;  %1198 = vmatprep.subr.bf16.mxu0 %v2394_v0  ;;  %v2297_v32 = vld [vmem:[%s3115_s0 + $0x1e8] ss:$16 sps:$4 sm:$0xff]  }
  0x3c   :  { %1487 = vmatprep.subr.bf16.mxu1 %v2394_v0  ;;  %v2249_v0 = vld [vmem:[%s3115_s0 + $0xe8] ss:$16 sps:$4 sm:$0xff]  }
  0x3e   :  { %1199 = vmatpush2.bf16.msra.mxu0 %v2200_v33  ;;  %v2298_v33 = vld [vmem:[%s3115_s0 + $0x204] ss:$16 sps:$4 sm:$0xff]  }
  0x3f   :  { %1488 = vmatpush2.bf16.msra.mxu1 %v2201_v34  ;;  %v2300_v34 = vld [vmem:[%s3115_s0 + $0x20c] ss:$16 sps:$4 sm:$0xff]  }
  0x41   :  { %1201 = vmatmul.mubr.bf16.vlgmr.msra.gmra.mxu0 %v2202_v35  ;;  %v2302_v35 = vld [vmem:[%s3115_s0 + $0x200] ss:$16 sps:$4 sm:$0xff]  }
  0x42   :  { %1490 = vmatmul.mubr.bf16.vlgmr.msra.gmra.mxu1 %v2205_v36  ;;  %1208 = vmatprep.mubr.bf16.mxu0 %v2208_v37  ;;  %v2303_v36 = vld [vmem:[%s3115_s0 + $0x208] ss:$16 sps:$4 sm:$0xff]   ;;  %v2304_v37 = vld [vmem:[%s3115_s0 + $0x224] ss:$16 sps:$4 sm:$0xff]  }
  0x43   :  { %1497 = vmatprep.mubr.bf16.mxu1 %v2210_v38  ;;  %v2306_v38 = vld [vmem:[%s3115_s0 + $0x22c] ss:$16 sps:$4 sm:$0xff]  }
  0x49   :  { %1209 = vmatmul.mubr.bf16.gmra.mxu0 %v2212_v39  ;;  %v2308_v39 = vld [vmem:[%s3115_s0 + $0x220] ss:$16 sps:$4 sm:$0xff]  }
  0x4a   :  { %1498 = vmatmul.mubr.bf16.gmra.mxu1 %v2213_v40  ;;  %1216 = vmatprep.mubr.bf16.mxu0 %v2214_v41  ;;  %v2309_v40 = vld [vmem:[%s3115_s0 + $0x228] ss:$16 sps:$4 sm:$0xff]   ;;  %v2310_v41 = vld [vmem:[%s3115_s0 + $0x244] ss:$16 sps:$4 sm:$0xff]  }
  0x4b   :  { %1505 = vmatprep.mubr.bf16.mxu1 %v2216_v42  ;;  %v2312_v42 = vld [vmem:[%s3115_s0 + $0x24c] ss:$16 sps:$4 sm:$0xff]  }
  0x51   :  { %1217 = vmatmul.mubr.bf16.gmra.mxu0 %v2218_v43  ;;  %v2314_v43 = vld [vmem:[%s3115_s0 + $0x240] ss:$16 sps:$4 sm:$0xff]  }
  0x52   :  { %1506 = vmatmul.mubr.bf16.gmra.mxu1 %v2219_v44  ;;  %1224 = vmatprep.mubr.bf16.mxu0 %v2220_v45  ;;  %v2315_v44 = vld [vmem:[%s3115_s0 + $0x248] ss:$16 sps:$4 sm:$0xff]   ;;  %v2316_v45 = vld [vmem:[%s3115_s0 + $0x264] ss:$16 sps:$4 sm:$0xff]  }
  0x53   :  { %1513 = vmatprep.mubr.bf16.mxu1 %v2222_v46  ;;  %v2318_v46 = vld [vmem:[%s3115_s0 + $0x26c] ss:$16 sps:$4 sm:$0xff]  }
  0x59   :  { %1225 = vmatmul.mubr.bf16.gmra.mxu0 %v2224_v47  ;;  %v2320_v47 = vld [vmem:[%s3115_s0 + $0x260] ss:$16 sps:$4 sm:$0xff]  }
  0x5a   :  { %1514 = vmatmul.mubr.bf16.gmra.mxu1 %v2225_v48  ;;  %1232 = vmatprep.mubr.bf16.mxu0 %v2226_v49  ;;  %v2321_v48 = vld [vmem:[%s3115_s0 + $0x268] ss:$16 sps:$4 sm:$0xff]   ;;  %v2322_v49 = vld [vmem:[%s3115_s0 + $0x284] ss:$16 sps:$4 sm:$0xff]  }
  0x5b   :  { %1521 = vmatprep.mubr.bf16.mxu1 %v2228_v50  ;;  %v2324_v50 = vld [vmem:[%s3115_s0 + $0x28c] ss:$16 sps:$4 sm:$0xff]  }
  0x61   :  { %1233 = vmatmul.mubr.bf16.gmra.mxu0 %v2230_v51  ;;  %v2326_v51 = vld [vmem:[%s3115_s0 + $0x280] ss:$16 sps:$4 sm:$0xff]  }
  0x62   :  { %1522 = vmatmul.mubr.bf16.gmra.mxu1 %v2231_v52  ;;  %1240 = vmatprep.mubr.bf16.mxu0 %v2232_v53  ;;  %v2327_v52 = vld [vmem:[%s3115_s0 + $0x288] ss:$16 sps:$4 sm:$0xff]   ;;  %v2328_v53 = vld [vmem:[%s3115_s0 + $0x2a4] ss:$16 sps:$4 sm:$0xff]  }
  0x63   :  { %1529 = vmatprep.mubr.bf16.mxu1 %v2234_v54  ;;  %v2330_v54 = vld [vmem:[%s3115_s0 + $0x2ac] ss:$16 sps:$4 sm:$0xff]  }
  0x69   :  { %1241 = vmatmul.mubr.bf16.gmra.mxu0 %v2236_v55  ;;  %v2332_v55 = vld [vmem:[%s3115_s0 + $0x2a0] ss:$16 sps:$4 sm:$0xff]  }
  0x6a   :  { %1530 = vmatmul.mubr.bf16.gmra.mxu1 %v2237_v56  ;;  %1248 = vmatprep.mubr.bf16.mxu0 %v2238_v57  ;;  %v2333_v56 = vld [vmem:[%s3115_s0 + $0x2a8] ss:$16 sps:$4 sm:$0xff]   ;;  %v2334_v57 = vld [vmem:[%s3115_s0 + $0x2c4] ss:$16 sps:$4 sm:$0xff]  }
  0x6b   :  { %1537 = vmatprep.mubr.bf16.mxu1 %v2240_v58  ;;  %v2336_v58 = vld [vmem:[%s3115_s0 + $0x2cc] ss:$16 sps:$4 sm:$0xff]  }
  0x71   :  { %1249 = vmatmul.mubr.bf16.gmra.mxu0 %v2242_v59  ;;  %v2338_v59 = vld [vmem:[%s3115_s0 + $0x2c0] ss:$16 sps:$4 sm:$0xff]  }
  0x72   :  { %1538 = vmatmul.mubr.bf16.gmra.mxu1 %v2243_v60  ;;  %1256 = vmatprep.mubr.bf16.mxu0 %v2244_v61  ;;  %v2339_v60 = vld [vmem:[%s3115_s0 + $0x2c8] ss:$16 sps:$4 sm:$0xff]   ;;  %v2340_v61 = vld [vmem:[%s3115_s0 + $0x2e4] ss:$16 sps:$4 sm:$0xff]  }
  0x73   :  { %1545 = vmatprep.mubr.bf16.mxu1 %v2246_v62  ;;  %v2342_v62 = vld [vmem:[%s3115_s0 + $0x2ec] ss:$16 sps:$4 sm:$0xff]  }
  0x79   :  { %1257 = vmatmul.mubr.bf16.gmra.mxu0 %v2248_v63  ;;  %v2344_v63 = vld [vmem:[%s3115_s0 + $0x2e0] ss:$16 sps:$4 sm:$0xff]  }
  0x7a   :  { %1546 = vmatmul.mubr.bf16.gmra.mxu1 %v2249_v0  ;;  %1264 = vmatprep.mubr.bf16.mxu0 %v2250_v1  ;;  %v2345_v0 = vld [vmem:[%s3115_s0 + $0x2e8] ss:$16 sps:$4 sm:$0xff]   ;;  %v2346_v1 = vld [vmem:[%s3115_s0 + $0x304] ss:$16 sps:$4 sm:$0xff]  }
  0x7b   :  { %1553 = vmatprep.mubr.bf16.mxu1 %v2252_v2  ;;  %v2348_v2 = vld [vmem:[%s3115_s0 + $0x30c] ss:$16 sps:$4 sm:$0xff]  }
  0x81   :  { %1265 = vmatmul.mubr.bf16.gmra.mxu0 %v2254_v3  ;;  %v2350_v3 = vld [vmem:[%s3115_s0 + $0x300] ss:$16 sps:$4 sm:$0xff]  }
  0x82   :  { %1554 = vmatmul.mubr.bf16.gmra.mxu1 %v2255_v4  ;;  %1272 = vmatprep.mubr.bf16.mxu0 %v2256_v5  ;;  %v2351_v4 = vld [vmem:[%s3115_s0 + $0x308] ss:$16 sps:$4 sm:$0xff]   ;;  %v2352_v5 = vld [vmem:[%s3115_s0 + $0x324] ss:$16 sps:$4 sm:$0xff]  }
  0x83   :  { %1561 = vmatprep.mubr.bf16.mxu1 %v2258_v6  ;;  %v2354_v6 = vld [vmem:[%s3115_s0 + $0x32c] ss:$16 sps:$4 sm:$0xff]  }
  0x89   :  { %1273 = vmatmul.mubr.bf16.gmra.mxu0 %v2260_v7 }
  0x8a   :  { %1562 = vmatmul.mubr.bf16.gmra.mxu1 %v2261_v8  ;;  %1280 = vmatprep.mubr.bf16.mxu0 %v2262_v9 }
  0x8b   :  { %1569 = vmatprep.mubr.bf16.mxu1 %v2264_v10 }
  0x91   :  { %1281 = vmatmul.mubr.bf16.gmra.mxu0 %v2266_v11 }
  0x92   :  { %1570 = vmatmul.mubr.bf16.gmra.mxu1 %v2267_v12  ;;  %1288 = vmatprep.mubr.bf16.mxu0 %v2268_v13  ;;  %v2356_v13 = vld [vmem:[%s3115_s0 + $0x320] ss:$16 sps:$4 sm:$0xff]  }
  0x93   :  { %1577 = vmatprep.mubr.bf16.mxu1 %v2270_v14 }
  0x99   :  { %1289 = vmatmul.mubr.bf16.gmra.mxu0 %v2272_v15  ;;  %v2357_v15 = vld [vmem:[%s3115_s0 + $0x328] ss:$16 sps:$4 sm:$0xff]  }
  0x9a   :  { %1578 = vmatmul.mubr.bf16.gmra.mxu1 %v2273_v16  ;;  %1296 = vmatprep.mubr.bf16.mxu0 %v2274_v17  ;;  %v2358_v16 = vld [vmem:[%s3115_s0 + $0x344] ss:$16 sps:$4 sm:$0xff]  }
  0x9b   :  { %1585 = vmatprep.mubr.bf16.mxu1 %v2276_v18 }
  0xa1   :  { %1297 = vmatmul.mubr.bf16.gmra.mxu0 %v2278_v19  ;;  %v2360_v19 = vld [vmem:[%s3115_s0 + $0x34c] ss:$16 sps:$4 sm:$0xff]  }
  0xa2   :  { %1586 = vmatmul.mubr.bf16.gmra.mxu1 %v2279_v20  ;;  %1304 = vmatprep.mubr.bf16.mxu0 %v2280_v21 }
  0xa3   :  { %1593 = vmatprep.mubr.bf16.mxu1 %v2282_v22 }
  0xa9   :  { %1305 = vmatmul.mubr.bf16.gmra.mxu0 %v2284_v23 }
  0xaa   :  { %1594 = vmatmul.mubr.bf16.gmra.mxu1 %v2285_v24  ;;  %1312 = vmatprep.mubr.bf16.mxu0 %v2286_v25 }
  0xab   :  { %1601 = vmatprep.mubr.bf16.mxu1 %v2288_v26 }
  0xb1   :  { %1313 = vmatmul.mubr.bf16.gmra.mxu0 %v2290_v27  ;;  %v2362_v27 = vld [vmem:[%s3115_s0 + $0x340] ss:$16 sps:$4 sm:$0xff]  }
  0xb2   :  { %1602 = vmatmul.mubr.bf16.gmra.mxu1 %v2291_v28  ;;  %1320 = vmatprep.mubr.bf16.mxu0 %v2292_v29  ;;  %v2363_v29 = vld [vmem:[%s3115_s0 + $0x348] ss:$16 sps:$4 sm:$0xff]  }
  0xb3   :  { %1609 = vmatprep.mubr.bf16.mxu1 %v2294_v30  ;;  %v2364_v30 = vld [vmem:[%s3115_s0 + $0x364] ss:$16 sps:$4 sm:$0xff]  }
  0xb9   :  { %1321 = vmatmul.mubr.bf16.gmra.mxu0 %v2296_v31 }
  0xba   :  { %1610 = vmatmul.mubr.bf16.gmra.mxu1 %v2297_v32  ;;  %1328 = vmatprep.mubr.bf16.mxu0 %v2298_v33  ;;  %v2366_v33 = vld [vmem:[%s3115_s0 + $0x36c] ss:$16 sps:$4 sm:$0xff]  }
  0xbb   :  { %1617 = vmatprep.mubr.bf16.mxu1 %v2300_v34 }
  0xc1   :  { %1329 = vmatmul.mubr.bf16.gmra.mxu0 %v2302_v35 }
  0xc2   :  { %1618 = vmatmul.mubr.bf16.gmra.mxu1 %v2303_v36  ;;  %1336 = vmatprep.mubr.bf16.mxu0 %v2304_v37 }
  0xc3   :  { %1625 = vmatprep.mubr.bf16.mxu1 %v2306_v38 }
  0xc9   :  { %1337 = vmatmul.mubr.bf16.gmra.mxu0 %v2308_v39 }
  0xca   :  { %1626 = vmatmul.mubr.bf16.gmra.mxu1 %v2309_v40  ;;  %1344 = vmatprep.mubr.bf16.mxu0 %v2310_v41  ;;  %v2368_v41 = vld [vmem:[%s3115_s0 + $0x360] ss:$16 sps:$4 sm:$0xff]  }
  0xcb   :  { %1633 = vmatprep.mubr.bf16.mxu1 %v2312_v42 }
  0xd1   :  { %1345 = vmatmul.mubr.bf16.gmra.mxu0 %v2314_v43  ;;  %v2369_v43 = vld [vmem:[%s3115_s0 + $0x368] ss:$16 sps:$4 sm:$0xff]  }
  0xd2   :  { %1634 = vmatmul.mubr.bf16.gmra.mxu1 %v2315_v44  ;;  %1352 = vmatprep.mubr.bf16.mxu0 %v2316_v45  ;;  %v2372_v44 = vld [vmem:[%s3115_s0 + $0x384] ss:$16 sps:$4 sm:$0xff]  }
  0xd3   :  { %1641 = vmatprep.mubr.bf16.mxu1 %v2318_v46 }
  0xd9   :  { %1353 = vmatmul.mubr.bf16.gmra.mxu0 %v2320_v47  ;;  %v2375_v47 = vld [vmem:[%s3115_s0 + $0x38c] ss:$16 sps:$4 sm:$0xff]  }
  0xda   :  { %1642 = vmatmul.mubr.bf16.gmra.mxu1 %v2321_v48  ;;  %1360 = vmatprep.mubr.bf16.mxu0 %v2322_v49 }
  0xdb   :  { %1649 = vmatprep.mubr.bf16.mxu1 %v2324_v50 }
  0xe1   :  { %1361 = vmatmul.mubr.bf16.gmra.mxu0 %v2326_v51 }
  0xe2   :  { %1650 = vmatmul.mubr.bf16.gmra.mxu1 %v2327_v52  ;;  %1368 = vmatprep.mubr.bf16.mxu0 %v2328_v53 }
  0xe3   :  { %1657 = vmatprep.mubr.bf16.mxu1 %v2330_v54 }
  0xe9   :  { %1369 = vmatmul.mubr.bf16.gmra.mxu0 %v2332_v55  ;;  %v2370_v55 = vld [vmem:[%s3115_s0 + $0x380] ss:$16 sps:$4 sm:$0xff]  }
  0xea   :  { %1658 = vmatmul.mubr.bf16.gmra.mxu1 %v2333_v56  ;;  %1376 = vmatprep.mubr.bf16.mxu0 %v2334_v57  ;;  %v2373_v57 = vld [vmem:[%s3115_s0 + $0x388] ss:$16 sps:$4 sm:$0xff]  }
  0xeb   :  { %1665 = vmatprep.mubr.bf16.mxu1 %v2336_v58  ;;  %v2378_v58 = vld [vmem:[%s3115_s0 + $0x3a4] ss:$16 sps:$4 sm:$0xff]  }
  0xf1   :  { %1377 = vmatmul.mubr.bf16.gmra.mxu0 %v2338_v59 }
  0xf2   :  { %1666 = vmatmul.mubr.bf16.gmra.mxu1 %v2339_v60  ;;  %1384 = vmatprep.mubr.bf16.mxu0 %v2340_v61  ;;  %v2381_v61 = vld [vmem:[%s3115_s0 + $0x3ac] ss:$16 sps:$4 sm:$0xff]  }
  0xf3   :  { %1673 = vmatprep.mubr.bf16.mxu1 %v2342_v62 }
  0xf9   :  { %1385 = vmatmul.mubr.bf16.gmra.mxu0 %v2344_v63 }
  0xfa   :  { %1674 = vmatmul.mubr.bf16.gmra.mxu1 %v2345_v0  ;;  %1392 = vmatprep.mubr.bf16.mxu0 %v2346_v1 }
  0xfb   :  { %1681 = vmatprep.mubr.bf16.mxu1 %v2348_v2 }
 0x101   :  { %v1202_v7 = vpop.f32.mrf.mxu0  ;;  %1393 = vmatmul.mubr.bf16.gmra.mxu0 %v2350_v3 }
 0x102   :  { %v1491_v8 = vpop.f32.mrf.mxu1  ;;  %1682 = vmatmul.mubr.bf16.gmra.mxu1 %v2351_v4  ;;  %1400 = vmatprep.mubr.bf16.mxu0 %v2352_v5  ;;  %v2376_v5 = vld [vmem:[%s3115_s0 + $0x3a0] ss:$16 sps:$4 sm:$0xff]  }
 0x103   :  { %v1492_v9 = vadd.f32 %v1491_v8, %v1202_v7  ;;  %v1204_v10 = vpop.f32.mrf.mxu0  ;;  %1689 = vmatprep.mubr.bf16.mxu1 %v2354_v6  ;;  %v2379_v7 = vld [vmem:[%s3115_s0 + $0x3a8] ss:$16 sps:$4 sm:$0xff]   ;;  %v2384_v8 = vld [vmem:[%s3115_s0 + $0x3c4] ss:$16 sps:$4 sm:$0xff]  }
 0x104   :  { %v1493_v11 = vpop.f32.mrf.mxu1 }
 0x105   :  { %1941 = vst [vmem:[%s3116_s2] sm:$0xff] %v1492_v9  ;;  %v1205_v12 = vpop.f32.mrf.mxu0  ;;  %v2387_v11 = vld [vmem:[%s3115_s0 + $0x3cc] ss:$16 sps:$4 sm:$0xff]  }
 0x106   :  { %v1494_v14 = vpop.f32.mrf.mxu1 }
 0x107   :  { %v1495_v17 = vadd.f32 %v1494_v14, %v1205_v12  ;;  %v1207_v18 = vpop.f32.mrf.mxu0 }
 0x108   :  { %v1496_v20 = vpop.f32.mrf.mxu1 }
 0x109   :  { %1942 = vst [vmem:[%s3116_s2 + $0x8] sm:$0xff] %v1495_v17  ;;  %v1210_v21 = vpop.f32.mrf.mxu0  ;;  %1401 = vmatmul.mubr.bf16.gmra.mxu0 %v2356_v13 }
 0x10a   :  { %v1499_v22 = vpop.f32.mrf.mxu1  ;;  %1690 = vmatmul.mubr.bf16.gmra.mxu1 %v2357_v15  ;;  %1408 = vmatprep.mubr.bf16.mxu0 %v2358_v16 }
 0x10b   :  { %v1500_v23 = vadd.f32 %v1499_v22, %v1210_v21  ;;  %v1212_v24 = vpop.f32.mrf.mxu0  ;;  %1697 = vmatprep.mubr.bf16.mxu1 %v2360_v19  ;;  %v2382_v19 = vld [vmem:[%s3115_s0 + $0x3c0] ss:$16 sps:$4 sm:$0xff]   ;;  %v2385_v21 = vld [vmem:[%s3115_s0 + $0x3c8] ss:$16 sps:$4 sm:$0xff]   ;;  %v2390_v22 = vld [vmem:[%s3115_s0 + $0x3e4] ss:$16 sps:$4 sm:$0xff]  }
 0x10c   :  { %v1501_v25 = vpop.f32.mrf.mxu1 }
 0x10d   :  { %1943 = vst [vmem:[%s3116_s2 + $0x10] sm:$0xff] %v1500_v23  ;;  %v1213_v26 = vpop.f32.mrf.mxu0  ;;  %v2393_v25 = vld [vmem:[%s3115_s0 + $0x3ec] ss:$16 sps:$4 sm:$0xff]  }
 0x10e   :  { %v1502_v28 = vpop.f32.mrf.mxu1 }
 0x10f   :  { %v1503_v31 = vadd.f32 %v1502_v28, %v1213_v26  ;;  %v1215_v32 = vpop.f32.mrf.mxu0 }
 0x110   :  { %v1504_v34 = vpop.f32.mrf.mxu1 }
 0x111   :  { %1944 = vst [vmem:[%s3116_s2 + $0x18] sm:$0xff] %v1503_v31  ;;  %v1218_v35 = vpop.f32.mrf.mxu0  ;;  %1409 = vmatmul.mubr.bf16.gmra.mxu0 %v2362_v27 }
 0x112   :  { %v1507_v36 = vpop.f32.mrf.mxu1  ;;  %1698 = vmatmul.mubr.bf16.gmra.mxu1 %v2363_v29  ;;  %1416 = vmatprep.mubr.bf16.mxu0 %v2364_v30 }
 0x113   :  { %v1508_v37 = vadd.f32 %v1507_v36, %v1218_v35  ;;  %v1220_v38 = vpop.f32.mrf.mxu0  ;;  %1705 = vmatprep.mubr.bf16.mxu1 %v2366_v33  ;;  %v2388_v33 = vld [vmem:[%s3115_s0 + $0x3e0] ss:$16 sps:$4 sm:$0xff]   ;;  %v2391_v35 = vld [vmem:[%s3115_s0 + $0x3e8] ss:$16 sps:$4 sm:$0xff]  }
 0x114   :  { %v1509_v39 = vpop.f32.mrf.mxu1 }
 0x115   :  { %1945 = vst [vmem:[%s3116_s2 + $0x20] sm:$0xff] %v1508_v37  ;;  %v1221_v40 = vpop.f32.mrf.mxu0 }
 0x116   :  { %v1510_v42 = vpop.f32.mrf.mxu1 }
 0x117   :  { %v1511_v45 = vadd.f32 %v1510_v42, %v1221_v40  ;;  %v1223_v46 = vpop.f32.mrf.mxu0 }
 0x118   :  { %v1512_v48 = vpop.f32.mrf.mxu1 }
 0x119   :  { %1946 = vst [vmem:[%s3116_s2 + $0x28] sm:$0xff] %v1511_v45  ;;  %v1226_v49 = vpop.f32.mrf.mxu0  ;;  %1417 = vmatmul.mubr.bf16.gmra.mxu0 %v2368_v41 }
 0x11a   :  { %v1515_v50 = vpop.f32.mrf.mxu1  ;;  %1706 = vmatmul.mubr.bf16.gmra.mxu1 %v2369_v43  ;;  %1424 = vmatprep.mubr.bf16.mxu0 %v2372_v44 }
 0x11b   :  { %v1516_v51 = vadd.f32 %v1515_v50, %v1226_v49  ;;  %v1228_v52 = vpop.f32.mrf.mxu0  ;;  %1713 = vmatprep.mubr.bf16.mxu1 %v2375_v47 }
 0x11c   :  { %v1517_v53 = vpop.f32.mrf.mxu1 }
 0x11d   :  { %1947 = vst [vmem:[%s3116_s2 + $0x30] sm:$0xff] %v1516_v51  ;;  %v1229_v54 = vpop.f32.mrf.mxu0 }
 0x11e   :  { %v1518_v56 = vpop.f32.mrf.mxu1 }
 0x11f   :  { %v1519_v59 = vadd.f32 %v1518_v56, %v1229_v54  ;;  %v1231_v60 = vpop.f32.mrf.mxu0 }
 0x120   :  { %v1520_v62 = vpop.f32.mrf.mxu1 }
 0x121   :  { %1948 = vst [vmem:[%s3116_s2 + $0x38] sm:$0xff] %v1519_v59  ;;  %v1234_v63 = vpop.f32.mrf.mxu0  ;;  %1425 = vmatmul.mubr.bf16.gmra.mxu0 %v2370_v55 }
 0x122   :  { %v1523_v0 = vpop.f32.mrf.mxu1  ;;  %1714 = vmatmul.mubr.bf16.gmra.mxu1 %v2373_v57  ;;  %1432 = vmatprep.mubr.bf16.mxu0 %v2378_v58 }
 0x123   :  { %v1524_v1 = vadd.f32 %v1523_v0, %v1234_v63  ;;  %v1236_v2 = vpop.f32.mrf.mxu0  ;;  %1721 = vmatprep.mubr.bf16.mxu1 %v2381_v61 }
 0x124   :  { %v1525_v3 = vpop.f32.mrf.mxu1 }
 0x125   :  { %1949 = vst [vmem:[%s3116_s2 + $0x40] sm:$0xff] %v1524_v1  ;;  %v1237_v4 = vpop.f32.mrf.mxu0 }
 0x126   :  { %v1526_v6 = vpop.f32.mrf.mxu1 }
 0x127   :  { %v1527_v9 = vadd.f32 %v1526_v6, %v1237_v4  ;;  %v1239_v10 = vpop.f32.mrf.mxu0 }
 0x128   :  { %v1528_v12 = vpop.f32.mrf.mxu1 }
 0x129   :  { %1950 = vst [vmem:[%s3116_s2 + $0x48] sm:$0xff] %v1527_v9  ;;  %v1242_v13 = vpop.f32.mrf.mxu0  ;;  %1433 = vmatmul.mubr.bf16.gmra.mxu0 %v2376_v5 }
 0x12a   :  { %v1531_v14 = vpop.f32.mrf.mxu1  ;;  %1722 = vmatmul.mubr.bf16.gmra.mxu1 %v2379_v7  ;;  %1440 = vmatprep.mubr.bf16.mxu0 %v2384_v8 }
 0x12b   :  { %v1532_v15 = vadd.f32 %v1531_v14, %v1242_v13  ;;  %v1244_v16 = vpop.f32.mrf.mxu0  ;;  %1729 = vmatprep.mubr.bf16.mxu1 %v2387_v11 }
 0x12c   :  { %v1533_v17 = vpop.f32.mrf.mxu1 }
 0x12d   :  { %1951 = vst [vmem:[%s3116_s2 + $0x50] sm:$0xff] %v1532_v15  ;;  %v1245_v18 = vpop.f32.mrf.mxu0 }
 0x12e   :  { %v1534_v20 = vpop.f32.mrf.mxu1 }
 0x12f   :  { %v1535_v23 = vadd.f32 %v1534_v20, %v1245_v18  ;;  %v1247_v24 = vpop.f32.mrf.mxu0 }
 0x130   :  { %v1536_v26 = vpop.f32.mrf.mxu1 }
 0x131   :  { %1952 = vst [vmem:[%s3116_s2 + $0x58] sm:$0xff] %v1535_v23  ;;  %v1250_v27 = vpop.f32.mrf.mxu0  ;;  %1441 = vmatmul.mubr.bf16.gmra.mxu0 %v2382_v19 }
 0x132   :  { %v1539_v28 = vpop.f32.mrf.mxu1  ;;  %1730 = vmatmul.mubr.bf16.gmra.mxu1 %v2385_v21  ;;  %1448 = vmatprep.mubr.bf16.mxu0 %v2390_v22 }
 0x133   :  { %v1540_v29 = vadd.f32 %v1539_v28, %v1250_v27  ;;  %v1252_v30 = vpop.f32.mrf.mxu0  ;;  %1737 = vmatprep.mubr.bf16.mxu1 %v2393_v25 }
 0x134   :  { %v1541_v31 = vpop.f32.mrf.mxu1 }
 0x135   :  { %1953 = vst [vmem:[%s3116_s2 + $0x60] sm:$0xff] %v1540_v29  ;;  %v1253_v32 = vpop.f32.mrf.mxu0 }
 0x136   :  { %v1542_v34 = vpop.f32.mrf.mxu1 }
 0x137   :  { %v1543_v36 = vadd.f32 %v1542_v34, %v1253_v32  ;;  %v1255_v37 = vpop.f32.mrf.mxu0 }
 0x138   :  { %v1544_v38 = vpop.f32.mrf.mxu1 }
 0x139   :  { %1954 = vst [vmem:[%s3116_s2 + $0x68] sm:$0xff] %v1543_v36  ;;  %v1258_v39 = vpop.f32.mrf.mxu0  ;;  %1449 = vmatmul.mubr.bf16.gmra.mxu0 %v2388_v33 }
 0x13a   :  { %v1547_v40 = vpop.f32.mrf.mxu1  ;;  %1738 = vmatmul.mubr.bf16.gmra.mxu1 %v2391_v35 }
 0x13b   :  { %v1548_v41 = vadd.f32 %v1547_v40, %v1258_v39  ;;  %v1260_v42 = vpop.f32.mrf.mxu0 }
 0x13c   :  { %v1549_v43 = vpop.f32.mrf.mxu1 }
 0x13d   :  { %1955 = vst [vmem:[%s3116_s2 + $0x70] sm:$0xff] %v1548_v41  ;;  %v1261_v44 = vpop.f32.mrf.mxu0 }
 0x13e   :  { %v1550_v45 = vpop.f32.mrf.mxu1 }
 0x13f   :  { %v1551_v46 = vadd.f32 %v1550_v45, %v1261_v44  ;;  %v1263_v47 = vpop.f32.mrf.mxu0 }
 0x140   :  { %v1552_v48 = vpop.f32.mrf.mxu1 }
 0x141   :  { %1956 = vst [vmem:[%s3116_s2 + $0x78] sm:$0xff] %v1551_v46  ;;  %v1266_v49 = vpop.f32.mrf.mxu0 }
 0x142   :  { %v1555_v50 = vpop.f32.mrf.mxu1 }
 0x143   :  { %v1556_v51 = vadd.f32 %v1555_v50, %v1266_v49  ;;  %v1268_v52 = vpop.f32.mrf.mxu0 }
 0x144   :  { %v1557_v53 = vpop.f32.mrf.mxu1 }
 0x145   :  { %1957 = vst [vmem:[%s3116_s2 + $0x80] sm:$0xff] %v1556_v51  ;;  %v1269_v54 = vpop.f32.mrf.mxu0 }
 0x146   :  { %v1558_v55 = vpop.f32.mrf.mxu1 }
 0x147   :  { %v1559_v56 = vadd.f32 %v1558_v55, %v1269_v54  ;;  %v1271_v57 = vpop.f32.mrf.mxu0 }
 0x148   :  { %v1560_v58 = vpop.f32.mrf.mxu1 }
 0x149   :  { %1958 = vst [vmem:[%s3116_s2 + $0x88] sm:$0xff] %v1559_v56  ;;  %v1274_v59 = vpop.f32.mrf.mxu0 }
 0x14a   :  { %v1563_v60 = vpop.f32.mrf.mxu1 }
 0x14b   :  { %v1564_v61 = vadd.f32 %v1563_v60, %v1274_v59  ;;  %v1276_v62 = vpop.f32.mrf.mxu0 }
 0x14c   :  { %v1565_v63 = vpop.f32.mrf.mxu1 }
 0x14d   :  { %1959 = vst [vmem:[%s3116_s2 + $0x90] sm:$0xff] %v1564_v61  ;;  %v1277_v0 = vpop.f32.mrf.mxu0 }
 0x14e   :  { %v1566_v1 = vpop.f32.mrf.mxu1 }
 0x14f   :  { %v1567_v2 = vadd.f32 %v1566_v1, %v1277_v0  ;;  %v1279_v3 = vpop.f32.mrf.mxu0 }
 0x150   :  { %v1568_v4 = vpop.f32.mrf.mxu1 }
 0x151   :  { %1960 = vst [vmem:[%s3116_s2 + $0x98] sm:$0xff] %v1567_v2  ;;  %v1282_v5 = vpop.f32.mrf.mxu0 }
 0x152   :  { %v1571_v6 = vpop.f32.mrf.mxu1 }
 0x153   :  { %v1572_v7 = vadd.f32 %v1571_v6, %v1282_v5  ;;  %v1284_v8 = vpop.f32.mrf.mxu0 }
 0x154   :  { %v1573_v9 = vpop.f32.mrf.mxu1 }
 0x155   :  { %1961 = vst [vmem:[%s3116_s2 + $0xa0] sm:$0xff] %v1572_v7  ;;  %v1285_v10 = vpop.f32.mrf.mxu0 }
 0x156   :  { %v1574_v11 = vpop.f32.mrf.mxu1 }
 0x157   :  { %v1575_v12 = vadd.f32 %v1574_v11, %v1285_v10  ;;  %v1287_v13 = vpop.f32.mrf.mxu0 }
 0x158   :  { %v1576_v14 = vpop.f32.mrf.mxu1 }
 0x159   :  { %1962 = vst [vmem:[%s3116_s2 + $0xa8] sm:$0xff] %v1575_v12  ;;  %v1290_v15 = vpop.f32.mrf.mxu0 }
 0x15a   :  { %v1579_v16 = vpop.f32.mrf.mxu1 }
 0x15b   :  { %v1580_v17 = vadd.f32 %v1579_v16, %v1290_v15  ;;  %v1292_v18 = vpop.f32.mrf.mxu0 }
 0x15c   :  { %v1581_v19 = vpop.f32.mrf.mxu1 }
 0x15d   :  { %1963 = vst [vmem:[%s3116_s2 + $0xb0] sm:$0xff] %v1580_v17  ;;  %v1293_v20 = vpop.f32.mrf.mxu0 }
 0x15e   :  { %v1582_v21 = vpop.f32.mrf.mxu1 }
 0x15f   :  { %v1583_v22 = vadd.f32 %v1582_v21, %v1293_v20  ;;  %v1295_v23 = vpop.f32.mrf.mxu0 }
 0x160   :  { %v1584_v24 = vpop.f32.mrf.mxu1 }
 0x161   :  { %1964 = vst [vmem:[%s3116_s2 + $0xb8] sm:$0xff] %v1583_v22  ;;  %v1298_v25 = vpop.f32.mrf.mxu0 }
 0x162   :  { %v1587_v26 = vpop.f32.mrf.mxu1 }
 0x163   :  { %v1588_v27 = vadd.f32 %v1587_v26, %v1298_v25  ;;  %v1300_v28 = vpop.f32.mrf.mxu0 }
 0x164   :  { %v1589_v29 = vpop.f32.mrf.mxu1 }
 0x165   :  { %1965 = vst [vmem:[%s3116_s2 + $0xc0] sm:$0xff] %v1588_v27  ;;  %v1301_v30 = vpop.f32.mrf.mxu0 }
 0x166   :  { %v1590_v31 = vpop.f32.mrf.mxu1 }
 0x167   :  { %v1591_v32 = vadd.f32 %v1590_v31, %v1301_v30  ;;  %v1303_v33 = vpop.f32.mrf.mxu0 }
 0x168   :  { %v1592_v34 = vpop.f32.mrf.mxu1 }
 0x169   :  { %1966 = vst [vmem:[%s3116_s2 + $0xc8] sm:$0xff] %v1591_v32  ;;  %v1306_v35 = vpop.f32.mrf.mxu0 }
 0x16a   :  { %v1595_v36 = vpop.f32.mrf.mxu1 }
 0x16b   :  { %v1596_v37 = vadd.f32 %v1595_v36, %v1306_v35  ;;  %v1308_v38 = vpop.f32.mrf.mxu0 }
 0x16c   :  { %v1597_v39 = vpop.f32.mrf.mxu1 }
 0x16d   :  { %1967 = vst [vmem:[%s3116_s2 + $0xd0] sm:$0xff] %v1596_v37  ;;  %v1309_v40 = vpop.f32.mrf.mxu0 }
 0x16e   :  { %v1598_v41 = vpop.f32.mrf.mxu1 }
 0x16f   :  { %v1599_v42 = vadd.f32 %v1598_v41, %v1309_v40  ;;  %v1311_v43 = vpop.f32.mrf.mxu0 }
 0x170   :  { %v1600_v44 = vpop.f32.mrf.mxu1 }
 0x171   :  { %1968 = vst [vmem:[%s3116_s2 + $0xd8] sm:$0xff] %v1599_v42  ;;  %v1314_v45 = vpop.f32.mrf.mxu0 }
 0x172   :  { %v1603_v46 = vpop.f32.mrf.mxu1 }
 0x173   :  { %v1604_v47 = vadd.f32 %v1603_v46, %v1314_v45  ;;  %v1316_v48 = vpop.f32.mrf.mxu0 }
 0x174   :  { %v1605_v49 = vpop.f32.mrf.mxu1 }
 0x175   :  { %1969 = vst [vmem:[%s3116_s2 + $0xe0] sm:$0xff] %v1604_v47  ;;  %v1317_v50 = vpop.f32.mrf.mxu0 }
 0x176   :  { %v1606_v51 = vpop.f32.mrf.mxu1 }
 0x177   :  { %v1607_v52 = vadd.f32 %v1606_v51, %v1317_v50  ;;  %v1319_v53 = vpop.f32.mrf.mxu0 }
 0x178   :  { %v1608_v54 = vpop.f32.mrf.mxu1 }
 0x179   :  { %1970 = vst [vmem:[%s3116_s2 + $0xe8] sm:$0xff] %v1607_v52  ;;  %v1322_v55 = vpop.f32.mrf.mxu0 }
 0x17a   :  { %v1611_v56 = vpop.f32.mrf.mxu1 }
 0x17b   :  { %v1612_v57 = vadd.f32 %v1611_v56, %v1322_v55  ;;  %v1324_v58 = vpop.f32.mrf.mxu0 }
 0x17c   :  { %v1613_v59 = vpop.f32.mrf.mxu1 }
 0x17d   :  { %1971 = vst [vmem:[%s3116_s2 + $0xf0] sm:$0xff] %v1612_v57  ;;  %v1325_v60 = vpop.f32.mrf.mxu0 }
 0x17e   :  { %v1614_v61 = vpop.f32.mrf.mxu1 }
 0x17f   :  { %v1615_v62 = vadd.f32 %v1614_v61, %v1325_v60  ;;  %v1327_v63 = vpop.f32.mrf.mxu0 }
 0x180   :  { %v1616_v0 = vpop.f32.mrf.mxu1 }
 0x181   :  { %1972 = vst [vmem:[%s3116_s2 + $0xf8] sm:$0xff] %v1615_v62  ;;  %v1330_v1 = vpop.f32.mrf.mxu0 }
 0x182   :  { %v1619_v2 = vpop.f32.mrf.mxu1 }
 0x183   :  { %v1620_v3 = vadd.f32 %v1619_v2, %v1330_v1  ;;  %v1332_v4 = vpop.f32.mrf.mxu0 }
 0x184   :  { %v1621_v5 = vpop.f32.mrf.mxu1 }
 0x185   :  { %1973 = vst [vmem:[%s3116_s2 + $0x100] sm:$0xff] %v1620_v3  ;;  %v1333_v6 = vpop.f32.mrf.mxu0 }
 0x186   :  { %v1622_v7 = vpop.f32.mrf.mxu1 }
 0x187   :  { %v1623_v8 = vadd.f32 %v1622_v7, %v1333_v6  ;;  %v1335_v9 = vpop.f32.mrf.mxu0 }
 0x188   :  { %v1624_v10 = vpop.f32.mrf.mxu1 }
 0x189   :  { %1974 = vst [vmem:[%s3116_s2 + $0x108] sm:$0xff] %v1623_v8  ;;  %v1338_v11 = vpop.f32.mrf.mxu0 }
 0x18a   :  { %v1627_v12 = vpop.f32.mrf.mxu1 }
 0x18b   :  { %v1628_v13 = vadd.f32 %v1627_v12, %v1338_v11  ;;  %v1340_v14 = vpop.f32.mrf.mxu0 }
 0x18c   :  { %v1629_v15 = vpop.f32.mrf.mxu1 }
 0x18d   :  { %1975 = vst [vmem:[%s3116_s2 + $0x110] sm:$0xff] %v1628_v13  ;;  %v1341_v16 = vpop.f32.mrf.mxu0 }
 0x18e   :  { %v1630_v17 = vpop.f32.mrf.mxu1 }
 0x18f   :  { %v1631_v18 = vadd.f32 %v1630_v17, %v1341_v16  ;;  %v1343_v19 = vpop.f32.mrf.mxu0 }
 0x190   :  { %v1632_v20 = vpop.f32.mrf.mxu1 }
 0x191   :  { %1976 = vst [vmem:[%s3116_s2 + $0x118] sm:$0xff] %v1631_v18  ;;  %v1346_v21 = vpop.f32.mrf.mxu0 }
 0x192   :  { %v1635_v22 = vpop.f32.mrf.mxu1 }
 0x193   :  { %v1636_v23 = vadd.f32 %v1635_v22, %v1346_v21  ;;  %v1348_v24 = vpop.f32.mrf.mxu0 }
 0x194   :  { %v1637_v25 = vpop.f32.mrf.mxu1 }
 0x195   :  { %1977 = vst [vmem:[%s3116_s2 + $0x120] sm:$0xff] %v1636_v23  ;;  %v1349_v26 = vpop.f32.mrf.mxu0 }
 0x196   :  { %v1638_v27 = vpop.f32.mrf.mxu1 }
 0x197   :  { %v1639_v28 = vadd.f32 %v1638_v27, %v1349_v26  ;;  %v1351_v29 = vpop.f32.mrf.mxu0 }
 0x198   :  { %v1640_v30 = vpop.f32.mrf.mxu1 }
 0x199   :  { %1978 = vst [vmem:[%s3116_s2 + $0x128] sm:$0xff] %v1639_v28  ;;  %v1354_v31 = vpop.f32.mrf.mxu0 }
 0x19a   :  { %v1643_v32 = vpop.f32.mrf.mxu1 }
 0x19b   :  { %v1644_v33 = vadd.f32 %v1643_v32, %v1354_v31  ;;  %v1356_v34 = vpop.f32.mrf.mxu0 }
 0x19c   :  { %v1645_v35 = vpop.f32.mrf.mxu1 }
 0x19d   :  { %1979 = vst [vmem:[%s3116_s2 + $0x130] sm:$0xff] %v1644_v33  ;;  %v1357_v36 = vpop.f32.mrf.mxu0 }
 0x19e   :  { %v1646_v37 = vpop.f32.mrf.mxu1 }
 0x19f   :  { %v1647_v38 = vadd.f32 %v1646_v37, %v1357_v36  ;;  %v1359_v39 = vpop.f32.mrf.mxu0 }
 0x1a0   :  { %v1648_v40 = vpop.f32.mrf.mxu1 }
 0x1a1   :  { %1980 = vst [vmem:[%s3116_s2 + $0x138] sm:$0xff] %v1647_v38  ;;  %v1362_v41 = vpop.f32.mrf.mxu0 }
 0x1a2   :  { %v1651_v42 = vpop.f32.mrf.mxu1 }
 0x1a3   :  { %v1652_v43 = vadd.f32 %v1651_v42, %v1362_v41  ;;  %v1364_v44 = vpop.f32.mrf.mxu0 }
 0x1a4   :  { %v1653_v45 = vpop.f32.mrf.mxu1 }
 0x1a5   :  { %1981 = vst [vmem:[%s3116_s2 + $0x140] sm:$0xff] %v1652_v43  ;;  %v1365_v46 = vpop.f32.mrf.mxu0 }
 0x1a6   :  { %v1654_v47 = vpop.f32.mrf.mxu1 }
 0x1a7   :  { %v1655_v48 = vadd.f32 %v1654_v47, %v1365_v46  ;;  %v1367_v49 = vpop.f32.mrf.mxu0 }
 0x1a8   :  { %v1656_v50 = vpop.f32.mrf.mxu1 }
 0x1a9   :  { %1982 = vst [vmem:[%s3116_s2 + $0x148] sm:$0xff] %v1655_v48  ;;  %v1370_v51 = vpop.f32.mrf.mxu0 }
 0x1aa   :  { %v1659_v52 = vpop.f32.mrf.mxu1 }
 0x1ab   :  { %v1660_v53 = vadd.f32 %v1659_v52, %v1370_v51  ;;  %v1372_v54 = vpop.f32.mrf.mxu0 }
 0x1ac   :  { %v1661_v55 = vpop.f32.mrf.mxu1 }
 0x1ad   :  { %1983 = vst [vmem:[%s3116_s2 + $0x150] sm:$0xff] %v1660_v53  ;;  %v1373_v56 = vpop.f32.mrf.mxu0 }
 0x1ae   :  { %v1662_v57 = vpop.f32.mrf.mxu1 }
 0x1af   :  { %v1663_v58 = vadd.f32 %v1662_v57, %v1373_v56  ;;  %v1375_v59 = vpop.f32.mrf.mxu0 }
 0x1b0   :  { %v1664_v60 = vpop.f32.mrf.mxu1 }
 0x1b1   :  { %1984 = vst [vmem:[%s3116_s2 + $0x158] sm:$0xff] %v1663_v58  ;;  %v1378_v61 = vpop.f32.mrf.mxu0 }
 0x1b2   :  { %v1667_v62 = vpop.f32.mrf.mxu1 }
 0x1b3   :  { %v1668_v63 = vadd.f32 %v1667_v62, %v1378_v61  ;;  %v1380_v0 = vpop.f32.mrf.mxu0 }
 0x1b4   :  { %v1669_v1 = vpop.f32.mrf.mxu1 }
 0x1b5   :  { %1985 = vst [vmem:[%s3116_s2 + $0x160] sm:$0xff] %v1668_v63  ;;  %v1381_v2 = vpop.f32.mrf.mxu0 }
 0x1b6   :  { %v1670_v3 = vpop.f32.mrf.mxu1 }
 0x1b7   :  { %v1671_v4 = vadd.f32 %v1670_v3, %v1381_v2  ;;  %v1383_v5 = vpop.f32.mrf.mxu0 }
 0x1b8   :  { %v1672_v6 = vpop.f32.mrf.mxu1 }
 0x1b9   :  { %1986 = vst [vmem:[%s3116_s2 + $0x168] sm:$0xff] %v1671_v4  ;;  %v1386_v7 = vpop.f32.mrf.mxu0 }
 0x1ba   :  { %v1675_v8 = vpop.f32.mrf.mxu1 }
 0x1bb   :  { %v1676_v9 = vadd.f32 %v1675_v8, %v1386_v7  ;;  %v1388_v10 = vpop.f32.mrf.mxu0 }
 0x1bc   :  { %v1677_v11 = vpop.f32.mrf.mxu1 }
 0x1bd   :  { %1987 = vst [vmem:[%s3116_s2 + $0x170] sm:$0xff] %v1676_v9  ;;  %v1389_v12 = vpop.f32.mrf.mxu0 }
 0x1be   :  { %v1678_v13 = vpop.f32.mrf.mxu1 }
 0x1bf   :  { %v1679_v14 = vadd.f32 %v1678_v13, %v1389_v12  ;;  %v1391_v15 = vpop.f32.mrf.mxu0 }
 0x1c0   :  { %v1680_v16 = vpop.f32.mrf.mxu1 }
 0x1c1   :  { %1988 = vst [vmem:[%s3116_s2 + $0x178] sm:$0xff] %v1679_v14  ;;  %v1394_v17 = vpop.f32.mrf.mxu0 }
 0x1c2   :  { %v1683_v18 = vpop.f32.mrf.mxu1 }
 0x1c3   :  { %v1684_v19 = vadd.f32 %v1683_v18, %v1394_v17  ;;  %v1396_v20 = vpop.f32.mrf.mxu0 }
 0x1c4   :  { %v1685_v21 = vpop.f32.mrf.mxu1 }
 0x1c5   :  { %1989 = vst [vmem:[%s3116_s2 + $0x180] sm:$0xff] %v1684_v19  ;;  %v1397_v22 = vpop.f32.mrf.mxu0 }
 0x1c6   :  { %v1686_v23 = vpop.f32.mrf.mxu1 }
 0x1c7   :  { %v1687_v24 = vadd.f32 %v1686_v23, %v1397_v22  ;;  %v1399_v25 = vpop.f32.mrf.mxu0 }
 0x1c8   :  { %v1688_v26 = vpop.f32.mrf.mxu1 }
 0x1c9   :  { %1990 = vst [vmem:[%s3116_s2 + $0x188] sm:$0xff] %v1687_v24  ;;  %v1402_v27 = vpop.f32.mrf.mxu0 }
 0x1ca   :  { %v1691_v28 = vpop.f32.mrf.mxu1 }
 0x1cb   :  { %v1692_v29 = vadd.f32 %v1691_v28, %v1402_v27  ;;  %v1404_v30 = vpop.f32.mrf.mxu0 }
 0x1cc   :  { %v1693_v31 = vpop.f32.mrf.mxu1 }
 0x1cd   :  { %1991 = vst [vmem:[%s3116_s2 + $0x190] sm:$0xff] %v1692_v29  ;;  %v1405_v32 = vpop.f32.mrf.mxu0 }
 0x1ce   :  { %v1694_v33 = vpop.f32.mrf.mxu1 }
 0x1cf   :  { %v1695_v34 = vadd.f32 %v1694_v33, %v1405_v32  ;;  %v1407_v35 = vpop.f32.mrf.mxu0 }
 0x1d0   :  { %v1696_v36 = vpop.f32.mrf.mxu1 }
 0x1d1   :  { %1992 = vst [vmem:[%s3116_s2 + $0x198] sm:$0xff] %v1695_v34  ;;  %v1410_v37 = vpop.f32.mrf.mxu0 }
 0x1d2   :  { %v1699_v38 = vpop.f32.mrf.mxu1 }
 0x1d3   :  { %v1700_v39 = vadd.f32 %v1699_v38, %v1410_v37  ;;  %v1412_v40 = vpop.f32.mrf.mxu0 }
 0x1d4   :  { %v1701_v41 = vpop.f32.mrf.mxu1 }
 0x1d5   :  { %1993 = vst [vmem:[%s3116_s2 + $0x1a0] sm:$0xff] %v1700_v39  ;;  %v1413_v42 = vpop.f32.mrf.mxu0 }
 0x1d6   :  { %v1702_v43 = vpop.f32.mrf.mxu1 }
 0x1d7   :  { %v1703_v44 = vadd.f32 %v1702_v43, %v1413_v42  ;;  %v1415_v45 = vpop.f32.mrf.mxu0 }
 0x1d8   :  { %v1704_v46 = vpop.f32.mrf.mxu1 }
 0x1d9   :  { %1994 = vst [vmem:[%s3116_s2 + $0x1a8] sm:$0xff] %v1703_v44  ;;  %v1418_v47 = vpop.f32.mrf.mxu0 }
 0x1da   :  { %v1707_v48 = vpop.f32.mrf.mxu1 }
 0x1db   :  { %v1708_v49 = vadd.f32 %v1707_v48, %v1418_v47  ;;  %v1420_v50 = vpop.f32.mrf.mxu0 }
 0x1dc   :  { %v1709_v51 = vpop.f32.mrf.mxu1 }
 0x1dd   :  { %1995 = vst [vmem:[%s3116_s2 + $0x1b0] sm:$0xff] %v1708_v49  ;;  %v1421_v52 = vpop.f32.mrf.mxu0 }
 0x1de   :  { %v1710_v53 = vpop.f32.mrf.mxu1 }
 0x1df   :  { %v1711_v54 = vadd.f32 %v1710_v53, %v1421_v52  ;;  %v1423_v55 = vpop.f32.mrf.mxu0 }
 0x1e0   :  { %v1712_v56 = vpop.f32.mrf.mxu1 }
 0x1e1   :  { %1996 = vst [vmem:[%s3116_s2 + $0x1b8] sm:$0xff] %v1711_v54  ;;  %v1426_v57 = vpop.f32.mrf.mxu0 }
 0x1e2   :  { %v1715_v58 = vpop.f32.mrf.mxu1 }
 0x1e3   :  { %v1716_v59 = vadd.f32 %v1715_v58, %v1426_v57  ;;  %v1428_v60 = vpop.f32.mrf.mxu0 }
 0x1e4   :  { %v1717_v61 = vpop.f32.mrf.mxu1 }
 0x1e5   :  { %1997 = vst [vmem:[%s3116_s2 + $0x1c0] sm:$0xff] %v1716_v59  ;;  %v1429_v62 = vpop.f32.mrf.mxu0 }
 0x1e6   :  { %v1718_v63 = vpop.f32.mrf.mxu1 }
 0x1e7   :  { %v1719_v0 = vadd.f32 %v1718_v63, %v1429_v62  ;;  %v1431_v1 = vpop.f32.mrf.mxu0 }
 0x1e8   :  { %v1720_v2 = vpop.f32.mrf.mxu1 }
 0x1e9   :  { %1998 = vst [vmem:[%s3116_s2 + $0x1c8] sm:$0xff] %v1719_v0  ;;  %v1434_v3 = vpop.f32.mrf.mxu0 }
 0x1ea   :  { %v1723_v4 = vpop.f32.mrf.mxu1 }
 0x1eb   :  { %v1724_v5 = vadd.f32 %v1723_v4, %v1434_v3  ;;  %v1436_v6 = vpop.f32.mrf.mxu0 }
 0x1ec   :  { %v1725_v7 = vpop.f32.mrf.mxu1 }
 0x1ed   :  { %1999 = vst [vmem:[%s3116_s2 + $0x1d0] sm:$0xff] %v1724_v5  ;;  %v1437_v8 = vpop.f32.mrf.mxu0 }
 0x1ee   :  { %v1726_v9 = vpop.f32.mrf.mxu1 }
 0x1ef   :  { %v1727_v10 = vadd.f32 %v1726_v9, %v1437_v8  ;;  %v1439_v11 = vpop.f32.mrf.mxu0 }
 0x1f0   :  { %v1728_v12 = vpop.f32.mrf.mxu1 }
 0x1f1   :  { %2000 = vst [vmem:[%s3116_s2 + $0x1d8] sm:$0xff] %v1727_v10  ;;  %v1442_v13 = vpop.f32.mrf.mxu0 }
 0x1f2   :  { %v1731_v14 = vpop.f32.mrf.mxu1 }
 0x1f3   :  { %v1732_v15 = vadd.f32 %v1731_v14, %v1442_v13  ;;  %v1444_v16 = vpop.f32.mrf.mxu0 }
 0x1f4   :  { %v1733_v17 = vpop.f32.mrf.mxu1 }
 0x1f5   :  { %2001 = vst [vmem:[%s3116_s2 + $0x1e0] sm:$0xff] %v1732_v15  ;;  %v1445_v18 = vpop.f32.mrf.mxu0 }
 0x1f6   :  { %v1734_v19 = vpop.f32.mrf.mxu1 }
 0x1f7   :  { %v1735_v20 = vadd.f32 %v1734_v19, %v1445_v18  ;;  %v1447_v21 = vpop.f32.mrf.mxu0 }
 0x1f8   :  { %v1736_v22 = vpop.f32.mrf.mxu1 }
 0x1f9   :  { %2002 = vst [vmem:[%s3116_s2 + $0x1e8] sm:$0xff] %v1735_v20  ;;  %v1450_v23 = vpop.f32.mrf.mxu0 }
 0x1fa   :  { %v1739_v24 = vpop.f32.mrf.mxu1 }
 0x1fb   :  { %v1740_v25 = vadd.f32 %v1739_v24, %v1450_v23  ;;  %v1452_v26 = vpop.f32.mrf.mxu0 }
 0x1fc   :  { %v1741_v27 = vpop.f32.mrf.mxu1 }
 0x1fd   :  { %2003 = vst [vmem:[%s3116_s2 + $0x1f0] sm:$0xff] %v1740_v25  ;;  %v1453_v28 = vpop.f32.mrf.mxu0 }
 0x1fe   :  { %v1742_v29 = vpop.f32.mrf.mxu1 }
 0x1ff   :  { %v1743_v30 = vadd.f32 %v1742_v29, %v1453_v28  ;;  %v1455_v31 = vpop.f32.mrf.mxu0 }
 0x200   :  { %v1744_v32 = vpop.f32.mrf.mxu1 }
 0x201   :  { %2004 = vst [vmem:[%s3116_s2 + $0x1f8] sm:$0xff] %v1743_v30 }

// kernel: forward.38
= control target key start
LH: loop header
LB: loop body
LE: loop exit
PB: predicated region body
PF: predicated region fallthrough
CT: control target
= control target key end

     0   :  { %v169_v0 = vmov 0.0   ;;  %s299_s1 = inlined_call_operand.vmem [shape: f32[1,128], index: 1, kind: output, shape index: {0}]   ;;  %s300_s2 = inlined_call_operand.vmem [shape: f32[1,128], index: 2, kind: output, shape index: {1}]   ;;  %s301_s0 = inlined_call_operand.vmem [shape: f32[256,128], index: 0, kind: input, shape index: {}]  }
   0x1   :  { %14 = vst [vmem:[%s299_s1] sm:$0x1] %v169_v0  ;;  %15 = vst [vmem:[%s300_s2] sm:$0x1] %v169_v0  ;;  %v16_v1 = vld [vmem:[%s301_s0] sm:$0xff]  ;;  %v17_v2 = vld [vmem:[%s301_s0 + $0x8] sm:$0xff] }
   0x2   :  { %v18_v3 = vld [vmem:[%s301_s0 + $0x10] sm:$0xff]  ;;  %v19_v4 = vld [vmem:[%s301_s0 + $0x18] sm:$0xff]  ;;  %v49_v5 = vadd.f32 %v17_v2, %v16_v1  ;;  %v89_v6 = vmul.f32 %v16_v1, %v16_v1  ;;  %v90_v7 = vmul.f32 %v17_v2, %v17_v2  ;;  %v20_v9 = vld [vmem:[%s301_s0 + $0x20] sm:$0xff] }
   0x3   :  { %v91_v8 = vmul.f32 %v18_v3, %v18_v3  ;;  %v92_v11 = vmul.f32 %v19_v4, %v19_v4  ;;  %v21_v13 = vld [vmem:[%s301_s0 + $0x28] sm:$0xff]  ;;  %v93_v15 = vmul.f32 %v20_v9, %v20_v9  ;;  %v22_v17 = vld [vmem:[%s301_s0 + $0x30] sm:$0xff]  ;;  %v23_v21 = vld [vmem:[%s301_s0 + $0x38] sm:$0xff] }
   0x4   :  { %v50_v10 = vadd.f32 %v49_v5, %v18_v3  ;;  %v121_v12 = vadd.f32 %v90_v7, %v89_v6  ;;  %v94_v19 = vmul.f32 %v21_v13, %v21_v13  ;;  %v95_v23 = vmul.f32 %v22_v17, %v22_v17  ;;  %v24_v25 = vld [vmem:[%s301_s0 + $0x40] sm:$0xff]  ;;  %v25_v29 = vld [vmem:[%s301_s0 + $0x48] sm:$0xff]  ;;  %v26_v33 = vld [vmem:[%s301_s0 + $0x50] sm:$0xff] }
   0x5   :  { %v96_v27 = vmul.f32 %v23_v21, %v23_v21  ;;  %v97_v31 = vmul.f32 %v24_v25, %v24_v25  ;;  %v98_v35 = vmul.f32 %v25_v29, %v25_v29  ;;  %v27_v37 = vld [vmem:[%s301_s0 + $0x58] sm:$0xff]  ;;  %v99_v39 = vmul.f32 %v26_v33, %v26_v33  ;;  %v28_v41 = vld [vmem:[%s301_s0 + $0x60] sm:$0xff]  ;;  %v29_v45 = vld [vmem:[%s301_s0 + $0x68] sm:$0xff] }
   0x6   :  { %v51_v14 = vadd.f32 %v50_v10, %v19_v4  ;;  %v122_v16 = vadd.f32 %v121_v12, %v91_v8  ;;  %v100_v43 = vmul.f32 %v27_v37, %v27_v37  ;;  %v101_v47 = vmul.f32 %v28_v41, %v28_v41  ;;  %v30_v49 = vld [vmem:[%s301_s0 + $0x70] sm:$0xff]  ;;  %v31_v53 = vld [vmem:[%s301_s0 + $0x78] sm:$0xff]  ;;  %v32_v57 = vld [vmem:[%s301_s0 + $0x80] sm:$0xff] }
   0x7   :  { %v102_v51 = vmul.f32 %v29_v45, %v29_v45  ;;  %v103_v55 = vmul.f32 %v30_v49, %v30_v49  ;;  %v104_v59 = vmul.f32 %v31_v53, %v31_v53  ;;  %v33_v61 = vld [vmem:[%s301_s0 + $0x88] sm:$0xff]  ;;  %v105_v63 = vmul.f32 %v32_v57, %v32_v57  ;;  %v34_v1 = vld [vmem:[%s301_s0 + $0x90] sm:$0xff]  ;;  %v35_v5 = vld [vmem:[%s301_s0 + $0x98] sm:$0xff] }
   0x8   :  { %v52_v18 = vadd.f32 %v51_v14, %v20_v9  ;;  %v123_v20 = vadd.f32 %v122_v16, %v92_v11  ;;  %v106_v3 = vmul.f32 %v33_v61, %v33_v61  ;;  %v107_v7 = vmul.f32 %v34_v1, %v34_v1  ;;  %v36_v9 = vld [vmem:[%s301_s0 + $0xa0] sm:$0xff] }
   0x9   :  { %v108_v11 = vmul.f32 %v35_v5, %v35_v5 }
   0xa   :  { %v53_v22 = vadd.f32 %v52_v18, %v21_v13  ;;  %v124_v24 = vadd.f32 %v123_v20, %v93_v15  ;;  %v37_v13 = vld [vmem:[%s301_s0 + $0xa8] sm:$0xff]  ;;  %v109_v15 = vmul.f32 %v36_v9, %v36_v9 }
   0xc   :  { %v54_v26 = vadd.f32 %v53_v22, %v22_v17  ;;  %v125_v28 = vadd.f32 %v124_v24, %v94_v19  ;;  %v38_v17 = vld [vmem:[%s301_s0 + $0xb0] sm:$0xff]  ;;  %v110_v19 = vmul.f32 %v37_v13, %v37_v13 }
   0xe   :  { %v55_v30 = vadd.f32 %v54_v26, %v23_v21  ;;  %v126_v32 = vadd.f32 %v125_v28, %v95_v23  ;;  %v39_v21 = vld [vmem:[%s301_s0 + $0xb8] sm:$0xff]  ;;  %v111_v23 = vmul.f32 %v38_v17, %v38_v17 }
  0x10   :  { %v56_v34 = vadd.f32 %v55_v30, %v24_v25  ;;  %v127_v36 = vadd.f32 %v126_v32, %v96_v27  ;;  %v40_v25 = vld [vmem:[%s301_s0 + $0xc0] sm:$0xff]  ;;  %v112_v27 = vmul.f32 %v39_v21, %v39_v21 }
  0x12   :  { %v57_v38 = vadd.f32 %v56_v34, %v25_v29  ;;  %v128_v40 = vadd.f32 %v127_v36, %v97_v31  ;;  %v41_v29 = vld [vmem:[%s301_s0 + $0xc8] sm:$0xff]  ;;  %v113_v31 = vmul.f32 %v40_v25, %v40_v25 }
  0x14   :  { %v58_v42 = vadd.f32 %v57_v38, %v26_v33  ;;  %v129_v44 = vadd.f32 %v128_v40, %v98_v35  ;;  %v42_v33 = vld [vmem:[%s301_s0 + $0xd0] sm:$0xff]  ;;  %v114_v35 = vmul.f32 %v41_v29, %v41_v29 }
  0x16   :  { %v59_v46 = vadd.f32 %v58_v42, %v27_v37  ;;  %v130_v48 = vadd.f32 %v129_v44, %v99_v39  ;;  %v43_v37 = vld [vmem:[%s301_s0 + $0xd8] sm:$0xff]  ;;  %v115_v39 = vmul.f32 %v42_v33, %v42_v33 }
  0x18   :  { %v60_v50 = vadd.f32 %v59_v46, %v28_v41  ;;  %v131_v52 = vadd.f32 %v130_v48, %v100_v43  ;;  %v44_v41 = vld [vmem:[%s301_s0 + $0xe0] sm:$0xff]  ;;  %v116_v43 = vmul.f32 %v43_v37, %v43_v37 }
  0x1a   :  { %v61_v54 = vadd.f32 %v60_v50, %v29_v45  ;;  %v132_v56 = vadd.f32 %v131_v52, %v101_v47  ;;  %v45_v45 = vld [vmem:[%s301_s0 + $0xe8] sm:$0xff]  ;;  %v117_v47 = vmul.f32 %v44_v41, %v44_v41 }
  0x1c   :  { %v62_v58 = vadd.f32 %v61_v54, %v30_v49  ;;  %v133_v60 = vadd.f32 %v132_v56, %v102_v51  ;;  %v46_v49 = vld [vmem:[%s301_s0 + $0xf0] sm:$0xff]  ;;  %v118_v51 = vmul.f32 %v45_v45, %v45_v45 }
  0x1e   :  { %v63_v62 = vadd.f32 %v62_v58, %v31_v53  ;;  %v134_v0 = vadd.f32 %v133_v60, %v103_v55  ;;  %v47_v53 = vld [vmem:[%s301_s0 + $0xf8] sm:$0xff]  ;;  %v119_v55 = vmul.f32 %v46_v49, %v46_v49 }
  0x1f   :  { %v120_v58 = vmul.f32 %v47_v53, %v47_v53 }
  0x20   :  { %v64_v2 = vadd.f32 %v63_v62, %v32_v57  ;;  %v135_v4 = vadd.f32 %v134_v0, %v104_v59 }
  0x22   :  { %v65_v6 = vadd.f32 %v64_v2, %v33_v61  ;;  %v136_v8 = vadd.f32 %v135_v4, %v105_v63 }
  0x24   :  { %v66_v10 = vadd.f32 %v65_v6, %v34_v1  ;;  %v137_v12 = vadd.f32 %v136_v8, %v106_v3 }
  0x26   :  { %v67_v14 = vadd.f32 %v66_v10, %v35_v5  ;;  %v138_v16 = vadd.f32 %v137_v12, %v107_v7  ;;  %v48_v7 = vld [vmem:[%s299_s1] sm:$0x1] }
  0x27   :  { %v88_v12 = vld [vmem:[%s300_s2] sm:$0x1] }
  0x28   :  { %v68_v18 = vadd.f32 %v67_v14, %v36_v9  ;;  %v139_v20 = vadd.f32 %v138_v16, %v108_v11 }
  0x2a   :  { %v69_v22 = vadd.f32 %v68_v18, %v37_v13  ;;  %v140_v24 = vadd.f32 %v139_v20, %v109_v15 }
  0x2c   :  { %v70_v26 = vadd.f32 %v69_v22, %v38_v17  ;;  %v141_v28 = vadd.f32 %v140_v24, %v110_v19 }
  0x2e   :  { %v71_v30 = vadd.f32 %v70_v26, %v39_v21  ;;  %v142_v32 = vadd.f32 %v141_v28, %v111_v23 }
  0x30   :  { %v72_v34 = vadd.f32 %v71_v30, %v40_v25  ;;  %v143_v36 = vadd.f32 %v142_v32, %v112_v27 }
  0x32   :  { %v73_v38 = vadd.f32 %v72_v34, %v41_v29  ;;  %v144_v40 = vadd.f32 %v143_v36, %v113_v31 }
  0x34   :  { %v74_v42 = vadd.f32 %v73_v38, %v42_v33  ;;  %v145_v44 = vadd.f32 %v144_v40, %v114_v35 }
  0x36   :  { %v75_v46 = vadd.f32 %v74_v42, %v43_v37  ;;  %v146_v48 = vadd.f32 %v145_v44, %v115_v39 }
  0x38   :  { %v76_v50 = vadd.f32 %v75_v46, %v44_v41  ;;  %v147_v52 = vadd.f32 %v146_v48, %v116_v43 }
  0x3a   :  { %v77_v54 = vadd.f32 %v76_v50, %v45_v45  ;;  %v148_v56 = vadd.f32 %v147_v52, %v117_v47 }
  0x3c   :  { %v78_v57 = vadd.f32 %v77_v54, %v46_v49  ;;  %v149_v59 = vadd.f32 %v148_v56, %v118_v51 }
  0x3e   :  { %v79_v60 = vadd.f32 %v78_v57, %v47_v53  ;;  %v150_v61 = vadd.f32 %v149_v59, %v119_v55 }
  0x40   :  { %v80_v62 = vrot.slane %v79_v60, 4  ;;  %v151_v63 = vadd.f32 %v150_v61, %v120_v58 }
  0x42   :  { %v81_v0 = vadd.f32 %v80_v62, %v79_v60  ;;  %v152_v1 = vrot.slane %v151_v63, 4 }
  0x44   :  { %v82_v2 = vrot.slane %v81_v0, 2  ;;  %v153_v3 = vadd.f32 %v152_v1, %v151_v63 }
  0x46   :  { %v83_v4 = vadd.f32 %v82_v2, %v81_v0  ;;  %v154_v5 = vrot.slane %v153_v3, 2 }
  0x48   :  { %v84_v6 = vrot.slane %v83_v4, 1  ;;  %v155_v8 = vadd.f32 %v154_v5, %v153_v3 }
  0x4a   :  { %v85_v9 = vadd.f32 %v84_v6, %v83_v4  ;;  %v156_v10 = vrot.slane %v155_v8, 1 }
  0x4c   :  { %v86_v11 = vadd.f32 %v85_v9, %v48_v7  ;;  %v157_v13 = vadd.f32 %v156_v10, %v155_v8 }
  0x4e   :  { %87 = vst [vmem:[%s299_s1] sm:$0x1] %v86_v11  ;;  %v158_v14 = vadd.f32 %v157_v13, %v88_v12 }
  0x50   :  { %159 = vst [vmem:[%s300_s2] sm:$0x1] %v158_v14 }

// kernel: tile.94
= control target key start
LH: loop header
LB: loop body
LE: loop exit
PB: predicated region body
PF: predicated region fallthrough
CT: control target
= control target key end

     0   :  { %s22_s0 = inlined_call_operand.vmem [shape: f32[64], index: 0, kind: input, shape index: {}]   ;;  %s23_s1 = inlined_call_operand.vmem [shape: f32[2,64], index: 1, kind: output, shape index: {}]  }
   0x1   :  { %v4_v0 = vld [vmem:[%s22_s0] ss:$0 sm:$0xff] }
   0x2   :  { %5 = vst [vmem:[%s23_s1] sm:$0x3] %v4_v0 }

// kernel: tile.95
= control target key start
LH: loop header
LB: loop body
LE: loop exit
PB: predicated region body
PF: predicated region fallthrough
CT: control target
= control target key end

     0   :  { %vm8_vm0 = vcmask 523264   ;;  %vm14_vm1 = vcmask 1048064   ;;  %s42_s0 = inlined_call_operand.vmem [shape: f32[2,64], index: 0, kind: input, shape index: {}]   ;;  %s43_s1 = inlined_call_operand.vmem [shape: f32[1,128], index: 1, kind: output, shape index: {}]  }
   0x1   :  { %v5_v0 = vld [vmem:[%s42_s0] sm:$0x3]  ;;  %s25_s0 = smov 64  }
   0x2   :  { %6 = vst [vmem:[#allocation1] sm:$0x3] %v5_v0 }
   0x9   :  { %v11_v1 = vld [vmem:[#allocation1 + $0x1] sm:$0x1]   ;;  %v7_v2 = vld [vmem:[#allocation1] sm:$0x1]  }
   0xa   :  { %12 = vrot.lane.b32.xlu0 %v11_v1, %s25_s0  ;;  %9 = vst.msk [vmem:[#allocation0] sm:$0x1] %vm8_vm0, %v7_v2  }
  0x7c   :  { %v13_v3 = vpop.permute.xlu0 %12  }
  0x7d   :  { %15 = vst.msk [vmem:[#allocation0] sm:$0x1] %vm14_vm1, %v13_v3  }
  0x84   :  { %v20_v4 = vld [vmem:[#allocation0] sm:$0x1] }
  0x85   :  { %23 = vst [vmem:[%s43_s1] sm:$0x1] %v20_v4 }

// kernel: forward.39
= control target key start
LH: loop header
LB: loop body
LE: loop exit
PB: predicated region body
PF: predicated region fallthrough
CT: control target
= control target key end

     0   :  { %s546_s0 = inlined_call_operand.vmem [shape: f32[256,128], index: 0, kind: input, shape index: {}]   ;;  %s547_s1 = inlined_call_operand.vmem [shape: f32[1,128], index: 1, kind: input, shape index: {}]   ;;  %s548_s2 = inlined_call_operand.vmem [shape: f32[1,128], index: 2, kind: input, shape index: {}]   ;;  %s549_s3 = inlined_call_operand.vmem [shape: f32[256,128], index: 3, kind: output, shape index: {}]  }
   0x1   :  { %v14_v0 = vld [vmem:[%s546_s0] sm:$0xff]  ;;  %v15_v4 = vld [vmem:[%s546_s0 + $0x8] sm:$0xff]  ;;  %v16_v5 = vld [vmem:[%s546_s0 + $0x10] sm:$0xff] }
   0x2   :  { %v284_v1 = vld [vmem:[%s547_s1] ss:$0 sm:$0xff]  ;;  %v17_v6 = vld [vmem:[%s546_s0 + $0x18] sm:$0xff]  ;;  %v19_v11 = vld [vmem:[%s546_s0 + $0x28] sm:$0xff] }
   0x3   :  { %v289_v2 = vld [vmem:[%s548_s2] ss:$0 sm:$0xff]  ;;  %v53_v3 = vmul.f32 %v284_v1, %v14_v0  ;;  %v54_v7 = vmul.f32 %v284_v1, %v15_v4  ;;  %v55_v8 = vmul.f32 %v284_v1, %v16_v5  ;;  %v56_v9 = vmul.f32 %v284_v1, %v17_v6  ;;  %v20_v12 = vld [vmem:[%s546_s0 + $0x30] sm:$0xff]  ;;  %v21_v17 = vld [vmem:[%s546_s0 + $0x38] sm:$0xff] }
   0x4   :  { %v18_v10 = vld [vmem:[%s546_s0 + $0x20] sm:$0xff]  ;;  %v58_v15 = vmul.f32 %v284_v1, %v19_v11  ;;  %v59_v16 = vmul.f32 %v284_v1, %v20_v12  ;;  %v60_v21 = vmul.f32 %v284_v1, %v21_v17  ;;  %v23_v30 = vld [vmem:[%s546_s0 + $0x48] sm:$0xff]  ;;  %v24_v31 = vld [vmem:[%s546_s0 + $0x50] sm:$0xff] }
   0x5   :  { %v92_v13 = vadd.f32 %v289_v2, %v53_v3  ;;  %v57_v14 = vmul.f32 %v284_v1, %v18_v10  ;;  %v93_v18 = vadd.f32 %v289_v2, %v54_v7  ;;  %v94_v19 = vadd.f32 %v289_v2, %v55_v8  ;;  %v22_v25 = vld [vmem:[%s546_s0 + $0x40] sm:$0xff]  ;;  %v25_v43 = vld [vmem:[%s546_s0 + $0x58] sm:$0xff]  ;;  %v27_v45 = vld [vmem:[%s546_s0 + $0x68] sm:$0xff] }
   0x6   :  { %v95_v20 = vadd.f32 %v289_v2, %v56_v9  ;;  %v97_v24 = vadd.f32 %v289_v2, %v58_v15  ;;  %v98_v37 = vadd.f32 %v289_v2, %v59_v16  ;;  %v99_v38 = vadd.f32 %v289_v2, %v60_v21  ;;  %v26_v44 = vld [vmem:[%s546_s0 + $0x60] sm:$0xff]  ;;  %v28_v56 = vld [vmem:[%s546_s0 + $0x70] sm:$0xff]  ;;  %v29_v4 = vld [vmem:[%s546_s0 + $0x78] sm:$0xff] }
   0x7   :  { %vm124_vm0 = vcmp.ge.f32.partialorder %v92_v13, 0.0  ;;  %v156_v22 = vmul.f32 0.2, %v92_v13  ;;  %v96_v23 = vadd.f32 %v289_v2, %v57_v14  ;;  %vm125_vm1 = vcmp.ge.f32.partialorder %v93_v18, 0.0  ;;  %v30_v5 = vld [vmem:[%s546_s0 + $0x80] sm:$0xff]  ;;  %v31_v9 = vld [vmem:[%s546_s0 + $0x88] sm:$0xff] }
   0x8   :  { %v157_v26 = vmul.f32 0.2, %v93_v18  ;;  %vm126_vm2 = vcmp.ge.f32.partialorder %v94_v19, 0.0  ;;  %v158_v27 = vmul.f32 0.2, %v94_v19  ;;  %vm127_vm3 = vcmp.ge.f32.partialorder %v95_v20, 0.0 }
   0x9   :  { %v188_v28 = vsel %vm124_vm0, %v92_v13, %v156_v22  ;;  %v159_v29 = vmul.f32 0.2, %v95_v20  ;;  %vm128_vm4 = vcmp.ge.f32.partialorder %v96_v23, 0.0  ;;  %v160_v34 = vmul.f32 0.2, %v96_v23  ;;  %v32_v10 = vld [vmem:[%s546_s0 + $0x90] sm:$0xff] }
   0xa   :  { %220 = vst [vmem:[%s549_s3] sm:$0xff] %v188_v28  ;;  %v189_v32 = vsel %vm125_vm1, %v93_v18, %v157_v26  ;;  %v190_v33 = vsel %vm126_vm2, %v94_v19, %v158_v27  ;;  %vm129_vm5 = vcmp.ge.f32.partialorder %v97_v24, 0.0  ;;  %v161_v36 = vmul.f32 0.2, %v97_v24  ;;  %v33_v17 = vld [vmem:[%s546_s0 + $0x98] sm:$0xff]  ;;  %v34_v18 = vld [vmem:[%s546_s0 + $0xa0] sm:$0xff] }
   0xb   :  { %221 = vst [vmem:[%s549_s3 + $0x8] sm:$0xff] %v189_v32  ;;  %222 = vst [vmem:[%s549_s3 + $0x10] sm:$0xff] %v190_v33  ;;  %v191_v35 = vsel %vm127_vm3, %v95_v20, %v159_v29  ;;  %v192_v39 = vsel %vm128_vm4, %v96_v23, %v160_v34  ;;  %v61_v40 = vmul.f32 %v284_v1, %v22_v25  ;;  %vm130_vm6 = vcmp.ge.f32.partialorder %v98_v37, 0.0  ;;  %v35_v32 = vld [vmem:[%s546_s0 + $0xa8] sm:$0xff]  ;;  %v36_v33 = vld [vmem:[%s546_s0 + $0xb0] sm:$0xff] }
   0xc   :  { %223 = vst [vmem:[%s549_s3 + $0x18] sm:$0xff] %v191_v35  ;;  %v62_v41 = vmul.f32 %v284_v1, %v23_v30  ;;  %v63_v42 = vmul.f32 %v284_v1, %v24_v31  ;;  %224 = vst [vmem:[%s549_s3 + $0x20] sm:$0xff] %v192_v39  ;;  %v193_v46 = vsel %vm129_vm5, %v97_v24, %v161_v36  ;;  %v162_v47 = vmul.f32 0.2, %v98_v37 }
   0xd   :  { %vm131_vm7 = vcmp.ge.f32.partialorder %v99_v38, 0.0  ;;  %225 = vst [vmem:[%s549_s3 + $0x28] sm:$0xff] %v193_v46  ;;  %v163_v48 = vmul.f32 0.2, %v99_v38  ;;  %v100_v49 = vadd.f32 %v289_v2, %v61_v40  ;;  %v64_v53 = vmul.f32 %v284_v1, %v25_v43  ;;  %v37_v40 = vld [vmem:[%s546_s0 + $0xb8] sm:$0xff]  ;;  %v39_v46 = vld [vmem:[%s546_s0 + $0xc8] sm:$0xff] }
   0xe   :  { %v101_v50 = vadd.f32 %v289_v2, %v62_v41  ;;  %v102_v51 = vadd.f32 %v289_v2, %v63_v42  ;;  %v194_v52 = vsel %vm130_vm6, %v98_v37, %v162_v47  ;;  %v65_v54 = vmul.f32 %v284_v1, %v26_v44  ;;  %v40_v47 = vld [vmem:[%s546_s0 + $0xd0] sm:$0xff] }
   0xf   :  { %v66_v55 = vmul.f32 %v284_v1, %v27_v45  ;;  %226 = vst [vmem:[%s549_s3 + $0x30] sm:$0xff] %v194_v52  ;;  %v195_v57 = vsel %vm131_vm7, %v99_v38, %v163_v48  ;;  %vm132_vm8 = vcmp.ge.f32.partialorder %v100_v49, 0.0  ;;  %v164_v58 = vmul.f32 0.2, %v100_v49  ;;  %v38_v45 = vld [vmem:[%s546_s0 + $0xc0] sm:$0xff] }
  0x10   :  { %vm133_vm9 = vcmp.ge.f32.partialorder %v101_v50, 0.0  ;;  %227 = vst [vmem:[%s549_s3 + $0x38] sm:$0xff] %v195_v57  ;;  %v165_v59 = vmul.f32 0.2, %v101_v50  ;;  %vm134_vm10 = vcmp.ge.f32.partialorder %v102_v51, 0.0  ;;  %v103_v61 = vadd.f32 %v289_v2, %v64_v53 }
  0x11   :  { %v166_v60 = vmul.f32 0.2, %v102_v51  ;;  %v196_v62 = vsel %vm132_vm8, %v100_v49, %v164_v58  ;;  %v104_v63 = vadd.f32 %v289_v2, %v65_v54  ;;  %v105_v0 = vadd.f32 %v289_v2, %v66_v55  ;;  %v41_v58 = vld [vmem:[%s546_s0 + $0xd8] sm:$0xff] }
  0x12   :  { %v67_v3 = vmul.f32 %v284_v1, %v28_v56  ;;  %228 = vst [vmem:[%s549_s3 + $0x40] sm:$0xff] %v196_v62  ;;  %v197_v6 = vsel %vm133_vm9, %v101_v50, %v165_v59  ;;  %vm135_vm11 = vcmp.ge.f32.partialorder %v103_v61, 0.0  ;;  %v167_v8 = vmul.f32 0.2, %v103_v61  ;;  %v42_v59 = vld [vmem:[%s546_s0 + $0xe0] sm:$0xff] }
  0x13   :  { %v198_v7 = vsel %vm134_vm10, %v102_v51, %v166_v60  ;;  %229 = vst [vmem:[%s549_s3 + $0x48] sm:$0xff] %v197_v6  ;;  %vm136_vm12 = vcmp.ge.f32.partialorder %v104_v63, 0.0  ;;  %v168_v11 = vmul.f32 0.2, %v104_v63  ;;  %vm137_vm13 = vcmp.ge.f32.partialorder %v105_v0, 0.0 }
  0x14   :  { %230 = vst [vmem:[%s549_s3 + $0x50] sm:$0xff] %v198_v7  ;;  %v169_v12 = vmul.f32 0.2, %v105_v0  ;;  %v199_v13 = vsel %vm135_vm11, %v103_v61, %v167_v8  ;;  %v106_v14 = vadd.f32 %v289_v2, %v67_v3  ;;  %v68_v15 = vmul.f32 %v284_v1, %v29_v4 }
  0x15   :  { %v69_v16 = vmul.f32 %v284_v1, %v30_v5  ;;  %231 = vst [vmem:[%s549_s3 + $0x58] sm:$0xff] %v199_v13  ;;  %v200_v19 = vsel %vm136_vm12, %v104_v63, %v168_v11  ;;  %v70_v21 = vmul.f32 %v284_v1, %v31_v9  ;;  %v71_v22 = vmul.f32 %v284_v1, %v32_v10  ;;  %v43_v10 = vld [vmem:[%s546_s0 + $0xe8] sm:$0xff]  ;;  %v44_v11 = vld [vmem:[%s546_s0 + $0xf0] sm:$0xff] }
  0x16   :  { %v201_v20 = vsel %vm137_vm13, %v105_v0, %v169_v12  ;;  %232 = vst [vmem:[%s549_s3 + $0x60] sm:$0xff] %v200_v19  ;;  %vm138_vm14 = vcmp.ge.f32.partialorder %v106_v14, 0.0  ;;  %v170_v23 = vmul.f32 0.2, %v106_v14  ;;  %v107_v24 = vadd.f32 %v289_v2, %v68_v15 }
  0x17   :  { %233 = vst [vmem:[%s549_s3 + $0x68] sm:$0xff] %v201_v20  ;;  %v108_v25 = vadd.f32 %v289_v2, %v69_v16  ;;  %v109_v26 = vadd.f32 %v289_v2, %v70_v21  ;;  %v110_v27 = vadd.f32 %v289_v2, %v71_v22  ;;  %v72_v28 = vmul.f32 %v284_v1, %v33_v17 }
  0x18   :  { %v73_v29 = vmul.f32 %v284_v1, %v34_v18  ;;  %v202_v30 = vsel %vm138_vm14, %v106_v14, %v170_v23  ;;  %vm139_vm15 = vcmp.ge.f32.partialorder %v107_v24, 0.0  ;;  %v171_v31 = vmul.f32 0.2, %v107_v24  ;;  %v45_v18 = vld [vmem:[%s546_s0 + $0xf8] sm:$0xff] }
  0x19   :  { %vm140_vm0 = vcmp.ge.f32.partialorder %v108_v25, 0.0  ;;  %234 = vst [vmem:[%s549_s3 + $0x70] sm:$0xff] %v202_v30  ;;  %v172_v34 = vmul.f32 0.2, %v108_v25  ;;  %vm141_vm1 = vcmp.ge.f32.partialorder %v109_v26, 0.0  ;;  %vm142_vm2 = vcmp.ge.f32.partialorder %v110_v27, 0.0 }
  0x1a   :  { %v173_v35 = vmul.f32 0.2, %v109_v26  ;;  %v203_v36 = vsel %vm139_vm15, %v107_v24, %v171_v31  ;;  %v174_v37 = vmul.f32 0.2, %v110_v27  ;;  %v111_v38 = vadd.f32 %v289_v2, %v72_v28 }
  0x1b   :  { %v112_v39 = vadd.f32 %v289_v2, %v73_v29  ;;  %235 = vst [vmem:[%s549_s3 + $0x78] sm:$0xff] %v203_v36  ;;  %v204_v41 = vsel %vm140_vm0, %v108_v25, %v172_v34  ;;  %v74_v43 = vmul.f32 %v284_v1, %v35_v32  ;;  %v75_v44 = vmul.f32 %v284_v1, %v36_v33 }
  0x1c   :  { %v205_v42 = vsel %vm141_vm1, %v109_v26, %v173_v35  ;;  %236 = vst [vmem:[%s549_s3 + $0x80] sm:$0xff] %v204_v41  ;;  %v206_v48 = vsel %vm142_vm2, %v110_v27, %v174_v37  ;;  %vm143_vm3 = vcmp.ge.f32.partialorder %v111_v38, 0.0  ;;  %v175_v49 = vmul.f32 0.2, %v111_v38 }
  0x1d   :  { %237 = vst [vmem:[%s549_s3 + $0x88] sm:$0xff] %v205_v42  ;;  %vm144_vm4 = vcmp.ge.f32.partialorder %v112_v39, 0.0  ;;  %238 = vst [vmem:[%s549_s3 + $0x90] sm:$0xff] %v206_v48  ;;  %v176_v50 = vmul.f32 0.2, %v112_v39  ;;  %v113_v51 = vadd.f32 %v289_v2, %v74_v43  ;;  %v114_v52 = vadd.f32 %v289_v2, %v75_v44 }
  0x1e   :  { %v76_v53 = vmul.f32 %v284_v1, %v37_v40  ;;  %v207_v54 = vsel %vm143_vm3, %v111_v38, %v175_v49  ;;  %v77_v55 = vmul.f32 %v284_v1, %v38_v45  ;;  %v78_v56 = vmul.f32 %v284_v1, %v39_v46 }
  0x1f   :  { %v79_v57 = vmul.f32 %v284_v1, %v40_v47  ;;  %239 = vst [vmem:[%s549_s3 + $0x98] sm:$0xff] %v207_v54  ;;  %v208_v60 = vsel %vm144_vm4, %v112_v39, %v176_v50  ;;  %vm145_vm5 = vcmp.ge.f32.partialorder %v113_v51, 0.0  ;;  %v177_v61 = vmul.f32 0.2, %v113_v51 }
  0x20   :  { %vm146_vm6 = vcmp.ge.f32.partialorder %v114_v52, 0.0  ;;  %240 = vst [vmem:[%s549_s3 + $0xa0] sm:$0xff] %v208_v60  ;;  %v178_v62 = vmul.f32 0.2, %v114_v52  ;;  %v115_v63 = vadd.f32 %v289_v2, %v76_v53  ;;  %v116_v0 = vadd.f32 %v289_v2, %v77_v55 }
  0x21   :  { %v117_v3 = vadd.f32 %v289_v2, %v78_v56  ;;  %v209_v4 = vsel %vm145_vm5, %v113_v51, %v177_v61  ;;  %v118_v5 = vadd.f32 %v289_v2, %v79_v57  ;;  %v80_v6 = vmul.f32 %v284_v1, %v41_v58 }
  0x22   :  { %v81_v7 = vmul.f32 %v284_v1, %v42_v59  ;;  %241 = vst [vmem:[%s549_s3 + $0xa8] sm:$0xff] %v209_v4  ;;  %v210_v8 = vsel %vm146_vm6, %v114_v52, %v178_v62  ;;  %vm147_vm7 = vcmp.ge.f32.partialorder %v115_v63, 0.0  ;;  %v179_v9 = vmul.f32 0.2, %v115_v63 }
  0x23   :  { %vm148_vm8 = vcmp.ge.f32.partialorder %v116_v0, 0.0  ;;  %242 = vst [vmem:[%s549_s3 + $0xb0] sm:$0xff] %v210_v8  ;;  %v180_v12 = vmul.f32 0.2, %v116_v0  ;;  %vm149_vm9 = vcmp.ge.f32.partialorder %v117_v3, 0.0  ;;  %vm150_vm10 = vcmp.ge.f32.partialorder %v118_v5, 0.0 }
  0x24   :  { %v181_v13 = vmul.f32 0.2, %v117_v3  ;;  %v211_v14 = vsel %vm147_vm7, %v115_v63, %v179_v9  ;;  %v182_v15 = vmul.f32 0.2, %v118_v5  ;;  %v119_v16 = vadd.f32 %v289_v2, %v80_v6 }
  0x25   :  { %v120_v17 = vadd.f32 %v289_v2, %v81_v7  ;;  %243 = vst [vmem:[%s549_s3 + $0xb8] sm:$0xff] %v211_v14  ;;  %v212_v19 = vsel %vm148_vm8, %v116_v0, %v180_v12  ;;  %v82_v21 = vmul.f32 %v284_v1, %v43_v10  ;;  %v83_v22 = vmul.f32 %v284_v1, %v44_v11 }
  0x26   :  { %v213_v20 = vsel %vm149_vm9, %v117_v3, %v181_v13  ;;  %244 = vst [vmem:[%s549_s3 + $0xc0] sm:$0xff] %v212_v19  ;;  %v214_v23 = vsel %vm150_vm10, %v118_v5, %v182_v15  ;;  %vm151_vm11 = vcmp.ge.f32.partialorder %v119_v16, 0.0  ;;  %v183_v24 = vmul.f32 0.2, %v119_v16 }
  0x27   :  { %245 = vst [vmem:[%s549_s3 + $0xc8] sm:$0xff] %v213_v20  ;;  %vm152_vm12 = vcmp.ge.f32.partialorder %v120_v17, 0.0  ;;  %246 = vst [vmem:[%s549_s3 + $0xd0] sm:$0xff] %v214_v23  ;;  %v184_v25 = vmul.f32 0.2, %v120_v17  ;;  %v121_v26 = vadd.f32 %v289_v2, %v82_v21  ;;  %v122_v27 = vadd.f32 %v289_v2, %v83_v22 }
  0x28   :  { %v84_v28 = vmul.f32 %v284_v1, %v45_v18  ;;  %v215_v29 = vsel %vm151_vm11, %v119_v16, %v183_v24 }
  0x29   :  { %247 = vst [vmem:[%s549_s3 + $0xd8] sm:$0xff] %v215_v29  ;;  %v216_v30 = vsel %vm152_vm12, %v120_v17, %v184_v25  ;;  %vm153_vm13 = vcmp.ge.f32.partialorder %v121_v26, 0.0  ;;  %v185_v31 = vmul.f32 0.2, %v121_v26  ;;  %vm154_vm14 = vcmp.ge.f32.partialorder %v122_v27, 0.0 }
  0x2a   :  { %248 = vst [vmem:[%s549_s3 + $0xe0] sm:$0xff] %v216_v30  ;;  %v186_v32 = vmul.f32 0.2, %v122_v27  ;;  %v123_v33 = vadd.f32 %v289_v2, %v84_v28 }
  0x2b   :  { %v217_v34 = vsel %vm153_vm13, %v121_v26, %v185_v31 }
  0x2c   :  { %249 = vst [vmem:[%s549_s3 + $0xe8] sm:$0xff] %v217_v34  ;;  %v218_v1 = vsel %vm154_vm14, %v122_v27, %v186_v32  ;;  %vm155_vm15 = vcmp.ge.f32.partialorder %v123_v33, 0.0  ;;  %v187_v35 = vmul.f32 0.2, %v123_v33 }
  0x2d   :  { %250 = vst [vmem:[%s549_s3 + $0xf0] sm:$0xff] %v218_v1 }
  0x2e   :  { %v219_v36 = vsel %vm155_vm15, %v123_v33, %v187_v35 }
  0x2f   :  { %251 = vst [vmem:[%s549_s3 + $0xf8] sm:$0xff] %v219_v36 }

// kernel: forward.40
= control target key start
LH: loop header
LB: loop body
LE: loop exit
PB: predicated region body
PF: predicated region fallthrough
CT: control target
= control target key end

     0   :  { %s2484_s1 = inlined_call_operand.vmem [shape: bf16[1024,128], index: 1, kind: input, shape index: {}]   ;;  %s2485_s0 = inlined_call_operand.vmem [shape: bf16[128,1024], index: 0, kind: input, shape index: {}]   ;;  %s2486_s2 = inlined_call_operand.vmem [shape: f32[128,128], index: 2, kind: output, shape index: {}]  }
   0x1   :  { %v1787_v0 = vld [vmem:[%s2484_s1 + $0x78] sm:$0xff]   ;;  %v1791_v4 = vld [vmem:[%s2484_s1 + $0x70] sm:$0xff]   ;;  %v1795_v8 = vld [vmem:[%s2484_s1 + $0x68] sm:$0xff]  }
   0x2   :  { %v1788_v1 = vld [vmem:[%s2484_s1 + $0xf8] sm:$0xff]   ;;  %1531 = vmatprep.subr.bf16.mxu0 %v1787_v0  ;;  %v1792_v5 = vld [vmem:[%s2484_s1 + $0xf0] sm:$0xff]   ;;  %v1796_v9 = vld [vmem:[%s2484_s1 + $0xe8] sm:$0xff]  }
   0x3   :  { %v1789_v2 = vld [vmem:[%s2484_s1 + $0x38] sm:$0xff]   ;;  %1595 = vmatprep.subr.bf16.mxu1 %v1788_v1  ;;  %v1793_v6 = vld [vmem:[%s2484_s1 + $0x30] sm:$0xff]   ;;  %v1797_v10 = vld [vmem:[%s2484_s1 + $0x28] sm:$0xff]  }
   0x4   :  { %v1790_v3 = vld [vmem:[%s2484_s1 + $0xb8] sm:$0xff]   ;;  %1532 = vmatpush3.bf16.msra.mxu0 %v1789_v2  ;;  %v1794_v7 = vld [vmem:[%s2484_s1 + $0xb0] sm:$0xff]   ;;  %v1798_v11 = vld [vmem:[%s2484_s1 + $0xa8] sm:$0xff]  }
   0x5   :  { %1596 = vmatpush3.bf16.msra.mxu1 %v1790_v3  ;;  %1533 = vmatprep.subr.bf16.mxu0 %v1791_v4  ;;  %v1799_v12 = vld [vmem:[%s2484_s1 + $0x60] sm:$0xff]   ;;  %v1803_v16 = vld [vmem:[%s2484_s1 + $0x58] sm:$0xff]   ;;  %v1807_v20 = vld [vmem:[%s2484_s1 + $0x50] sm:$0xff]  }
   0x6   :  { %1597 = vmatprep.subr.bf16.mxu1 %v1792_v5  ;;  %v1800_v13 = vld [vmem:[%s2484_s1 + $0xe0] sm:$0xff]   ;;  %v1804_v17 = vld [vmem:[%s2484_s1 + $0xd8] sm:$0xff]   ;;  %v1808_v21 = vld [vmem:[%s2484_s1 + $0xd0] sm:$0xff]  }
   0x7   :  { %v1801_v14 = vld [vmem:[%s2484_s1 + $0x20] sm:$0xff]   ;;  %v1805_v18 = vld [vmem:[%s2484_s1 + $0x18] sm:$0xff]   ;;  %v1809_v22 = vld [vmem:[%s2484_s1 + $0x10] sm:$0xff]  }
   0x8   :  { %1534 = vmatpush3.bf16.msra.mxu0 %v1793_v6  ;;  %v1802_v15 = vld [vmem:[%s2484_s1 + $0xa0] sm:$0xff]   ;;  %v1806_v19 = vld [vmem:[%s2484_s1 + $0x98] sm:$0xff]   ;;  %v1810_v23 = vld [vmem:[%s2484_s1 + $0x90] sm:$0xff]  }
   0x9   :  { %1598 = vmatpush3.bf16.msra.mxu1 %v1794_v7  ;;  %1535 = vmatprep.subr.bf16.mxu0 %v1795_v8  ;;  %v1811_v24 = vld [vmem:[%s2484_s1 + $0x48] sm:$0xff]   ;;  %v1815_v28 = vld [vmem:[%s2484_s1 + $0x40] sm:$0xff]   ;;  %v1819_v40 = vld [vmem:[%s2484_s1 + $0x178] sm:$0xff]  }
   0xa   :  { %1599 = vmatprep.subr.bf16.mxu1 %v1796_v9  ;;  %v1812_v25 = vld [vmem:[%s2484_s1 + $0xc8] sm:$0xff]   ;;  %v1816_v29 = vld [vmem:[%s2484_s1 + $0xc0] sm:$0xff]   ;;  %v1820_v41 = vld [vmem:[%s2484_s1 + $0x138] sm:$0xff]  }
   0xb   :  { %v1813_v26 = vld [vmem:[%s2484_s1 + $0x8] sm:$0xff]   ;;  %v1817_v30 = vld [vmem:[%s2484_s1] sm:$0xff]   ;;  %v1821_v42 = vld [vmem:[%s2484_s1 + $0x1f8] sm:$0xff]  }
   0xc   :  { %1536 = vmatpush3.bf16.msra.mxu0 %v1797_v10  ;;  %v1814_v27 = vld [vmem:[%s2484_s1 + $0x88] sm:$0xff]   ;;  %v1818_v31 = vld [vmem:[%s2484_s1 + $0x80] sm:$0xff]   ;;  %v1822_v43 = vld [vmem:[%s2484_s1 + $0x1b8] sm:$0xff]  }
   0xd   :  { %1600 = vmatpush3.bf16.msra.mxu1 %v1798_v11  ;;  %1537 = vmatprep.subr.bf16.mxu0 %v1799_v12  ;;  %v48_v32 = vld [vmem:[%s2485_s0] sm:$0xff]  ;;  %v49_v34 = vld [vmem:[%s2485_s0 + $0x8] sm:$0xff]  ;;  %v1823_v50 = vld [vmem:[%s2484_s1 + $0x170] sm:$0xff]  }
   0xe   :  { %1601 = vmatprep.subr.bf16.mxu1 %v1800_v13  ;;  %v52_v33 = vld [vmem:[%s2485_s0 + $0x20] sm:$0xff]  ;;  %v53_v37 = vld [vmem:[%s2485_s0 + $0x28] sm:$0xff]  ;;  %v1824_v52 = vld [vmem:[%s2484_s1 + $0x130] sm:$0xff]  }
   0xf   :  { %v1403_v35 = vcombine.low %v48_v32, %v52_v33  ;;  %v1404_v36 = vcombine.high %v48_v32, %v52_v33  ;;  %v1405_v38 = vcombine.low %v49_v34, %v53_v37  ;;  %v1406_v39 = vcombine.high %v49_v34, %v53_v37  ;;  %v56_v44 = vld [vmem:[%s2485_s0 + $0x40] sm:$0xff]  ;;  %v57_v47 = vld [vmem:[%s2485_s0 + $0x48] sm:$0xff]  ;;  %v1825_v54 = vld [vmem:[%s2484_s1 + $0x1f0] sm:$0xff]  }
  0x10   :  { %1538 = vmatpush3.bf16.msra.mxu0 %v1801_v14  ;;  %v60_v45 = vld [vmem:[%s2485_s0 + $0x60] sm:$0xff]  ;;  %v61_v48 = vld [vmem:[%s2485_s0 + $0x68] sm:$0xff]  ;;  %v1826_v55 = vld [vmem:[%s2484_s1 + $0x1b0] sm:$0xff]  }
  0x11   :  { %1602 = vmatpush3.bf16.msra.mxu1 %v1802_v15  ;;  %1539 = vmatprep.subr.bf16.mxu0 %v1803_v16  ;;  %v1412_v46 = vcombine.high %v56_v44, %v60_v45  ;;  %v1414_v49 = vcombine.high %v57_v47, %v61_v48  ;;  %v1411_v51 = vcombine.low %v56_v44, %v60_v45  ;;  %v64_v56 = vld [vmem:[%s2485_s0 + $0x80] sm:$0xff]  ;;  %v65_v58 = vld [vmem:[%s2485_s0 + $0x88] sm:$0xff]  ;;  %v1841_v32 = vld [vmem:[%s2484_s1 + $0x1d0] sm:$0xff]  }
  0x12   :  { %1603 = vmatprep.subr.bf16.mxu1 %v1804_v17  ;;  %976 = vmatprep.mubr.bf16.mxu0 %v1404_v36  ;;  %v1413_v53 = vcombine.low %v57_v47, %v61_v48  ;;  %v68_v57 = vld [vmem:[%s2485_s0 + $0xa0] sm:$0xff]  ;;  %v69_v59 = vld [vmem:[%s2485_s0 + $0xa8] sm:$0xff]  ;;  %v1842_v33 = vld [vmem:[%s2484_s1 + $0x190] sm:$0xff]  }
  0x13   :  { %1073 = vmatprep.mubr.bf16.mxu1 %v1406_v39  ;;  %v1420_v60 = vcombine.high %v64_v56, %v68_v57  ;;  %v1422_v61 = vcombine.high %v65_v58, %v69_v59  ;;  %v1827_v62 = vld [vmem:[%s2484_s1 + $0x168] sm:$0xff]   ;;  %v1419_v2 = vcombine.low %v64_v56, %v68_v57  ;;  %v72_v3 = vld [vmem:[%s2485_s0 + $0xc0] sm:$0xff]  ;;  %v1421_v6 = vcombine.low %v65_v58, %v69_v59 }
  0x14   :  { %1540 = vmatpush3.bf16.msra.mxu0 %v1805_v18  ;;  %v1828_v63 = vld [vmem:[%s2484_s1 + $0x128] sm:$0xff]   ;;  %v76_v4 = vld [vmem:[%s2485_s0 + $0xe0] sm:$0xff]  ;;  %v1835_v18 = vld [vmem:[%s2484_s1 + $0x158] sm:$0xff]  }
  0x15   :  { %1604 = vmatpush3.bf16.msra.mxu1 %v1806_v19  ;;  %1541 = vmatprep.subr.bf16.mxu0 %v1807_v20  ;;  %v1829_v0 = vld [vmem:[%s2484_s1 + $0x1e8] sm:$0xff]   ;;  %v1428_v7 = vcombine.high %v72_v3, %v76_v4  ;;  %v1831_v10 = vld [vmem:[%s2484_s1 + $0x160] sm:$0xff]   ;;  %v1427_v19 = vcombine.low %v72_v3, %v76_v4  ;;  %v1836_v20 = vld [vmem:[%s2484_s1 + $0x118] sm:$0xff]  }
  0x16   :  { %1605 = vmatprep.subr.bf16.mxu1 %v1808_v21  ;;  %v1830_v1 = vld [vmem:[%s2484_s1 + $0x1a8] sm:$0xff]   ;;  %v1832_v11 = vld [vmem:[%s2484_s1 + $0x120] sm:$0xff]  }
  0x17   :  { %v73_v5 = vld [vmem:[%s2485_s0 + $0xc8] sm:$0xff]  ;;  %v1833_v12 = vld [vmem:[%s2484_s1 + $0x1e0] sm:$0xff]  }
  0x18   :  { %1542 = vmatpush3.bf16.msra.mxu0 %v1809_v22  ;;  %v77_v8 = vld [vmem:[%s2485_s0 + $0xe8] sm:$0xff]  ;;  %v1834_v13 = vld [vmem:[%s2484_s1 + $0x1a0] sm:$0xff]  }
  0x19   :  { %1606 = vmatpush3.bf16.msra.mxu1 %v1810_v23  ;;  %1543 = vmatprep.subr.bf16.mxu0 %v1811_v24  ;;  %v1430_v9 = vcombine.high %v73_v5, %v77_v8  ;;  %v80_v14 = vld [vmem:[%s2485_s0 + $0x100] sm:$0xff]  ;;  %v81_v16 = vld [vmem:[%s2485_s0 + $0x108] sm:$0xff]  ;;  %v1429_v21 = vcombine.low %v73_v5, %v77_v8  ;;  %v1837_v23 = vld [vmem:[%s2484_s1 + $0x1d8] sm:$0xff]  }
  0x1a   :  { %1607 = vmatprep.subr.bf16.mxu1 %v1812_v25  ;;  %v84_v15 = vld [vmem:[%s2485_s0 + $0x120] sm:$0xff]  ;;  %v85_v17 = vld [vmem:[%s2485_s0 + $0x128] sm:$0xff]  ;;  %v1838_v25 = vld [vmem:[%s2484_s1 + $0x198] sm:$0xff]  }
  0x1b   :  { %v1436_v22 = vcombine.high %v80_v14, %v84_v15  ;;  %v1438_v24 = vcombine.high %v81_v16, %v85_v17  ;;  %v1435_v34 = vcombine.low %v80_v14, %v84_v15  ;;  %v1844_v39 = vld [vmem:[%s2484_s1 + $0x108] sm:$0xff]   ;;  %v1848_v48 = vld [vmem:[%s2484_s1 + $0x100] sm:$0xff]   ;;  %v59_v8 = vld [vmem:[%s2485_s0 + $0x58] sm:$0xff] }
  0x1c   :  { %1544 = vmatpush3.bf16.msra.mxu0 %v1813_v26  ;;  %v88_v26 = vld [vmem:[%s2485_s0 + $0x140] sm:$0xff]  ;;  %v97_v44 = vld [vmem:[%s2485_s0 + $0x188] sm:$0xff]  ;;  %v66_v14 = vld [vmem:[%s2485_s0 + $0x90] sm:$0xff] }
  0x1d   :  { %1608 = vmatpush3.bf16.msra.mxu1 %v1814_v27  ;;  %1545 = vmatprep.subr.bf16.mxu0 %v1815_v28  ;;  %v92_v27 = vld [vmem:[%s2485_s0 + $0x160] sm:$0xff]  ;;  %v1839_v28 = vld [vmem:[%s2484_s1 + $0x150] sm:$0xff]   ;;  %v101_v45 = vld [vmem:[%s2485_s0 + $0x1a8] sm:$0xff] }
  0x1e   :  { %1609 = vmatprep.subr.bf16.mxu1 %v1816_v29  ;;  %v89_v29 = vld [vmem:[%s2485_s0 + $0x148] sm:$0xff]  ;;  %v1444_v36 = vcombine.high %v88_v26, %v92_v27  ;;  %v1443_v47 = vcombine.low %v88_v26, %v92_v27  ;;  %v1453_v59 = vcombine.low %v97_v44, %v101_v45  ;;  %v70_v15 = vld [vmem:[%s2485_s0 + $0xb0] sm:$0xff] }
  0x1f   :  { %v105_v56 = vld [vmem:[%s2485_s0 + $0x1c8] sm:$0xff]  ;;  %v1423_v26 = vcombine.low %v66_v14, %v70_v15 }
  0x20   :  { %1546 = vmatpush3.bf16.msra.mxu0 %v1817_v30  ;;  %v93_v30 = vld [vmem:[%s2485_s0 + $0x168] sm:$0xff] }
  0x21   :  { %1610 = vmatpush3.bf16.msra.mxu1 %v1818_v31  ;;  %1659 = vmatprep.subr.bf16.mxu0 %v1819_v40  ;;  %v1840_v31 = vld [vmem:[%s2484_s1 + $0x110] sm:$0xff]   ;;  %v1446_v37 = vcombine.high %v89_v29, %v93_v30  ;;  %v1845_v40 = vld [vmem:[%s2484_s1 + $0x1c8] sm:$0xff]  }
  0x22   :  { %1723 = vmatprep.subr.bf16.mxu1 %v1821_v42  ;;  %v100_v42 = vld [vmem:[%s2485_s0 + $0x1a0] sm:$0xff]  ;;  %v109_v57 = vld [vmem:[%s2485_s0 + $0x1e8] sm:$0xff] }
  0x23   :  { %977 = vmatmul.mubr.bf16.vlgmr.msra.gmra.mxu0 %v1403_v35  ;;  %v1437_v35 = vcombine.low %v81_v16, %v85_v17  ;;  %v1461_v3 = vcombine.low %v105_v56, %v109_v57  ;;  %v67_v16 = vld [vmem:[%s2485_s0 + $0x98] sm:$0xff] }
  0x24   :  { %1074 = vmatmul.mubr.bf16.vlgmr.msra.gmra.mxu1 %v1405_v38  ;;  %1660 = vmatpush3.bf16.msra.mxu0 %v1820_v41  ;;  %v1843_v38 = vld [vmem:[%s2484_s1 + $0x148] sm:$0xff]   ;;  %v96_v41 = vld [vmem:[%s2485_s0 + $0x180] sm:$0xff]  ;;  %v71_v17 = vld [vmem:[%s2485_s0 + $0xb8] sm:$0xff] }
  0x25   :  { %1724 = vmatpush3.bf16.msra.mxu1 %v1822_v43  ;;  %984 = vmatprep.mubr.bf16.mxu0 %v1412_v46  ;;  %v1846_v43 = vld [vmem:[%s2484_s1 + $0x188] sm:$0xff]   ;;  %v1847_v46 = vld [vmem:[%s2484_s1 + $0x140] sm:$0xff]   ;;  %v1451_v58 = vcombine.low %v96_v41, %v100_v42  ;;  %v1425_v27 = vcombine.low %v67_v16, %v71_v17 }
  0x26   :  { %1081 = vmatprep.mubr.bf16.mxu1 %v1414_v49  ;;  %1661 = vmatprep.subr.bf16.mxu0 %v1823_v50  ;;  %v1445_v49 = vcombine.low %v89_v29, %v93_v30  ;;  %v1452_v50 = vcombine.high %v96_v41, %v100_v42  ;;  %v82_v30 = vld [vmem:[%s2485_s0 + $0x110] sm:$0xff]  ;;  %v95_v41 = vld [vmem:[%s2485_s0 + $0x178] sm:$0xff] }
  0x27   :  { %1725 = vmatprep.subr.bf16.mxu1 %v1825_v54  ;;  %v104_v54 = vld [vmem:[%s2485_s0 + $0x1c0] sm:$0xff] }
  0x28   :  { %1662 = vmatpush3.bf16.msra.mxu0 %v1824_v52  ;;  %v1454_v52 = vcombine.high %v97_v44, %v101_v45 }
  0x29   :  { %1726 = vmatpush3.bf16.msra.mxu1 %v1826_v55  ;;  %1663 = vmatprep.subr.bf16.mxu0 %v1827_v62  ;;  %v108_v55 = vld [vmem:[%s2485_s0 + $0x1e0] sm:$0xff]  ;;  %v50_v62 = vld [vmem:[%s2485_s0 + $0x10] sm:$0xff] }
  0x2a   :  { %1727 = vmatprep.subr.bf16.mxu1 %v1829_v0  ;;  %v51_v0 = vld [vmem:[%s2485_s0 + $0x18] sm:$0xff] }
  0x2b   :  { %985 = vmatmul.mubr.bf16.gmra.mxu0 %v1411_v51  ;;  %v1849_v51 = vld [vmem:[%s2484_s1 + $0x1c0] sm:$0xff]  }
  0x2c   :  { %1082 = vmatmul.mubr.bf16.gmra.mxu1 %v1413_v53  ;;  %992 = vmatprep.mubr.bf16.mxu0 %v1420_v60  ;;  %v1850_v53 = vld [vmem:[%s2484_s1 + $0x180] sm:$0xff]   ;;  %v1460_v60 = vcombine.high %v104_v54, %v108_v55 }
  0x2d   :  { %1089 = vmatprep.mubr.bf16.mxu1 %v1422_v61  ;;  %1664 = vmatpush3.bf16.msra.mxu0 %v1828_v63  ;;  %v1462_v61 = vcombine.high %v105_v56, %v109_v57  ;;  %v54_v63 = vld [vmem:[%s2485_s0 + $0x30] sm:$0xff]  ;;  %v107_v56 = vld [vmem:[%s2485_s0 + $0x1d8] sm:$0xff] }
  0x2e   :  { %1728 = vmatpush3.bf16.msra.mxu1 %v1830_v1  ;;  %1665 = vmatprep.subr.bf16.mxu0 %v1831_v10  ;;  %v55_v1 = vld [vmem:[%s2485_s0 + $0x38] sm:$0xff]  ;;  %v1408_v4 = vcombine.high %v50_v62, %v54_v63  ;;  %v1407_v10 = vcombine.low %v50_v62, %v54_v63 }
  0x2f   :  { %1729 = vmatprep.subr.bf16.mxu1 %v1833_v12  ;;  %v1410_v5 = vcombine.high %v51_v0, %v55_v1  ;;  %v111_v57 = vld [vmem:[%s2485_s0 + $0x1f8] sm:$0xff] }
  0x30   :  { %v1465_v63 = vcombine.low %v107_v56, %v111_v57 }
  0x31   :  { %1666 = vmatpush3.bf16.msra.mxu0 %v1832_v11  ;;  %v1409_v11 = vcombine.low %v51_v0, %v55_v1 }
  0x32   :  { %1730 = vmatpush3.bf16.msra.mxu1 %v1834_v13  ;;  %1667 = vmatprep.subr.bf16.mxu0 %v1835_v18 }
  0x33   :  { %993 = vmatmul.mubr.bf16.gmra.mxu0 %v1419_v2  ;;  %1731 = vmatprep.subr.bf16.mxu1 %v1837_v23  ;;  %v1459_v2 = vcombine.low %v104_v54, %v108_v55  ;;  %v78_v23 = vld [vmem:[%s2485_s0 + $0xf0] sm:$0xff] }
  0x34   :  { %1090 = vmatmul.mubr.bf16.gmra.mxu1 %v1421_v6  ;;  %1000 = vmatprep.mubr.bf16.mxu0 %v1428_v7  ;;  %v58_v6 = vld [vmem:[%s2485_s0 + $0x50] sm:$0xff] }
  0x35   :  { %1097 = vmatprep.mubr.bf16.mxu1 %v1430_v9  ;;  %1668 = vmatpush3.bf16.msra.mxu0 %v1836_v20  ;;  %v62_v7 = vld [vmem:[%s2485_s0 + $0x70] sm:$0xff]  ;;  %v63_v9 = vld [vmem:[%s2485_s0 + $0x78] sm:$0xff]  ;;  %v1424_v20 = vcombine.high %v66_v14, %v70_v15 }
  0x36   :  { %1732 = vmatpush3.bf16.msra.mxu1 %v1838_v25  ;;  %1669 = vmatprep.subr.bf16.mxu0 %v1839_v28  ;;  %v1416_v12 = vcombine.high %v58_v6, %v62_v7  ;;  %v1418_v13 = vcombine.high %v59_v8, %v63_v9  ;;  %v1415_v18 = vcombine.low %v58_v6, %v62_v7  ;;  %v79_v25 = vld [vmem:[%s2485_s0 + $0xf8] sm:$0xff]  ;;  %v106_v54 = vld [vmem:[%s2485_s0 + $0x1d0] sm:$0xff] }
  0x37   :  { %1733 = vmatprep.subr.bf16.mxu1 %v1841_v32  ;;  %v83_v32 = vld [vmem:[%s2485_s0 + $0x118] sm:$0xff]  ;;  %v110_v55 = vld [vmem:[%s2485_s0 + $0x1f0] sm:$0xff] }
  0x38   :  { %v1463_v62 = vcombine.low %v106_v54, %v110_v55 }
  0x39   :  { %1670 = vmatpush3.bf16.msra.mxu0 %v1840_v31  ;;  %v86_v31 = vld [vmem:[%s2485_s0 + $0x130] sm:$0xff] }
  0x3a   :  { %1734 = vmatpush3.bf16.msra.mxu1 %v1842_v33  ;;  %1671 = vmatprep.subr.bf16.mxu0 %v1843_v38  ;;  %v87_v33 = vld [vmem:[%s2485_s0 + $0x138] sm:$0xff]  ;;  %v90_v38 = vld [vmem:[%s2485_s0 + $0x150] sm:$0xff]  ;;  %v1439_v42 = vcombine.low %v82_v30, %v86_v31 }
  0x3b   :  { %1001 = vmatmul.mubr.bf16.gmra.mxu0 %v1427_v19  ;;  %1735 = vmatprep.subr.bf16.mxu1 %v1845_v40  ;;  %v1417_v19 = vcombine.low %v59_v8, %v63_v9  ;;  %v91_v40 = vld [vmem:[%s2485_s0 + $0x158] sm:$0xff] }
  0x3c   :  { %1098 = vmatmul.mubr.bf16.gmra.mxu1 %v1429_v21  ;;  %1008 = vmatprep.mubr.bf16.mxu0 %v1436_v22  ;;  %v1426_v21 = vcombine.high %v67_v16, %v71_v17  ;;  %v74_v22 = vld [vmem:[%s2485_s0 + $0xd0] sm:$0xff]  ;;  %v1450_v45 = vcombine.high %v91_v40, %v95_v41 }
  0x3d   :  { %1105 = vmatprep.mubr.bf16.mxu1 %v1438_v24  ;;  %1672 = vmatpush3.bf16.msra.mxu0 %v1844_v39  ;;  %v75_v24 = vld [vmem:[%s2485_s0 + $0xd8] sm:$0xff]  ;;  %v1432_v28 = vcombine.high %v74_v22, %v78_v23  ;;  %v94_v39 = vld [vmem:[%s2485_s0 + $0x170] sm:$0xff] }
  0x3e   :  { %1736 = vmatpush3.bf16.msra.mxu1 %v1846_v43  ;;  %1673 = vmatprep.subr.bf16.mxu0 %v1847_v46  ;;  %v1434_v29 = vcombine.high %v75_v24, %v79_v25  ;;  %v1441_v43 = vcombine.low %v83_v32, %v87_v33  ;;  %v1448_v44 = vcombine.high %v90_v38, %v94_v39  ;;  %v98_v46 = vld [vmem:[%s2485_s0 + $0x190] sm:$0xff] }
  0x3f   :  { %1737 = vmatprep.subr.bf16.mxu1 %v1849_v51  ;;  %v1449_v51 = vcombine.low %v91_v40, %v95_v41 }
  0x41   :  { %1674 = vmatpush3.bf16.msra.mxu0 %v1848_v48  ;;  %v99_v48 = vld [vmem:[%s2485_s0 + $0x198] sm:$0xff] }
  0x42   :  { %1738 = vmatpush3.bf16.msra.mxu1 %v1850_v53 }
  0x43   :  { %1009 = vmatmul.mubr.bf16.gmra.mxu0 %v1435_v34  ;;  %v1431_v34 = vcombine.low %v74_v22, %v78_v23 }
  0x44   :  { %1106 = vmatmul.mubr.bf16.gmra.mxu1 %v1437_v35  ;;  %1016 = vmatprep.mubr.bf16.mxu0 %v1444_v36  ;;  %v1433_v35 = vcombine.low %v75_v24, %v79_v25  ;;  %v1440_v36 = vcombine.high %v82_v30, %v86_v31 }
  0x45   :  { %1113 = vmatprep.mubr.bf16.mxu1 %v1446_v37  ;;  %v1442_v37 = vcombine.high %v83_v32, %v87_v33 }
  0x4b   :  { %1017 = vmatmul.mubr.bf16.gmra.mxu0 %v1443_v47  ;;  %v102_v47 = vld [vmem:[%s2485_s0 + $0x1b0] sm:$0xff] }
  0x4c   :  { %1114 = vmatmul.mubr.bf16.gmra.mxu1 %v1445_v49  ;;  %1024 = vmatprep.mubr.bf16.mxu0 %v1452_v50  ;;  %v103_v49 = vld [vmem:[%s2485_s0 + $0x1b8] sm:$0xff]  ;;  %v1447_v50 = vcombine.low %v90_v38, %v94_v39 }
  0x4d   :  { %1121 = vmatprep.mubr.bf16.mxu1 %v1454_v52  ;;  %v1456_v52 = vcombine.high %v98_v46, %v102_v47  ;;  %v1458_v53 = vcombine.high %v99_v48, %v103_v49 }
  0x53   :  { %1025 = vmatmul.mubr.bf16.gmra.mxu0 %v1451_v58  ;;  %v1455_v58 = vcombine.low %v98_v46, %v102_v47 }
  0x54   :  { %1122 = vmatmul.mubr.bf16.gmra.mxu1 %v1453_v59  ;;  %1032 = vmatprep.mubr.bf16.mxu0 %v1460_v60  ;;  %v1457_v59 = vcombine.low %v99_v48, %v103_v49  ;;  %v1464_v60 = vcombine.high %v106_v54, %v110_v55 }
  0x55   :  { %1129 = vmatprep.mubr.bf16.mxu1 %v1462_v61  ;;  %v1466_v61 = vcombine.high %v107_v56, %v111_v57 }
  0x5b   :  { %1033 = vmatmul.mubr.bf16.gmra.mxu0 %v1459_v2 }
  0x5c   :  { %1130 = vmatmul.mubr.bf16.gmra.mxu1 %v1461_v3  ;;  %1170 = vmatprep.mubr.bf16.mxu0 %v1408_v4 }
  0x5d   :  { %1267 = vmatprep.mubr.bf16.mxu1 %v1410_v5 }
  0x63   :  { %1171 = vmatmul.mubr.bf16.vlgmr.msra.gmra.mxu0 %v1407_v10 }
  0x64   :  { %1268 = vmatmul.mubr.bf16.vlgmr.msra.gmra.mxu1 %v1409_v11  ;;  %1178 = vmatprep.mubr.bf16.mxu0 %v1416_v12 }
  0x65   :  { %1275 = vmatprep.mubr.bf16.mxu1 %v1418_v13 }
  0x6b   :  { %1179 = vmatmul.mubr.bf16.gmra.mxu0 %v1415_v18 }
  0x6c   :  { %1276 = vmatmul.mubr.bf16.gmra.mxu1 %v1417_v19  ;;  %1186 = vmatprep.mubr.bf16.mxu0 %v1424_v20 }
  0x6d   :  { %1283 = vmatprep.mubr.bf16.mxu1 %v1426_v21 }
  0x73   :  { %1187 = vmatmul.mubr.bf16.gmra.mxu0 %v1423_v26 }
  0x74   :  { %1284 = vmatmul.mubr.bf16.gmra.mxu1 %v1425_v27  ;;  %1194 = vmatprep.mubr.bf16.mxu0 %v1432_v28 }
  0x75   :  { %1291 = vmatprep.mubr.bf16.mxu1 %v1434_v29 }
  0x7b   :  { %1195 = vmatmul.mubr.bf16.gmra.mxu0 %v1431_v34 }
  0x7c   :  { %1292 = vmatmul.mubr.bf16.gmra.mxu1 %v1433_v35  ;;  %1202 = vmatprep.mubr.bf16.mxu0 %v1440_v36 }
  0x7d   :  { %1299 = vmatprep.mubr.bf16.mxu1 %v1442_v37 }
  0x83   :  { %1203 = vmatmul.mubr.bf16.gmra.mxu0 %v1439_v42 }
  0x84   :  { %1300 = vmatmul.mubr.bf16.gmra.mxu1 %v1441_v43  ;;  %1210 = vmatprep.mubr.bf16.mxu0 %v1448_v44 }
  0x85   :  { %1307 = vmatprep.mubr.bf16.mxu1 %v1450_v45 }
  0x8b   :  { %1211 = vmatmul.mubr.bf16.gmra.mxu0 %v1447_v50 }
  0x8c   :  { %1308 = vmatmul.mubr.bf16.gmra.mxu1 %v1449_v51  ;;  %1218 = vmatprep.mubr.bf16.mxu0 %v1456_v52 }
  0x8d   :  { %1315 = vmatprep.mubr.bf16.mxu1 %v1458_v53 }
  0x93   :  { %1219 = vmatmul.mubr.bf16.gmra.mxu0 %v1455_v58 }
  0x94   :  { %1316 = vmatmul.mubr.bf16.gmra.mxu1 %v1457_v59  ;;  %1226 = vmatprep.mubr.bf16.mxu0 %v1464_v60 }
  0x95   :  { %1323 = vmatprep.mubr.bf16.mxu1 %v1466_v61 }
  0x9b   :  { %1227 = vmatmul.mubr.bf16.gmra.mxu0 %v1463_v62 }
  0x9c   :  { %1324 = vmatmul.mubr.bf16.gmra.mxu1 %v1465_v63 }
  0xe3   :  { %v2250_v0 = vpop.f32.mrf.mxu0 }
  0xe4   :  { %v2252_v1 = vpop.f32.mrf.mxu1 }
  0xe5   :  { %v1548_v2 = vpop.f32.mrf.mxu0 }
  0xe6   :  { %v1612_v3 = vpop.f32.mrf.mxu1  ;;  %v1549_v63 = vadd.f32 %v1548_v2, %v2250_v0 }
  0xe7   :  { %v2254_v4 = vpop.f32.mrf.mxu0 }
  0xe8   :  { %v2256_v5 = vpop.f32.mrf.mxu1 }
  0xe9   :  { %v2258_v6 = vpop.f32.mrf.mxu0 }
  0xea   :  { %v2260_v7 = vpop.f32.mrf.mxu1 }
  0xeb   :  { %v2262_v8 = vpop.f32.mrf.mxu0 }
  0xec   :  { %v2264_v9 = vpop.f32.mrf.mxu1 }
  0xed   :  { %v2266_v10 = vpop.f32.mrf.mxu0 }
  0xee   :  { %v2268_v11 = vpop.f32.mrf.mxu1 }
  0xef   :  { %v2270_v12 = vpop.f32.mrf.mxu0  ;;  %v1619_v2 = vadd.f32 %v2268_v11, %v2264_v9 }
  0xf0   :  { %v2272_v13 = vpop.f32.mrf.mxu1 }
  0xf1   :  { %v2274_v14 = vpop.f32.mrf.mxu0 }
  0xf2   :  { %v2276_v15 = vpop.f32.mrf.mxu1 }
  0xf3   :  { %v2278_v16 = vpop.f32.mrf.mxu0  ;;  %v1622_v9 = vadd.f32 %v2276_v15, %v2272_v13 }
  0xf4   :  { %v2280_v17 = vpop.f32.mrf.mxu1 }
  0xf5   :  { %v2282_v18 = vpop.f32.mrf.mxu0 }
  0xf6   :  { %v2284_v19 = vpop.f32.mrf.mxu1 }
  0xf7   :  { %v2286_v20 = vpop.f32.mrf.mxu0 }
  0xf8   :  { %v2288_v21 = vpop.f32.mrf.mxu1 }
  0xf9   :  { %v2290_v22 = vpop.f32.mrf.mxu0 }
  0xfa   :  { %v2292_v23 = vpop.f32.mrf.mxu1 }
  0xfb   :  { %v2294_v24 = vpop.f32.mrf.mxu0 }
  0xfc   :  { %v2296_v25 = vpop.f32.mrf.mxu1 }
  0xfd   :  { %v2298_v26 = vpop.f32.mrf.mxu0 }
  0xfe   :  { %v2300_v27 = vpop.f32.mrf.mxu1 }
  0xff   :  { %v2302_v28 = vpop.f32.mrf.mxu0 }
 0x100   :  { %v2304_v29 = vpop.f32.mrf.mxu1 }
 0x101   :  { %v2306_v30 = vpop.f32.mrf.mxu0 }
 0x102   :  { %v2308_v31 = vpop.f32.mrf.mxu1 }
 0x103   :  { %v2310_v32 = vpop.f32.mrf.mxu0 }
 0x104   :  { %v2312_v33 = vpop.f32.mrf.mxu1 }
 0x105   :  { %v2314_v34 = vpop.f32.mrf.mxu0 }
 0x106   :  { %v2316_v35 = vpop.f32.mrf.mxu1 }
 0x107   :  { %v2318_v36 = vpop.f32.mrf.mxu0 }
 0x108   :  { %v2320_v37 = vpop.f32.mrf.mxu1 }
 0x109   :  { %v2322_v38 = vpop.f32.mrf.mxu0 }
 0x10a   :  { %v2324_v39 = vpop.f32.mrf.mxu1 }
 0x10b   :  { %v2326_v40 = vpop.f32.mrf.mxu0 }
 0x10c   :  { %v2328_v41 = vpop.f32.mrf.mxu1 }
 0x10d   :  { %v2330_v42 = vpop.f32.mrf.mxu0 }
 0x10e   :  { %v2332_v43 = vpop.f32.mrf.mxu1 }
 0x10f   :  { %v2334_v44 = vpop.f32.mrf.mxu0 }
 0x110   :  { %v2336_v45 = vpop.f32.mrf.mxu1 }
 0x111   :  { %v2338_v46 = vpop.f32.mrf.mxu0 }
 0x112   :  { %v2340_v47 = vpop.f32.mrf.mxu1 }
 0x113   :  { %v2342_v48 = vpop.f32.mrf.mxu0 }
 0x114   :  { %v2344_v49 = vpop.f32.mrf.mxu1 }
 0x115   :  { %2487 = vst [vmem:[#allocation3_spill] sm:$0xff] %v2344_v49  ;;  %v2346_v50 = vpop.f32.mrf.mxu0 }
 0x116   :  { %v2348_v51 = vpop.f32.mrf.mxu1 }
 0x117   :  { %2488 = vst [vmem:[#allocation4_spill] sm:$0xff] %v2348_v51  ;;  %v2350_v52 = vpop.f32.mrf.mxu0 }
 0x118   :  { %2489 = vst [vmem:[#allocation5_spill] sm:$0xff] %v2350_v52  ;;  %v2352_v53 = vpop.f32.mrf.mxu1 }
 0x119   :  { %2490 = vst [vmem:[#allocation6_spill] sm:$0xff] %v2352_v53  ;;  %v2354_v54 = vpop.f32.mrf.mxu0  ;;  %v1613_v53 = vadd.f32 %v1612_v3, %v2252_v1  ;;  %v1555_v1 = vadd.f32 %v2266_v10, %v2262_v8  ;;  %v1558_v8 = vadd.f32 %v2274_v14, %v2270_v12  ;;  %v1625_v12 = vadd.f32 %v2284_v19, %v2280_v17 }
 0x11a   :  { %2491 = vst [vmem:[#allocation7_spill] sm:$0xff] %v2354_v54  ;;  %v2356_v55 = vpop.f32.mrf.mxu1  ;;  %v1628_v17 = vadd.f32 %v2292_v23, %v2288_v21 }
 0x11b   :  { %2492 = vst [vmem:[#allocation8_spill] sm:$0xff] %v2356_v55  ;;  %v2358_v56 = vpop.f32.mrf.mxu0 }
 0x11c   :  { %2493 = vst [vmem:[#allocation9_spill] sm:$0xff] %v2358_v56  ;;  %v2360_v57 = vpop.f32.mrf.mxu1 }
 0x11d   :  { %2494 = vst [vmem:[#allocation10_spill] sm:$0xff] %v2360_v57  ;;  %v2362_v58 = vpop.f32.mrf.mxu0  ;;  %v1076_v57 = vadd.f32 %v1613_v53, %v1549_v63 }
 0x11e   :  { %2495 = vst [vmem:[#allocation11_spill] sm:$0xff] %v2362_v58  ;;  %v2364_v59 = vpop.f32.mrf.mxu1  ;;  %v1552_v58 = vadd.f32 %v2258_v6, %v2254_v4 }
 0x11f   :  { %2496 = vst [vmem:[#allocation12_spill] sm:$0xff] %v2364_v59  ;;  %v2366_v60 = vpop.f32.mrf.mxu0 }
 0x120   :  { %2497 = vst [vmem:[#allocation13_spill] sm:$0xff] %v2366_v60  ;;  %v2368_v61 = vpop.f32.mrf.mxu1  ;;  %v1616_v60 = vadd.f32 %v2260_v7, %v2256_v5 }
 0x121   :  { %2498 = vst [vmem:[#allocation14_spill] sm:$0xff] %v2368_v61  ;;  %v2370_v62 = vpop.f32.mrf.mxu0 }
 0x122   :  { %2499 = vst [vmem:[#allocation15_spill] sm:$0xff] %v2370_v62  ;;  %v2374_v54 = vpop.f32.mrf.mxu1  ;;  %v1079_v53 = vadd.f32 %v1616_v60, %v1552_v58  ;;  %v1087_v60 = vadd.f32 %v1622_v9, %v1558_v8 }
 0x123   :  { %2500 = vst [vmem:[#allocation16_spill] sm:$0xff] %v2374_v54  ;;  %v1675_v55 = vpop.f32.mrf.mxu0 }
 0x124   :  { %v1739_v56 = vpop.f32.mrf.mxu1 }
 0x125   :  { %v1676_v52 = vpop.f32.mrf.mxu0 }
 0x126   :  { %v1677_v59 = vadd.f32 %v1676_v52, %v1675_v55  ;;  %v1740_v61 = vpop.f32.mrf.mxu1  ;;  %v1084_v55 = vadd.f32 %v1619_v2, %v1555_v1 }
 0x127   :  { %v1678_v51 = vpop.f32.mrf.mxu0  ;;  %v1741_v49 = vadd.f32 %v1740_v61, %v1739_v56 }
 0x128   :  { %v1173_v62 = vadd.f32 %v1677_v59, %v1076_v57  ;;  %v1742_v0 = vpop.f32.mrf.mxu1  ;;  %v1561_v59 = vadd.f32 %v2282_v18, %v2278_v16  ;;  %v1564_v16 = vadd.f32 %v2290_v22, %v2286_v20  ;;  %v1631_v20 = vadd.f32 %v2300_v27, %v2296_v25 }
 0x129   :  { %v1679_v3 = vpop.f32.mrf.mxu0  ;;  %v1634_v25 = vadd.f32 %v2308_v31, %v2304_v29 }
 0x12a   :  { %v1270_v63 = vadd.f32 %v1741_v49, %v1173_v62  ;;  %v1680_v54 = vadd.f32 %v1679_v3, %v1678_v51  ;;  %v1743_v4 = vpop.f32.mrf.mxu1  ;;  %v1092_v3 = vadd.f32 %v1625_v12, %v1561_v59 }
 0x12b   :  { %v1681_v6 = vpop.f32.mrf.mxu0  ;;  %v1744_v7 = vadd.f32 %v1743_v4, %v1742_v0 }
 0x12c   :  { %1383 = vst [vmem:[%s2486_s2] sm:$0xff] %v1270_v63  ;;  %v1176_v5 = vadd.f32 %v1680_v54, %v1079_v53  ;;  %v1745_v52 = vpop.f32.mrf.mxu1 }
 0x12d   :  { %v1682_v56 = vpop.f32.mrf.mxu0 }
 0x12e   :  { %v1273_v10 = vadd.f32 %v1744_v7, %v1176_v5  ;;  %v1683_v11 = vadd.f32 %v1682_v56, %v1681_v6  ;;  %v1746_v49 = vpop.f32.mrf.mxu1 }
 0x12f   :  { %v1684_v51 = vpop.f32.mrf.mxu0  ;;  %v1747_v54 = vadd.f32 %v1746_v49, %v1745_v52  ;;  %v1567_v52 = vadd.f32 %v2298_v26, %v2294_v24  ;;  %v1570_v24 = vadd.f32 %v2306_v30, %v2302_v28  ;;  %v1637_v28 = vadd.f32 %v2316_v35, %v2312_v33 }
 0x130   :  { %1384 = vst [vmem:[%s2486_s2 + $0x8] sm:$0xff] %v1273_v10  ;;  %v1181_v57 = vadd.f32 %v1683_v11, %v1084_v55  ;;  %v1748_v58 = vpop.f32.mrf.mxu1  ;;  %v1095_v55 = vadd.f32 %v1628_v17, %v1564_v16  ;;  %v1640_v33 = vadd.f32 %v2324_v39, %v2320_v37 }
 0x131   :  { %v1685_v14 = vpop.f32.mrf.mxu0  ;;  %v1100_v49 = vadd.f32 %v1631_v20, %v1567_v52 }
 0x132   :  { %v1278_v13 = vadd.f32 %v1747_v54, %v1181_v57  ;;  %v1686_v15 = vadd.f32 %v1685_v14, %v1684_v51  ;;  %v1749_v61 = vpop.f32.mrf.mxu1  ;;  %v1573_v14 = vadd.f32 %v2314_v34, %v2310_v32  ;;  %v1576_v32 = vadd.f32 %v2322_v38, %v2318_v36 }
 0x133   :  { %v1687_v62 = vpop.f32.mrf.mxu0  ;;  %v1750_v1 = vadd.f32 %v1749_v61, %v1748_v58  ;;  %v1643_v36 = vadd.f32 %v2332_v43, %v2328_v41  ;;  %v1646_v41 = vadd.f32 %v2340_v47, %v2336_v45 }
 0x134   :  { %1385 = vst [vmem:[%s2486_s2 + $0x10] sm:$0xff] %v1278_v13  ;;  %v1184_v0 = vadd.f32 %v1686_v15, %v1087_v60  ;;  %v1751_v2 = vpop.f32.mrf.mxu1  ;;  %v1103_v60 = vadd.f32 %v1634_v25, %v1570_v24 }
 0x135   :  { %v1688_v53 = vpop.f32.mrf.mxu0 }
 0x136   :  { %v1281_v18 = vadd.f32 %v1750_v1, %v1184_v0  ;;  %v1689_v19 = vadd.f32 %v1688_v53, %v1687_v62  ;;  %v1752_v63 = vpop.f32.mrf.mxu1  ;;  %v1108_v1 = vadd.f32 %v1637_v28, %v1573_v14 }
 0x137   :  { %v1690_v4 = vpop.f32.mrf.mxu0  ;;  %v1753_v5 = vadd.f32 %v1752_v63, %v1751_v2  ;;  %v1111_v63 = vadd.f32 %v1640_v33, %v1576_v32 }
 0x138   :  { %1386 = vst [vmem:[%s2486_s2 + $0x18] sm:$0xff] %v1281_v18  ;;  %v1189_v6 = vadd.f32 %v1689_v19, %v1092_v3  ;;  %v1754_v7 = vpop.f32.mrf.mxu1  ;;  %v1579_v19 = vadd.f32 %v2330_v42, %v2326_v40  ;;  %v1582_v40 = vadd.f32 %v2338_v46, %v2334_v44 }
 0x139   :  { %v1691_v22 = vpop.f32.mrf.mxu0 }
 0x13a   :  { %v1286_v21 = vadd.f32 %v1753_v5, %v1189_v6  ;;  %v1692_v23 = vadd.f32 %v1691_v22, %v1690_v4  ;;  %v1755_v56 = vpop.f32.mrf.mxu1  ;;  %v1116_v20 = vadd.f32 %v1643_v36, %v1579_v19 }
 0x13b   :  { %v1693_v8 = vpop.f32.mrf.mxu0  ;;  %v1756_v10 = vadd.f32 %v1755_v56, %v1754_v7 }
 0x13c   :  { %1387 = vst [vmem:[%s2486_s2 + $0x20] sm:$0xff] %v1286_v21  ;;  %v1192_v9 = vadd.f32 %v1692_v23, %v1095_v55  ;;  %v1757_v11 = vpop.f32.mrf.mxu1 }
 0x13d   :  { %v1694_v51 = vpop.f32.mrf.mxu0 }
 0x13e   :  { %v1289_v26 = vadd.f32 %v1756_v10, %v1192_v9  ;;  %v1695_v27 = vadd.f32 %v1694_v51, %v1693_v8  ;;  %v1758_v57 = vpop.f32.mrf.mxu1  ;;  %v1585_v9 = vadd.f32 %v2346_v50, %v2342_v48  ;;  %v2501_v10 = vld [vmem:[#allocation3_spill] sm:$0xff] }
 0x13f   :  { %v1696_v54 = vpop.f32.mrf.mxu0  ;;  %v1759_v59 = vadd.f32 %v1758_v57, %v1757_v11  ;;  %v2502_v11 = vld [vmem:[#allocation4_spill] sm:$0xff]  ;;  %v2504_v48 = vld [vmem:[#allocation7_spill] sm:$0xff] }
 0x140   :  { %1388 = vst [vmem:[%s2486_s2 + $0x28] sm:$0xff] %v1289_v26  ;;  %v1197_v58 = vadd.f32 %v1695_v27, %v1100_v49  ;;  %v1760_v12 = vpop.f32.mrf.mxu1  ;;  %v1649_v44 = vadd.f32 %v2502_v11, %v2501_v10  ;;  %v1119_v49 = vadd.f32 %v1646_v41, %v1582_v40 }
 0x141   :  { %v1697_v30 = vpop.f32.mrf.mxu0 }
 0x142   :  { %v1294_v29 = vadd.f32 %v1759_v59, %v1197_v58  ;;  %v1698_v31 = vadd.f32 %v1697_v30, %v1696_v54  ;;  %v1761_v13 = vpop.f32.mrf.mxu1  ;;  %v1124_v57 = vadd.f32 %v1649_v44, %v1585_v9  ;;  %v2503_v58 = vld [vmem:[#allocation5_spill] sm:$0xff]  ;;  %v2505_v59 = vld [vmem:[#allocation6_spill] sm:$0xff] }
 0x143   :  { %v1699_v15 = vpop.f32.mrf.mxu0  ;;  %v1762_v62 = vadd.f32 %v1761_v13, %v1760_v12  ;;  %v1588_v50 = vadd.f32 %v2504_v48, %v2503_v58  ;;  %v2506_v12 = vld [vmem:[#allocation8_spill] sm:$0xff] }
 0x144   :  { %1389 = vst [vmem:[%s2486_s2 + $0x30] sm:$0xff] %v1294_v29  ;;  %v1200_v61 = vadd.f32 %v1698_v31, %v1103_v60  ;;  %v1763_v0 = vpop.f32.mrf.mxu1  ;;  %v1652_v14 = vadd.f32 %v2506_v12, %v2505_v59 }
 0x145   :  { %v1700_v2 = vpop.f32.mrf.mxu0 }
 0x146   :  { %v1297_v34 = vadd.f32 %v1762_v62, %v1200_v61  ;;  %v1701_v35 = vadd.f32 %v1700_v2, %v1699_v15  ;;  %v1764_v3 = vpop.f32.mrf.mxu1  ;;  %v2507_v61 = vld [vmem:[#allocation9_spill] sm:$0xff]  ;;  %v2508_v62 = vld [vmem:[#allocation11_spill] sm:$0xff]  ;;  %v2510_v2 = vld [vmem:[#allocation12_spill] sm:$0xff] }
 0x147   :  { %v1702_v53 = vpop.f32.mrf.mxu0  ;;  %v1765_v17 = vadd.f32 %v1764_v3, %v1763_v0  ;;  %v1591_v0 = vadd.f32 %v2508_v62, %v2507_v61 }
 0x148   :  { %1390 = vst [vmem:[%s2486_s2 + $0x38] sm:$0xff] %v1297_v34  ;;  %v1205_v16 = vadd.f32 %v1701_v35, %v1108_v1  ;;  %v1766_v18 = vpop.f32.mrf.mxu1  ;;  %v2509_v1 = vld [vmem:[#allocation10_spill] sm:$0xff]  ;;  %v1127_v34 = vadd.f32 %v1652_v14, %v1588_v50 }
 0x149   :  { %v1703_v38 = vpop.f32.mrf.mxu0  ;;  %v1655_v32 = vadd.f32 %v2510_v2, %v2509_v1 }
 0x14a   :  { %v1302_v37 = vadd.f32 %v1765_v17, %v1205_v16  ;;  %v1704_v39 = vadd.f32 %v1703_v38, %v1702_v53  ;;  %v1767_v4 = vpop.f32.mrf.mxu1 }
 0x14b   :  { %v1705_v6 = vpop.f32.mrf.mxu0  ;;  %v1768_v7 = vadd.f32 %v1767_v4, %v1766_v18  ;;  %v1132_v36 = vadd.f32 %v1655_v32, %v1591_v0  ;;  %v2513_v4 = vld [vmem:[#allocation14_spill] sm:$0xff] }
 0x14c   :  { %1391 = vst [vmem:[%s2486_s2 + $0x40] sm:$0xff] %v1302_v37  ;;  %v1208_v5 = vadd.f32 %v1704_v39, %v1111_v63  ;;  %v1769_v52 = vpop.f32.mrf.mxu1  ;;  %v2511_v63 = vld [vmem:[#allocation13_spill] sm:$0xff]  ;;  %v2512_v37 = vld [vmem:[#allocation15_spill] sm:$0xff] }
 0x14d   :  { %v1706_v22 = vpop.f32.mrf.mxu0  ;;  %v1594_v39 = vadd.f32 %v2512_v37, %v2511_v63 }
 0x14e   :  { %v1305_v42 = vadd.f32 %v1768_v7, %v1208_v5  ;;  %v1707_v43 = vadd.f32 %v1706_v22, %v1705_v6  ;;  %v1770_v55 = vpop.f32.mrf.mxu1  ;;  %v2514_v6 = vld [vmem:[#allocation16_spill] sm:$0xff] }
 0x14f   :  { %v1708_v21 = vpop.f32.mrf.mxu0  ;;  %v1771_v56 = vadd.f32 %v1770_v55, %v1769_v52  ;;  %v1658_v5 = vadd.f32 %v2514_v6, %v2513_v4 }
 0x150   :  { %1392 = vst [vmem:[%s2486_s2 + $0x48] sm:$0xff] %v1305_v42  ;;  %v1213_v23 = vadd.f32 %v1707_v43, %v1116_v20  ;;  %v1772_v8 = vpop.f32.mrf.mxu1 }
 0x151   :  { %v1709_v46 = vpop.f32.mrf.mxu0  ;;  %v1135_v55 = vadd.f32 %v1658_v5, %v1594_v39 }
 0x152   :  { %v1310_v45 = vadd.f32 %v1771_v56, %v1213_v23  ;;  %v1710_v47 = vadd.f32 %v1709_v46, %v1708_v21  ;;  %v1773_v51 = vpop.f32.mrf.mxu1 }
 0x153   :  { %v1711_v24 = vpop.f32.mrf.mxu0  ;;  %v1774_v26 = vadd.f32 %v1773_v51, %v1772_v8 }
 0x154   :  { %1393 = vst [vmem:[%s2486_s2 + $0x50] sm:$0xff] %v1310_v45  ;;  %v1216_v25 = vadd.f32 %v1710_v47, %v1119_v49  ;;  %v1775_v27 = vpop.f32.mrf.mxu1 }
 0x155   :  { %v1712_v54 = vpop.f32.mrf.mxu0 }
 0x156   :  { %v1313_v28 = vadd.f32 %v1774_v26, %v1216_v25  ;;  %v1713_v30 = vadd.f32 %v1712_v54, %v1711_v24  ;;  %v1776_v60 = vpop.f32.mrf.mxu1 }
 0x157   :  { %v1714_v29 = vpop.f32.mrf.mxu0  ;;  %v1777_v13 = vadd.f32 %v1776_v60, %v1775_v27 }
 0x158   :  { %1394 = vst [vmem:[%s2486_s2 + $0x58] sm:$0xff] %v1313_v28  ;;  %v1221_v31 = vadd.f32 %v1713_v30, %v1124_v57  ;;  %v1778_v15 = vpop.f32.mrf.mxu1 }
 0x159   :  { %v1715_v33 = vpop.f32.mrf.mxu0 }
 0x15a   :  { %v1318_v35 = vadd.f32 %v1777_v13, %v1221_v31  ;;  %v1716_v3 = vadd.f32 %v1715_v33, %v1714_v29  ;;  %v1779_v53 = vpop.f32.mrf.mxu1 }
 0x15b   :  { %v1717_v16 = vpop.f32.mrf.mxu0  ;;  %v1780_v18 = vadd.f32 %v1779_v53, %v1778_v15 }
 0x15c   :  { %1395 = vst [vmem:[%s2486_s2 + $0x60] sm:$0xff] %v1318_v35  ;;  %v1224_v17 = vadd.f32 %v1716_v3, %v1127_v34  ;;  %v1781_v19 = vpop.f32.mrf.mxu1 }
 0x15d   :  { %v1718_v38 = vpop.f32.mrf.mxu0 }
 0x15e   :  { %v1321_v7 = vadd.f32 %v1780_v18, %v1224_v17  ;;  %v1719_v52 = vadd.f32 %v1718_v38, %v1717_v16  ;;  %v1782_v20 = vpop.f32.mrf.mxu1 }
 0x15f   :  { %v1720_v22 = vpop.f32.mrf.mxu0  ;;  %v1783_v41 = vadd.f32 %v1782_v20, %v1781_v19 }
 0x160   :  { %1396 = vst [vmem:[%s2486_s2 + $0x68] sm:$0xff] %v1321_v7  ;;  %v1229_v40 = vadd.f32 %v1719_v52, %v1132_v36  ;;  %v1784_v42 = vpop.f32.mrf.mxu1 }
 0x161   :  { %v1721_v43 = vpop.f32.mrf.mxu0 }
 0x162   :  { %v1326_v21 = vadd.f32 %v1783_v41, %v1229_v40  ;;  %v1722_v23 = vadd.f32 %v1721_v43, %v1720_v22  ;;  %v1785_v56 = vpop.f32.mrf.mxu1 }
 0x163   :  { %v1786_v9 = vadd.f32 %v1785_v56, %v1784_v42 }
 0x164   :  { %1397 = vst [vmem:[%s2486_s2 + $0x70] sm:$0xff] %v1326_v21  ;;  %v1232_v8 = vadd.f32 %v1722_v23, %v1135_v55 }
 0x166   :  { %v1329_v10 = vadd.f32 %v1786_v9, %v1232_v8 }
 0x168   :  { %1398 = vst [vmem:[%s2486_s2 + $0x78] sm:$0xff] %v1329_v10 }

// kernel: forward.41
= control target key start
LH: loop header
LB: loop body
LE: loop exit
PB: predicated region body
PF: predicated region fallthrough
CT: control target
= control target key end

     0   :  { %v105_v0 = vmov 0.0   ;;  %s187_s1 = inlined_call_operand.vmem [shape: f32[1,128], index: 1, kind: output, shape index: {0}]   ;;  %s188_s2 = inlined_call_operand.vmem [shape: f32[1,128], index: 2, kind: output, shape index: {1}]   ;;  %s189_s0 = inlined_call_operand.vmem [shape: f32[128,128], index: 0, kind: input, shape index: {}]  }
   0x1   :  { %14 = vst [vmem:[%s187_s1] sm:$0x1] %v105_v0  ;;  %15 = vst [vmem:[%s188_s2] sm:$0x1] %v105_v0  ;;  %v16_v1 = vld [vmem:[%s189_s0] sm:$0xff]  ;;  %v17_v2 = vld [vmem:[%s189_s0 + $0x8] sm:$0xff] }
   0x2   :  { %v18_v3 = vld [vmem:[%s189_s0 + $0x10] sm:$0xff]  ;;  %v19_v4 = vld [vmem:[%s189_s0 + $0x18] sm:$0xff]  ;;  %v33_v5 = vadd.f32 %v17_v2, %v16_v1  ;;  %v57_v6 = vmul.f32 %v16_v1, %v16_v1  ;;  %v58_v7 = vmul.f32 %v17_v2, %v17_v2  ;;  %v20_v9 = vld [vmem:[%s189_s0 + $0x20] sm:$0xff] }
   0x3   :  { %v59_v8 = vmul.f32 %v18_v3, %v18_v3  ;;  %v60_v11 = vmul.f32 %v19_v4, %v19_v4  ;;  %v21_v13 = vld [vmem:[%s189_s0 + $0x28] sm:$0xff]  ;;  %v61_v15 = vmul.f32 %v20_v9, %v20_v9  ;;  %v22_v17 = vld [vmem:[%s189_s0 + $0x30] sm:$0xff]  ;;  %v23_v21 = vld [vmem:[%s189_s0 + $0x38] sm:$0xff] }
   0x4   :  { %v34_v10 = vadd.f32 %v33_v5, %v18_v3  ;;  %v73_v12 = vadd.f32 %v58_v7, %v57_v6  ;;  %v62_v19 = vmul.f32 %v21_v13, %v21_v13  ;;  %v63_v23 = vmul.f32 %v22_v17, %v22_v17  ;;  %v24_v25 = vld [vmem:[%s189_s0 + $0x40] sm:$0xff]  ;;  %v25_v29 = vld [vmem:[%s189_s0 + $0x48] sm:$0xff]  ;;  %v26_v33 = vld [vmem:[%s189_s0 + $0x50] sm:$0xff] }
   0x5   :  { %v64_v27 = vmul.f32 %v23_v21, %v23_v21  ;;  %v65_v31 = vmul.f32 %v24_v25, %v24_v25  ;;  %v66_v35 = vmul.f32 %v25_v29, %v25_v29  ;;  %v27_v37 = vld [vmem:[%s189_s0 + $0x58] sm:$0xff]  ;;  %v67_v39 = vmul.f32 %v26_v33, %v26_v33  ;;  %v28_v41 = vld [vmem:[%s189_s0 + $0x60] sm:$0xff]  ;;  %v29_v45 = vld [vmem:[%s189_s0 + $0x68] sm:$0xff] }
   0x6   :  { %v35_v14 = vadd.f32 %v34_v10, %v19_v4  ;;  %v74_v16 = vadd.f32 %v73_v12, %v59_v8  ;;  %v68_v43 = vmul.f32 %v27_v37, %v27_v37  ;;  %v69_v47 = vmul.f32 %v28_v41, %v28_v41  ;;  %v30_v49 = vld [vmem:[%s189_s0 + $0x70] sm:$0xff]  ;;  %v31_v53 = vld [vmem:[%s189_s0 + $0x78] sm:$0xff] }
   0x7   :  { %v70_v51 = vmul.f32 %v29_v45, %v29_v45  ;;  %v71_v55 = vmul.f32 %v30_v49, %v30_v49  ;;  %v72_v58 = vmul.f32 %v31_v53, %v31_v53 }
   0x8   :  { %v36_v18 = vadd.f32 %v35_v14, %v20_v9  ;;  %v75_v20 = vadd.f32 %v74_v16, %v60_v11  ;;  %v32_v7 = vld [vmem:[%s187_s1] sm:$0x1] }
   0x9   :  { %v56_v12 = vld [vmem:[%s188_s2] sm:$0x1] }
   0xa   :  { %v37_v22 = vadd.f32 %v36_v18, %v21_v13  ;;  %v76_v24 = vadd.f32 %v75_v20, %v61_v15 }
   0xc   :  { %v38_v26 = vadd.f32 %v37_v22, %v22_v17  ;;  %v77_v28 = vadd.f32 %v76_v24, %v62_v19 }
   0xe   :  { %v39_v30 = vadd.f32 %v38_v26, %v23_v21  ;;  %v78_v32 = vadd.f32 %v77_v28, %v63_v23 }
  0x10   :  { %v40_v34 = vadd.f32 %v39_v30, %v24_v25  ;;  %v79_v36 = vadd.f32 %v78_v32, %v64_v27 }
  0x12   :  { %v41_v38 = vadd.f32 %v40_v34, %v25_v29  ;;  %v80_v40 = vadd.f32 %v79_v36, %v65_v31 }
  0x14   :  { %v42_v42 = vadd.f32 %v41_v38, %v26_v33  ;;  %v81_v44 = vadd.f32 %v80_v40, %v66_v35 }
  0x16   :  { %v43_v46 = vadd.f32 %v42_v42, %v27_v37  ;;  %v82_v48 = vadd.f32 %v81_v44, %v67_v39 }
  0x18   :  { %v44_v50 = vadd.f32 %v43_v46, %v28_v41  ;;  %v83_v52 = vadd.f32 %v82_v48, %v68_v43 }
  0x1a   :  { %v45_v54 = vadd.f32 %v44_v50, %v29_v45  ;;  %v84_v56 = vadd.f32 %v83_v52, %v69_v47 }
  0x1c   :  { %v46_v57 = vadd.f32 %v45_v54, %v30_v49  ;;  %v85_v59 = vadd.f32 %v84_v56, %v70_v51 }
  0x1e   :  { %v47_v60 = vadd.f32 %v46_v57, %v31_v53  ;;  %v86_v61 = vadd.f32 %v85_v59, %v71_v55 }
  0x20   :  { %v48_v62 = vrot.slane %v47_v60, 4  ;;  %v87_v63 = vadd.f32 %v86_v61, %v72_v58 }
  0x22   :  { %v49_v0 = vadd.f32 %v48_v62, %v47_v60  ;;  %v88_v1 = vrot.slane %v87_v63, 4 }
  0x24   :  { %v50_v2 = vrot.slane %v49_v0, 2  ;;  %v89_v3 = vadd.f32 %v88_v1, %v87_v63 }
  0x26   :  { %v51_v4 = vadd.f32 %v50_v2, %v49_v0  ;;  %v90_v5 = vrot.slane %v89_v3, 2 }
  0x28   :  { %v52_v6 = vrot.slane %v51_v4, 1  ;;  %v91_v8 = vadd.f32 %v90_v5, %v89_v3 }
  0x2a   :  { %v53_v9 = vadd.f32 %v52_v6, %v51_v4  ;;  %v92_v10 = vrot.slane %v91_v8, 1 }
  0x2c   :  { %v54_v11 = vadd.f32 %v53_v9, %v32_v7  ;;  %v93_v13 = vadd.f32 %v92_v10, %v91_v8 }
  0x2e   :  { %55 = vst [vmem:[%s187_s1] sm:$0x1] %v54_v11  ;;  %v94_v14 = vadd.f32 %v93_v13, %v56_v12 }
  0x30   :  { %95 = vst [vmem:[%s188_s2] sm:$0x1] %v94_v14 }

// kernel: forward.42
= control target key start
LH: loop header
LB: loop body
LE: loop exit
PB: predicated region body
PF: predicated region fallthrough
CT: control target
= control target key end

     0   :  { %s305_s0 = inlined_call_operand.vmem [shape: f32[128,128], index: 0, kind: input, shape index: {}]   ;;  %s306_s1 = inlined_call_operand.vmem [shape: f32[1,128], index: 1, kind: input, shape index: {}]   ;;  %s307_s2 = inlined_call_operand.vmem [shape: f32[1,128], index: 2, kind: input, shape index: {}]   ;;  %s308_s3 = inlined_call_operand.vmem [shape: f32[128,128], index: 3, kind: output, shape index: {}]  }
   0x1   :  { %v14_v0 = vld [vmem:[%s305_s0] sm:$0xff]  ;;  %v15_v4 = vld [vmem:[%s305_s0 + $0x8] sm:$0xff]  ;;  %v16_v5 = vld [vmem:[%s305_s0 + $0x10] sm:$0xff] }
   0x2   :  { %v172_v1 = vld [vmem:[%s306_s1] ss:$0 sm:$0xff]  ;;  %v17_v6 = vld [vmem:[%s305_s0 + $0x18] sm:$0xff]  ;;  %v19_v11 = vld [vmem:[%s305_s0 + $0x28] sm:$0xff] }
   0x3   :  { %v177_v2 = vld [vmem:[%s307_s2] ss:$0 sm:$0xff]  ;;  %v37_v3 = vmul.f32 %v172_v1, %v14_v0  ;;  %v38_v7 = vmul.f32 %v172_v1, %v15_v4  ;;  %v39_v8 = vmul.f32 %v172_v1, %v16_v5  ;;  %v40_v9 = vmul.f32 %v172_v1, %v17_v6  ;;  %v20_v12 = vld [vmem:[%s305_s0 + $0x30] sm:$0xff]  ;;  %v21_v17 = vld [vmem:[%s305_s0 + $0x38] sm:$0xff] }
   0x4   :  { %v18_v10 = vld [vmem:[%s305_s0 + $0x20] sm:$0xff]  ;;  %v42_v15 = vmul.f32 %v172_v1, %v19_v11  ;;  %v43_v16 = vmul.f32 %v172_v1, %v20_v12  ;;  %v44_v21 = vmul.f32 %v172_v1, %v21_v17  ;;  %v23_v30 = vld [vmem:[%s305_s0 + $0x48] sm:$0xff]  ;;  %v24_v31 = vld [vmem:[%s305_s0 + $0x50] sm:$0xff] }
   0x5   :  { %v60_v13 = vadd.f32 %v177_v2, %v37_v3  ;;  %v41_v14 = vmul.f32 %v172_v1, %v18_v10  ;;  %v61_v18 = vadd.f32 %v177_v2, %v38_v7  ;;  %v62_v19 = vadd.f32 %v177_v2, %v39_v8  ;;  %v22_v25 = vld [vmem:[%s305_s0 + $0x40] sm:$0xff]  ;;  %v25_v43 = vld [vmem:[%s305_s0 + $0x58] sm:$0xff]  ;;  %v27_v45 = vld [vmem:[%s305_s0 + $0x68] sm:$0xff] }
   0x6   :  { %v63_v20 = vadd.f32 %v177_v2, %v40_v9  ;;  %v65_v24 = vadd.f32 %v177_v2, %v42_v15  ;;  %v66_v37 = vadd.f32 %v177_v2, %v43_v16  ;;  %v67_v38 = vadd.f32 %v177_v2, %v44_v21  ;;  %v26_v44 = vld [vmem:[%s305_s0 + $0x60] sm:$0xff]  ;;  %v28_v56 = vld [vmem:[%s305_s0 + $0x70] sm:$0xff]  ;;  %v29_v4 = vld [vmem:[%s305_s0 + $0x78] sm:$0xff] }
   0x7   :  { %vm76_vm0 = vcmp.ge.f32.partialorder %v60_v13, 0.0  ;;  %v92_v22 = vmul.f32 0.2, %v60_v13  ;;  %v64_v23 = vadd.f32 %v177_v2, %v41_v14  ;;  %vm77_vm1 = vcmp.ge.f32.partialorder %v61_v18, 0.0 }
   0x8   :  { %v93_v26 = vmul.f32 0.2, %v61_v18  ;;  %vm78_vm2 = vcmp.ge.f32.partialorder %v62_v19, 0.0  ;;  %v94_v27 = vmul.f32 0.2, %v62_v19  ;;  %vm79_vm3 = vcmp.ge.f32.partialorder %v63_v20, 0.0 }
   0x9   :  { %v108_v28 = vsel %vm76_vm0, %v60_v13, %v92_v22  ;;  %v95_v29 = vmul.f32 0.2, %v63_v20  ;;  %vm80_vm4 = vcmp.ge.f32.partialorder %v64_v23, 0.0  ;;  %v96_v34 = vmul.f32 0.2, %v64_v23 }
   0xa   :  { %124 = vst [vmem:[%s308_s3] sm:$0xff] %v108_v28  ;;  %v109_v32 = vsel %vm77_vm1, %v61_v18, %v93_v26  ;;  %v110_v33 = vsel %vm78_vm2, %v62_v19, %v94_v27  ;;  %vm81_vm5 = vcmp.ge.f32.partialorder %v65_v24, 0.0  ;;  %v97_v36 = vmul.f32 0.2, %v65_v24 }
   0xb   :  { %125 = vst [vmem:[%s308_s3 + $0x8] sm:$0xff] %v109_v32  ;;  %126 = vst [vmem:[%s308_s3 + $0x10] sm:$0xff] %v110_v33  ;;  %v111_v35 = vsel %vm79_vm3, %v63_v20, %v95_v29  ;;  %v112_v39 = vsel %vm80_vm4, %v64_v23, %v96_v34  ;;  %v45_v40 = vmul.f32 %v172_v1, %v22_v25  ;;  %vm82_vm6 = vcmp.ge.f32.partialorder %v66_v37, 0.0 }
   0xc   :  { %127 = vst [vmem:[%s308_s3 + $0x18] sm:$0xff] %v111_v35  ;;  %v46_v41 = vmul.f32 %v172_v1, %v23_v30  ;;  %v47_v42 = vmul.f32 %v172_v1, %v24_v31  ;;  %128 = vst [vmem:[%s308_s3 + $0x20] sm:$0xff] %v112_v39  ;;  %v113_v46 = vsel %vm81_vm5, %v65_v24, %v97_v36  ;;  %v98_v47 = vmul.f32 0.2, %v66_v37 }
   0xd   :  { %vm83_vm7 = vcmp.ge.f32.partialorder %v67_v38, 0.0  ;;  %129 = vst [vmem:[%s308_s3 + $0x28] sm:$0xff] %v113_v46  ;;  %v99_v48 = vmul.f32 0.2, %v67_v38  ;;  %v68_v49 = vadd.f32 %v177_v2, %v45_v40  ;;  %v48_v53 = vmul.f32 %v172_v1, %v25_v43 }
   0xe   :  { %v69_v50 = vadd.f32 %v177_v2, %v46_v41  ;;  %v70_v51 = vadd.f32 %v177_v2, %v47_v42  ;;  %v114_v52 = vsel %vm82_vm6, %v66_v37, %v98_v47  ;;  %v49_v54 = vmul.f32 %v172_v1, %v26_v44 }
   0xf   :  { %v50_v55 = vmul.f32 %v172_v1, %v27_v45  ;;  %130 = vst [vmem:[%s308_s3 + $0x30] sm:$0xff] %v114_v52  ;;  %v115_v57 = vsel %vm83_vm7, %v67_v38, %v99_v48  ;;  %vm84_vm8 = vcmp.ge.f32.partialorder %v68_v49, 0.0  ;;  %v100_v58 = vmul.f32 0.2, %v68_v49 }
  0x10   :  { %vm85_vm9 = vcmp.ge.f32.partialorder %v69_v50, 0.0  ;;  %131 = vst [vmem:[%s308_s3 + $0x38] sm:$0xff] %v115_v57  ;;  %v101_v59 = vmul.f32 0.2, %v69_v50  ;;  %vm86_vm10 = vcmp.ge.f32.partialorder %v70_v51, 0.0  ;;  %v71_v61 = vadd.f32 %v177_v2, %v48_v53 }
  0x11   :  { %v102_v60 = vmul.f32 0.2, %v70_v51  ;;  %v116_v62 = vsel %vm84_vm8, %v68_v49, %v100_v58  ;;  %v72_v63 = vadd.f32 %v177_v2, %v49_v54  ;;  %v73_v0 = vadd.f32 %v177_v2, %v50_v55 }
  0x12   :  { %v51_v3 = vmul.f32 %v172_v1, %v28_v56  ;;  %132 = vst [vmem:[%s308_s3 + $0x40] sm:$0xff] %v116_v62  ;;  %v117_v5 = vsel %vm85_vm9, %v69_v50, %v101_v59  ;;  %vm87_vm11 = vcmp.ge.f32.partialorder %v71_v61, 0.0  ;;  %v103_v7 = vmul.f32 0.2, %v71_v61 }
  0x13   :  { %v118_v6 = vsel %vm86_vm10, %v70_v51, %v102_v60  ;;  %133 = vst [vmem:[%s308_s3 + $0x48] sm:$0xff] %v117_v5  ;;  %vm88_vm12 = vcmp.ge.f32.partialorder %v72_v63, 0.0  ;;  %v104_v8 = vmul.f32 0.2, %v72_v63  ;;  %vm89_vm13 = vcmp.ge.f32.partialorder %v73_v0, 0.0 }
  0x14   :  { %134 = vst [vmem:[%s308_s3 + $0x50] sm:$0xff] %v118_v6  ;;  %v105_v9 = vmul.f32 0.2, %v73_v0  ;;  %v119_v10 = vsel %vm87_vm11, %v71_v61, %v103_v7  ;;  %v74_v11 = vadd.f32 %v177_v2, %v51_v3  ;;  %v52_v12 = vmul.f32 %v172_v1, %v29_v4 }
  0x15   :  { %135 = vst [vmem:[%s308_s3 + $0x58] sm:$0xff] %v119_v10  ;;  %v120_v13 = vsel %vm88_vm12, %v72_v63, %v104_v8 }
  0x16   :  { %v121_v14 = vsel %vm89_vm13, %v73_v0, %v105_v9  ;;  %136 = vst [vmem:[%s308_s3 + $0x60] sm:$0xff] %v120_v13  ;;  %vm90_vm14 = vcmp.ge.f32.partialorder %v74_v11, 0.0  ;;  %v106_v15 = vmul.f32 0.2, %v74_v11  ;;  %v75_v16 = vadd.f32 %v177_v2, %v52_v12 }
  0x17   :  { %137 = vst [vmem:[%s308_s3 + $0x68] sm:$0xff] %v121_v14 }
  0x18   :  { %v122_v17 = vsel %vm90_vm14, %v74_v11, %v106_v15  ;;  %vm91_vm15 = vcmp.ge.f32.partialorder %v75_v16, 0.0  ;;  %v107_v1 = vmul.f32 0.2, %v75_v16 }
  0x19   :  { %138 = vst [vmem:[%s308_s3 + $0x70] sm:$0xff] %v122_v17 }
  0x1a   :  { %v123_v18 = vsel %vm91_vm15, %v75_v16, %v107_v1 }
  0x1b   :  { %139 = vst [vmem:[%s308_s3 + $0x78] sm:$0xff] %v123_v18 }

// kernel: forward.44
= control target key start
LH: loop header
LB: loop body
LE: loop exit
PB: predicated region body
PF: predicated region fallthrough
CT: control target
= control target key end

     0   :  { %s254_s0 = inlined_call_operand.vmem [shape: f32[128,128], index: 0, kind: input, shape index: {}]   ;;  %s255_s1 = inlined_call_operand.vmem [shape: f32[1,128], index: 1, kind: input, shape index: {}]   ;;  %s256_s2 = inlined_call_operand.vmem [shape: f32[1,128], index: 2, kind: input, shape index: {}]   ;;  %s257_s3 = inlined_call_operand.vmem [shape: f32[128,128], index: 3, kind: output, shape index: {}]  }
   0x1   :  { %v14_v0 = vld [vmem:[%s254_s0] sm:$0xff]  ;;  %v15_v4 = vld [vmem:[%s254_s0 + $0x8] sm:$0xff]  ;;  %v16_v5 = vld [vmem:[%s254_s0 + $0x10] sm:$0xff] }
   0x2   :  { %v112_v1 = vld [vmem:[%s255_s1] ss:$0 sm:$0xff]  ;;  %v17_v6 = vld [vmem:[%s254_s0 + $0x18] sm:$0xff]  ;;  %v19_v11 = vld [vmem:[%s254_s0 + $0x28] sm:$0xff] }
   0x3   :  { %v143_v2 = vld [vmem:[%s256_s2] ss:$0 sm:$0xff]  ;;  %v37_v3 = vmul.f32 %v112_v1, %v14_v0  ;;  %v38_v7 = vmul.f32 %v112_v1, %v15_v4  ;;  %v39_v8 = vmul.f32 %v112_v1, %v16_v5  ;;  %v40_v9 = vmul.f32 %v112_v1, %v17_v6  ;;  %v20_v12 = vld [vmem:[%s254_s0 + $0x30] sm:$0xff]  ;;  %v21_v17 = vld [vmem:[%s254_s0 + $0x38] sm:$0xff] }
   0x4   :  { %v18_v10 = vld [vmem:[%s254_s0 + $0x20] sm:$0xff]  ;;  %v42_v15 = vmul.f32 %v112_v1, %v19_v11  ;;  %v43_v16 = vmul.f32 %v112_v1, %v20_v12  ;;  %v44_v21 = vmul.f32 %v112_v1, %v21_v17  ;;  %v23_v27 = vld [vmem:[%s254_s0 + $0x48] sm:$0xff]  ;;  %v24_v28 = vld [vmem:[%s254_s0 + $0x50] sm:$0xff] }
   0x5   :  { %v60_v13 = vadd.f32 %v143_v2, %v37_v3  ;;  %v41_v14 = vmul.f32 %v112_v1, %v18_v10  ;;  %v61_v18 = vadd.f32 %v143_v2, %v38_v7  ;;  %v62_v19 = vadd.f32 %v143_v2, %v39_v8  ;;  %v22_v22 = vld [vmem:[%s254_s0 + $0x40] sm:$0xff]  ;;  %v25_v29 = vld [vmem:[%s254_s0 + $0x58] sm:$0xff]  ;;  %v27_v35 = vld [vmem:[%s254_s0 + $0x68] sm:$0xff] }
   0x6   :  { %v63_v20 = vadd.f32 %v143_v2, %v40_v9  ;;  %v65_v25 = vadd.f32 %v143_v2, %v42_v15  ;;  %v66_v26 = vadd.f32 %v143_v2, %v43_v16  ;;  %v67_v33 = vadd.f32 %v143_v2, %v44_v21  ;;  %v26_v34 = vld [vmem:[%s254_s0 + $0x60] sm:$0xff]  ;;  %v28_v36 = vld [vmem:[%s254_s0 + $0x70] sm:$0xff]  ;;  %v29_v41 = vld [vmem:[%s254_s0 + $0x78] sm:$0xff] }
   0x7   :  { %v76_v23 = vmax.f32 %v60_v13, 0.0  ;;  %v64_v24 = vadd.f32 %v143_v2, %v41_v14  ;;  %v77_v30 = vmax.f32 %v61_v18, 0.0  ;;  %v78_v31 = vmax.f32 %v62_v19, 0.0 }
   0x8   :  { %v79_v32 = vmax.f32 %v63_v20, 0.0  ;;  %v81_v38 = vmax.f32 %v65_v25, 0.0  ;;  %v82_v39 = vmax.f32 %v66_v26, 0.0  ;;  %v45_v40 = vmul.f32 %v112_v1, %v22_v22 }
   0x9   :  { %92 = vst [vmem:[%s257_s3] sm:$0xff] %v76_v23  ;;  %v80_v37 = vmax.f32 %v64_v24, 0.0  ;;  %93 = vst [vmem:[%s257_s3 + $0x8] sm:$0xff] %v77_v30  ;;  %v83_v42 = vmax.f32 %v67_v33, 0.0  ;;  %v46_v43 = vmul.f32 %v112_v1, %v23_v27  ;;  %v47_v44 = vmul.f32 %v112_v1, %v24_v28 }
   0xa   :  { %94 = vst [vmem:[%s257_s3 + $0x10] sm:$0xff] %v78_v31  ;;  %95 = vst [vmem:[%s257_s3 + $0x18] sm:$0xff] %v79_v32  ;;  %v48_v45 = vmul.f32 %v112_v1, %v25_v29  ;;  %v68_v46 = vadd.f32 %v143_v2, %v45_v40  ;;  %v49_v47 = vmul.f32 %v112_v1, %v26_v34 }
   0xb   :  { %96 = vst [vmem:[%s257_s3 + $0x20] sm:$0xff] %v80_v37  ;;  %97 = vst [vmem:[%s257_s3 + $0x28] sm:$0xff] %v81_v38  ;;  %v50_v48 = vmul.f32 %v112_v1, %v27_v35  ;;  %v51_v49 = vmul.f32 %v112_v1, %v28_v36  ;;  %v69_v50 = vadd.f32 %v143_v2, %v46_v43 }
   0xc   :  { %98 = vst [vmem:[%s257_s3 + $0x30] sm:$0xff] %v82_v39  ;;  %99 = vst [vmem:[%s257_s3 + $0x38] sm:$0xff] %v83_v42  ;;  %v70_v51 = vadd.f32 %v143_v2, %v47_v44  ;;  %v71_v52 = vadd.f32 %v143_v2, %v48_v45  ;;  %v52_v53 = vmul.f32 %v112_v1, %v29_v41  ;;  %v84_v54 = vmax.f32 %v68_v46, 0.0 }
   0xd   :  { %v72_v55 = vadd.f32 %v143_v2, %v49_v47  ;;  %v73_v56 = vadd.f32 %v143_v2, %v50_v48  ;;  %v74_v57 = vadd.f32 %v143_v2, %v51_v49  ;;  %v85_v58 = vmax.f32 %v69_v50, 0.0 }
   0xe   :  { %v86_v59 = vmax.f32 %v70_v51, 0.0  ;;  %v87_v60 = vmax.f32 %v71_v52, 0.0  ;;  %v75_v61 = vadd.f32 %v143_v2, %v52_v53  ;;  %100 = vst [vmem:[%s257_s3 + $0x40] sm:$0xff] %v84_v54 }
   0xf   :  { %v88_v62 = vmax.f32 %v72_v55, 0.0  ;;  %v89_v63 = vmax.f32 %v73_v56, 0.0  ;;  %v90_v0 = vmax.f32 %v74_v57, 0.0  ;;  %101 = vst [vmem:[%s257_s3 + $0x48] sm:$0xff] %v85_v58 }
  0x10   :  { %102 = vst [vmem:[%s257_s3 + $0x50] sm:$0xff] %v86_v59  ;;  %103 = vst [vmem:[%s257_s3 + $0x58] sm:$0xff] %v87_v60  ;;  %v91_v1 = vmax.f32 %v75_v61, 0.0 }
  0x11   :  { %104 = vst [vmem:[%s257_s3 + $0x60] sm:$0xff] %v88_v62  ;;  %105 = vst [vmem:[%s257_s3 + $0x68] sm:$0xff] %v89_v63 }
  0x12   :  { %106 = vst [vmem:[%s257_s3 + $0x70] sm:$0xff] %v90_v0  ;;  %107 = vst [vmem:[%s257_s3 + $0x78] sm:$0xff] %v91_v1 }

// kernel: forward.50
= control target key start
LH: loop header
LB: loop body
LE: loop exit
PB: predicated region body
PF: predicated region fallthrough
CT: control target
= control target key end

     0   :  { %s480_s0 = inlined_call_operand.vmem [shape: f32[256,128], index: 0, kind: input, shape index: {}]   ;;  %s481_s1 = inlined_call_operand.vmem [shape: f32[1,128], index: 1, kind: input, shape index: {}]   ;;  %s482_s2 = inlined_call_operand.vmem [shape: f32[1,128], index: 2, kind: input, shape index: {}]   ;;  %s483_s3 = inlined_call_operand.vmem [shape: f32[256,128], index: 3, kind: output, shape index: {}]  }
   0x1   :  { %v14_v0 = vld [vmem:[%s480_s0] sm:$0xff]  ;;  %v15_v4 = vld [vmem:[%s480_s0 + $0x8] sm:$0xff]  ;;  %v16_v5 = vld [vmem:[%s480_s0 + $0x10] sm:$0xff] }
   0x2   :  { %v220_v1 = vld [vmem:[%s481_s1] ss:$0 sm:$0xff]  ;;  %v17_v6 = vld [vmem:[%s480_s0 + $0x18] sm:$0xff]  ;;  %v19_v11 = vld [vmem:[%s480_s0 + $0x28] sm:$0xff] }
   0x3   :  { %v225_v2 = vld [vmem:[%s482_s2] ss:$0 sm:$0xff]  ;;  %v53_v3 = vmul.f32 %v220_v1, %v14_v0  ;;  %v54_v7 = vmul.f32 %v220_v1, %v15_v4  ;;  %v55_v8 = vmul.f32 %v220_v1, %v16_v5  ;;  %v56_v9 = vmul.f32 %v220_v1, %v17_v6  ;;  %v20_v12 = vld [vmem:[%s480_s0 + $0x30] sm:$0xff]  ;;  %v21_v17 = vld [vmem:[%s480_s0 + $0x38] sm:$0xff] }
   0x4   :  { %v18_v10 = vld [vmem:[%s480_s0 + $0x20] sm:$0xff]  ;;  %v58_v15 = vmul.f32 %v220_v1, %v19_v11  ;;  %v59_v16 = vmul.f32 %v220_v1, %v20_v12  ;;  %v60_v21 = vmul.f32 %v220_v1, %v21_v17  ;;  %v23_v27 = vld [vmem:[%s480_s0 + $0x48] sm:$0xff]  ;;  %v24_v28 = vld [vmem:[%s480_s0 + $0x50] sm:$0xff] }
   0x5   :  { %v92_v13 = vadd.f32 %v225_v2, %v53_v3  ;;  %v57_v14 = vmul.f32 %v220_v1, %v18_v10  ;;  %v93_v18 = vadd.f32 %v225_v2, %v54_v7  ;;  %v94_v19 = vadd.f32 %v225_v2, %v55_v8  ;;  %v22_v22 = vld [vmem:[%s480_s0 + $0x40] sm:$0xff]  ;;  %v25_v29 = vld [vmem:[%s480_s0 + $0x58] sm:$0xff]  ;;  %v27_v35 = vld [vmem:[%s480_s0 + $0x68] sm:$0xff] }
   0x6   :  { %v95_v20 = vadd.f32 %v225_v2, %v56_v9  ;;  %v97_v25 = vadd.f32 %v225_v2, %v58_v15  ;;  %v98_v26 = vadd.f32 %v225_v2, %v59_v16  ;;  %v99_v33 = vadd.f32 %v225_v2, %v60_v21  ;;  %v26_v34 = vld [vmem:[%s480_s0 + $0x60] sm:$0xff]  ;;  %v28_v36 = vld [vmem:[%s480_s0 + $0x70] sm:$0xff]  ;;  %v29_v41 = vld [vmem:[%s480_s0 + $0x78] sm:$0xff] }
   0x7   :  { %v124_v23 = vmax.f32 %v92_v13, 0.0  ;;  %v96_v24 = vadd.f32 %v225_v2, %v57_v14  ;;  %v125_v30 = vmax.f32 %v93_v18, 0.0  ;;  %v126_v31 = vmax.f32 %v94_v19, 0.0  ;;  %v30_v54 = vld [vmem:[%s480_s0 + $0x80] sm:$0xff]  ;;  %v31_v59 = vld [vmem:[%s480_s0 + $0x88] sm:$0xff]  ;;  %v32_v60 = vld [vmem:[%s480_s0 + $0x90] sm:$0xff] }
   0x8   :  { %v127_v32 = vmax.f32 %v95_v20, 0.0  ;;  %v129_v38 = vmax.f32 %v97_v25, 0.0  ;;  %v130_v39 = vmax.f32 %v98_v26, 0.0  ;;  %v61_v40 = vmul.f32 %v220_v1, %v22_v22  ;;  %v33_v61 = vld [vmem:[%s480_s0 + $0x98] sm:$0xff]  ;;  %v34_v4 = vld [vmem:[%s480_s0 + $0xa0] sm:$0xff]  ;;  %v35_v5 = vld [vmem:[%s480_s0 + $0xa8] sm:$0xff] }
   0x9   :  { %156 = vst [vmem:[%s483_s3] sm:$0xff] %v124_v23  ;;  %v128_v37 = vmax.f32 %v96_v24, 0.0  ;;  %157 = vst [vmem:[%s483_s3 + $0x8] sm:$0xff] %v125_v30  ;;  %v131_v42 = vmax.f32 %v99_v33, 0.0  ;;  %v62_v43 = vmul.f32 %v220_v1, %v23_v27  ;;  %v63_v44 = vmul.f32 %v220_v1, %v24_v28  ;;  %v36_v6 = vld [vmem:[%s480_s0 + $0xb0] sm:$0xff]  ;;  %v37_v11 = vld [vmem:[%s480_s0 + $0xb8] sm:$0xff] }
   0xa   :  { %158 = vst [vmem:[%s483_s3 + $0x10] sm:$0xff] %v126_v31  ;;  %159 = vst [vmem:[%s483_s3 + $0x18] sm:$0xff] %v127_v32  ;;  %v64_v45 = vmul.f32 %v220_v1, %v25_v29  ;;  %v100_v46 = vadd.f32 %v225_v2, %v61_v40  ;;  %v65_v47 = vmul.f32 %v220_v1, %v26_v34  ;;  %v38_v24 = vld [vmem:[%s480_s0 + $0xc0] sm:$0xff]  ;;  %v39_v29 = vld [vmem:[%s480_s0 + $0xc8] sm:$0xff] }
   0xb   :  { %160 = vst [vmem:[%s483_s3 + $0x20] sm:$0xff] %v128_v37  ;;  %161 = vst [vmem:[%s483_s3 + $0x28] sm:$0xff] %v129_v38  ;;  %v66_v48 = vmul.f32 %v220_v1, %v27_v35  ;;  %v67_v49 = vmul.f32 %v220_v1, %v28_v36  ;;  %v101_v50 = vadd.f32 %v225_v2, %v62_v43  ;;  %v40_v30 = vld [vmem:[%s480_s0 + $0xd0] sm:$0xff]  ;;  %v41_v31 = vld [vmem:[%s480_s0 + $0xd8] sm:$0xff] }
   0xc   :  { %162 = vst [vmem:[%s483_s3 + $0x30] sm:$0xff] %v130_v39  ;;  %163 = vst [vmem:[%s483_s3 + $0x38] sm:$0xff] %v131_v42  ;;  %v102_v51 = vadd.f32 %v225_v2, %v63_v44  ;;  %v103_v52 = vadd.f32 %v225_v2, %v64_v45  ;;  %v68_v53 = vmul.f32 %v220_v1, %v29_v41  ;;  %v132_v55 = vmax.f32 %v100_v46, 0.0  ;;  %v42_v36 = vld [vmem:[%s480_s0 + $0xe0] sm:$0xff]  ;;  %v43_v37 = vld [vmem:[%s480_s0 + $0xe8] sm:$0xff] }
   0xd   :  { %v104_v56 = vadd.f32 %v225_v2, %v65_v47  ;;  %v105_v57 = vadd.f32 %v225_v2, %v66_v48  ;;  %v106_v58 = vadd.f32 %v225_v2, %v67_v49  ;;  %v133_v62 = vmax.f32 %v101_v50, 0.0  ;;  %v44_v38 = vld [vmem:[%s480_s0 + $0xf0] sm:$0xff]  ;;  %v45_v43 = vld [vmem:[%s480_s0 + $0xf8] sm:$0xff] }
   0xe   :  { %v134_v63 = vmax.f32 %v102_v51, 0.0  ;;  %v135_v0 = vmax.f32 %v103_v52, 0.0  ;;  %v107_v3 = vadd.f32 %v225_v2, %v68_v53  ;;  %164 = vst [vmem:[%s483_s3 + $0x40] sm:$0xff] %v132_v55  ;;  %v69_v10 = vmul.f32 %v220_v1, %v30_v54 }
   0xf   :  { %v136_v7 = vmax.f32 %v104_v56, 0.0  ;;  %v137_v8 = vmax.f32 %v105_v57, 0.0  ;;  %v138_v9 = vmax.f32 %v106_v58, 0.0  ;;  %165 = vst [vmem:[%s483_s3 + $0x48] sm:$0xff] %v133_v62  ;;  %v70_v13 = vmul.f32 %v220_v1, %v31_v59 }
  0x10   :  { %166 = vst [vmem:[%s483_s3 + $0x50] sm:$0xff] %v134_v63  ;;  %167 = vst [vmem:[%s483_s3 + $0x58] sm:$0xff] %v135_v0  ;;  %v139_v12 = vmax.f32 %v107_v3, 0.0  ;;  %v71_v14 = vmul.f32 %v220_v1, %v32_v60  ;;  %v72_v15 = vmul.f32 %v220_v1, %v33_v61  ;;  %v108_v16 = vadd.f32 %v225_v2, %v69_v10 }
  0x11   :  { %168 = vst [vmem:[%s483_s3 + $0x60] sm:$0xff] %v136_v7  ;;  %169 = vst [vmem:[%s483_s3 + $0x68] sm:$0xff] %v137_v8  ;;  %v73_v17 = vmul.f32 %v220_v1, %v34_v4  ;;  %v74_v18 = vmul.f32 %v220_v1, %v35_v5  ;;  %v75_v19 = vmul.f32 %v220_v1, %v36_v6 }
  0x12   :  { %170 = vst [vmem:[%s483_s3 + $0x70] sm:$0xff] %v138_v9  ;;  %171 = vst [vmem:[%s483_s3 + $0x78] sm:$0xff] %v139_v12  ;;  %v109_v20 = vadd.f32 %v225_v2, %v70_v13  ;;  %v110_v21 = vadd.f32 %v225_v2, %v71_v14  ;;  %v111_v22 = vadd.f32 %v225_v2, %v72_v15  ;;  %v140_v25 = vmax.f32 %v108_v16, 0.0 }
  0x13   :  { %v76_v23 = vmul.f32 %v220_v1, %v37_v11  ;;  %v112_v26 = vadd.f32 %v225_v2, %v73_v17  ;;  %v113_v27 = vadd.f32 %v225_v2, %v74_v18  ;;  %v114_v28 = vadd.f32 %v225_v2, %v75_v19 }
  0x14   :  { %v141_v32 = vmax.f32 %v109_v20, 0.0  ;;  %v142_v33 = vmax.f32 %v110_v21, 0.0  ;;  %v143_v34 = vmax.f32 %v111_v22, 0.0  ;;  %172 = vst [vmem:[%s483_s3 + $0x80] sm:$0xff] %v140_v25  ;;  %v77_v42 = vmul.f32 %v220_v1, %v38_v24 }
  0x15   :  { %v115_v35 = vadd.f32 %v225_v2, %v76_v23  ;;  %v144_v39 = vmax.f32 %v112_v26, 0.0  ;;  %v145_v40 = vmax.f32 %v113_v27, 0.0  ;;  %v146_v41 = vmax.f32 %v114_v28, 0.0 }
  0x16   :  { %173 = vst [vmem:[%s483_s3 + $0x88] sm:$0xff] %v141_v32  ;;  %174 = vst [vmem:[%s483_s3 + $0x90] sm:$0xff] %v142_v33  ;;  %v78_v45 = vmul.f32 %v220_v1, %v39_v29  ;;  %v79_v46 = vmul.f32 %v220_v1, %v40_v30  ;;  %v80_v47 = vmul.f32 %v220_v1, %v41_v31 }
  0x17   :  { %175 = vst [vmem:[%s483_s3 + $0x98] sm:$0xff] %v143_v34  ;;  %v147_v44 = vmax.f32 %v115_v35, 0.0  ;;  %176 = vst [vmem:[%s483_s3 + $0xa0] sm:$0xff] %v144_v39  ;;  %v116_v48 = vadd.f32 %v225_v2, %v77_v42  ;;  %v81_v49 = vmul.f32 %v220_v1, %v42_v36  ;;  %v82_v50 = vmul.f32 %v220_v1, %v43_v37 }
  0x18   :  { %177 = vst [vmem:[%s483_s3 + $0xa8] sm:$0xff] %v145_v40  ;;  %178 = vst [vmem:[%s483_s3 + $0xb0] sm:$0xff] %v146_v41  ;;  %v83_v51 = vmul.f32 %v220_v1, %v44_v38  ;;  %v117_v52 = vadd.f32 %v225_v2, %v78_v45  ;;  %v118_v53 = vadd.f32 %v225_v2, %v79_v46 }
  0x19   :  { %179 = vst [vmem:[%s483_s3 + $0xb8] sm:$0xff] %v147_v44  ;;  %v119_v54 = vadd.f32 %v225_v2, %v80_v47  ;;  %v84_v55 = vmul.f32 %v220_v1, %v45_v43  ;;  %v148_v56 = vmax.f32 %v116_v48, 0.0  ;;  %v120_v57 = vadd.f32 %v225_v2, %v81_v49 }
  0x1a   :  { %v121_v58 = vadd.f32 %v225_v2, %v82_v50  ;;  %v122_v59 = vadd.f32 %v225_v2, %v83_v51  ;;  %v149_v60 = vmax.f32 %v117_v52, 0.0  ;;  %v150_v61 = vmax.f32 %v118_v53, 0.0 }
  0x1b   :  { %v151_v62 = vmax.f32 %v119_v54, 0.0  ;;  %v123_v63 = vadd.f32 %v225_v2, %v84_v55  ;;  %180 = vst [vmem:[%s483_s3 + $0xc0] sm:$0xff] %v148_v56  ;;  %v152_v0 = vmax.f32 %v120_v57, 0.0 }
  0x1c   :  { %v153_v3 = vmax.f32 %v121_v58, 0.0  ;;  %v154_v4 = vmax.f32 %v122_v59, 0.0  ;;  %181 = vst [vmem:[%s483_s3 + $0xc8] sm:$0xff] %v149_v60  ;;  %182 = vst [vmem:[%s483_s3 + $0xd0] sm:$0xff] %v150_v61 }
  0x1d   :  { %183 = vst [vmem:[%s483_s3 + $0xd8] sm:$0xff] %v151_v62  ;;  %v155_v1 = vmax.f32 %v123_v63, 0.0  ;;  %184 = vst [vmem:[%s483_s3 + $0xe0] sm:$0xff] %v152_v0 }
  0x1e   :  { %185 = vst [vmem:[%s483_s3 + $0xe8] sm:$0xff] %v153_v3  ;;  %186 = vst [vmem:[%s483_s3 + $0xf0] sm:$0xff] %v154_v4 }
  0x1f   :  { %187 = vst [vmem:[%s483_s3 + $0xf8] sm:$0xff] %v155_v1 }

// kernel: forward.56
= control target key start
LH: loop header
LB: loop body
LE: loop exit
PB: predicated region body
PF: predicated region fallthrough
CT: control target
= control target key end

     0   :  { %s896_s0 = inlined_call_operand.vmem [shape: f32[512,128], index: 0, kind: input, shape index: {}]   ;;  %s897_s1 = inlined_call_operand.vmem [shape: f32[1,128], index: 1, kind: input, shape index: {}]   ;;  %s898_s2 = inlined_call_operand.vmem [shape: f32[1,128], index: 2, kind: input, shape index: {}]   ;;  %s899_s3 = inlined_call_operand.vmem [shape: f32[512,128], index: 3, kind: output, shape index: {}]  }
   0x1   :  { %v14_v0 = vld [vmem:[%s896_s0] sm:$0xff]  ;;  %v15_v4 = vld [vmem:[%s896_s0 + $0x8] sm:$0xff]  ;;  %v16_v5 = vld [vmem:[%s896_s0 + $0x10] sm:$0xff] }
   0x2   :  { %v380_v1 = vld [vmem:[%s897_s1] ss:$0 sm:$0xff]  ;;  %v17_v6 = vld [vmem:[%s896_s0 + $0x18] sm:$0xff]  ;;  %v19_v11 = vld [vmem:[%s896_s0 + $0x28] sm:$0xff] }
   0x3   :  { %v385_v2 = vld [vmem:[%s898_s2] ss:$0 sm:$0xff]  ;;  %v85_v3 = vmul.f32 %v380_v1, %v14_v0  ;;  %v86_v7 = vmul.f32 %v380_v1, %v15_v4  ;;  %v87_v8 = vmul.f32 %v380_v1, %v16_v5  ;;  %v88_v9 = vmul.f32 %v380_v1, %v17_v6  ;;  %v20_v12 = vld [vmem:[%s896_s0 + $0x30] sm:$0xff]  ;;  %v21_v17 = vld [vmem:[%s896_s0 + $0x38] sm:$0xff] }
   0x4   :  { %v18_v10 = vld [vmem:[%s896_s0 + $0x20] sm:$0xff]  ;;  %v90_v15 = vmul.f32 %v380_v1, %v19_v11  ;;  %v91_v16 = vmul.f32 %v380_v1, %v20_v12  ;;  %v92_v21 = vmul.f32 %v380_v1, %v21_v17  ;;  %v23_v27 = vld [vmem:[%s896_s0 + $0x48] sm:$0xff]  ;;  %v24_v28 = vld [vmem:[%s896_s0 + $0x50] sm:$0xff] }
   0x5   :  { %v156_v13 = vadd.f32 %v385_v2, %v85_v3  ;;  %v89_v14 = vmul.f32 %v380_v1, %v18_v10  ;;  %v157_v18 = vadd.f32 %v385_v2, %v86_v7  ;;  %v158_v19 = vadd.f32 %v385_v2, %v87_v8  ;;  %v22_v22 = vld [vmem:[%s896_s0 + $0x40] sm:$0xff]  ;;  %v25_v29 = vld [vmem:[%s896_s0 + $0x58] sm:$0xff]  ;;  %v27_v35 = vld [vmem:[%s896_s0 + $0x68] sm:$0xff] }
   0x6   :  { %v159_v20 = vadd.f32 %v385_v2, %v88_v9  ;;  %v161_v25 = vadd.f32 %v385_v2, %v90_v15  ;;  %v162_v26 = vadd.f32 %v385_v2, %v91_v16  ;;  %v163_v33 = vadd.f32 %v385_v2, %v92_v21  ;;  %v26_v34 = vld [vmem:[%s896_s0 + $0x60] sm:$0xff]  ;;  %v28_v36 = vld [vmem:[%s896_s0 + $0x70] sm:$0xff]  ;;  %v29_v41 = vld [vmem:[%s896_s0 + $0x78] sm:$0xff] }
   0x7   :  { %v220_v23 = vmax.f32 %v156_v13, 0.0  ;;  %v160_v24 = vadd.f32 %v385_v2, %v89_v14  ;;  %v221_v30 = vmax.f32 %v157_v18, 0.0  ;;  %v222_v31 = vmax.f32 %v158_v19, 0.0  ;;  %v30_v54 = vld [vmem:[%s896_s0 + $0x80] sm:$0xff]  ;;  %v31_v59 = vld [vmem:[%s896_s0 + $0x88] sm:$0xff]  ;;  %v32_v60 = vld [vmem:[%s896_s0 + $0x90] sm:$0xff] }
   0x8   :  { %v223_v32 = vmax.f32 %v159_v20, 0.0  ;;  %v225_v38 = vmax.f32 %v161_v25, 0.0  ;;  %v226_v39 = vmax.f32 %v162_v26, 0.0  ;;  %v93_v40 = vmul.f32 %v380_v1, %v22_v22  ;;  %v33_v61 = vld [vmem:[%s896_s0 + $0x98] sm:$0xff]  ;;  %v34_v4 = vld [vmem:[%s896_s0 + $0xa0] sm:$0xff]  ;;  %v35_v5 = vld [vmem:[%s896_s0 + $0xa8] sm:$0xff] }
   0x9   :  { %284 = vst [vmem:[%s899_s3] sm:$0xff] %v220_v23  ;;  %v224_v37 = vmax.f32 %v160_v24, 0.0  ;;  %285 = vst [vmem:[%s899_s3 + $0x8] sm:$0xff] %v221_v30  ;;  %v227_v42 = vmax.f32 %v163_v33, 0.0  ;;  %v94_v43 = vmul.f32 %v380_v1, %v23_v27  ;;  %v95_v44 = vmul.f32 %v380_v1, %v24_v28  ;;  %v36_v6 = vld [vmem:[%s896_s0 + $0xb0] sm:$0xff]  ;;  %v37_v11 = vld [vmem:[%s896_s0 + $0xb8] sm:$0xff] }
   0xa   :  { %286 = vst [vmem:[%s899_s3 + $0x10] sm:$0xff] %v222_v31  ;;  %287 = vst [vmem:[%s899_s3 + $0x18] sm:$0xff] %v223_v32  ;;  %v96_v45 = vmul.f32 %v380_v1, %v25_v29  ;;  %v164_v46 = vadd.f32 %v385_v2, %v93_v40  ;;  %v97_v47 = vmul.f32 %v380_v1, %v26_v34  ;;  %v38_v24 = vld [vmem:[%s896_s0 + $0xc0] sm:$0xff]  ;;  %v39_v29 = vld [vmem:[%s896_s0 + $0xc8] sm:$0xff] }
   0xb   :  { %288 = vst [vmem:[%s899_s3 + $0x20] sm:$0xff] %v224_v37  ;;  %289 = vst [vmem:[%s899_s3 + $0x28] sm:$0xff] %v225_v38  ;;  %v98_v48 = vmul.f32 %v380_v1, %v27_v35  ;;  %v99_v49 = vmul.f32 %v380_v1, %v28_v36  ;;  %v165_v50 = vadd.f32 %v385_v2, %v94_v43  ;;  %v40_v30 = vld [vmem:[%s896_s0 + $0xd0] sm:$0xff]  ;;  %v41_v31 = vld [vmem:[%s896_s0 + $0xd8] sm:$0xff] }
   0xc   :  { %290 = vst [vmem:[%s899_s3 + $0x30] sm:$0xff] %v226_v39  ;;  %291 = vst [vmem:[%s899_s3 + $0x38] sm:$0xff] %v227_v42  ;;  %v166_v51 = vadd.f32 %v385_v2, %v95_v44  ;;  %v167_v52 = vadd.f32 %v385_v2, %v96_v45  ;;  %v100_v53 = vmul.f32 %v380_v1, %v29_v41  ;;  %v228_v55 = vmax.f32 %v164_v46, 0.0  ;;  %v42_v36 = vld [vmem:[%s896_s0 + $0xe0] sm:$0xff]  ;;  %v43_v37 = vld [vmem:[%s896_s0 + $0xe8] sm:$0xff] }
   0xd   :  { %v168_v56 = vadd.f32 %v385_v2, %v97_v47  ;;  %v169_v57 = vadd.f32 %v385_v2, %v98_v48  ;;  %v170_v58 = vadd.f32 %v385_v2, %v99_v49  ;;  %v229_v62 = vmax.f32 %v165_v50, 0.0  ;;  %v44_v38 = vld [vmem:[%s896_s0 + $0xf0] sm:$0xff]  ;;  %v45_v43 = vld [vmem:[%s896_s0 + $0xf8] sm:$0xff] }
   0xe   :  { %v230_v63 = vmax.f32 %v166_v51, 0.0  ;;  %v231_v0 = vmax.f32 %v167_v52, 0.0  ;;  %v171_v3 = vadd.f32 %v385_v2, %v100_v53  ;;  %292 = vst [vmem:[%s899_s3 + $0x40] sm:$0xff] %v228_v55  ;;  %v101_v10 = vmul.f32 %v380_v1, %v30_v54 }
   0xf   :  { %v232_v7 = vmax.f32 %v168_v56, 0.0  ;;  %v233_v8 = vmax.f32 %v169_v57, 0.0  ;;  %v234_v9 = vmax.f32 %v170_v58, 0.0  ;;  %293 = vst [vmem:[%s899_s3 + $0x48] sm:$0xff] %v229_v62  ;;  %v102_v13 = vmul.f32 %v380_v1, %v31_v59  ;;  %v46_v56 = vld [vmem:[%s896_s0 + $0x100] sm:$0xff]  ;;  %v48_v62 = vld [vmem:[%s896_s0 + $0x110] sm:$0xff] }
  0x10   :  { %294 = vst [vmem:[%s899_s3 + $0x50] sm:$0xff] %v230_v63  ;;  %295 = vst [vmem:[%s899_s3 + $0x58] sm:$0xff] %v231_v0  ;;  %v235_v12 = vmax.f32 %v171_v3, 0.0  ;;  %v103_v14 = vmul.f32 %v380_v1, %v32_v60  ;;  %v104_v15 = vmul.f32 %v380_v1, %v33_v61  ;;  %v172_v16 = vadd.f32 %v385_v2, %v101_v10  ;;  %v47_v61 = vld [vmem:[%s896_s0 + $0x108] sm:$0xff]  ;;  %v49_v63 = vld [vmem:[%s896_s0 + $0x118] sm:$0xff] }
  0x11   :  { %296 = vst [vmem:[%s899_s3 + $0x60] sm:$0xff] %v232_v7  ;;  %297 = vst [vmem:[%s899_s3 + $0x68] sm:$0xff] %v233_v8  ;;  %v105_v17 = vmul.f32 %v380_v1, %v34_v4  ;;  %v106_v18 = vmul.f32 %v380_v1, %v35_v5  ;;  %v107_v19 = vmul.f32 %v380_v1, %v36_v6  ;;  %v50_v6 = vld [vmem:[%s896_s0 + $0x120] sm:$0xff]  ;;  %v51_v7 = vld [vmem:[%s896_s0 + $0x128] sm:$0xff] }
  0x12   :  { %298 = vst [vmem:[%s899_s3 + $0x70] sm:$0xff] %v234_v9  ;;  %299 = vst [vmem:[%s899_s3 + $0x78] sm:$0xff] %v235_v12  ;;  %v173_v20 = vadd.f32 %v385_v2, %v102_v13  ;;  %v174_v21 = vadd.f32 %v385_v2, %v103_v14  ;;  %v175_v22 = vadd.f32 %v385_v2, %v104_v15  ;;  %v236_v25 = vmax.f32 %v172_v16, 0.0  ;;  %v52_v8 = vld [vmem:[%s896_s0 + $0x130] sm:$0xff]  ;;  %v53_v13 = vld [vmem:[%s896_s0 + $0x138] sm:$0xff] }
  0x13   :  { %v108_v23 = vmul.f32 %v380_v1, %v37_v11  ;;  %v176_v26 = vadd.f32 %v385_v2, %v105_v17  ;;  %v177_v27 = vadd.f32 %v385_v2, %v106_v18  ;;  %v178_v28 = vadd.f32 %v385_v2, %v107_v19 }
  0x14   :  { %v237_v32 = vmax.f32 %v173_v20, 0.0  ;;  %v238_v33 = vmax.f32 %v174_v21, 0.0  ;;  %v239_v34 = vmax.f32 %v175_v22, 0.0  ;;  %300 = vst [vmem:[%s899_s3 + $0x80] sm:$0xff] %v236_v25  ;;  %v109_v42 = vmul.f32 %v380_v1, %v38_v24 }
  0x15   :  { %v179_v35 = vadd.f32 %v385_v2, %v108_v23  ;;  %v240_v39 = vmax.f32 %v176_v26, 0.0  ;;  %v241_v40 = vmax.f32 %v177_v27, 0.0  ;;  %v242_v41 = vmax.f32 %v178_v28, 0.0  ;;  %v54_v26 = vld [vmem:[%s896_s0 + $0x140] sm:$0xff] }
  0x16   :  { %301 = vst [vmem:[%s899_s3 + $0x88] sm:$0xff] %v237_v32  ;;  %302 = vst [vmem:[%s899_s3 + $0x90] sm:$0xff] %v238_v33  ;;  %v110_v45 = vmul.f32 %v380_v1, %v39_v29  ;;  %v111_v46 = vmul.f32 %v380_v1, %v40_v30  ;;  %v112_v47 = vmul.f32 %v380_v1, %v41_v31  ;;  %v55_v31 = vld [vmem:[%s896_s0 + $0x148] sm:$0xff]  ;;  %v56_v32 = vld [vmem:[%s896_s0 + $0x150] sm:$0xff] }
  0x17   :  { %303 = vst [vmem:[%s899_s3 + $0x98] sm:$0xff] %v239_v34  ;;  %v243_v44 = vmax.f32 %v179_v35, 0.0  ;;  %304 = vst [vmem:[%s899_s3 + $0xa0] sm:$0xff] %v240_v39  ;;  %v180_v48 = vadd.f32 %v385_v2, %v109_v42  ;;  %v113_v49 = vmul.f32 %v380_v1, %v42_v36  ;;  %v114_v50 = vmul.f32 %v380_v1, %v43_v37  ;;  %v57_v33 = vld [vmem:[%s896_s0 + $0x158] sm:$0xff]  ;;  %v59_v39 = vld [vmem:[%s896_s0 + $0x168] sm:$0xff] }
  0x18   :  { %305 = vst [vmem:[%s899_s3 + $0xa8] sm:$0xff] %v241_v40  ;;  %306 = vst [vmem:[%s899_s3 + $0xb0] sm:$0xff] %v242_v41  ;;  %v115_v51 = vmul.f32 %v380_v1, %v44_v38  ;;  %v181_v52 = vadd.f32 %v385_v2, %v110_v45  ;;  %v182_v53 = vadd.f32 %v385_v2, %v111_v46  ;;  %v58_v38 = vld [vmem:[%s896_s0 + $0x160] sm:$0xff]  ;;  %v60_v40 = vld [vmem:[%s896_s0 + $0x170] sm:$0xff] }
  0x19   :  { %307 = vst [vmem:[%s899_s3 + $0xb8] sm:$0xff] %v243_v44  ;;  %v183_v54 = vadd.f32 %v385_v2, %v112_v47  ;;  %v116_v55 = vmul.f32 %v380_v1, %v45_v43  ;;  %v244_v57 = vmax.f32 %v180_v48, 0.0  ;;  %v184_v58 = vadd.f32 %v385_v2, %v113_v49  ;;  %v61_v45 = vld [vmem:[%s896_s0 + $0x178] sm:$0xff] }
  0x1a   :  { %v185_v59 = vadd.f32 %v385_v2, %v114_v50  ;;  %v186_v60 = vadd.f32 %v385_v2, %v115_v51  ;;  %v245_v0 = vmax.f32 %v181_v52, 0.0  ;;  %v246_v3 = vmax.f32 %v182_v53, 0.0 }
  0x1b   :  { %v247_v4 = vmax.f32 %v183_v54, 0.0  ;;  %v187_v5 = vadd.f32 %v385_v2, %v116_v55  ;;  %308 = vst [vmem:[%s899_s3 + $0xc0] sm:$0xff] %v244_v57  ;;  %v248_v9 = vmax.f32 %v184_v58, 0.0  ;;  %v117_v12 = vmul.f32 %v380_v1, %v46_v56  ;;  %v62_v58 = vld [vmem:[%s896_s0 + $0x180] sm:$0xff] }
  0x1c   :  { %v249_v10 = vmax.f32 %v185_v59, 0.0  ;;  %v250_v11 = vmax.f32 %v186_v60, 0.0  ;;  %309 = vst [vmem:[%s899_s3 + $0xc8] sm:$0xff] %v245_v0  ;;  %310 = vst [vmem:[%s899_s3 + $0xd0] sm:$0xff] %v246_v3  ;;  %v118_v15 = vmul.f32 %v380_v1, %v47_v61  ;;  %v119_v16 = vmul.f32 %v380_v1, %v48_v62  ;;  %v64_v0 = vld [vmem:[%s896_s0 + $0x190] sm:$0xff]  ;;  %v65_v3 = vld [vmem:[%s896_s0 + $0x198] sm:$0xff] }
  0x1d   :  { %311 = vst [vmem:[%s899_s3 + $0xd8] sm:$0xff] %v247_v4  ;;  %v251_v14 = vmax.f32 %v187_v5, 0.0  ;;  %v120_v17 = vmul.f32 %v380_v1, %v49_v63  ;;  %312 = vst [vmem:[%s899_s3 + $0xe0] sm:$0xff] %v248_v9  ;;  %v188_v18 = vadd.f32 %v385_v2, %v117_v12  ;;  %v121_v19 = vmul.f32 %v380_v1, %v50_v6  ;;  %v63_v63 = vld [vmem:[%s896_s0 + $0x188] sm:$0xff] }
  0x1e   :  { %313 = vst [vmem:[%s899_s3 + $0xe8] sm:$0xff] %v249_v10  ;;  %314 = vst [vmem:[%s899_s3 + $0xf0] sm:$0xff] %v250_v11  ;;  %v122_v20 = vmul.f32 %v380_v1, %v51_v7  ;;  %v123_v21 = vmul.f32 %v380_v1, %v52_v8  ;;  %v189_v22 = vadd.f32 %v385_v2, %v118_v15  ;;  %v66_v8 = vld [vmem:[%s896_s0 + $0x1a0] sm:$0xff]  ;;  %v67_v9 = vld [vmem:[%s896_s0 + $0x1a8] sm:$0xff] }
  0x1f   :  { %315 = vst [vmem:[%s899_s3 + $0xf8] sm:$0xff] %v251_v14  ;;  %v190_v23 = vadd.f32 %v385_v2, %v119_v16  ;;  %v191_v24 = vadd.f32 %v385_v2, %v120_v17  ;;  %v124_v25 = vmul.f32 %v380_v1, %v53_v13  ;;  %v252_v27 = vmax.f32 %v188_v18, 0.0  ;;  %v68_v10 = vld [vmem:[%s896_s0 + $0x1b0] sm:$0xff]  ;;  %v69_v15 = vld [vmem:[%s896_s0 + $0x1b8] sm:$0xff] }
  0x20   :  { %v192_v28 = vadd.f32 %v385_v2, %v121_v19  ;;  %v193_v29 = vadd.f32 %v385_v2, %v122_v20  ;;  %v194_v30 = vadd.f32 %v385_v2, %v123_v21  ;;  %v253_v34 = vmax.f32 %v189_v22, 0.0 }
  0x21   :  { %v254_v35 = vmax.f32 %v190_v23, 0.0  ;;  %v255_v36 = vmax.f32 %v191_v24, 0.0  ;;  %v195_v37 = vadd.f32 %v385_v2, %v124_v25  ;;  %316 = vst [vmem:[%s899_s3 + $0x100] sm:$0xff] %v252_v27  ;;  %v125_v44 = vmul.f32 %v380_v1, %v54_v26 }
  0x22   :  { %v256_v41 = vmax.f32 %v192_v28, 0.0  ;;  %v257_v42 = vmax.f32 %v193_v29, 0.0  ;;  %v258_v43 = vmax.f32 %v194_v30, 0.0  ;;  %317 = vst [vmem:[%s899_s3 + $0x108] sm:$0xff] %v253_v34  ;;  %v126_v47 = vmul.f32 %v380_v1, %v55_v31  ;;  %v70_v28 = vld [vmem:[%s896_s0 + $0x1c0] sm:$0xff]  ;;  %v72_v34 = vld [vmem:[%s896_s0 + $0x1d0] sm:$0xff] }
  0x23   :  { %318 = vst [vmem:[%s899_s3 + $0x110] sm:$0xff] %v254_v35  ;;  %319 = vst [vmem:[%s899_s3 + $0x118] sm:$0xff] %v255_v36  ;;  %v259_v46 = vmax.f32 %v195_v37, 0.0  ;;  %v127_v48 = vmul.f32 %v380_v1, %v56_v32  ;;  %v128_v49 = vmul.f32 %v380_v1, %v57_v33  ;;  %v196_v50 = vadd.f32 %v385_v2, %v125_v44  ;;  %v71_v33 = vld [vmem:[%s896_s0 + $0x1c8] sm:$0xff]  ;;  %v73_v35 = vld [vmem:[%s896_s0 + $0x1d8] sm:$0xff] }
  0x24   :  { %320 = vst [vmem:[%s899_s3 + $0x120] sm:$0xff] %v256_v41  ;;  %321 = vst [vmem:[%s899_s3 + $0x128] sm:$0xff] %v257_v42  ;;  %v129_v51 = vmul.f32 %v380_v1, %v58_v38  ;;  %v130_v52 = vmul.f32 %v380_v1, %v59_v39  ;;  %v131_v53 = vmul.f32 %v380_v1, %v60_v40  ;;  %v74_v40 = vld [vmem:[%s896_s0 + $0x1e0] sm:$0xff]  ;;  %v75_v41 = vld [vmem:[%s896_s0 + $0x1e8] sm:$0xff] }
  0x25   :  { %322 = vst [vmem:[%s899_s3 + $0x130] sm:$0xff] %v258_v43  ;;  %323 = vst [vmem:[%s899_s3 + $0x138] sm:$0xff] %v259_v46  ;;  %v197_v54 = vadd.f32 %v385_v2, %v126_v47  ;;  %v198_v55 = vadd.f32 %v385_v2, %v127_v48  ;;  %v199_v56 = vadd.f32 %v385_v2, %v128_v49  ;;  %v260_v59 = vmax.f32 %v196_v50, 0.0  ;;  %v76_v42 = vld [vmem:[%s896_s0 + $0x1f0] sm:$0xff]  ;;  %v77_v47 = vld [vmem:[%s896_s0 + $0x1f8] sm:$0xff] }
  0x26   :  { %v132_v57 = vmul.f32 %v380_v1, %v61_v45  ;;  %v200_v60 = vadd.f32 %v385_v2, %v129_v51  ;;  %v201_v61 = vadd.f32 %v385_v2, %v130_v52  ;;  %v202_v62 = vadd.f32 %v385_v2, %v131_v53 }
  0x27   :  { %v261_v4 = vmax.f32 %v197_v54, 0.0  ;;  %v262_v5 = vmax.f32 %v198_v55, 0.0  ;;  %v263_v6 = vmax.f32 %v199_v56, 0.0  ;;  %324 = vst [vmem:[%s899_s3 + $0x140] sm:$0xff] %v260_v59  ;;  %v133_v14 = vmul.f32 %v380_v1, %v62_v58 }
  0x28   :  { %v203_v7 = vadd.f32 %v385_v2, %v132_v57  ;;  %v264_v11 = vmax.f32 %v200_v60, 0.0  ;;  %v265_v12 = vmax.f32 %v201_v61, 0.0  ;;  %v266_v13 = vmax.f32 %v202_v62, 0.0 }
  0x29   :  { %325 = vst [vmem:[%s899_s3 + $0x148] sm:$0xff] %v261_v4  ;;  %326 = vst [vmem:[%s899_s3 + $0x150] sm:$0xff] %v262_v5  ;;  %v134_v17 = vmul.f32 %v380_v1, %v63_v63  ;;  %v135_v18 = vmul.f32 %v380_v1, %v64_v0  ;;  %v136_v19 = vmul.f32 %v380_v1, %v65_v3 }
  0x2a   :  { %327 = vst [vmem:[%s899_s3 + $0x158] sm:$0xff] %v263_v6  ;;  %v267_v16 = vmax.f32 %v203_v7, 0.0  ;;  %328 = vst [vmem:[%s899_s3 + $0x160] sm:$0xff] %v264_v11  ;;  %v204_v20 = vadd.f32 %v385_v2, %v133_v14  ;;  %v137_v21 = vmul.f32 %v380_v1, %v66_v8  ;;  %v138_v22 = vmul.f32 %v380_v1, %v67_v9 }
  0x2b   :  { %329 = vst [vmem:[%s899_s3 + $0x168] sm:$0xff] %v265_v12  ;;  %330 = vst [vmem:[%s899_s3 + $0x170] sm:$0xff] %v266_v13  ;;  %v139_v23 = vmul.f32 %v380_v1, %v68_v10  ;;  %v205_v24 = vadd.f32 %v385_v2, %v134_v17  ;;  %v206_v25 = vadd.f32 %v385_v2, %v135_v18 }
  0x2c   :  { %331 = vst [vmem:[%s899_s3 + $0x178] sm:$0xff] %v267_v16  ;;  %v207_v26 = vadd.f32 %v385_v2, %v136_v19  ;;  %v140_v27 = vmul.f32 %v380_v1, %v69_v15  ;;  %v268_v29 = vmax.f32 %v204_v20, 0.0  ;;  %v208_v30 = vadd.f32 %v385_v2, %v137_v21 }
  0x2d   :  { %v209_v31 = vadd.f32 %v385_v2, %v138_v22  ;;  %v210_v32 = vadd.f32 %v385_v2, %v139_v23  ;;  %v269_v36 = vmax.f32 %v205_v24, 0.0  ;;  %v270_v37 = vmax.f32 %v206_v25, 0.0 }
  0x2e   :  { %v271_v38 = vmax.f32 %v207_v26, 0.0  ;;  %v211_v39 = vadd.f32 %v385_v2, %v140_v27  ;;  %332 = vst [vmem:[%s899_s3 + $0x180] sm:$0xff] %v268_v29  ;;  %v272_v43 = vmax.f32 %v208_v30, 0.0  ;;  %v141_v46 = vmul.f32 %v380_v1, %v70_v28 }
  0x2f   :  { %v273_v44 = vmax.f32 %v209_v31, 0.0  ;;  %v274_v45 = vmax.f32 %v210_v32, 0.0  ;;  %333 = vst [vmem:[%s899_s3 + $0x188] sm:$0xff] %v269_v36  ;;  %334 = vst [vmem:[%s899_s3 + $0x190] sm:$0xff] %v270_v37  ;;  %v142_v49 = vmul.f32 %v380_v1, %v71_v33  ;;  %v143_v50 = vmul.f32 %v380_v1, %v72_v34 }
  0x30   :  { %335 = vst [vmem:[%s899_s3 + $0x198] sm:$0xff] %v271_v38  ;;  %v275_v48 = vmax.f32 %v211_v39, 0.0  ;;  %v144_v51 = vmul.f32 %v380_v1, %v73_v35  ;;  %336 = vst [vmem:[%s899_s3 + $0x1a0] sm:$0xff] %v272_v43  ;;  %v212_v52 = vadd.f32 %v385_v2, %v141_v46  ;;  %v145_v53 = vmul.f32 %v380_v1, %v74_v40 }
  0x31   :  { %337 = vst [vmem:[%s899_s3 + $0x1a8] sm:$0xff] %v273_v44  ;;  %338 = vst [vmem:[%s899_s3 + $0x1b0] sm:$0xff] %v274_v45  ;;  %v146_v54 = vmul.f32 %v380_v1, %v75_v41  ;;  %v147_v55 = vmul.f32 %v380_v1, %v76_v42  ;;  %v213_v56 = vadd.f32 %v385_v2, %v142_v49 }
  0x32   :  { %339 = vst [vmem:[%s899_s3 + $0x1b8] sm:$0xff] %v275_v48  ;;  %v214_v57 = vadd.f32 %v385_v2, %v143_v50  ;;  %v215_v58 = vadd.f32 %v385_v2, %v144_v51  ;;  %v148_v59 = vmul.f32 %v380_v1, %v77_v47  ;;  %v276_v60 = vmax.f32 %v212_v52, 0.0 }
  0x33   :  { %v216_v61 = vadd.f32 %v385_v2, %v145_v53  ;;  %v217_v62 = vadd.f32 %v385_v2, %v146_v54  ;;  %v218_v63 = vadd.f32 %v385_v2, %v147_v55  ;;  %v277_v0 = vmax.f32 %v213_v56, 0.0 }
  0x34   :  { %v278_v3 = vmax.f32 %v214_v57, 0.0  ;;  %v279_v4 = vmax.f32 %v215_v58, 0.0  ;;  %v219_v5 = vadd.f32 %v385_v2, %v148_v59  ;;  %340 = vst [vmem:[%s899_s3 + $0x1c0] sm:$0xff] %v276_v60 }
  0x35   :  { %v280_v6 = vmax.f32 %v216_v61, 0.0  ;;  %v281_v7 = vmax.f32 %v217_v62, 0.0  ;;  %v282_v8 = vmax.f32 %v218_v63, 0.0  ;;  %341 = vst [vmem:[%s899_s3 + $0x1c8] sm:$0xff] %v277_v0 }
  0x36   :  { %342 = vst [vmem:[%s899_s3 + $0x1d0] sm:$0xff] %v278_v3  ;;  %343 = vst [vmem:[%s899_s3 + $0x1d8] sm:$0xff] %v279_v4  ;;  %v283_v1 = vmax.f32 %v219_v5, 0.0 }
  0x37   :  { %344 = vst [vmem:[%s899_s3 + $0x1e0] sm:$0xff] %v280_v6  ;;  %345 = vst [vmem:[%s899_s3 + $0x1e8] sm:$0xff] %v281_v7 }
  0x38   :  { %346 = vst [vmem:[%s899_s3 + $0x1f0] sm:$0xff] %v282_v8  ;;  %347 = vst [vmem:[%s899_s3 + $0x1f8] sm:$0xff] %v283_v1 }

// kernel: forward.62
= control target key start
LH: loop header
LB: loop body
LE: loop exit
PB: predicated region body
PF: predicated region fallthrough
CT: control target
= control target key end

     0   :  { %s1740_s0 = inlined_call_operand.vmem [shape: f32[1024,128], index: 0, kind: input, shape index: {}]   ;;  %s1741_s1 = inlined_call_operand.vmem [shape: f32[1,128], index: 1, kind: input, shape index: {}]   ;;  %s1742_s2 = inlined_call_operand.vmem [shape: f32[1,128], index: 2, kind: input, shape index: {}]   ;;  %s1743_s3 = inlined_call_operand.vmem [shape: f32[1024,128], index: 3, kind: output, shape index: {}]  }
   0x1   :  { %v14_v0 = vld [vmem:[%s1740_s0] sm:$0xff]  ;;  %v15_v4 = vld [vmem:[%s1740_s0 + $0x8] sm:$0xff]  ;;  %v16_v5 = vld [vmem:[%s1740_s0 + $0x10] sm:$0xff] }
   0x2   :  { %v702_v1 = vld [vmem:[%s1741_s1] ss:$0 sm:$0xff]  ;;  %v17_v6 = vld [vmem:[%s1740_s0 + $0x18] sm:$0xff]  ;;  %v19_v11 = vld [vmem:[%s1740_s0 + $0x28] sm:$0xff] }
   0x3   :  { %v707_v2 = vld [vmem:[%s1742_s2] ss:$0 sm:$0xff]  ;;  %v149_v3 = vmul.f32 %v702_v1, %v14_v0  ;;  %v150_v7 = vmul.f32 %v702_v1, %v15_v4  ;;  %v151_v8 = vmul.f32 %v702_v1, %v16_v5  ;;  %v152_v9 = vmul.f32 %v702_v1, %v17_v6  ;;  %v20_v12 = vld [vmem:[%s1740_s0 + $0x30] sm:$0xff]  ;;  %v21_v17 = vld [vmem:[%s1740_s0 + $0x38] sm:$0xff] }
   0x4   :  { %v18_v10 = vld [vmem:[%s1740_s0 + $0x20] sm:$0xff]  ;;  %v154_v15 = vmul.f32 %v702_v1, %v19_v11  ;;  %v155_v16 = vmul.f32 %v702_v1, %v20_v12  ;;  %v156_v21 = vmul.f32 %v702_v1, %v21_v17  ;;  %v23_v27 = vld [vmem:[%s1740_s0 + $0x48] sm:$0xff]  ;;  %v24_v28 = vld [vmem:[%s1740_s0 + $0x50] sm:$0xff] }
   0x5   :  { %v284_v13 = vadd.f32 %v707_v2, %v149_v3  ;;  %v153_v14 = vmul.f32 %v702_v1, %v18_v10  ;;  %v285_v18 = vadd.f32 %v707_v2, %v150_v7  ;;  %v286_v19 = vadd.f32 %v707_v2, %v151_v8  ;;  %v22_v22 = vld [vmem:[%s1740_s0 + $0x40] sm:$0xff]  ;;  %v25_v29 = vld [vmem:[%s1740_s0 + $0x58] sm:$0xff]  ;;  %v27_v35 = vld [vmem:[%s1740_s0 + $0x68] sm:$0xff] }
   0x6   :  { %v287_v20 = vadd.f32 %v707_v2, %v152_v9  ;;  %v289_v25 = vadd.f32 %v707_v2, %v154_v15  ;;  %v290_v26 = vadd.f32 %v707_v2, %v155_v16  ;;  %v291_v33 = vadd.f32 %v707_v2, %v156_v21  ;;  %v26_v34 = vld [vmem:[%s1740_s0 + $0x60] sm:$0xff]  ;;  %v28_v36 = vld [vmem:[%s1740_s0 + $0x70] sm:$0xff]  ;;  %v29_v41 = vld [vmem:[%s1740_s0 + $0x78] sm:$0xff] }
   0x7   :  { %v412_v23 = vmax.f32 %v284_v13, 0.0  ;;  %v288_v24 = vadd.f32 %v707_v2, %v153_v14  ;;  %v413_v30 = vmax.f32 %v285_v18, 0.0  ;;  %v414_v31 = vmax.f32 %v286_v19, 0.0  ;;  %v30_v54 = vld [vmem:[%s1740_s0 + $0x80] sm:$0xff]  ;;  %v31_v59 = vld [vmem:[%s1740_s0 + $0x88] sm:$0xff]  ;;  %v32_v60 = vld [vmem:[%s1740_s0 + $0x90] sm:$0xff] }
   0x8   :  { %v415_v32 = vmax.f32 %v287_v20, 0.0  ;;  %v417_v38 = vmax.f32 %v289_v25, 0.0  ;;  %v418_v39 = vmax.f32 %v290_v26, 0.0  ;;  %v157_v40 = vmul.f32 %v702_v1, %v22_v22  ;;  %v33_v61 = vld [vmem:[%s1740_s0 + $0x98] sm:$0xff]  ;;  %v34_v4 = vld [vmem:[%s1740_s0 + $0xa0] sm:$0xff]  ;;  %v35_v5 = vld [vmem:[%s1740_s0 + $0xa8] sm:$0xff] }
   0x9   :  { %540 = vst [vmem:[%s1743_s3] sm:$0xff] %v412_v23  ;;  %v416_v37 = vmax.f32 %v288_v24, 0.0  ;;  %541 = vst [vmem:[%s1743_s3 + $0x8] sm:$0xff] %v413_v30  ;;  %v419_v42 = vmax.f32 %v291_v33, 0.0  ;;  %v158_v43 = vmul.f32 %v702_v1, %v23_v27  ;;  %v159_v44 = vmul.f32 %v702_v1, %v24_v28  ;;  %v36_v6 = vld [vmem:[%s1740_s0 + $0xb0] sm:$0xff]  ;;  %v37_v11 = vld [vmem:[%s1740_s0 + $0xb8] sm:$0xff] }
   0xa   :  { %542 = vst [vmem:[%s1743_s3 + $0x10] sm:$0xff] %v414_v31  ;;  %543 = vst [vmem:[%s1743_s3 + $0x18] sm:$0xff] %v415_v32  ;;  %v160_v45 = vmul.f32 %v702_v1, %v25_v29  ;;  %v292_v46 = vadd.f32 %v707_v2, %v157_v40  ;;  %v161_v47 = vmul.f32 %v702_v1, %v26_v34  ;;  %v38_v24 = vld [vmem:[%s1740_s0 + $0xc0] sm:$0xff]  ;;  %v39_v29 = vld [vmem:[%s1740_s0 + $0xc8] sm:$0xff] }
   0xb   :  { %544 = vst [vmem:[%s1743_s3 + $0x20] sm:$0xff] %v416_v37  ;;  %545 = vst [vmem:[%s1743_s3 + $0x28] sm:$0xff] %v417_v38  ;;  %v162_v48 = vmul.f32 %v702_v1, %v27_v35  ;;  %v163_v49 = vmul.f32 %v702_v1, %v28_v36  ;;  %v293_v50 = vadd.f32 %v707_v2, %v158_v43  ;;  %v40_v30 = vld [vmem:[%s1740_s0 + $0xd0] sm:$0xff]  ;;  %v41_v31 = vld [vmem:[%s1740_s0 + $0xd8] sm:$0xff] }
   0xc   :  { %546 = vst [vmem:[%s1743_s3 + $0x30] sm:$0xff] %v418_v39  ;;  %547 = vst [vmem:[%s1743_s3 + $0x38] sm:$0xff] %v419_v42  ;;  %v294_v51 = vadd.f32 %v707_v2, %v159_v44  ;;  %v295_v52 = vadd.f32 %v707_v2, %v160_v45  ;;  %v164_v53 = vmul.f32 %v702_v1, %v29_v41  ;;  %v420_v55 = vmax.f32 %v292_v46, 0.0  ;;  %v42_v36 = vld [vmem:[%s1740_s0 + $0xe0] sm:$0xff]  ;;  %v43_v37 = vld [vmem:[%s1740_s0 + $0xe8] sm:$0xff] }
   0xd   :  { %v296_v56 = vadd.f32 %v707_v2, %v161_v47  ;;  %v297_v57 = vadd.f32 %v707_v2, %v162_v48  ;;  %v298_v58 = vadd.f32 %v707_v2, %v163_v49  ;;  %v421_v62 = vmax.f32 %v293_v50, 0.0  ;;  %v44_v38 = vld [vmem:[%s1740_s0 + $0xf0] sm:$0xff]  ;;  %v45_v43 = vld [vmem:[%s1740_s0 + $0xf8] sm:$0xff] }
   0xe   :  { %v422_v63 = vmax.f32 %v294_v51, 0.0  ;;  %v423_v0 = vmax.f32 %v295_v52, 0.0  ;;  %v299_v3 = vadd.f32 %v707_v2, %v164_v53  ;;  %548 = vst [vmem:[%s1743_s3 + $0x40] sm:$0xff] %v420_v55  ;;  %v165_v10 = vmul.f32 %v702_v1, %v30_v54 }
   0xf   :  { %v424_v7 = vmax.f32 %v296_v56, 0.0  ;;  %v425_v8 = vmax.f32 %v297_v57, 0.0  ;;  %v426_v9 = vmax.f32 %v298_v58, 0.0  ;;  %549 = vst [vmem:[%s1743_s3 + $0x48] sm:$0xff] %v421_v62  ;;  %v166_v13 = vmul.f32 %v702_v1, %v31_v59  ;;  %v46_v56 = vld [vmem:[%s1740_s0 + $0x100] sm:$0xff]  ;;  %v48_v62 = vld [vmem:[%s1740_s0 + $0x110] sm:$0xff] }
  0x10   :  { %550 = vst [vmem:[%s1743_s3 + $0x50] sm:$0xff] %v422_v63  ;;  %551 = vst [vmem:[%s1743_s3 + $0x58] sm:$0xff] %v423_v0  ;;  %v427_v12 = vmax.f32 %v299_v3, 0.0  ;;  %v167_v14 = vmul.f32 %v702_v1, %v32_v60  ;;  %v168_v15 = vmul.f32 %v702_v1, %v33_v61  ;;  %v300_v16 = vadd.f32 %v707_v2, %v165_v10  ;;  %v47_v61 = vld [vmem:[%s1740_s0 + $0x108] sm:$0xff]  ;;  %v49_v63 = vld [vmem:[%s1740_s0 + $0x118] sm:$0xff] }
  0x11   :  { %552 = vst [vmem:[%s1743_s3 + $0x60] sm:$0xff] %v424_v7  ;;  %553 = vst [vmem:[%s1743_s3 + $0x68] sm:$0xff] %v425_v8  ;;  %v169_v17 = vmul.f32 %v702_v1, %v34_v4  ;;  %v170_v18 = vmul.f32 %v702_v1, %v35_v5  ;;  %v171_v19 = vmul.f32 %v702_v1, %v36_v6  ;;  %v50_v6 = vld [vmem:[%s1740_s0 + $0x120] sm:$0xff]  ;;  %v51_v7 = vld [vmem:[%s1740_s0 + $0x128] sm:$0xff] }
  0x12   :  { %554 = vst [vmem:[%s1743_s3 + $0x70] sm:$0xff] %v426_v9  ;;  %555 = vst [vmem:[%s1743_s3 + $0x78] sm:$0xff] %v427_v12  ;;  %v301_v20 = vadd.f32 %v707_v2, %v166_v13  ;;  %v302_v21 = vadd.f32 %v707_v2, %v167_v14  ;;  %v303_v22 = vadd.f32 %v707_v2, %v168_v15  ;;  %v428_v25 = vmax.f32 %v300_v16, 0.0  ;;  %v52_v8 = vld [vmem:[%s1740_s0 + $0x130] sm:$0xff]  ;;  %v53_v13 = vld [vmem:[%s1740_s0 + $0x138] sm:$0xff] }
  0x13   :  { %v172_v23 = vmul.f32 %v702_v1, %v37_v11  ;;  %v304_v26 = vadd.f32 %v707_v2, %v169_v17  ;;  %v305_v27 = vadd.f32 %v707_v2, %v170_v18  ;;  %v306_v28 = vadd.f32 %v707_v2, %v171_v19 }
  0x14   :  { %v429_v32 = vmax.f32 %v301_v20, 0.0  ;;  %v430_v33 = vmax.f32 %v302_v21, 0.0  ;;  %v431_v34 = vmax.f32 %v303_v22, 0.0  ;;  %556 = vst [vmem:[%s1743_s3 + $0x80] sm:$0xff] %v428_v25  ;;  %v173_v42 = vmul.f32 %v702_v1, %v38_v24 }
  0x15   :  { %v307_v35 = vadd.f32 %v707_v2, %v172_v23  ;;  %v432_v39 = vmax.f32 %v304_v26, 0.0  ;;  %v433_v40 = vmax.f32 %v305_v27, 0.0  ;;  %v434_v41 = vmax.f32 %v306_v28, 0.0  ;;  %v54_v26 = vld [vmem:[%s1740_s0 + $0x140] sm:$0xff] }
  0x16   :  { %557 = vst [vmem:[%s1743_s3 + $0x88] sm:$0xff] %v429_v32  ;;  %558 = vst [vmem:[%s1743_s3 + $0x90] sm:$0xff] %v430_v33  ;;  %v174_v45 = vmul.f32 %v702_v1, %v39_v29  ;;  %v175_v46 = vmul.f32 %v702_v1, %v40_v30  ;;  %v176_v47 = vmul.f32 %v702_v1, %v41_v31  ;;  %v55_v31 = vld [vmem:[%s1740_s0 + $0x148] sm:$0xff]  ;;  %v56_v32 = vld [vmem:[%s1740_s0 + $0x150] sm:$0xff] }
  0x17   :  { %559 = vst [vmem:[%s1743_s3 + $0x98] sm:$0xff] %v431_v34  ;;  %v435_v44 = vmax.f32 %v307_v35, 0.0  ;;  %560 = vst [vmem:[%s1743_s3 + $0xa0] sm:$0xff] %v432_v39  ;;  %v308_v48 = vadd.f32 %v707_v2, %v173_v42  ;;  %v177_v49 = vmul.f32 %v702_v1, %v42_v36  ;;  %v178_v50 = vmul.f32 %v702_v1, %v43_v37  ;;  %v57_v33 = vld [vmem:[%s1740_s0 + $0x158] sm:$0xff]  ;;  %v59_v39 = vld [vmem:[%s1740_s0 + $0x168] sm:$0xff] }
  0x18   :  { %561 = vst [vmem:[%s1743_s3 + $0xa8] sm:$0xff] %v433_v40  ;;  %562 = vst [vmem:[%s1743_s3 + $0xb0] sm:$0xff] %v434_v41  ;;  %v179_v51 = vmul.f32 %v702_v1, %v44_v38  ;;  %v309_v52 = vadd.f32 %v707_v2, %v174_v45  ;;  %v310_v53 = vadd.f32 %v707_v2, %v175_v46  ;;  %v58_v38 = vld [vmem:[%s1740_s0 + $0x160] sm:$0xff]  ;;  %v60_v40 = vld [vmem:[%s1740_s0 + $0x170] sm:$0xff] }
  0x19   :  { %563 = vst [vmem:[%s1743_s3 + $0xb8] sm:$0xff] %v435_v44  ;;  %v311_v54 = vadd.f32 %v707_v2, %v176_v47  ;;  %v180_v55 = vmul.f32 %v702_v1, %v45_v43  ;;  %v436_v57 = vmax.f32 %v308_v48, 0.0  ;;  %v312_v58 = vadd.f32 %v707_v2, %v177_v49  ;;  %v61_v45 = vld [vmem:[%s1740_s0 + $0x178] sm:$0xff] }
  0x1a   :  { %v313_v59 = vadd.f32 %v707_v2, %v178_v50  ;;  %v314_v60 = vadd.f32 %v707_v2, %v179_v51  ;;  %v437_v0 = vmax.f32 %v309_v52, 0.0  ;;  %v438_v3 = vmax.f32 %v310_v53, 0.0 }
  0x1b   :  { %v439_v4 = vmax.f32 %v311_v54, 0.0  ;;  %v315_v5 = vadd.f32 %v707_v2, %v180_v55  ;;  %564 = vst [vmem:[%s1743_s3 + $0xc0] sm:$0xff] %v436_v57  ;;  %v440_v9 = vmax.f32 %v312_v58, 0.0  ;;  %v181_v12 = vmul.f32 %v702_v1, %v46_v56  ;;  %v62_v58 = vld [vmem:[%s1740_s0 + $0x180] sm:$0xff] }
  0x1c   :  { %v441_v10 = vmax.f32 %v313_v59, 0.0  ;;  %v442_v11 = vmax.f32 %v314_v60, 0.0  ;;  %565 = vst [vmem:[%s1743_s3 + $0xc8] sm:$0xff] %v437_v0  ;;  %566 = vst [vmem:[%s1743_s3 + $0xd0] sm:$0xff] %v438_v3  ;;  %v182_v15 = vmul.f32 %v702_v1, %v47_v61  ;;  %v183_v16 = vmul.f32 %v702_v1, %v48_v62  ;;  %v64_v0 = vld [vmem:[%s1740_s0 + $0x190] sm:$0xff]  ;;  %v65_v3 = vld [vmem:[%s1740_s0 + $0x198] sm:$0xff] }
  0x1d   :  { %567 = vst [vmem:[%s1743_s3 + $0xd8] sm:$0xff] %v439_v4  ;;  %v443_v14 = vmax.f32 %v315_v5, 0.0  ;;  %v184_v17 = vmul.f32 %v702_v1, %v49_v63  ;;  %568 = vst [vmem:[%s1743_s3 + $0xe0] sm:$0xff] %v440_v9  ;;  %v316_v18 = vadd.f32 %v707_v2, %v181_v12  ;;  %v185_v19 = vmul.f32 %v702_v1, %v50_v6  ;;  %v63_v63 = vld [vmem:[%s1740_s0 + $0x188] sm:$0xff] }
  0x1e   :  { %569 = vst [vmem:[%s1743_s3 + $0xe8] sm:$0xff] %v441_v10  ;;  %570 = vst [vmem:[%s1743_s3 + $0xf0] sm:$0xff] %v442_v11  ;;  %v186_v20 = vmul.f32 %v702_v1, %v51_v7  ;;  %v187_v21 = vmul.f32 %v702_v1, %v52_v8  ;;  %v317_v22 = vadd.f32 %v707_v2, %v182_v15  ;;  %v66_v8 = vld [vmem:[%s1740_s0 + $0x1a0] sm:$0xff]  ;;  %v67_v9 = vld [vmem:[%s1740_s0 + $0x1a8] sm:$0xff] }
  0x1f   :  { %571 = vst [vmem:[%s1743_s3 + $0xf8] sm:$0xff] %v443_v14  ;;  %v318_v23 = vadd.f32 %v707_v2, %v183_v16  ;;  %v319_v24 = vadd.f32 %v707_v2, %v184_v17  ;;  %v188_v25 = vmul.f32 %v702_v1, %v53_v13  ;;  %v444_v27 = vmax.f32 %v316_v18, 0.0  ;;  %v68_v10 = vld [vmem:[%s1740_s0 + $0x1b0] sm:$0xff]  ;;  %v69_v15 = vld [vmem:[%s1740_s0 + $0x1b8] sm:$0xff] }
  0x20   :  { %v320_v28 = vadd.f32 %v707_v2, %v185_v19  ;;  %v321_v29 = vadd.f32 %v707_v2, %v186_v20  ;;  %v322_v30 = vadd.f32 %v707_v2, %v187_v21  ;;  %v445_v34 = vmax.f32 %v317_v22, 0.0 }
  0x21   :  { %v446_v35 = vmax.f32 %v318_v23, 0.0  ;;  %v447_v36 = vmax.f32 %v319_v24, 0.0  ;;  %v323_v37 = vadd.f32 %v707_v2, %v188_v25  ;;  %572 = vst [vmem:[%s1743_s3 + $0x100] sm:$0xff] %v444_v27  ;;  %v189_v44 = vmul.f32 %v702_v1, %v54_v26 }
  0x22   :  { %v448_v41 = vmax.f32 %v320_v28, 0.0  ;;  %v449_v42 = vmax.f32 %v321_v29, 0.0  ;;  %v450_v43 = vmax.f32 %v322_v30, 0.0  ;;  %573 = vst [vmem:[%s1743_s3 + $0x108] sm:$0xff] %v445_v34  ;;  %v190_v47 = vmul.f32 %v702_v1, %v55_v31  ;;  %v70_v28 = vld [vmem:[%s1740_s0 + $0x1c0] sm:$0xff]  ;;  %v72_v34 = vld [vmem:[%s1740_s0 + $0x1d0] sm:$0xff] }
  0x23   :  { %574 = vst [vmem:[%s1743_s3 + $0x110] sm:$0xff] %v446_v35  ;;  %575 = vst [vmem:[%s1743_s3 + $0x118] sm:$0xff] %v447_v36  ;;  %v451_v46 = vmax.f32 %v323_v37, 0.0  ;;  %v191_v48 = vmul.f32 %v702_v1, %v56_v32  ;;  %v192_v49 = vmul.f32 %v702_v1, %v57_v33  ;;  %v324_v50 = vadd.f32 %v707_v2, %v189_v44  ;;  %v71_v33 = vld [vmem:[%s1740_s0 + $0x1c8] sm:$0xff]  ;;  %v73_v35 = vld [vmem:[%s1740_s0 + $0x1d8] sm:$0xff] }
  0x24   :  { %576 = vst [vmem:[%s1743_s3 + $0x120] sm:$0xff] %v448_v41  ;;  %577 = vst [vmem:[%s1743_s3 + $0x128] sm:$0xff] %v449_v42  ;;  %v193_v51 = vmul.f32 %v702_v1, %v58_v38  ;;  %v194_v52 = vmul.f32 %v702_v1, %v59_v39  ;;  %v195_v53 = vmul.f32 %v702_v1, %v60_v40  ;;  %v74_v40 = vld [vmem:[%s1740_s0 + $0x1e0] sm:$0xff]  ;;  %v75_v41 = vld [vmem:[%s1740_s0 + $0x1e8] sm:$0xff] }
  0x25   :  { %578 = vst [vmem:[%s1743_s3 + $0x130] sm:$0xff] %v450_v43  ;;  %579 = vst [vmem:[%s1743_s3 + $0x138] sm:$0xff] %v451_v46  ;;  %v325_v54 = vadd.f32 %v707_v2, %v190_v47  ;;  %v326_v55 = vadd.f32 %v707_v2, %v191_v48  ;;  %v327_v56 = vadd.f32 %v707_v2, %v192_v49  ;;  %v452_v59 = vmax.f32 %v324_v50, 0.0  ;;  %v76_v42 = vld [vmem:[%s1740_s0 + $0x1f0] sm:$0xff]  ;;  %v77_v47 = vld [vmem:[%s1740_s0 + $0x1f8] sm:$0xff] }
  0x26   :  { %v196_v57 = vmul.f32 %v702_v1, %v61_v45  ;;  %v328_v60 = vadd.f32 %v707_v2, %v193_v51  ;;  %v329_v61 = vadd.f32 %v707_v2, %v194_v52  ;;  %v330_v62 = vadd.f32 %v707_v2, %v195_v53 }
  0x27   :  { %v453_v4 = vmax.f32 %v325_v54, 0.0  ;;  %v454_v5 = vmax.f32 %v326_v55, 0.0  ;;  %v455_v6 = vmax.f32 %v327_v56, 0.0  ;;  %580 = vst [vmem:[%s1743_s3 + $0x140] sm:$0xff] %v452_v59  ;;  %v197_v14 = vmul.f32 %v702_v1, %v62_v58 }
  0x28   :  { %v331_v7 = vadd.f32 %v707_v2, %v196_v57  ;;  %v456_v11 = vmax.f32 %v328_v60, 0.0  ;;  %v457_v12 = vmax.f32 %v329_v61, 0.0  ;;  %v458_v13 = vmax.f32 %v330_v62, 0.0  ;;  %v78_v60 = vld [vmem:[%s1740_s0 + $0x200] sm:$0xff] }
  0x29   :  { %581 = vst [vmem:[%s1743_s3 + $0x148] sm:$0xff] %v453_v4  ;;  %582 = vst [vmem:[%s1743_s3 + $0x150] sm:$0xff] %v454_v5  ;;  %v198_v17 = vmul.f32 %v702_v1, %v63_v63  ;;  %v199_v18 = vmul.f32 %v702_v1, %v64_v0  ;;  %v200_v19 = vmul.f32 %v702_v1, %v65_v3  ;;  %v79_v3 = vld [vmem:[%s1740_s0 + $0x208] sm:$0xff]  ;;  %v80_v4 = vld [vmem:[%s1740_s0 + $0x210] sm:$0xff] }
  0x2a   :  { %583 = vst [vmem:[%s1743_s3 + $0x158] sm:$0xff] %v455_v6  ;;  %v459_v16 = vmax.f32 %v331_v7, 0.0  ;;  %584 = vst [vmem:[%s1743_s3 + $0x160] sm:$0xff] %v456_v11  ;;  %v332_v20 = vadd.f32 %v707_v2, %v197_v14  ;;  %v201_v21 = vmul.f32 %v702_v1, %v66_v8  ;;  %v202_v22 = vmul.f32 %v702_v1, %v67_v9  ;;  %v81_v5 = vld [vmem:[%s1740_s0 + $0x218] sm:$0xff]  ;;  %v83_v11 = vld [vmem:[%s1740_s0 + $0x228] sm:$0xff] }
  0x2b   :  { %585 = vst [vmem:[%s1743_s3 + $0x168] sm:$0xff] %v457_v12  ;;  %586 = vst [vmem:[%s1743_s3 + $0x170] sm:$0xff] %v458_v13  ;;  %v203_v23 = vmul.f32 %v702_v1, %v68_v10  ;;  %v333_v24 = vadd.f32 %v707_v2, %v198_v17  ;;  %v334_v25 = vadd.f32 %v707_v2, %v199_v18  ;;  %v82_v10 = vld [vmem:[%s1740_s0 + $0x220] sm:$0xff]  ;;  %v84_v12 = vld [vmem:[%s1740_s0 + $0x230] sm:$0xff] }
  0x2c   :  { %587 = vst [vmem:[%s1743_s3 + $0x178] sm:$0xff] %v459_v16  ;;  %v335_v26 = vadd.f32 %v707_v2, %v200_v19  ;;  %v204_v27 = vmul.f32 %v702_v1, %v69_v15  ;;  %v460_v29 = vmax.f32 %v332_v20, 0.0  ;;  %v336_v30 = vadd.f32 %v707_v2, %v201_v21  ;;  %v85_v17 = vld [vmem:[%s1740_s0 + $0x238] sm:$0xff] }
  0x2d   :  { %v337_v31 = vadd.f32 %v707_v2, %v202_v22  ;;  %v338_v32 = vadd.f32 %v707_v2, %v203_v23  ;;  %v461_v36 = vmax.f32 %v333_v24, 0.0  ;;  %v462_v37 = vmax.f32 %v334_v25, 0.0 }
  0x2e   :  { %v463_v38 = vmax.f32 %v335_v26, 0.0  ;;  %v339_v39 = vadd.f32 %v707_v2, %v204_v27  ;;  %588 = vst [vmem:[%s1743_s3 + $0x180] sm:$0xff] %v460_v29  ;;  %v464_v43 = vmax.f32 %v336_v30, 0.0  ;;  %v205_v46 = vmul.f32 %v702_v1, %v70_v28  ;;  %v86_v30 = vld [vmem:[%s1740_s0 + $0x240] sm:$0xff] }
  0x2f   :  { %v465_v44 = vmax.f32 %v337_v31, 0.0  ;;  %v466_v45 = vmax.f32 %v338_v32, 0.0  ;;  %589 = vst [vmem:[%s1743_s3 + $0x188] sm:$0xff] %v461_v36  ;;  %590 = vst [vmem:[%s1743_s3 + $0x190] sm:$0xff] %v462_v37  ;;  %v206_v49 = vmul.f32 %v702_v1, %v71_v33  ;;  %v207_v50 = vmul.f32 %v702_v1, %v72_v34  ;;  %v88_v36 = vld [vmem:[%s1740_s0 + $0x250] sm:$0xff]  ;;  %v89_v37 = vld [vmem:[%s1740_s0 + $0x258] sm:$0xff] }
  0x30   :  { %591 = vst [vmem:[%s1743_s3 + $0x198] sm:$0xff] %v463_v38  ;;  %v467_v48 = vmax.f32 %v339_v39, 0.0  ;;  %v208_v51 = vmul.f32 %v702_v1, %v73_v35  ;;  %592 = vst [vmem:[%s1743_s3 + $0x1a0] sm:$0xff] %v464_v43  ;;  %v340_v52 = vadd.f32 %v707_v2, %v205_v46  ;;  %v209_v53 = vmul.f32 %v702_v1, %v74_v40  ;;  %v87_v35 = vld [vmem:[%s1740_s0 + $0x248] sm:$0xff] }
  0x31   :  { %593 = vst [vmem:[%s1743_s3 + $0x1a8] sm:$0xff] %v465_v44  ;;  %594 = vst [vmem:[%s1743_s3 + $0x1b0] sm:$0xff] %v466_v45  ;;  %v210_v54 = vmul.f32 %v702_v1, %v75_v41  ;;  %v211_v55 = vmul.f32 %v702_v1, %v76_v42  ;;  %v341_v56 = vadd.f32 %v707_v2, %v206_v49  ;;  %v90_v42 = vld [vmem:[%s1740_s0 + $0x260] sm:$0xff]  ;;  %v91_v43 = vld [vmem:[%s1740_s0 + $0x268] sm:$0xff] }
  0x32   :  { %595 = vst [vmem:[%s1743_s3 + $0x1b8] sm:$0xff] %v467_v48  ;;  %v342_v57 = vadd.f32 %v707_v2, %v207_v50  ;;  %v343_v58 = vadd.f32 %v707_v2, %v208_v51  ;;  %v212_v59 = vmul.f32 %v702_v1, %v77_v47  ;;  %v468_v61 = vmax.f32 %v340_v52, 0.0  ;;  %v92_v44 = vld [vmem:[%s1740_s0 + $0x270] sm:$0xff]  ;;  %v93_v49 = vld [vmem:[%s1740_s0 + $0x278] sm:$0xff] }
  0x33   :  { %v344_v62 = vadd.f32 %v707_v2, %v209_v53  ;;  %v345_v63 = vadd.f32 %v707_v2, %v210_v54  ;;  %v346_v0 = vadd.f32 %v707_v2, %v211_v55  ;;  %v469_v6 = vmax.f32 %v341_v56, 0.0 }
  0x34   :  { %v470_v7 = vmax.f32 %v342_v57, 0.0  ;;  %v471_v8 = vmax.f32 %v343_v58, 0.0  ;;  %v347_v9 = vadd.f32 %v707_v2, %v212_v59  ;;  %596 = vst [vmem:[%s1743_s3 + $0x1c0] sm:$0xff] %v468_v61  ;;  %v213_v16 = vmul.f32 %v702_v1, %v78_v60 }
  0x35   :  { %v472_v13 = vmax.f32 %v344_v62, 0.0  ;;  %v473_v14 = vmax.f32 %v345_v63, 0.0  ;;  %v474_v15 = vmax.f32 %v346_v0, 0.0  ;;  %597 = vst [vmem:[%s1743_s3 + $0x1c8] sm:$0xff] %v469_v6  ;;  %v214_v19 = vmul.f32 %v702_v1, %v79_v3  ;;  %v94_v62 = vld [vmem:[%s1740_s0 + $0x280] sm:$0xff]  ;;  %v96_v6 = vld [vmem:[%s1740_s0 + $0x290] sm:$0xff] }
  0x36   :  { %598 = vst [vmem:[%s1743_s3 + $0x1d0] sm:$0xff] %v470_v7  ;;  %599 = vst [vmem:[%s1743_s3 + $0x1d8] sm:$0xff] %v471_v8  ;;  %v475_v18 = vmax.f32 %v347_v9, 0.0  ;;  %v215_v20 = vmul.f32 %v702_v1, %v80_v4  ;;  %v216_v21 = vmul.f32 %v702_v1, %v81_v5  ;;  %v348_v22 = vadd.f32 %v707_v2, %v213_v16  ;;  %v95_v5 = vld [vmem:[%s1740_s0 + $0x288] sm:$0xff]  ;;  %v97_v7 = vld [vmem:[%s1740_s0 + $0x298] sm:$0xff] }
  0x37   :  { %600 = vst [vmem:[%s1743_s3 + $0x1e0] sm:$0xff] %v472_v13  ;;  %601 = vst [vmem:[%s1743_s3 + $0x1e8] sm:$0xff] %v473_v14  ;;  %v217_v23 = vmul.f32 %v702_v1, %v82_v10  ;;  %v218_v24 = vmul.f32 %v702_v1, %v83_v11  ;;  %v219_v25 = vmul.f32 %v702_v1, %v84_v12  ;;  %v98_v12 = vld [vmem:[%s1740_s0 + $0x2a0] sm:$0xff]  ;;  %v99_v13 = vld [vmem:[%s1740_s0 + $0x2a8] sm:$0xff] }
  0x38   :  { %602 = vst [vmem:[%s1743_s3 + $0x1f0] sm:$0xff] %v474_v15  ;;  %603 = vst [vmem:[%s1743_s3 + $0x1f8] sm:$0xff] %v475_v18  ;;  %v349_v26 = vadd.f32 %v707_v2, %v214_v19  ;;  %v350_v27 = vadd.f32 %v707_v2, %v215_v20  ;;  %v351_v28 = vadd.f32 %v707_v2, %v216_v21  ;;  %v476_v31 = vmax.f32 %v348_v22, 0.0  ;;  %v100_v14 = vld [vmem:[%s1740_s0 + $0x2b0] sm:$0xff]  ;;  %v101_v19 = vld [vmem:[%s1740_s0 + $0x2b8] sm:$0xff] }
  0x39   :  { %v220_v29 = vmul.f32 %v702_v1, %v85_v17  ;;  %v352_v32 = vadd.f32 %v707_v2, %v217_v23  ;;  %v353_v33 = vadd.f32 %v707_v2, %v218_v24  ;;  %v354_v34 = vadd.f32 %v707_v2, %v219_v25 }
  0x3a   :  { %v477_v38 = vmax.f32 %v349_v26, 0.0  ;;  %v478_v39 = vmax.f32 %v350_v27, 0.0  ;;  %v479_v40 = vmax.f32 %v351_v28, 0.0  ;;  %604 = vst [vmem:[%s1743_s3 + $0x200] sm:$0xff] %v476_v31  ;;  %v221_v48 = vmul.f32 %v702_v1, %v86_v30 }
  0x3b   :  { %v355_v41 = vadd.f32 %v707_v2, %v220_v29  ;;  %v480_v45 = vmax.f32 %v352_v32, 0.0  ;;  %v481_v46 = vmax.f32 %v353_v33, 0.0  ;;  %v482_v47 = vmax.f32 %v354_v34, 0.0  ;;  %v102_v32 = vld [vmem:[%s1740_s0 + $0x2c0] sm:$0xff] }
  0x3c   :  { %605 = vst [vmem:[%s1743_s3 + $0x208] sm:$0xff] %v477_v38  ;;  %606 = vst [vmem:[%s1743_s3 + $0x210] sm:$0xff] %v478_v39  ;;  %v222_v51 = vmul.f32 %v702_v1, %v87_v35  ;;  %v223_v52 = vmul.f32 %v702_v1, %v88_v36  ;;  %v224_v53 = vmul.f32 %v702_v1, %v89_v37  ;;  %v103_v37 = vld [vmem:[%s1740_s0 + $0x2c8] sm:$0xff]  ;;  %v104_v38 = vld [vmem:[%s1740_s0 + $0x2d0] sm:$0xff] }
  0x3d   :  { %607 = vst [vmem:[%s1743_s3 + $0x218] sm:$0xff] %v479_v40  ;;  %v483_v50 = vmax.f32 %v355_v41, 0.0  ;;  %608 = vst [vmem:[%s1743_s3 + $0x220] sm:$0xff] %v480_v45  ;;  %v356_v54 = vadd.f32 %v707_v2, %v221_v48  ;;  %v225_v55 = vmul.f32 %v702_v1, %v90_v42  ;;  %v226_v56 = vmul.f32 %v702_v1, %v91_v43  ;;  %v105_v39 = vld [vmem:[%s1740_s0 + $0x2d8] sm:$0xff]  ;;  %v107_v45 = vld [vmem:[%s1740_s0 + $0x2e8] sm:$0xff] }
  0x3e   :  { %609 = vst [vmem:[%s1743_s3 + $0x228] sm:$0xff] %v481_v46  ;;  %610 = vst [vmem:[%s1743_s3 + $0x230] sm:$0xff] %v482_v47  ;;  %v227_v57 = vmul.f32 %v702_v1, %v92_v44  ;;  %v357_v58 = vadd.f32 %v707_v2, %v222_v51  ;;  %v358_v59 = vadd.f32 %v707_v2, %v223_v52  ;;  %v106_v44 = vld [vmem:[%s1740_s0 + $0x2e0] sm:$0xff]  ;;  %v108_v46 = vld [vmem:[%s1740_s0 + $0x2f0] sm:$0xff] }
  0x3f   :  { %611 = vst [vmem:[%s1743_s3 + $0x238] sm:$0xff] %v483_v50  ;;  %v359_v60 = vadd.f32 %v707_v2, %v224_v53  ;;  %v228_v61 = vmul.f32 %v702_v1, %v93_v49  ;;  %v484_v63 = vmax.f32 %v356_v54, 0.0  ;;  %v360_v0 = vadd.f32 %v707_v2, %v225_v55  ;;  %v109_v51 = vld [vmem:[%s1740_s0 + $0x2f8] sm:$0xff] }
  0x40   :  { %v361_v3 = vadd.f32 %v707_v2, %v226_v56  ;;  %v362_v4 = vadd.f32 %v707_v2, %v227_v57  ;;  %v485_v8 = vmax.f32 %v357_v58, 0.0  ;;  %v486_v9 = vmax.f32 %v358_v59, 0.0 }
  0x41   :  { %v487_v10 = vmax.f32 %v359_v60, 0.0  ;;  %v363_v11 = vadd.f32 %v707_v2, %v228_v61  ;;  %612 = vst [vmem:[%s1743_s3 + $0x240] sm:$0xff] %v484_v63  ;;  %v488_v15 = vmax.f32 %v360_v0, 0.0  ;;  %v229_v18 = vmul.f32 %v702_v1, %v94_v62  ;;  %v110_v0 = vld [vmem:[%s1740_s0 + $0x300] sm:$0xff] }
  0x42   :  { %v489_v16 = vmax.f32 %v361_v3, 0.0  ;;  %v490_v17 = vmax.f32 %v362_v4, 0.0  ;;  %613 = vst [vmem:[%s1743_s3 + $0x248] sm:$0xff] %v485_v8  ;;  %614 = vst [vmem:[%s1743_s3 + $0x250] sm:$0xff] %v486_v9  ;;  %v230_v21 = vmul.f32 %v702_v1, %v95_v5  ;;  %v231_v22 = vmul.f32 %v702_v1, %v96_v6  ;;  %v112_v8 = vld [vmem:[%s1740_s0 + $0x310] sm:$0xff]  ;;  %v113_v9 = vld [vmem:[%s1740_s0 + $0x318] sm:$0xff] }
  0x43   :  { %615 = vst [vmem:[%s1743_s3 + $0x258] sm:$0xff] %v487_v10  ;;  %v491_v20 = vmax.f32 %v363_v11, 0.0  ;;  %v232_v23 = vmul.f32 %v702_v1, %v97_v7  ;;  %616 = vst [vmem:[%s1743_s3 + $0x260] sm:$0xff] %v488_v15  ;;  %v364_v24 = vadd.f32 %v707_v2, %v229_v18  ;;  %v233_v25 = vmul.f32 %v702_v1, %v98_v12  ;;  %v111_v7 = vld [vmem:[%s1740_s0 + $0x308] sm:$0xff] }
  0x44   :  { %617 = vst [vmem:[%s1743_s3 + $0x268] sm:$0xff] %v489_v16  ;;  %618 = vst [vmem:[%s1743_s3 + $0x270] sm:$0xff] %v490_v17  ;;  %v234_v26 = vmul.f32 %v702_v1, %v99_v13  ;;  %v235_v27 = vmul.f32 %v702_v1, %v100_v14  ;;  %v365_v28 = vadd.f32 %v707_v2, %v230_v21  ;;  %v114_v14 = vld [vmem:[%s1740_s0 + $0x320] sm:$0xff]  ;;  %v115_v15 = vld [vmem:[%s1740_s0 + $0x328] sm:$0xff] }
  0x45   :  { %619 = vst [vmem:[%s1743_s3 + $0x278] sm:$0xff] %v491_v20  ;;  %v366_v29 = vadd.f32 %v707_v2, %v231_v22  ;;  %v367_v30 = vadd.f32 %v707_v2, %v232_v23  ;;  %v236_v31 = vmul.f32 %v702_v1, %v101_v19  ;;  %v492_v33 = vmax.f32 %v364_v24, 0.0  ;;  %v116_v16 = vld [vmem:[%s1740_s0 + $0x330] sm:$0xff]  ;;  %v117_v21 = vld [vmem:[%s1740_s0 + $0x338] sm:$0xff] }
  0x46   :  { %v368_v34 = vadd.f32 %v707_v2, %v233_v25  ;;  %v369_v35 = vadd.f32 %v707_v2, %v234_v26  ;;  %v370_v36 = vadd.f32 %v707_v2, %v235_v27  ;;  %v493_v40 = vmax.f32 %v365_v28, 0.0 }
  0x47   :  { %v494_v41 = vmax.f32 %v366_v29, 0.0  ;;  %v495_v42 = vmax.f32 %v367_v30, 0.0  ;;  %v371_v43 = vadd.f32 %v707_v2, %v236_v31  ;;  %620 = vst [vmem:[%s1743_s3 + $0x280] sm:$0xff] %v492_v33  ;;  %v237_v50 = vmul.f32 %v702_v1, %v102_v32 }
  0x48   :  { %v496_v47 = vmax.f32 %v368_v34, 0.0  ;;  %v497_v48 = vmax.f32 %v369_v35, 0.0  ;;  %v498_v49 = vmax.f32 %v370_v36, 0.0  ;;  %621 = vst [vmem:[%s1743_s3 + $0x288] sm:$0xff] %v493_v40  ;;  %v238_v53 = vmul.f32 %v702_v1, %v103_v37  ;;  %v118_v34 = vld [vmem:[%s1740_s0 + $0x340] sm:$0xff]  ;;  %v120_v40 = vld [vmem:[%s1740_s0 + $0x350] sm:$0xff] }
  0x49   :  { %622 = vst [vmem:[%s1743_s3 + $0x290] sm:$0xff] %v494_v41  ;;  %623 = vst [vmem:[%s1743_s3 + $0x298] sm:$0xff] %v495_v42  ;;  %v499_v52 = vmax.f32 %v371_v43, 0.0  ;;  %v239_v54 = vmul.f32 %v702_v1, %v104_v38  ;;  %v240_v55 = vmul.f32 %v702_v1, %v105_v39  ;;  %v372_v56 = vadd.f32 %v707_v2, %v237_v50  ;;  %v119_v39 = vld [vmem:[%s1740_s0 + $0x348] sm:$0xff] }
  0x4a   :  { %624 = vst [vmem:[%s1743_s3 + $0x2a0] sm:$0xff] %v496_v47  ;;  %625 = vst [vmem:[%s1743_s3 + $0x2a8] sm:$0xff] %v497_v48  ;;  %v241_v57 = vmul.f32 %v702_v1, %v106_v44  ;;  %v242_v58 = vmul.f32 %v702_v1, %v107_v45  ;;  %v243_v59 = vmul.f32 %v702_v1, %v108_v46  ;;  %v1528_v44 = vld [vmem:[%s1742_s2] ss:$0 sm:$0xff]  ;;  %v123_v46 = vld [vmem:[%s1740_s0 + $0x368] sm:$0xff] }
  0x4b   :  { %626 = vst [vmem:[%s1743_s3 + $0x2b0] sm:$0xff] %v498_v49  ;;  %627 = vst [vmem:[%s1743_s3 + $0x2b8] sm:$0xff] %v499_v52  ;;  %v373_v60 = vadd.f32 %v707_v2, %v238_v53  ;;  %v374_v61 = vadd.f32 %v707_v2, %v239_v54  ;;  %v375_v62 = vadd.f32 %v707_v2, %v240_v55  ;;  %v500_v3 = vmax.f32 %v372_v56, 0.0  ;;  %v122_v45 = vld [vmem:[%s1740_s0 + $0x360] sm:$0xff]  ;;  %v124_v47 = vld [vmem:[%s1740_s0 + $0x370] sm:$0xff] }
  0x4c   :  { %v244_v63 = vmul.f32 %v702_v1, %v109_v51  ;;  %v376_v4 = vadd.f32 %v707_v2, %v241_v57  ;;  %v377_v5 = vadd.f32 %v707_v2, %v242_v58  ;;  %v378_v6 = vadd.f32 %v707_v2, %v243_v59  ;;  %v1546_v51 = vld [vmem:[%s1741_s1] ss:$0 sm:$0xff]  ;;  %v125_v53 = vld [vmem:[%s1740_s0 + $0x378] sm:$0xff] }
  0x4d   :  { %v501_v10 = vmax.f32 %v373_v60, 0.0  ;;  %v502_v11 = vmax.f32 %v374_v61, 0.0  ;;  %v503_v12 = vmax.f32 %v375_v62, 0.0  ;;  %628 = vst [vmem:[%s1743_s3 + $0x2c0] sm:$0xff] %v500_v3  ;;  %v245_v20 = vmul.f32 %v702_v1, %v110_v0 }
  0x4e   :  { %v379_v13 = vadd.f32 %v707_v2, %v244_v63  ;;  %v504_v17 = vmax.f32 %v376_v4, 0.0  ;;  %v505_v18 = vmax.f32 %v377_v5, 0.0  ;;  %v506_v19 = vmax.f32 %v378_v6, 0.0  ;;  %v126_v4 = vld [vmem:[%s1740_s0 + $0x380] sm:$0xff] }
  0x4f   :  { %629 = vst [vmem:[%s1743_s3 + $0x2c8] sm:$0xff] %v501_v10  ;;  %630 = vst [vmem:[%s1743_s3 + $0x2d0] sm:$0xff] %v502_v11  ;;  %v246_v23 = vmul.f32 %v702_v1, %v111_v7  ;;  %v247_v24 = vmul.f32 %v702_v1, %v112_v8  ;;  %v248_v25 = vmul.f32 %v702_v1, %v113_v9  ;;  %v127_v9 = vld [vmem:[%s1740_s0 + $0x388] sm:$0xff]  ;;  %v128_v10 = vld [vmem:[%s1740_s0 + $0x390] sm:$0xff] }
  0x50   :  { %631 = vst [vmem:[%s1743_s3 + $0x2d8] sm:$0xff] %v503_v12  ;;  %v507_v22 = vmax.f32 %v379_v13, 0.0  ;;  %632 = vst [vmem:[%s1743_s3 + $0x2e0] sm:$0xff] %v504_v17  ;;  %v380_v26 = vadd.f32 %v707_v2, %v245_v20  ;;  %v249_v27 = vmul.f32 %v702_v1, %v114_v14  ;;  %v250_v28 = vmul.f32 %v702_v1, %v115_v15  ;;  %v129_v11 = vld [vmem:[%s1740_s0 + $0x398] sm:$0xff]  ;;  %v131_v17 = vld [vmem:[%s1740_s0 + $0x3a8] sm:$0xff] }
  0x51   :  { %633 = vst [vmem:[%s1743_s3 + $0x2e8] sm:$0xff] %v505_v18  ;;  %634 = vst [vmem:[%s1743_s3 + $0x2f0] sm:$0xff] %v506_v19  ;;  %v251_v29 = vmul.f32 %v702_v1, %v116_v16  ;;  %v381_v30 = vadd.f32 %v707_v2, %v246_v23  ;;  %v382_v31 = vadd.f32 %v707_v2, %v247_v24  ;;  %v130_v16 = vld [vmem:[%s1740_s0 + $0x3a0] sm:$0xff]  ;;  %v132_v18 = vld [vmem:[%s1740_s0 + $0x3b0] sm:$0xff] }
  0x52   :  { %635 = vst [vmem:[%s1743_s3 + $0x2f8] sm:$0xff] %v507_v22  ;;  %v383_v32 = vadd.f32 %v707_v2, %v248_v25  ;;  %v252_v33 = vmul.f32 %v702_v1, %v117_v21  ;;  %v508_v35 = vmax.f32 %v380_v26, 0.0  ;;  %v384_v36 = vadd.f32 %v707_v2, %v249_v27  ;;  %v121_v1 = vld [vmem:[%s1740_s0 + $0x358] sm:$0xff] }
  0x53   :  { %v385_v37 = vadd.f32 %v707_v2, %v250_v28  ;;  %v386_v38 = vadd.f32 %v707_v2, %v251_v29  ;;  %v509_v41 = vmax.f32 %v381_v30, 0.0  ;;  %v510_v42 = vmax.f32 %v382_v31, 0.0  ;;  %v133_v23 = vld [vmem:[%s1740_s0 + $0x3b8] sm:$0xff] }
  0x54   :  { %v511_v43 = vmax.f32 %v383_v32, 0.0  ;;  %v387_v2 = vadd.f32 %v1528_v44, %v252_v33  ;;  %636 = vst [vmem:[%s1743_s3 + $0x300] sm:$0xff] %v508_v35  ;;  %v512_v48 = vmax.f32 %v384_v36, 0.0  ;;  %v253_v52 = vmul.f32 %v1546_v51, %v118_v34  ;;  %v134_v36 = vld [vmem:[%s1740_s0 + $0x3c0] sm:$0xff] }
  0x55   :  { %v513_v49 = vmax.f32 %v385_v37, 0.0  ;;  %v514_v50 = vmax.f32 %v386_v38, 0.0  ;;  %637 = vst [vmem:[%s1743_s3 + $0x308] sm:$0xff] %v509_v41  ;;  %638 = vst [vmem:[%s1743_s3 + $0x310] sm:$0xff] %v510_v42  ;;  %v254_v55 = vmul.f32 %v1546_v51, %v119_v39  ;;  %v255_v56 = vmul.f32 %v1546_v51, %v120_v40  ;;  %v136_v41 = vld [vmem:[%s1740_s0 + $0x3d0] sm:$0xff]  ;;  %v137_v42 = vld [vmem:[%s1740_s0 + $0x3d8] sm:$0xff] }
  0x56   :  { %639 = vst [vmem:[%s1743_s3 + $0x318] sm:$0xff] %v511_v43  ;;  %v515_v54 = vmax.f32 %v387_v2, 0.0  ;;  %v256_v57 = vmul.f32 %v1546_v51, %v121_v1  ;;  %640 = vst [vmem:[%s1743_s3 + $0x320] sm:$0xff] %v512_v48  ;;  %v388_v58 = vadd.f32 %v1528_v44, %v253_v52  ;;  %v257_v59 = vmul.f32 %v1546_v51, %v122_v45  ;;  %v135_v1 = vld [vmem:[%s1740_s0 + $0x3c8] sm:$0xff] }
  0x57   :  { %641 = vst [vmem:[%s1743_s3 + $0x328] sm:$0xff] %v513_v49  ;;  %642 = vst [vmem:[%s1743_s3 + $0x330] sm:$0xff] %v514_v50  ;;  %v258_v60 = vmul.f32 %v1546_v51, %v123_v46  ;;  %v259_v61 = vmul.f32 %v1546_v51, %v124_v47  ;;  %v389_v62 = vadd.f32 %v1528_v44, %v254_v55  ;;  %v138_v47 = vld [vmem:[%s1740_s0 + $0x3e0] sm:$0xff]  ;;  %v139_v48 = vld [vmem:[%s1740_s0 + $0x3e8] sm:$0xff] }
  0x58   :  { %643 = vst [vmem:[%s1743_s3 + $0x338] sm:$0xff] %v515_v54  ;;  %v390_v63 = vadd.f32 %v1528_v44, %v255_v56  ;;  %v391_v0 = vadd.f32 %v1528_v44, %v256_v57  ;;  %v260_v3 = vmul.f32 %v1546_v51, %v125_v53  ;;  %v516_v5 = vmax.f32 %v388_v58, 0.0  ;;  %v140_v49 = vld [vmem:[%s1740_s0 + $0x3f0] sm:$0xff]  ;;  %v141_v55 = vld [vmem:[%s1740_s0 + $0x3f8] sm:$0xff] }
  0x59   :  { %v392_v6 = vadd.f32 %v1528_v44, %v257_v59  ;;  %v393_v7 = vadd.f32 %v1528_v44, %v258_v60  ;;  %v394_v8 = vadd.f32 %v1528_v44, %v259_v61  ;;  %v517_v12 = vmax.f32 %v389_v62, 0.0 }
  0x5a   :  { %v518_v13 = vmax.f32 %v390_v63, 0.0  ;;  %v519_v14 = vmax.f32 %v391_v0, 0.0  ;;  %v395_v15 = vadd.f32 %v1528_v44, %v260_v3  ;;  %644 = vst [vmem:[%s1743_s3 + $0x340] sm:$0xff] %v516_v5  ;;  %v261_v22 = vmul.f32 %v1546_v51, %v126_v4 }
  0x5b   :  { %v520_v19 = vmax.f32 %v392_v6, 0.0  ;;  %v521_v20 = vmax.f32 %v393_v7, 0.0  ;;  %v522_v21 = vmax.f32 %v394_v8, 0.0  ;;  %645 = vst [vmem:[%s1743_s3 + $0x348] sm:$0xff] %v517_v12  ;;  %v262_v25 = vmul.f32 %v1546_v51, %v127_v9 }
  0x5c   :  { %646 = vst [vmem:[%s1743_s3 + $0x350] sm:$0xff] %v518_v13  ;;  %647 = vst [vmem:[%s1743_s3 + $0x358] sm:$0xff] %v519_v14  ;;  %v523_v24 = vmax.f32 %v395_v15, 0.0  ;;  %v263_v26 = vmul.f32 %v1546_v51, %v128_v10  ;;  %v264_v27 = vmul.f32 %v1546_v51, %v129_v11  ;;  %v396_v28 = vadd.f32 %v1528_v44, %v261_v22 }
  0x5d   :  { %648 = vst [vmem:[%s1743_s3 + $0x360] sm:$0xff] %v520_v19  ;;  %649 = vst [vmem:[%s1743_s3 + $0x368] sm:$0xff] %v521_v20  ;;  %v265_v29 = vmul.f32 %v1546_v51, %v130_v16  ;;  %v266_v30 = vmul.f32 %v1546_v51, %v131_v17  ;;  %v267_v31 = vmul.f32 %v1546_v51, %v132_v18 }
  0x5e   :  { %650 = vst [vmem:[%s1743_s3 + $0x370] sm:$0xff] %v522_v21  ;;  %651 = vst [vmem:[%s1743_s3 + $0x378] sm:$0xff] %v523_v24  ;;  %v397_v32 = vadd.f32 %v1528_v44, %v262_v25  ;;  %v398_v33 = vadd.f32 %v1528_v44, %v263_v26  ;;  %v399_v34 = vadd.f32 %v1528_v44, %v264_v27  ;;  %v524_v37 = vmax.f32 %v396_v28, 0.0 }
  0x5f   :  { %v268_v35 = vmul.f32 %v1546_v51, %v133_v23  ;;  %v400_v38 = vadd.f32 %v1528_v44, %v265_v29  ;;  %v401_v39 = vadd.f32 %v1528_v44, %v266_v30  ;;  %v402_v40 = vadd.f32 %v1528_v44, %v267_v31 }
  0x60   :  { %v525_v43 = vmax.f32 %v397_v32, 0.0  ;;  %v526_v2 = vmax.f32 %v398_v33, 0.0  ;;  %v527_v45 = vmax.f32 %v399_v34, 0.0  ;;  %652 = vst [vmem:[%s1743_s3 + $0x380] sm:$0xff] %v524_v37  ;;  %v269_v54 = vmul.f32 %v1546_v51, %v134_v36 }
  0x61   :  { %v403_v46 = vadd.f32 %v1528_v44, %v268_v35  ;;  %v528_v50 = vmax.f32 %v400_v38, 0.0  ;;  %v529_v52 = vmax.f32 %v401_v39, 0.0  ;;  %v530_v53 = vmax.f32 %v402_v40, 0.0 }
  0x62   :  { %653 = vst [vmem:[%s1743_s3 + $0x388] sm:$0xff] %v525_v43  ;;  %654 = vst [vmem:[%s1743_s3 + $0x390] sm:$0xff] %v526_v2  ;;  %v270_v57 = vmul.f32 %v1546_v51, %v135_v1  ;;  %v271_v58 = vmul.f32 %v1546_v51, %v136_v41  ;;  %v272_v59 = vmul.f32 %v1546_v51, %v137_v42 }
  0x63   :  { %655 = vst [vmem:[%s1743_s3 + $0x398] sm:$0xff] %v527_v45  ;;  %v531_v56 = vmax.f32 %v403_v46, 0.0  ;;  %656 = vst [vmem:[%s1743_s3 + $0x3a0] sm:$0xff] %v528_v50  ;;  %v404_v60 = vadd.f32 %v1528_v44, %v269_v54  ;;  %v273_v61 = vmul.f32 %v1546_v51, %v138_v47  ;;  %v274_v62 = vmul.f32 %v1546_v51, %v139_v48 }
  0x64   :  { %657 = vst [vmem:[%s1743_s3 + $0x3a8] sm:$0xff] %v529_v52  ;;  %658 = vst [vmem:[%s1743_s3 + $0x3b0] sm:$0xff] %v530_v53  ;;  %v275_v63 = vmul.f32 %v1546_v51, %v140_v49  ;;  %v405_v0 = vadd.f32 %v1528_v44, %v270_v57  ;;  %v406_v3 = vadd.f32 %v1528_v44, %v271_v58 }
  0x65   :  { %659 = vst [vmem:[%s1743_s3 + $0x3b8] sm:$0xff] %v531_v56  ;;  %v407_v4 = vadd.f32 %v1528_v44, %v272_v59  ;;  %v276_v5 = vmul.f32 %v1546_v51, %v141_v55  ;;  %v532_v6 = vmax.f32 %v404_v60, 0.0  ;;  %v408_v7 = vadd.f32 %v1528_v44, %v273_v61 }
  0x66   :  { %v409_v8 = vadd.f32 %v1528_v44, %v274_v62  ;;  %v410_v9 = vadd.f32 %v1528_v44, %v275_v63  ;;  %v533_v10 = vmax.f32 %v405_v0, 0.0  ;;  %v534_v11 = vmax.f32 %v406_v3, 0.0 }
  0x67   :  { %v535_v12 = vmax.f32 %v407_v4, 0.0  ;;  %v411_v13 = vadd.f32 %v1528_v44, %v276_v5  ;;  %660 = vst [vmem:[%s1743_s3 + $0x3c0] sm:$0xff] %v532_v6  ;;  %v536_v14 = vmax.f32 %v408_v7, 0.0 }
  0x68   :  { %v537_v15 = vmax.f32 %v409_v8, 0.0  ;;  %v538_v16 = vmax.f32 %v410_v9, 0.0  ;;  %661 = vst [vmem:[%s1743_s3 + $0x3c8] sm:$0xff] %v533_v10  ;;  %662 = vst [vmem:[%s1743_s3 + $0x3d0] sm:$0xff] %v534_v11 }
  0x69   :  { %663 = vst [vmem:[%s1743_s3 + $0x3d8] sm:$0xff] %v535_v12  ;;  %v539_v44 = vmax.f32 %v411_v13, 0.0  ;;  %664 = vst [vmem:[%s1743_s3 + $0x3e0] sm:$0xff] %v536_v14 }
  0x6a   :  { %665 = vst [vmem:[%s1743_s3 + $0x3e8] sm:$0xff] %v537_v15  ;;  %666 = vst [vmem:[%s1743_s3 + $0x3f0] sm:$0xff] %v538_v16 }
  0x6b   :  { %667 = vst [vmem:[%s1743_s3 + $0x3f8] sm:$0xff] %v539_v44 }

// kernel: tile.138
= control target key start
LH: loop header
LB: loop body
LE: loop exit
PB: predicated region body
PF: predicated region fallthrough
CT: control target
= control target key end

     0   :  { %s64_s0 = inlined_call_operand.vmem [shape: f32[2], index: 0, kind: input, shape index: {}]   ;;  %s65_s1 = inlined_call_operand.vmem [shape: f32[64,2], index: 1, kind: output, shape index: {}]  }
   0x1   :  { %v4_v0 = vld [vmem:[%s64_s0] ss:$0 sm:$0xff] }
   0x2   :  { %5 = vst [vmem:[%s65_s1] sm:$0xff] %v4_v0  ;;  %20 = vst [vmem:[%s65_s1 + $0x8] sm:$0xff] %v4_v0 }
   0x3   :  { %21 = vst [vmem:[%s65_s1 + $0x10] sm:$0xff] %v4_v0  ;;  %22 = vst [vmem:[%s65_s1 + $0x18] sm:$0xff] %v4_v0 }
   0x4   :  { %23 = vst [vmem:[%s65_s1 + $0x20] sm:$0xff] %v4_v0  ;;  %24 = vst [vmem:[%s65_s1 + $0x28] sm:$0xff] %v4_v0 }
   0x5   :  { %25 = vst [vmem:[%s65_s1 + $0x30] sm:$0xff] %v4_v0  ;;  %26 = vst [vmem:[%s65_s1 + $0x38] sm:$0xff] %v4_v0 }

// kernel: tile.139
= control target key start
LH: loop header
LB: loop body
LE: loop exit
PB: predicated region body
PF: predicated region fallthrough
CT: control target
= control target key end

     0   :  { %s517_s10 = smov 126   ;;  %s518_s11 = smov 122   ;;  %vm3_vm0 = vcmask 15360   ;;  %vm9_vm1 = vcmask 1048560   ;;  %vm21_vm2 = vcmask 1015760   ;;  %vm15_vm3 = vcmask 1032160   ;;  %s785_s0 = inlined_call_operand.vmem [shape: f32[64,2], index: 0, kind: input, shape index: {}]   ;;  %s786_s1 = inlined_call_operand.vmem [shape: f32[1,128], index: 1, kind: output, shape index: {}]  }
   0x1   :  { %v391_v0 = vld [vmem:[%s785_s0 + $0x3f] sm:$0x1]   ;;  %v393_v1 = vld [vmem:[%s785_s0 + $0x3d] sm:$0x1]   ;;  %v392_v2 = vld [vmem:[%s785_s0 + $0x3e] sm:$0x1]  }
   0x2   :  { %7 = vrot.lane.b32.xlu0 %v391_v0, %s517_s10  ;;  %19 = vrot.lane.b32.xlu1 %v393_v1, %s518_s11  ;;  %v394_v3 = vld [vmem:[%s785_s0 + $0x3c] sm:$0x1]   ;;  %s519_s16 = smov 124   ;;  %s520_s17 = smov 120   ;;  %v395_v4 = vld [vmem:[%s785_s0 + $0x3b] sm:$0x1]  }
   0x3   :  { %v396_v5 = vld [vmem:[%s785_s0 + $0x3a] sm:$0x1]   ;;  %s521_s22 = smov 118   ;;  %s522_s23 = smov 116   ;;  %v397_v6 = vld [vmem:[%s785_s0 + $0x39] sm:$0x1]  }
   0x4   :  { %v398_v7 = vld [vmem:[%s785_s0 + $0x38] sm:$0x1]   ;;  %s523_s28 = smov 114   ;;  %s524_s29 = smov 112   ;;  %v399_v8 = vld [vmem:[%s785_s0 + $0x37] sm:$0x1]  }
   0x5   :  { %v400_v9 = vld [vmem:[%s785_s0 + $0x36] sm:$0x1]   ;;  %s525_s5 = smov 110   ;;  %s526_s6 = smov 108   ;;  %v401_v10 = vld [vmem:[%s785_s0 + $0x35] sm:$0x1]  }
   0x6   :  { %13 = vrot.lane.b32.xlu0 %v392_v2, %s519_s16  ;;  %25 = vrot.lane.b32.xlu1 %v394_v3, %s520_s17  ;;  %v402_v11 = vld [vmem:[%s785_s0 + $0x34] sm:$0x1]   ;;  %s527_s11 = smov 106   ;;  %s528_s12 = smov 104   ;;  %v403_v12 = vld [vmem:[%s785_s0 + $0x33] sm:$0x1]  }
   0x7   :  { %v404_v13 = vld [vmem:[%s785_s0 + $0x32] sm:$0x1]   ;;  %s529_s17 = smov 102   ;;  %s530_s18 = smov 100   ;;  %v405_v14 = vld [vmem:[%s785_s0 + $0x31] sm:$0x1]  }
   0x8   :  { %v406_v15 = vld [vmem:[%s785_s0 + $0x30] sm:$0x1]   ;;  %v2_v16 = vld [vmem:[%s785_s0] sm:$0x1]   ;;  %s531_s25 = smov 98   ;;  %s532_s26 = smov 96  }
   0x9   :  { %v407_v17 = vld [vmem:[%s785_s0 + $0x2f] sm:$0x1]   ;;  %v408_v18 = vld [vmem:[%s785_s0 + $0x2e] sm:$0x1]   ;;  %4 = vst.msk [vmem:[#allocation0] sm:$0x1] %vm3_vm0, %v2_v16  }
   0xa   :  { %31 = vrot.lane.b32.xlu0 %v395_v4, %s521_s22  ;;  %37 = vrot.lane.b32.xlu1 %v396_v5, %s522_s23  ;;  %s533_s2 = smov 94   ;;  %s534_s3 = smov 92   ;;  %v409_v19 = vld [vmem:[%s785_s0 + $0x2d] sm:$0x1]   ;;  %v410_v20 = vld [vmem:[%s785_s0 + $0x2c] sm:$0x1]  }
   0xb   :  { %s535_s8 = smov 90   ;;  %s536_s9 = smov 88   ;;  %v411_v21 = vld [vmem:[%s785_s0 + $0x2b] sm:$0x1]   ;;  %v412_v22 = vld [vmem:[%s785_s0 + $0x2a] sm:$0x1]  }
   0xc   :  { %s537_s14 = smov 86   ;;  %s538_s15 = smov 84   ;;  %v413_v23 = vld [vmem:[%s785_s0 + $0x29] sm:$0x1]   ;;  %v414_v24 = vld [vmem:[%s785_s0 + $0x28] sm:$0x1]  }
   0xd   :  { %s539_s20 = smov 82   ;;  %s540_s21 = smov 80   ;;  %v415_v25 = vld [vmem:[%s785_s0 + $0x27] sm:$0x1]   ;;  %v416_v26 = vld [vmem:[%s785_s0 + $0x26] sm:$0x1]  }
   0xe   :  { %43 = vrot.lane.b32.xlu0 %v397_v6, %s523_s28  ;;  %49 = vrot.lane.b32.xlu1 %v398_v7, %s524_s29  ;;  %s542_s27 = smov 76   ;;  %v417_v27 = vld [vmem:[%s785_s0 + $0x25] sm:$0x1]   ;;  %v418_v28 = vld [vmem:[%s785_s0 + $0x24] sm:$0x1]   ;;  %s544_s4 = smov 72  }
   0xf   :  { %v419_v29 = vld [vmem:[%s785_s0 + $0x23] sm:$0x1]   ;;  %v420_v30 = vld [vmem:[%s785_s0 + $0x22] sm:$0x1]   ;;  %s546_s10 = smov 68   ;;  %s548_s16 = smov 64  }
  0x10   :  { %v421_v31 = vld [vmem:[%s785_s0 + $0x21] sm:$0x1]   ;;  %v422_v32 = vld [vmem:[%s785_s0 + $0x20] sm:$0x1]   ;;  %v423_v33 = vld [vmem:[%s785_s0 + $0x1f] sm:$0x1]  }
  0x11   :  { %v424_v34 = vld [vmem:[%s785_s0 + $0x1e] sm:$0x1]   ;;  %s550_s22 = smov 60   ;;  %v425_v35 = vld [vmem:[%s785_s0 + $0x1d] sm:$0x1]   ;;  %s552_s28 = smov 56  }
  0x12   :  { %55 = vrot.lane.b32.xlu0 %v399_v8, %s525_s5  ;;  %61 = vrot.lane.b32.xlu1 %v400_v9, %s526_s6  ;;  %v426_v36 = vld [vmem:[%s785_s0 + $0x1c] sm:$0x1]   ;;  %v427_v37 = vld [vmem:[%s785_s0 + $0x1b] sm:$0x1]   ;;  %s554_s5 = smov 52   ;;  %s560_s23 = smov 40  }
  0x13   :  { %v428_v38 = vld [vmem:[%s785_s0 + $0x1a] sm:$0x1]   ;;  %v429_v39 = vld [vmem:[%s785_s0 + $0x19] sm:$0x1]   ;;  %v430_v40 = vld [vmem:[%s785_s0 + $0x18] sm:$0x1]  }
  0x14   :  { %v431_v41 = vld [vmem:[%s785_s0 + $0x17] sm:$0x1]   ;;  %v432_v42 = vld [vmem:[%s785_s0 + $0x16] sm:$0x1]   ;;  %v433_v43 = vld [vmem:[%s785_s0 + $0x15] sm:$0x1]  }
  0x15   :  { %v434_v44 = vld [vmem:[%s785_s0 + $0x14] sm:$0x1]   ;;  %v435_v45 = vld [vmem:[%s785_s0 + $0x13] sm:$0x1]   ;;  %v436_v46 = vld [vmem:[%s785_s0 + $0x12] sm:$0x1]  }
  0x16   :  { %67 = vrot.lane.b32.xlu0 %v401_v10, %s527_s11  ;;  %73 = vrot.lane.b32.xlu1 %v402_v11, %s528_s12  ;;  %s556_s11 = smov 48   ;;  %s562_s29 = smov 36   ;;  %v437_v47 = vld [vmem:[%s785_s0 + $0x11] sm:$0x1]   ;;  %v438_v48 = vld [vmem:[%s785_s0 + $0x10] sm:$0x1]  }
  0x17   :  { %s564_s6 = smov 32   ;;  %v439_v49 = vld [vmem:[%s785_s0 + $0xf] sm:$0x1]   ;;  %v440_v50 = vld [vmem:[%s785_s0 + $0xe] sm:$0x1]   ;;  %s566_s12 = smov 28  }
  0x18   :  { %v441_v51 = vld [vmem:[%s785_s0 + $0xd] sm:$0x1]   ;;  %v442_v52 = vld [vmem:[%s785_s0 + $0xc] sm:$0x1]   ;;  %v443_v53 = vld [vmem:[%s785_s0 + $0xb] sm:$0x1]  }
  0x19   :  { %v444_v54 = vld [vmem:[%s785_s0 + $0xa] sm:$0x1]   ;;  %s570_s24 = smov 20   ;;  %v445_v55 = vld [vmem:[%s785_s0 + $0x9] sm:$0x1]   ;;  %s572_s30 = smov 16  }
  0x1a   :  { %79 = vrot.lane.b32.xlu0 %v403_v12, %s529_s17  ;;  %85 = vrot.lane.b32.xlu1 %v404_v13, %s530_s18  ;;  %s558_s17 = smov 44   ;;  %s568_s18 = smov 24   ;;  %v446_v56 = vld [vmem:[%s785_s0 + $0x8] sm:$0x1]   ;;  %v447_v57 = vld [vmem:[%s785_s0 + $0x7] sm:$0x1]  }
  0x1b   :  { %v448_v58 = vld [vmem:[%s785_s0 + $0x6] sm:$0x1]   ;;  %s574_s7 = smov 12   ;;  %v449_v59 = vld [vmem:[%s785_s0 + $0x5] sm:$0x1]   ;;  %s576_s13 = smov 8  }
  0x1c   :  { %v450_v60 = vld [vmem:[%s785_s0 + $0x4] sm:$0x1]   ;;  %v451_v63 = vld [vmem:[%s785_s0 + $0x3] sm:$0x1]   ;;  %v452_v0 = vld [vmem:[%s785_s0 + $0x2] sm:$0x1]  }
  0x1d   :  { %vm27_vm4 = vcmask 999360   ;;  %vm33_vm5 = vcmask 982960   ;;  %s578_s19 = smov 4   ;;  %v453_v3 = vld [vmem:[%s785_s0 + $0x1] sm:$0x1]   ;;  %vm39_vm6 = vcmask 966560  }
  0x1e   :  { %91 = vrot.lane.b32.xlu0 %v405_v14, %s531_s25  ;;  %97 = vrot.lane.b32.xlu1 %v406_v15, %s532_s26  ;;  %s541_s26 = smov 78   ;;  %s579_s0 = smov 2   ;;  %vm45_vm7 = vcmask 950160   ;;  %vm51_vm8 = vcmask 933760   ;;  %vm57_vm9 = vcmask 917360   ;;  %vm63_vm10 = vcmask 900960  }
  0x1f   :  { %vm69_vm11 = vcmask 884560   ;;  %vm75_vm12 = vcmask 868160   ;;  %vm81_vm13 = vcmask 851760   ;;  %vm87_vm14 = vcmask 835360  }
  0x20   :  { %vm93_vm15 = vcmask 818960   ;;  %vm99_vm0 = vcmask 802560  }
  0x22   :  { %103 = vrot.lane.b32.xlu0 %v407_v17, %s533_s2  ;;  %109 = vrot.lane.b32.xlu1 %v408_v18, %s534_s3  ;;  %s543_s3 = smov 74  }
  0x26   :  { %115 = vrot.lane.b32.xlu0 %v409_v19, %s535_s8  ;;  %121 = vrot.lane.b32.xlu1 %v410_v20, %s536_s9  ;;  %s545_s9 = smov 70  }
  0x2a   :  { %127 = vrot.lane.b32.xlu0 %v411_v21, %s537_s14  ;;  %133 = vrot.lane.b32.xlu1 %v412_v22, %s538_s15  ;;  %s547_s15 = smov 66  }
  0x2e   :  { %139 = vrot.lane.b32.xlu0 %v413_v23, %s539_s20  ;;  %145 = vrot.lane.b32.xlu1 %v414_v24, %s540_s21  ;;  %s549_s21 = smov 62  }
  0x32   :  { %151 = vrot.lane.b32.xlu0 %v415_v25, %s541_s26  ;;  %157 = vrot.lane.b32.xlu1 %v416_v26, %s542_s27  ;;  %s551_s27 = smov 58  }
  0x36   :  { %163 = vrot.lane.b32.xlu0 %v417_v27, %s543_s3  ;;  %169 = vrot.lane.b32.xlu1 %v418_v28, %s544_s4  ;;  %s553_s4 = smov 54  }
  0x3a   :  { %175 = vrot.lane.b32.xlu0 %v419_v29, %s545_s9  ;;  %181 = vrot.lane.b32.xlu1 %v420_v30, %s546_s10  ;;  %s555_s10 = smov 50  }
  0x3e   :  { %187 = vrot.lane.b32.xlu0 %v421_v31, %s547_s15  ;;  %193 = vrot.lane.b32.xlu1 %v422_v32, %s548_s16  ;;  %s557_s16 = smov 46  }
  0x42   :  { %199 = vrot.lane.b32.xlu0 %v423_v33, %s549_s21  ;;  %205 = vrot.lane.b32.xlu1 %v424_v34, %s550_s22  ;;  %s559_s22 = smov 42  }
  0x46   :  { %211 = vrot.lane.b32.xlu0 %v425_v35, %s551_s27  ;;  %217 = vrot.lane.b32.xlu1 %v426_v36, %s552_s28  ;;  %s561_s28 = smov 38  }
  0x4a   :  { %223 = vrot.lane.b32.xlu0 %v427_v37, %s553_s4  ;;  %229 = vrot.lane.b32.xlu1 %v428_v38, %s554_s5  ;;  %s563_s5 = smov 34  }
  0x4e   :  { %235 = vrot.lane.b32.xlu0 %v429_v39, %s555_s10  ;;  %241 = vrot.lane.b32.xlu1 %v430_v40, %s556_s11  ;;  %s565_s11 = smov 30  }
  0x52   :  { %247 = vrot.lane.b32.xlu0 %v431_v41, %s557_s16  ;;  %253 = vrot.lane.b32.xlu1 %v432_v42, %s558_s17  ;;  %s567_s17 = smov 26  }
  0x56   :  { %259 = vrot.lane.b32.xlu0 %v433_v43, %s559_s22  ;;  %265 = vrot.lane.b32.xlu1 %v434_v44, %s560_s23  ;;  %s569_s23 = smov 22  }
  0x5a   :  { %271 = vrot.lane.b32.xlu0 %v435_v45, %s561_s28  ;;  %277 = vrot.lane.b32.xlu1 %v436_v46, %s562_s29  ;;  %s571_s29 = smov 18  }
  0x5e   :  { %283 = vrot.lane.b32.xlu0 %v437_v47, %s563_s5  ;;  %289 = vrot.lane.b32.xlu1 %v438_v48, %s564_s6  ;;  %s573_s6 = smov 14  }
  0x62   :  { %295 = vrot.lane.b32.xlu0 %v439_v49, %s565_s11  ;;  %301 = vrot.lane.b32.xlu1 %v440_v50, %s566_s12  ;;  %s575_s12 = smov 10  }
  0x66   :  { %307 = vrot.lane.b32.xlu0 %v441_v51, %s567_s17  ;;  %313 = vrot.lane.b32.xlu1 %v442_v52, %s568_s18  ;;  %s577_s18 = smov 6  }
  0x6a   :  { %319 = vrot.lane.b32.xlu0 %v443_v53, %s569_s23  ;;  %325 = vrot.lane.b32.xlu1 %v444_v54, %s570_s24 }
  0x6e   :  { %331 = vrot.lane.b32.xlu0 %v445_v55, %s571_s29  ;;  %337 = vrot.lane.b32.xlu1 %v446_v56, %s572_s30 }
  0x72   :  { %343 = vrot.lane.b32.xlu0 %v447_v57, %s573_s6  ;;  %349 = vrot.lane.b32.xlu1 %v448_v58, %s574_s7 }
  0x74   :  { %v8_v61 = vpop.permute.xlu0 %7   ;;  %v20_v62 = vpop.permute.xlu1 %19  }
  0x75   :  { %10 = vst.msk [vmem:[#allocation0] sm:$0x1] %vm9_vm1, %v8_v61   ;;  %vm105_vm1 = vcmask 786160  }
  0x76   :  { %355 = vrot.lane.b32.xlu0 %v449_v59, %s575_s12  ;;  %361 = vrot.lane.b32.xlu1 %v450_v60, %s576_s13 }
  0x78   :  { %v14_v1 = vpop.permute.xlu0 %13   ;;  %v26_v2 = vpop.permute.xlu1 %25  }
  0x79   :  { %16 = vst.msk [vmem:[#allocation0] sm:$0x1] %vm15_vm3, %v14_v1   ;;  %vm117_vm3 = vcmask 753360  }
  0x7a   :  { %22 = vst.msk [vmem:[#allocation0] sm:$0x1] %vm21_vm2, %v20_v62   ;;  %367 = vrot.lane.b32.xlu0 %v451_v63, %s577_s18  ;;  %373 = vrot.lane.b32.xlu1 %v452_v0, %s578_s19  ;;  %vm111_vm2 = vcmask 769760  }
  0x7b   :  { %28 = vst.msk [vmem:[#allocation0] sm:$0x1] %vm27_vm4, %v26_v2   ;;  %vm123_vm4 = vcmask 736960  }
  0x7c   :  { %v32_v4 = vpop.permute.xlu0 %31   ;;  %v38_v5 = vpop.permute.xlu1 %37  }
  0x7d   :  { %34 = vst.msk [vmem:[#allocation0] sm:$0x1] %vm33_vm5, %v32_v4   ;;  %vm129_vm5 = vcmask 720560  }
  0x7e   :  { %379 = vrot.lane.b32.xlu0 %v453_v3, %s579_s0  ;;  %40 = vst.msk [vmem:[#allocation0] sm:$0x1] %vm39_vm6, %v38_v5   ;;  %vm135_vm6 = vcmask 704160  }
  0x80   :  { %v44_v6 = vpop.permute.xlu0 %43   ;;  %v50_v7 = vpop.permute.xlu1 %49  }
  0x81   :  { %46 = vst.msk [vmem:[#allocation0] sm:$0x1] %vm45_vm7, %v44_v6   ;;  %vm141_vm7 = vcmask 687760  }
  0x82   :  { %52 = vst.msk [vmem:[#allocation0] sm:$0x1] %vm51_vm8, %v50_v7   ;;  %vm147_vm8 = vcmask 671360  }
  0x84   :  { %v56_v8 = vpop.permute.xlu0 %55   ;;  %v62_v9 = vpop.permute.xlu1 %61  }
  0x85   :  { %58 = vst.msk [vmem:[#allocation0] sm:$0x1] %vm57_vm9, %v56_v8   ;;  %vm153_vm9 = vcmask 654960  }
  0x86   :  { %64 = vst.msk [vmem:[#allocation0] sm:$0x1] %vm63_vm10, %v62_v9   ;;  %vm159_vm10 = vcmask 638560  }
  0x88   :  { %v68_v10 = vpop.permute.xlu0 %67   ;;  %v74_v11 = vpop.permute.xlu1 %73  }
  0x89   :  { %70 = vst.msk [vmem:[#allocation0] sm:$0x1] %vm69_vm11, %v68_v10   ;;  %vm165_vm11 = vcmask 622160  }
  0x8a   :  { %76 = vst.msk [vmem:[#allocation0] sm:$0x1] %vm75_vm12, %v74_v11   ;;  %vm171_vm12 = vcmask 605760  }
  0x8c   :  { %v80_v12 = vpop.permute.xlu0 %79   ;;  %v86_v13 = vpop.permute.xlu1 %85  }
  0x8d   :  { %82 = vst.msk [vmem:[#allocation0] sm:$0x1] %vm81_vm13, %v80_v12   ;;  %vm177_vm13 = vcmask 589360  }
  0x8e   :  { %88 = vst.msk [vmem:[#allocation0] sm:$0x1] %vm87_vm14, %v86_v13   ;;  %vm183_vm14 = vcmask 572960  }
  0x90   :  { %v92_v14 = vpop.permute.xlu0 %91   ;;  %v98_v15 = vpop.permute.xlu1 %97  }
  0x91   :  { %94 = vst.msk [vmem:[#allocation0] sm:$0x1] %vm93_vm15, %v92_v14   ;;  %vm189_vm15 = vcmask 556560  }
  0x92   :  { %100 = vst.msk [vmem:[#allocation0] sm:$0x1] %vm99_vm0, %v98_v15   ;;  %vm195_vm0 = vcmask 540160  }
  0x94   :  { %v104_v16 = vpop.permute.xlu0 %103   ;;  %v110_v17 = vpop.permute.xlu1 %109  }
  0x95   :  { %106 = vst.msk [vmem:[#allocation0] sm:$0x1] %vm105_vm1, %v104_v16   ;;  %vm201_vm1 = vcmask 523760  }
  0x96   :  { %112 = vst.msk [vmem:[#allocation0] sm:$0x1] %vm111_vm2, %v110_v17   ;;  %vm207_vm2 = vcmask 507360  }
  0x98   :  { %v116_v18 = vpop.permute.xlu0 %115   ;;  %v122_v19 = vpop.permute.xlu1 %121  }
  0x99   :  { %118 = vst.msk [vmem:[#allocation0] sm:$0x1] %vm117_vm3, %v116_v18   ;;  %vm213_vm3 = vcmask 490960  }
  0x9a   :  { %124 = vst.msk [vmem:[#allocation0] sm:$0x1] %vm123_vm4, %v122_v19   ;;  %vm219_vm4 = vcmask 474560  }
  0x9c   :  { %v128_v20 = vpop.permute.xlu0 %127   ;;  %v134_v21 = vpop.permute.xlu1 %133  }
  0x9d   :  { %130 = vst.msk [vmem:[#allocation0] sm:$0x1] %vm129_vm5, %v128_v20   ;;  %vm225_vm5 = vcmask 458160  }
  0x9e   :  { %136 = vst.msk [vmem:[#allocation0] sm:$0x1] %vm135_vm6, %v134_v21   ;;  %vm231_vm6 = vcmask 441760  }
  0xa0   :  { %v140_v22 = vpop.permute.xlu0 %139   ;;  %v146_v23 = vpop.permute.xlu1 %145  }
  0xa1   :  { %142 = vst.msk [vmem:[#allocation0] sm:$0x1] %vm141_vm7, %v140_v22   ;;  %vm237_vm7 = vcmask 425360  }
  0xa2   :  { %148 = vst.msk [vmem:[#allocation0] sm:$0x1] %vm147_vm8, %v146_v23   ;;  %vm243_vm8 = vcmask 408960  }
  0xa4   :  { %v152_v24 = vpop.permute.xlu0 %151   ;;  %v158_v25 = vpop.permute.xlu1 %157  }
  0xa5   :  { %154 = vst.msk [vmem:[#allocation0] sm:$0x1] %vm153_vm9, %v152_v24   ;;  %vm249_vm9 = vcmask 392560  }
  0xa6   :  { %160 = vst.msk [vmem:[#allocation0] sm:$0x1] %vm159_vm10, %v158_v25   ;;  %vm255_vm10 = vcmask 376160  }
  0xa8   :  { %v164_v26 = vpop.permute.xlu0 %163   ;;  %v170_v27 = vpop.permute.xlu1 %169  }
  0xa9   :  { %166 = vst.msk [vmem:[#allocation0] sm:$0x1] %vm165_vm11, %v164_v26   ;;  %vm261_vm11 = vcmask 359760  }
  0xaa   :  { %172 = vst.msk [vmem:[#allocation0] sm:$0x1] %vm171_vm12, %v170_v27   ;;  %vm267_vm12 = vcmask 343360  }
  0xac   :  { %v176_v28 = vpop.permute.xlu0 %175   ;;  %v182_v29 = vpop.permute.xlu1 %181  }
  0xad   :  { %178 = vst.msk [vmem:[#allocation0] sm:$0x1] %vm177_vm13, %v176_v28   ;;  %vm273_vm13 = vcmask 326960  }
  0xae   :  { %184 = vst.msk [vmem:[#allocation0] sm:$0x1] %vm183_vm14, %v182_v29   ;;  %vm279_vm14 = vcmask 310560  }
  0xb0   :  { %v188_v30 = vpop.permute.xlu0 %187   ;;  %v194_v31 = vpop.permute.xlu1 %193  }
  0xb1   :  { %190 = vst.msk [vmem:[#allocation0] sm:$0x1] %vm189_vm15, %v188_v30   ;;  %vm285_vm15 = vcmask 294160  }
  0xb2   :  { %196 = vst.msk [vmem:[#allocation0] sm:$0x1] %vm195_vm0, %v194_v31   ;;  %vm291_vm0 = vcmask 277760  }
  0xb4   :  { %v200_v32 = vpop.permute.xlu0 %199   ;;  %v206_v33 = vpop.permute.xlu1 %205  }
  0xb5   :  { %202 = vst.msk [vmem:[#allocation0] sm:$0x1] %vm201_vm1, %v200_v32   ;;  %vm297_vm1 = vcmask 261360  }
  0xb6   :  { %208 = vst.msk [vmem:[#allocation0] sm:$0x1] %vm207_vm2, %v206_v33   ;;  %vm303_vm2 = vcmask 244960  }
  0xb8   :  { %v212_v34 = vpop.permute.xlu0 %211   ;;  %v218_v35 = vpop.permute.xlu1 %217  }
  0xb9   :  { %214 = vst.msk [vmem:[#allocation0] sm:$0x1] %vm213_vm3, %v212_v34   ;;  %vm309_vm3 = vcmask 228560  }
  0xba   :  { %220 = vst.msk [vmem:[#allocation0] sm:$0x1] %vm219_vm4, %v218_v35   ;;  %vm315_vm4 = vcmask 212160  }
  0xbc   :  { %v224_v36 = vpop.permute.xlu0 %223   ;;  %v230_v37 = vpop.permute.xlu1 %229  }
  0xbd   :  { %226 = vst.msk [vmem:[#allocation0] sm:$0x1] %vm225_vm5, %v224_v36   ;;  %vm321_vm5 = vcmask 195760  }
  0xbe   :  { %232 = vst.msk [vmem:[#allocation0] sm:$0x1] %vm231_vm6, %v230_v37   ;;  %vm327_vm6 = vcmask 179360  }
  0xc0   :  { %v236_v38 = vpop.permute.xlu0 %235   ;;  %v242_v39 = vpop.permute.xlu1 %241  }
  0xc1   :  { %238 = vst.msk [vmem:[#allocation0] sm:$0x1] %vm237_vm7, %v236_v38   ;;  %vm333_vm7 = vcmask 162960  }
  0xc2   :  { %244 = vst.msk [vmem:[#allocation0] sm:$0x1] %vm243_vm8, %v242_v39   ;;  %vm339_vm8 = vcmask 146560  }
  0xc4   :  { %v248_v40 = vpop.permute.xlu0 %247   ;;  %v254_v41 = vpop.permute.xlu1 %253  }
  0xc5   :  { %250 = vst.msk [vmem:[#allocation0] sm:$0x1] %vm249_vm9, %v248_v40   ;;  %vm345_vm9 = vcmask 130160  }
  0xc6   :  { %256 = vst.msk [vmem:[#allocation0] sm:$0x1] %vm255_vm10, %v254_v41   ;;  %vm351_vm10 = vcmask 113760  }
  0xc8   :  { %v260_v42 = vpop.permute.xlu0 %259   ;;  %v266_v43 = vpop.permute.xlu1 %265  }
  0xc9   :  { %262 = vst.msk [vmem:[#allocation0] sm:$0x1] %vm261_vm11, %v260_v42   ;;  %vm357_vm11 = vcmask 97360  }
  0xca   :  { %268 = vst.msk [vmem:[#allocation0] sm:$0x1] %vm267_vm12, %v266_v43   ;;  %vm363_vm12 = vcmask 80960  }
  0xcc   :  { %v272_v44 = vpop.permute.xlu0 %271   ;;  %v278_v45 = vpop.permute.xlu1 %277  }
  0xcd   :  { %274 = vst.msk [vmem:[#allocation0] sm:$0x1] %vm273_vm13, %v272_v44   ;;  %vm369_vm13 = vcmask 64560  }
  0xce   :  { %280 = vst.msk [vmem:[#allocation0] sm:$0x1] %vm279_vm14, %v278_v45   ;;  %vm375_vm14 = vcmask 48160  }
  0xd0   :  { %v284_v46 = vpop.permute.xlu0 %283   ;;  %v290_v47 = vpop.permute.xlu1 %289  }
  0xd1   :  { %286 = vst.msk [vmem:[#allocation0] sm:$0x1] %vm285_vm15, %v284_v46   ;;  %vm381_vm15 = vcmask 31760  }
  0xd2   :  { %292 = vst.msk [vmem:[#allocation0] sm:$0x1] %vm291_vm0, %v290_v47  }
  0xd4   :  { %v296_v48 = vpop.permute.xlu0 %295   ;;  %v302_v49 = vpop.permute.xlu1 %301  }
  0xd5   :  { %298 = vst.msk [vmem:[#allocation0] sm:$0x1] %vm297_vm1, %v296_v48  }
  0xd6   :  { %304 = vst.msk [vmem:[#allocation0] sm:$0x1] %vm303_vm2, %v302_v49  }
  0xd8   :  { %v308_v50 = vpop.permute.xlu0 %307   ;;  %v314_v51 = vpop.permute.xlu1 %313  }
  0xd9   :  { %310 = vst.msk [vmem:[#allocation0] sm:$0x1] %vm309_vm3, %v308_v50  }
  0xda   :  { %316 = vst.msk [vmem:[#allocation0] sm:$0x1] %vm315_vm4, %v314_v51  }
  0xdc   :  { %v320_v52 = vpop.permute.xlu0 %319   ;;  %v326_v53 = vpop.permute.xlu1 %325  }
  0xdd   :  { %322 = vst.msk [vmem:[#allocation0] sm:$0x1] %vm321_vm5, %v320_v52  }
  0xde   :  { %328 = vst.msk [vmem:[#allocation0] sm:$0x1] %vm327_vm6, %v326_v53  }
  0xe0   :  { %v332_v54 = vpop.permute.xlu0 %331   ;;  %v338_v55 = vpop.permute.xlu1 %337  }
  0xe1   :  { %334 = vst.msk [vmem:[#allocation0] sm:$0x1] %vm333_vm7, %v332_v54  }
  0xe2   :  { %340 = vst.msk [vmem:[#allocation0] sm:$0x1] %vm339_vm8, %v338_v55  }
  0xe4   :  { %v344_v56 = vpop.permute.xlu0 %343   ;;  %v350_v57 = vpop.permute.xlu1 %349  }
  0xe5   :  { %346 = vst.msk [vmem:[#allocation0] sm:$0x1] %vm345_vm9, %v344_v56  }
  0xe6   :  { %352 = vst.msk [vmem:[#allocation0] sm:$0x1] %vm351_vm10, %v350_v57  }
  0xe8   :  { %v356_v58 = vpop.permute.xlu0 %355   ;;  %v362_v59 = vpop.permute.xlu1 %361  }
  0xe9   :  { %358 = vst.msk [vmem:[#allocation0] sm:$0x1] %vm357_vm11, %v356_v58  }
  0xea   :  { %364 = vst.msk [vmem:[#allocation0] sm:$0x1] %vm363_vm12, %v362_v59  }
  0xec   :  { %v368_v60 = vpop.permute.xlu0 %367   ;;  %v374_v61 = vpop.permute.xlu1 %373  }
  0xed   :  { %370 = vst.msk [vmem:[#allocation0] sm:$0x1] %vm369_vm13, %v368_v60  }
  0xee   :  { %376 = vst.msk [vmem:[#allocation0] sm:$0x1] %vm375_vm14, %v374_v61  }
  0xf0   :  { %v380_v62 = vpop.permute.xlu0 %379  }
  0xf1   :  { %382 = vst.msk [vmem:[#allocation0] sm:$0x1] %vm381_vm15, %v380_v62  }
  0xf8   :  { %v387_v63 = vld [vmem:[#allocation0] sm:$0x1] }
  0xf9   :  { %390 = vst [vmem:[%s786_s1] sm:$0x1] %v387_v63 }

// kernel: tile.70
= control target key start
LH: loop header
LB: loop body
LE: loop exit
PB: predicated region body
PF: predicated region fallthrough
CT: control target
= control target key end

     0   :  { %s20_s0 = inlined_call_operand.<no memory space> [shape: f32[], index: 0, kind: input, shape index: {}]   ;;  %s21_s1 = inlined_call_operand.vmem [shape: f32[1,128], index: 1, kind: output, shape index: {}]  }
   0x1   :  { %v2_v0 = vstv %s20_s0 }
   0x2   :  { %3 = vst [vmem:[%s21_s1] sm:$0x1] %v2_v0 }

// kernel: forward.63
= control target key start
LH: loop header
LB: loop body
LE: loop exit
PB: predicated region body
PF: predicated region fallthrough
CT: control target
= control target key end

     0   :  { %s1537_s0 = inlined_call_operand.vmem [shape: f32[512,128], index: 0, kind: input, shape index: {}]   ;;  %s1538_s1 = inlined_call_operand.vmem [shape: f32[1,128], index: 1, kind: input, shape index: {}]   ;;  %s1539_s2 = inlined_call_operand.vmem [shape: f32[1,128], index: 2, kind: input, shape index: {}]   ;;  %s1540_s3 = inlined_call_operand.vmem [shape: f32[512,128], index: 3, kind: output, shape index: {}]  }
   0x1   :  { %v14_v0 = vld [vmem:[%s1537_s0] sm:$0xff]  ;;  %v15_v4 = vld [vmem:[%s1537_s0 + $0x8] sm:$0xff]  ;;  %v16_v5 = vld [vmem:[%s1537_s0 + $0x10] sm:$0xff] }
   0x2   :  { %v1022_v1 = vld [vmem:[%s1538_s1] ss:$0 sm:$0xff]  ;;  %v17_v6 = vld [vmem:[%s1537_s0 + $0x18] sm:$0xff]  ;;  %v19_v11 = vld [vmem:[%s1537_s0 + $0x28] sm:$0xff] }
   0x3   :  { %v1027_v2 = vld [vmem:[%s1539_s2] ss:$0 sm:$0xff]  ;;  %v85_v3 = vmul.f32 %v1022_v1, %v14_v0  ;;  %v86_v7 = vmul.f32 %v1022_v1, %v15_v4  ;;  %v87_v8 = vmul.f32 %v1022_v1, %v16_v5  ;;  %v88_v9 = vmul.f32 %v1022_v1, %v17_v6  ;;  %v20_v12 = vld [vmem:[%s1537_s0 + $0x30] sm:$0xff]  ;;  %v21_v17 = vld [vmem:[%s1537_s0 + $0x38] sm:$0xff] }
   0x4   :  { %v18_v10 = vld [vmem:[%s1537_s0 + $0x20] sm:$0xff]  ;;  %v90_v15 = vmul.f32 %v1022_v1, %v19_v11  ;;  %v91_v16 = vmul.f32 %v1022_v1, %v20_v12  ;;  %v92_v21 = vmul.f32 %v1022_v1, %v21_v17  ;;  %v23_v23 = vld [vmem:[%s1537_s0 + $0x48] sm:$0xff]  ;;  %v24_v24 = vld [vmem:[%s1537_s0 + $0x50] sm:$0xff] }
   0x5   :  { %v156_v13 = vadd.f32 %v1027_v2, %v85_v3  ;;  %v89_v14 = vmul.f32 %v1022_v1, %v18_v10  ;;  %v157_v18 = vadd.f32 %v1027_v2, %v86_v7  ;;  %v158_v19 = vadd.f32 %v1027_v2, %v87_v8  ;;  %v22_v22 = vld [vmem:[%s1537_s0 + $0x40] sm:$0xff]  ;;  %v25_v29 = vld [vmem:[%s1537_s0 + $0x58] sm:$0xff]  ;;  %v27_v31 = vld [vmem:[%s1537_s0 + $0x68] sm:$0xff] }
   0x6   :  { %v159_v20 = vadd.f32 %v1027_v2, %v88_v9  ;;  %v161_v27 = vadd.f32 %v1027_v2, %v90_v15  ;;  %v162_v28 = vadd.f32 %v1027_v2, %v91_v16  ;;  %v26_v30 = vld [vmem:[%s1537_s0 + $0x60] sm:$0xff]  ;;  %v163_v35 = vadd.f32 %v1027_v2, %v92_v21  ;;  %v28_v51 = vld [vmem:[%s1537_s0 + $0x70] sm:$0xff]  ;;  %v29_v52 = vld [vmem:[%s1537_s0 + $0x78] sm:$0xff] }
   0x7   :  { %v674_v25 = vmul.f32 -1.442695, %v156_v13  ;;  %v160_v26 = vadd.f32 %v1027_v2, %v89_v14  ;;  %v675_v32 = vmul.f32 -1.442695, %v157_v18  ;;  %v676_v33 = vmul.f32 -1.442695, %v158_v19 }
   0x8   :  { %v677_v34 = vmul.f32 -1.442695, %v159_v20  ;;  %v679_v37 = vmul.f32 -1.442695, %v161_v27  ;;  %v680_v38 = vmul.f32 -1.442695, %v162_v28  ;;  %v93_v40 = vmul.f32 %v1022_v1, %v22_v22 }
   0x9   :  { %738 = vpow2.f32 %v674_v25  ;;  %v678_v36 = vmul.f32 -1.442695, %v160_v26  ;;  %v681_v39 = vmul.f32 -1.442695, %v163_v35  ;;  %v94_v41 = vmul.f32 %v1022_v1, %v23_v23  ;;  %v30_v9 = vld [vmem:[%s1537_s0 + $0x80] sm:$0xff]  ;;  %v31_v12 = vld [vmem:[%s1537_s0 + $0x88] sm:$0xff] }
   0xa   :  { %740 = vpow2.f32 %v675_v32  ;;  %v95_v42 = vmul.f32 %v1022_v1, %v24_v24  ;;  %v96_v43 = vmul.f32 %v1022_v1, %v25_v29  ;;  %v97_v44 = vmul.f32 %v1022_v1, %v26_v30  ;;  %v32_v15 = vld [vmem:[%s1537_s0 + $0x90] sm:$0xff]  ;;  %v33_v19 = vld [vmem:[%s1537_s0 + $0x98] sm:$0xff]  ;;  %v34_v29 = vld [vmem:[%s1537_s0 + $0xa0] sm:$0xff] }
   0xb   :  { %742 = vpow2.f32 %v676_v33  ;;  %v164_v45 = vadd.f32 %v1027_v2, %v93_v40  ;;  %v165_v46 = vadd.f32 %v1027_v2, %v94_v41  ;;  %v98_v47 = vmul.f32 %v1022_v1, %v27_v31  ;;  %v35_v33 = vld [vmem:[%s1537_s0 + $0xa8] sm:$0xff] }
   0xc   :  { %744 = vpow2.f32 %v677_v34  ;;  %v166_v48 = vadd.f32 %v1027_v2, %v95_v42  ;;  %v167_v49 = vadd.f32 %v1027_v2, %v96_v43  ;;  %v168_v50 = vadd.f32 %v1027_v2, %v97_v44  ;;  %v37_v42 = vld [vmem:[%s1537_s0 + $0xb8] sm:$0xff] }
   0xd   :  { %746 = vpow2.f32 %v678_v36  ;;  %v682_v53 = vmul.f32 -1.442695, %v164_v45  ;;  %v683_v54 = vmul.f32 -1.442695, %v165_v46  ;;  %v169_v55 = vadd.f32 %v1027_v2, %v98_v47  ;;  %v38_v47 = vld [vmem:[%s1537_s0 + $0xc0] sm:$0xff] }
   0xe   :  { %748 = vpow2.f32 %v679_v37  ;;  %v684_v56 = vmul.f32 -1.442695, %v166_v48  ;;  %v685_v57 = vmul.f32 -1.442695, %v167_v49  ;;  %v99_v58 = vmul.f32 %v1022_v1, %v28_v51  ;;  %v36_v37 = vld [vmem:[%s1537_s0 + $0xb0] sm:$0xff] }
   0xf   :  { %750 = vpow2.f32 %v680_v38  ;;  %v100_v59 = vmul.f32 %v1022_v1, %v29_v52  ;;  %v686_v60 = vmul.f32 -1.442695, %v168_v50  ;;  %v687_v61 = vmul.f32 -1.442695, %v169_v55  ;;  %v39_v52 = vld [vmem:[%s1537_s0 + $0xc8] sm:$0xff] }
  0x10   :  { %752 = vpow2.f32 %v681_v39  ;;  %v170_v62 = vadd.f32 %v1027_v2, %v99_v58  ;;  %v101_v18 = vmul.f32 %v1022_v1, %v30_v9  ;;  %v102_v22 = vmul.f32 %v1022_v1, %v31_v12 }
  0x11   :  { %754 = vpow2.f32 %v682_v53  ;;  %v171_v63 = vadd.f32 %v1027_v2, %v100_v59  ;;  %v103_v25 = vmul.f32 %v1022_v1, %v32_v15  ;;  %v104_v28 = vmul.f32 %v1022_v1, %v33_v19  ;;  %v44_v15 = vld [vmem:[%s1537_s0 + $0xf0] sm:$0xff] }
  0x12   :  { %756 = vpow2.f32 %v683_v54  ;;  %v688_v0 = vmul.f32 -1.442695, %v170_v62  ;;  %v172_v32 = vadd.f32 %v1027_v2, %v101_v18  ;;  %v173_v36 = vadd.f32 %v1027_v2, %v102_v22  ;;  %v41_v62 = vld [vmem:[%s1537_s0 + $0xd8] sm:$0xff] }
  0x13   :  { %758 = vpow2.f32 %v684_v56  ;;  %v689_v3 = vmul.f32 -1.442695, %v171_v63  ;;  %v174_v40 = vadd.f32 %v1027_v2, %v103_v25  ;;  %v105_v41 = vmul.f32 %v1022_v1, %v34_v29 }
  0x14   :  { %760 = vpow2.f32 %v685_v57  ;;  %v175_v45 = vadd.f32 %v1027_v2, %v104_v28  ;;  %v106_v46 = vmul.f32 %v1022_v1, %v35_v33  ;;  %v690_v50 = vmul.f32 -1.442695, %v172_v32  ;;  %v40_v57 = vld [vmem:[%s1537_s0 + $0xd0] sm:$0xff] }
  0x15   :  { %762 = vpow2.f32 %v686_v60  ;;  %v107_v51 = vmul.f32 %v1022_v1, %v36_v37  ;;  %v691_v55 = vmul.f32 -1.442695, %v173_v36  ;;  %v108_v56 = vmul.f32 %v1022_v1, %v37_v42 }
  0x16   :  { %v739_v4 = vpop.eup %738  ;;  %764 = vpow2.f32 %v687_v61  ;;  %v176_v60 = vadd.f32 %v1027_v2, %v105_v41  ;;  %v109_v61 = vmul.f32 %v1022_v1, %v38_v47  ;;  %v111_v9 = vmul.f32 %v1022_v1, %v40_v57 }
  0x17   :  { %v741_v5 = vpop.eup %740  ;;  %v412_v6 = vadd.f32 1.0, %v739_v4  ;;  %766 = vpow2.f32 %v688_v0  ;;  %v110_v4 = vmul.f32 %v1022_v1, %v39_v52  ;;  %v693_v12 = vmul.f32 -1.442695, %v175_v45 }
  0x18   :  { %v743_v7 = vpop.eup %742  ;;  %v413_v8 = vadd.f32 1.0, %v741_v5  ;;  %768 = vpow2.f32 %v689_v3  ;;  %v177_v3 = vadd.f32 %v1027_v2, %v106_v46  ;;  %v42_v5 = vld [vmem:[%s1537_s0 + $0xe0] sm:$0xff]  ;;  %v180_v18 = vadd.f32 %v1027_v2, %v109_v61 }
  0x19   :  { %v745_v10 = vpop.eup %744  ;;  %770 = vrcp.f32 %v412_v6  ;;  %v414_v11 = vadd.f32 1.0, %v743_v7  ;;  %v692_v7 = vmul.f32 -1.442695, %v174_v40  ;;  %v113_v19 = vmul.f32 %v1022_v1, %v42_v5 }
  0x1a   :  { %v747_v13 = vpop.eup %746  ;;  %772 = vrcp.f32 %v413_v8  ;;  %v415_v14 = vadd.f32 1.0, %v745_v10  ;;  %v178_v8 = vadd.f32 %v1027_v2, %v107_v51  ;;  %v43_v10 = vld [vmem:[%s1537_s0 + $0xe8] sm:$0xff]  ;;  %v695_v22 = vmul.f32 -1.442695, %v177_v3 }
  0x1b   :  { %v749_v16 = vpop.eup %748  ;;  %774 = vrcp.f32 %v414_v11  ;;  %v416_v17 = vadd.f32 1.0, %v747_v13  ;;  %v179_v13 = vadd.f32 %v1027_v2, %v108_v56  ;;  %v115_v28 = vmul.f32 %v1022_v1, %v44_v15 }
  0x1c   :  { %v751_v20 = vpop.eup %750  ;;  %776 = vrcp.f32 %v415_v14  ;;  %v417_v21 = vadd.f32 1.0, %v749_v16  ;;  %v112_v14 = vmul.f32 %v1022_v1, %v41_v62 }
  0x1d   :  { %v753_v23 = vpop.eup %752  ;;  %778 = vrcp.f32 %v416_v17  ;;  %v418_v24 = vadd.f32 1.0, %v751_v20  ;;  %v694_v17 = vmul.f32 -1.442695, %v176_v60  ;;  %v45_v20 = vld [vmem:[%s1537_s0 + $0xf8] sm:$0xff]  ;;  %v186_v41 = vadd.f32 %v1027_v2, %v115_v28 }
  0x1e   :  { %v755_v26 = vpop.eup %754  ;;  %780 = vrcp.f32 %v417_v21  ;;  %v419_v27 = vadd.f32 1.0, %v753_v23  ;;  %v181_v23 = vadd.f32 %v1027_v2, %v110_v4  ;;  %v116_v32 = vmul.f32 %v1022_v1, %v45_v20 }
  0x1f   :  { %v757_v30 = vpop.eup %756  ;;  %782 = vrcp.f32 %v418_v24  ;;  %v420_v31 = vadd.f32 1.0, %v755_v26  ;;  %v114_v24 = vmul.f32 %v1022_v1, %v43_v10  ;;  %v696_v26 = vmul.f32 -1.442695, %v178_v8 }
  0x20   :  { %v759_v34 = vpop.eup %758  ;;  %784 = vrcp.f32 %v419_v27  ;;  %v421_v35 = vadd.f32 1.0, %v757_v30  ;;  %v182_v27 = vadd.f32 %v1027_v2, %v111_v9  ;;  %v697_v30 = vmul.f32 -1.442695, %v179_v13  ;;  %v50_v13 = vld [vmem:[%s1537_s0 + $0x120] sm:$0xff] }
  0x21   :  { %v761_v38 = vpop.eup %760  ;;  %786 = vrcp.f32 %v420_v31  ;;  %v422_v39 = vadd.f32 1.0, %v759_v34  ;;  %v183_v31 = vadd.f32 %v1027_v2, %v112_v14  ;;  %v698_v34 = vmul.f32 -1.442695, %v180_v18  ;;  %v51_v18 = vld [vmem:[%s1537_s0 + $0x128] sm:$0xff] }
  0x22   :  { %v763_v43 = vpop.eup %762  ;;  %788 = vrcp.f32 %v421_v35  ;;  %v423_v44 = vadd.f32 1.0, %v761_v38  ;;  %v184_v35 = vadd.f32 %v1027_v2, %v113_v19  ;;  %v699_v37 = vmul.f32 -1.442695, %v181_v23 }
  0x23   :  { %v765_v48 = vpop.eup %764  ;;  %790 = vrcp.f32 %v422_v39  ;;  %v424_v49 = vadd.f32 1.0, %v763_v43  ;;  %v185_v38 = vadd.f32 %v1027_v2, %v114_v24  ;;  %v700_v40 = vmul.f32 -1.442695, %v182_v27 }
  0x24   :  { %v767_v53 = vpop.eup %766  ;;  %792 = vrcp.f32 %v423_v44  ;;  %v425_v54 = vadd.f32 1.0, %v765_v48  ;;  %v701_v43 = vmul.f32 -1.442695, %v183_v31  ;;  %v187_v44 = vadd.f32 %v1027_v2, %v116_v32 }
  0x25   :  { %v769_v58 = vpop.eup %768  ;;  %794 = vrcp.f32 %v424_v49  ;;  %v426_v59 = vadd.f32 1.0, %v767_v53  ;;  %v702_v46 = vmul.f32 -1.442695, %v184_v35  ;;  %v703_v48 = vmul.f32 -1.442695, %v185_v38  ;;  %v54_v35 = vld [vmem:[%s1537_s0 + $0x140] sm:$0xff] }
  0x26   :  { %v771_v63 = vpop.eup %770  ;;  %796 = vrcp.f32 %v425_v54  ;;  %v427_v0 = vadd.f32 1.0, %v769_v58  ;;  %v705_v52 = vmul.f32 -1.442695, %v187_v44  ;;  %v121_v24 = vmul.f32 %v1022_v1, %v50_v13 }
  0x27   :  { %v773_v6 = vpop.eup %772  ;;  %604 = vst [vmem:[%s1540_s3] sm:$0xff] %v771_v63  ;;  %798 = vrcp.f32 %v426_v59  ;;  %v46_v59 = vld [vmem:[%s1537_s0 + $0x100] sm:$0xff] }
  0x28   :  { %v775_v11 = vpop.eup %774  ;;  %605 = vst [vmem:[%s1540_s3 + $0x8] sm:$0xff] %v773_v6  ;;  %800 = vrcp.f32 %v427_v0  ;;  %v47_v0 = vld [vmem:[%s1537_s0 + $0x108] sm:$0xff]  ;;  %v117_v5 = vmul.f32 %v1022_v1, %v46_v59  ;;  %v48_v6 = vld [vmem:[%s1537_s0 + $0x110] sm:$0xff] }
  0x29   :  { %v777_v16 = vpop.eup %776  ;;  %606 = vst [vmem:[%s1540_s3 + $0x10] sm:$0xff] %v775_v11  ;;  %802 = vpow2.f32 %v690_v50  ;;  %v704_v50 = vmul.f32 -1.442695, %v186_v41 }
  0x2a   :  { %v779_v21 = vpop.eup %778  ;;  %607 = vst [vmem:[%s1540_s3 + $0x18] sm:$0xff] %v777_v16  ;;  %804 = vpow2.f32 %v691_v55  ;;  %v119_v16 = vmul.f32 %v1022_v1, %v48_v6 }
  0x2b   :  { %v781_v25 = vpop.eup %780  ;;  %608 = vst [vmem:[%s1540_s3 + $0x20] sm:$0xff] %v779_v21  ;;  %806 = vpow2.f32 %v692_v7  ;;  %v49_v7 = vld [vmem:[%s1537_s0 + $0x118] sm:$0xff]  ;;  %v188_v21 = vadd.f32 %v1027_v2, %v117_v5 }
  0x2c   :  { %v783_v29 = vpop.eup %782  ;;  %609 = vst [vmem:[%s1540_s3 + $0x28] sm:$0xff] %v781_v25  ;;  %808 = vpow2.f32 %v693_v12  ;;  %v118_v12 = vmul.f32 %v1022_v1, %v47_v0  ;;  %v52_v25 = vld [vmem:[%s1537_s0 + $0x130] sm:$0xff] }
  0x2d   :  { %v785_v33 = vpop.eup %784  ;;  %610 = vst [vmem:[%s1540_s3 + $0x30] sm:$0xff] %v783_v29  ;;  %810 = vpow2.f32 %v694_v17  ;;  %v120_v17 = vmul.f32 %v1022_v1, %v49_v7  ;;  %v122_v29 = vmul.f32 %v1022_v1, %v51_v18  ;;  %v706_v38 = vmul.f32 -1.442695, %v188_v21 }
  0x2e   :  { %v787_v36 = vpop.eup %786  ;;  %611 = vst [vmem:[%s1540_s3 + $0x38] sm:$0xff] %v785_v33  ;;  %812 = vpow2.f32 %v695_v22  ;;  %v189_v28 = vadd.f32 %v1027_v2, %v118_v12  ;;  %v190_v33 = vadd.f32 %v1027_v2, %v119_v16 }
  0x2f   :  { %v789_v39 = vpop.eup %788  ;;  %612 = vst [vmem:[%s1540_s3 + $0x40] sm:$0xff] %v787_v36  ;;  %814 = vpow2.f32 %v696_v26 }
  0x30   :  { %v791_v42 = vpop.eup %790  ;;  %613 = vst [vmem:[%s1540_s3 + $0x48] sm:$0xff] %v789_v39  ;;  %816 = vpow2.f32 %v697_v30  ;;  %v53_v30 = vld [vmem:[%s1537_s0 + $0x138] sm:$0xff]  ;;  %v123_v39 = vmul.f32 %v1022_v1, %v52_v25 }
  0x31   :  { %v793_v45 = vpop.eup %792  ;;  %614 = vst [vmem:[%s1540_s3 + $0x50] sm:$0xff] %v791_v42  ;;  %818 = vpow2.f32 %v698_v34  ;;  %v191_v34 = vadd.f32 %v1027_v2, %v120_v17  ;;  %v124_v44 = vmul.f32 %v1022_v1, %v53_v30 }
  0x32   :  { %v795_v47 = vpop.eup %794  ;;  %615 = vst [vmem:[%s1540_s3 + $0x58] sm:$0xff] %v793_v45  ;;  %820 = vpow2.f32 %v699_v37  ;;  %v56_v45 = vld [vmem:[%s1537_s0 + $0x150] sm:$0xff] }
  0x33   :  { %v797_v49 = vpop.eup %796  ;;  %616 = vst [vmem:[%s1540_s3 + $0x60] sm:$0xff] %v795_v47  ;;  %822 = vpow2.f32 %v700_v40  ;;  %v55_v40 = vld [vmem:[%s1537_s0 + $0x148] sm:$0xff]  ;;  %v127_v59 = vmul.f32 %v1022_v1, %v56_v45 }
  0x34   :  { %v799_v51 = vpop.eup %798  ;;  %617 = vst [vmem:[%s1540_s3 + $0x68] sm:$0xff] %v797_v49  ;;  %824 = vpow2.f32 %v701_v43  ;;  %v192_v43 = vadd.f32 %v1027_v2, %v121_v24  ;;  %v125_v49 = vmul.f32 %v1022_v1, %v54_v35 }
  0x35   :  { %v801_v53 = vpop.eup %800  ;;  %618 = vst [vmem:[%s1540_s3 + $0x70] sm:$0xff] %v799_v51  ;;  %826 = vpow2.f32 %v702_v46 }
  0x36   :  { %v803_v54 = vpop.eup %802  ;;  %619 = vst [vmem:[%s1540_s3 + $0x78] sm:$0xff] %v801_v53  ;;  %828 = vpow2.f32 %v703_v48  ;;  %v193_v48 = vadd.f32 %v1027_v2, %v122_v29  ;;  %v707_v53 = vmul.f32 -1.442695, %v189_v28  ;;  %v710_v5 = vmul.f32 -1.442695, %v192_v43  ;;  %v62_v43 = vld [vmem:[%s1537_s0 + $0x180] sm:$0xff] }
  0x37   :  { %v805_v55 = vpop.eup %804  ;;  %v428_v56 = vadd.f32 1.0, %v803_v54  ;;  %830 = vpow2.f32 %v704_v50  ;;  %v57_v50 = vld [vmem:[%s1537_s0 + $0x158] sm:$0xff]  ;;  %v126_v54 = vmul.f32 %v1022_v1, %v55_v40  ;;  %v196_v6 = vadd.f32 %v1027_v2, %v125_v49 }
  0x38   :  { %v807_v57 = vpop.eup %806  ;;  %v429_v58 = vadd.f32 1.0, %v805_v55  ;;  %832 = vpow2.f32 %v705_v52  ;;  %v58_v55 = vld [vmem:[%s1537_s0 + $0x160] sm:$0xff]  ;;  %v128_v0 = vmul.f32 %v1022_v1, %v57_v50 }
  0x39   :  { %v809_v60 = vpop.eup %808  ;;  %834 = vrcp.f32 %v428_v56  ;;  %v430_v61 = vadd.f32 1.0, %v807_v57  ;;  %v708_v57 = vmul.f32 -1.442695, %v190_v33  ;;  %v129_v7 = vmul.f32 %v1022_v1, %v58_v55 }
  0x3a   :  { %v811_v62 = vpop.eup %810  ;;  %836 = vrcp.f32 %v429_v58  ;;  %v431_v63 = vadd.f32 1.0, %v809_v60  ;;  %v194_v58 = vadd.f32 %v1027_v2, %v123_v39  ;;  %v59_v60 = vld [vmem:[%s1537_s0 + $0x168] sm:$0xff] }
  0x3b   :  { %v813_v3 = vpop.eup %812  ;;  %838 = vrcp.f32 %v430_v61  ;;  %v432_v4 = vadd.f32 1.0, %v811_v62  ;;  %v709_v62 = vmul.f32 -1.442695, %v191_v34  ;;  %v130_v12 = vmul.f32 %v1022_v1, %v59_v60 }
  0x3c   :  { %v815_v8 = vpop.eup %814  ;;  %840 = vrcp.f32 %v431_v63  ;;  %v433_v9 = vadd.f32 1.0, %v813_v3  ;;  %v195_v63 = vadd.f32 %v1027_v2, %v124_v44  ;;  %v60_v3 = vld [vmem:[%s1537_s0 + $0x170] sm:$0xff] }
  0x3d   :  { %v817_v10 = vpop.eup %816  ;;  %842 = vrcp.f32 %v432_v4  ;;  %v434_v11 = vadd.f32 1.0, %v815_v8  ;;  %v61_v8 = vld [vmem:[%s1537_s0 + $0x178] sm:$0xff]  ;;  %v131_v16 = vmul.f32 %v1022_v1, %v60_v3 }
  0x3e   :  { %v819_v14 = vpop.eup %818  ;;  %844 = vrcp.f32 %v433_v9  ;;  %v435_v15 = vadd.f32 1.0, %v817_v10  ;;  %v711_v10 = vmul.f32 -1.442695, %v193_v48  ;;  %v713_v18 = vmul.f32 -1.442695, %v195_v63  ;;  %v65_v63 = vld [vmem:[%s1537_s0 + $0x198] sm:$0xff] }
  0x3f   :  { %v821_v19 = vpop.eup %820  ;;  %846 = vrcp.f32 %v434_v11  ;;  %v436_v20 = vadd.f32 1.0, %v819_v14  ;;  %v197_v11 = vadd.f32 %v1027_v2, %v126_v54  ;;  %v712_v14 = vmul.f32 -1.442695, %v194_v58 }
  0x40   :  { %v823_v22 = vpop.eup %822  ;;  %848 = vrcp.f32 %v435_v15  ;;  %v437_v23 = vadd.f32 1.0, %v821_v19  ;;  %v198_v15 = vadd.f32 %v1027_v2, %v127_v59  ;;  %v199_v19 = vadd.f32 %v1027_v2, %v128_v0  ;;  %v64_v59 = vld [vmem:[%s1537_s0 + $0x190] sm:$0xff] }
  0x41   :  { %v825_v26 = vpop.eup %824  ;;  %850 = vrcp.f32 %v436_v20  ;;  %v438_v27 = vadd.f32 1.0, %v823_v22  ;;  %v132_v20 = vmul.f32 %v1022_v1, %v61_v8  ;;  %v714_v22 = vmul.f32 -1.442695, %v196_v6 }
  0x42   :  { %v827_v31 = vpop.eup %826  ;;  %852 = vrcp.f32 %v437_v23  ;;  %v439_v32 = vadd.f32 1.0, %v825_v26  ;;  %v200_v23 = vadd.f32 %v1027_v2, %v129_v7  ;;  %v715_v25 = vmul.f32 -1.442695, %v197_v11 }
  0x43   :  { %v829_v36 = vpop.eup %828  ;;  %854 = vrcp.f32 %v438_v27  ;;  %v440_v37 = vadd.f32 1.0, %v827_v31  ;;  %v201_v26 = vadd.f32 %v1027_v2, %v130_v12  ;;  %v716_v28 = vmul.f32 -1.442695, %v198_v15 }
  0x44   :  { %v831_v41 = vpop.eup %830  ;;  %856 = vrcp.f32 %v439_v32  ;;  %v441_v42 = vadd.f32 1.0, %v829_v36  ;;  %v202_v29 = vadd.f32 %v1027_v2, %v131_v16  ;;  %v717_v31 = vmul.f32 -1.442695, %v199_v19 }
  0x45   :  { %v833_v46 = vpop.eup %832  ;;  %858 = vrcp.f32 %v440_v37  ;;  %v442_v47 = vadd.f32 1.0, %v831_v41  ;;  %v203_v32 = vadd.f32 %v1027_v2, %v132_v20  ;;  %v718_v34 = vmul.f32 -1.442695, %v200_v23  ;;  %v70_v23 = vld [vmem:[%s1537_s0 + $0x1c0] sm:$0xff] }
  0x46   :  { %v835_v51 = vpop.eup %834  ;;  %860 = vrcp.f32 %v441_v42  ;;  %v443_v52 = vadd.f32 1.0, %v833_v46  ;;  %v719_v36 = vmul.f32 -1.442695, %v201_v26  ;;  %v63_v46 = vld [vmem:[%s1537_s0 + $0x188] sm:$0xff]  ;;  %v135_v8 = vmul.f32 %v1022_v1, %v64_v59 }
  0x47   :  { %v837_v56 = vpop.eup %836  ;;  %620 = vst [vmem:[%s1540_s3 + $0x80] sm:$0xff] %v835_v51  ;;  %862 = vrcp.f32 %v442_v47  ;;  %v721_v40 = vmul.f32 -1.442695, %v203_v32  ;;  %v133_v51 = vmul.f32 %v1022_v1, %v62_v43  ;;  %v134_v54 = vmul.f32 %v1022_v1, %v63_v46  ;;  %v74_v43 = vld [vmem:[%s1537_s0 + $0x1e0] sm:$0xff] }
  0x48   :  { %v839_v61 = vpop.eup %838  ;;  %621 = vst [vmem:[%s1540_s3 + $0x88] sm:$0xff] %v837_v56  ;;  %864 = vrcp.f32 %v443_v52  ;;  %v136_v12 = vmul.f32 %v1022_v1, %v65_v63  ;;  %v206_v26 = vadd.f32 %v1027_v2, %v135_v8 }
  0x49   :  { %v841_v4 = vpop.eup %840  ;;  %622 = vst [vmem:[%s1540_s3 + $0x90] sm:$0xff] %v839_v61  ;;  %866 = vpow2.f32 %v706_v38  ;;  %v720_v38 = vmul.f32 -1.442695, %v202_v29 }
  0x4a   :  { %v843_v9 = vpop.eup %842  ;;  %623 = vst [vmem:[%s1540_s3 + $0x98] sm:$0xff] %v841_v4  ;;  %868 = vpow2.f32 %v707_v53  ;;  %v205_v4 = vadd.f32 %v1027_v2, %v134_v54 }
  0x4b   :  { %v845_v13 = vpop.eup %844  ;;  %624 = vst [vmem:[%s1540_s3 + $0xa0] sm:$0xff] %v843_v9  ;;  %870 = vpow2.f32 %v708_v57  ;;  %v67_v9 = vld [vmem:[%s1537_s0 + $0x1a8] sm:$0xff] }
  0x4c   :  { %v847_v17 = vpop.eup %846  ;;  %625 = vst [vmem:[%s1540_s3 + $0xa8] sm:$0xff] %v845_v13  ;;  %872 = vpow2.f32 %v709_v62  ;;  %v204_v62 = vadd.f32 %v1027_v2, %v133_v51  ;;  %v68_v13 = vld [vmem:[%s1537_s0 + $0x1b0] sm:$0xff] }
  0x4d   :  { %v849_v21 = vpop.eup %848  ;;  %626 = vst [vmem:[%s1540_s3 + $0xb0] sm:$0xff] %v847_v17  ;;  %874 = vpow2.f32 %v710_v5  ;;  %v66_v5 = vld [vmem:[%s1537_s0 + $0x1a0] sm:$0xff] }
  0x4e   :  { %v851_v24 = vpop.eup %850  ;;  %627 = vst [vmem:[%s1540_s3 + $0xb8] sm:$0xff] %v849_v21  ;;  %876 = vpow2.f32 %v711_v10  ;;  %v722_v16 = vmul.f32 -1.442695, %v204_v62  ;;  %v137_v17 = vmul.f32 %v1022_v1, %v66_v5  ;;  %v723_v21 = vmul.f32 -1.442695, %v205_v4 }
  0x4f   :  { %v853_v27 = vpop.eup %852  ;;  %628 = vst [vmem:[%s1540_s3 + $0xc0] sm:$0xff] %v851_v24  ;;  %878 = vpow2.f32 %v712_v14  ;;  %v994_v4 = vld [vmem:[%s1538_s1] ss:$0 sm:$0xff] }
  0x50   :  { %v855_v30 = vpop.eup %854  ;;  %629 = vst [vmem:[%s1540_s3 + $0xc8] sm:$0xff] %v853_v27  ;;  %880 = vpow2.f32 %v713_v18  ;;  %v69_v18 = vld [vmem:[%s1537_s0 + $0x1b8] sm:$0xff]  ;;  %v139_v27 = vmul.f32 %v1022_v1, %v68_v13 }
  0x51   :  { %v857_v33 = vpop.eup %856  ;;  %630 = vst [vmem:[%s1540_s3 + $0xd0] sm:$0xff] %v855_v30  ;;  %882 = vpow2.f32 %v714_v22  ;;  %v138_v22 = vmul.f32 %v1022_v1, %v67_v9  ;;  %v140_v32 = vmul.f32 %v1022_v1, %v69_v18 }
  0x52   :  { %v859_v35 = vpop.eup %858  ;;  %631 = vst [vmem:[%s1540_s3 + $0xd8] sm:$0xff] %v857_v33  ;;  %884 = vpow2.f32 %v715_v25  ;;  %v72_v33 = vld [vmem:[%s1537_s0 + $0x1d0] sm:$0xff]  ;;  %v210_v46 = vadd.f32 %v1027_v2, %v139_v27 }
  0x53   :  { %v861_v37 = vpop.eup %860  ;;  %632 = vst [vmem:[%s1540_s3 + $0xe0] sm:$0xff] %v859_v35  ;;  %886 = vpow2.f32 %v716_v28  ;;  %v71_v28 = vld [vmem:[%s1537_s0 + $0x1c8] sm:$0xff]  ;;  %v211_v51 = vadd.f32 %v1027_v2, %v140_v32 }
  0x54   :  { %v863_v39 = vpop.eup %862  ;;  %633 = vst [vmem:[%s1540_s3 + $0xe8] sm:$0xff] %v861_v37  ;;  %888 = vpow2.f32 %v717_v31  ;;  %v207_v31 = vadd.f32 %v1027_v2, %v136_v12  ;;  %v141_v37 = vmul.f32 %v1022_v1, %v70_v23 }
  0x55   :  { %v865_v41 = vpop.eup %864  ;;  %634 = vst [vmem:[%s1540_s3 + $0xf0] sm:$0xff] %v863_v39  ;;  %890 = vpow2.f32 %v718_v34 }
  0x56   :  { %v867_v42 = vpop.eup %866  ;;  %635 = vst [vmem:[%s1540_s3 + $0xf8] sm:$0xff] %v865_v41  ;;  %892 = vpow2.f32 %v719_v36  ;;  %v208_v36 = vadd.f32 %v1027_v2, %v137_v17  ;;  %v209_v41 = vadd.f32 %v1027_v2, %v138_v22 }
  0x57   :  { %v869_v44 = vpop.eup %868  ;;  %v444_v45 = vadd.f32 1.0, %v867_v42  ;;  %894 = vpow2.f32 %v720_v38  ;;  %v73_v38 = vld [vmem:[%s1537_s0 + $0x1d8] sm:$0xff]  ;;  %v142_v42 = vmul.f32 %v1022_v1, %v71_v28 }
  0x58   :  { %v871_v47 = vpop.eup %870  ;;  %v445_v48 = vadd.f32 1.0, %v869_v44  ;;  %896 = vpow2.f32 %v721_v40 }
  0x59   :  { %v873_v49 = vpop.eup %872  ;;  %898 = vrcp.f32 %v444_v45  ;;  %v446_v50 = vadd.f32 1.0, %v871_v47  ;;  %v724_v45 = vmul.f32 -1.442695, %v206_v26  ;;  %v143_v47 = vmul.f32 %v1022_v1, %v72_v33 }
  0x5a   :  { %v875_v52 = vpop.eup %874  ;;  %900 = vrcp.f32 %v445_v48  ;;  %v447_v53 = vadd.f32 1.0, %v873_v49  ;;  %v75_v48 = vld [vmem:[%s1537_s0 + $0x1e8] sm:$0xff] }
  0x5b   :  { %v877_v55 = vpop.eup %876  ;;  %902 = vrcp.f32 %v446_v50  ;;  %v448_v56 = vadd.f32 1.0, %v875_v52  ;;  %v725_v50 = vmul.f32 -1.442695, %v207_v31  ;;  %v144_v52 = vmul.f32 %v1022_v1, %v73_v38 }
  0x5c   :  { %v879_v57 = vpop.eup %878  ;;  %904 = vrcp.f32 %v447_v53  ;;  %v449_v58 = vadd.f32 1.0, %v877_v55  ;;  %v76_v53 = vld [vmem:[%s1537_s0 + $0x1f0] sm:$0xff]  ;;  %v726_v55 = vmul.f32 -1.442695, %v208_v36  ;;  %v146_v62 = vmul.f32 %v1022_v1, %v75_v48 }
  0x5d   :  { %v881_v60 = vpop.eup %880  ;;  %906 = vrcp.f32 %v448_v56  ;;  %v450_v61 = vadd.f32 1.0, %v879_v57  ;;  %v212_v56 = vadd.f32 %v1027_v2, %v141_v37  ;;  %v145_v57 = vmul.f32 %v1022_v1, %v74_v43 }
  0x5e   :  { %v883_v0 = vpop.eup %882  ;;  %908 = vrcp.f32 %v449_v58  ;;  %v451_v3 = vadd.f32 1.0, %v881_v60  ;;  %v77_v58 = vld [vmem:[%s1537_s0 + $0x1f8] sm:$0xff]  ;;  %v727_v60 = vmul.f32 -1.442695, %v209_v41  ;;  %v147_v5 = vmul.f32 %v994_v4, %v76_v53 }
  0x5f   :  { %v885_v6 = vpop.eup %884  ;;  %910 = vrcp.f32 %v450_v61  ;;  %v452_v7 = vadd.f32 1.0, %v883_v0  ;;  %v213_v61 = vadd.f32 %v1027_v2, %v142_v42  ;;  %v728_v0 = vmul.f32 -1.442695, %v210_v46 }
  0x60   :  { %v887_v10 = vpop.eup %886  ;;  %912 = vrcp.f32 %v451_v3  ;;  %v453_v11 = vadd.f32 1.0, %v885_v6  ;;  %v214_v3 = vadd.f32 %v1027_v2, %v143_v47  ;;  %v729_v1 = vmul.f32 -1.442695, %v211_v51 }
  0x61   :  { %v889_v14 = vpop.eup %888  ;;  %914 = vrcp.f32 %v452_v7  ;;  %v454_v15 = vadd.f32 1.0, %v887_v10  ;;  %v995_v7 = vld [vmem:[%s1539_s2] ss:$0 sm:$0xff]  ;;  %v148_v9 = vmul.f32 %v994_v4, %v77_v58  ;;  %v730_v2 = vmul.f32 -1.442695, %v212_v56 }
  0x62   :  { %v891_v19 = vpop.eup %890  ;;  %916 = vrcp.f32 %v453_v11  ;;  %v455_v20 = vadd.f32 1.0, %v889_v14  ;;  %v215_v8 = vadd.f32 %v995_v7, %v144_v52  ;;  %v216_v11 = vadd.f32 %v995_v7, %v145_v57 }
  0x63   :  { %v893_v24 = vpop.eup %892  ;;  %918 = vrcp.f32 %v454_v15  ;;  %v456_v25 = vadd.f32 1.0, %v891_v19  ;;  %v731_v13 = vmul.f32 -1.442695, %v213_v61  ;;  %v217_v14 = vadd.f32 %v995_v7, %v146_v62 }
  0x64   :  { %v895_v29 = vpop.eup %894  ;;  %920 = vrcp.f32 %v455_v20  ;;  %v457_v30 = vadd.f32 1.0, %v893_v24  ;;  %v218_v17 = vadd.f32 %v995_v7, %v147_v5  ;;  %v733_v19 = vmul.f32 -1.442695, %v215_v8 }
  0x65   :  { %v897_v34 = vpop.eup %896  ;;  %922 = vrcp.f32 %v456_v25  ;;  %v458_v35 = vadd.f32 1.0, %v895_v29  ;;  %v219_v20 = vadd.f32 %v995_v7, %v148_v9  ;;  %v734_v22 = vmul.f32 -1.442695, %v216_v11 }
  0x66   :  { %v899_v39 = vpop.eup %898  ;;  %924 = vrcp.f32 %v457_v30  ;;  %v459_v40 = vadd.f32 1.0, %v897_v34  ;;  %v735_v24 = vmul.f32 -1.442695, %v217_v14  ;;  %v736_v26 = vmul.f32 -1.442695, %v218_v17 }
  0x67   :  { %v901_v44 = vpop.eup %900  ;;  %636 = vst [vmem:[%s1540_s3 + $0x100] sm:$0xff] %v899_v39  ;;  %926 = vrcp.f32 %v458_v35  ;;  %v737_v28 = vmul.f32 -1.442695, %v219_v20 }
  0x68   :  { %v903_v49 = vpop.eup %902  ;;  %637 = vst [vmem:[%s1540_s3 + $0x108] sm:$0xff] %v901_v44  ;;  %928 = vrcp.f32 %v459_v40 }
  0x69   :  { %v905_v54 = vpop.eup %904  ;;  %638 = vst [vmem:[%s1540_s3 + $0x110] sm:$0xff] %v903_v49  ;;  %930 = vpow2.f32 %v722_v16  ;;  %v732_v16 = vmul.f32 -1.442695, %v214_v3 }
  0x6a   :  { %v907_v59 = vpop.eup %906  ;;  %639 = vst [vmem:[%s1540_s3 + $0x118] sm:$0xff] %v905_v54  ;;  %932 = vpow2.f32 %v723_v21 }
  0x6b   :  { %v909_v63 = vpop.eup %908  ;;  %640 = vst [vmem:[%s1540_s3 + $0x120] sm:$0xff] %v907_v59  ;;  %934 = vpow2.f32 %v724_v45 }
  0x6c   :  { %v911_v6 = vpop.eup %910  ;;  %641 = vst [vmem:[%s1540_s3 + $0x128] sm:$0xff] %v909_v63  ;;  %936 = vpow2.f32 %v725_v50 }
  0x6d   :  { %v913_v10 = vpop.eup %912  ;;  %642 = vst [vmem:[%s1540_s3 + $0x130] sm:$0xff] %v911_v6  ;;  %938 = vpow2.f32 %v726_v55 }
  0x6e   :  { %v915_v12 = vpop.eup %914  ;;  %643 = vst [vmem:[%s1540_s3 + $0x138] sm:$0xff] %v913_v10  ;;  %940 = vpow2.f32 %v727_v60 }
  0x6f   :  { %v917_v15 = vpop.eup %916  ;;  %644 = vst [vmem:[%s1540_s3 + $0x140] sm:$0xff] %v915_v12  ;;  %942 = vpow2.f32 %v728_v0 }
  0x70   :  { %v919_v18 = vpop.eup %918  ;;  %645 = vst [vmem:[%s1540_s3 + $0x148] sm:$0xff] %v917_v15  ;;  %944 = vpow2.f32 %v729_v1 }
  0x71   :  { %v921_v21 = vpop.eup %920  ;;  %646 = vst [vmem:[%s1540_s3 + $0x150] sm:$0xff] %v919_v18  ;;  %946 = vpow2.f32 %v730_v2 }
  0x72   :  { %v923_v23 = vpop.eup %922  ;;  %647 = vst [vmem:[%s1540_s3 + $0x158] sm:$0xff] %v921_v21  ;;  %948 = vpow2.f32 %v731_v13 }
  0x73   :  { %v925_v25 = vpop.eup %924  ;;  %648 = vst [vmem:[%s1540_s3 + $0x160] sm:$0xff] %v923_v23  ;;  %950 = vpow2.f32 %v732_v16 }
  0x74   :  { %v927_v27 = vpop.eup %926  ;;  %649 = vst [vmem:[%s1540_s3 + $0x168] sm:$0xff] %v925_v25  ;;  %952 = vpow2.f32 %v733_v19 }
  0x75   :  { %v929_v29 = vpop.eup %928  ;;  %650 = vst [vmem:[%s1540_s3 + $0x170] sm:$0xff] %v927_v27  ;;  %954 = vpow2.f32 %v734_v22 }
  0x76   :  { %v931_v30 = vpop.eup %930  ;;  %651 = vst [vmem:[%s1540_s3 + $0x178] sm:$0xff] %v929_v29  ;;  %956 = vpow2.f32 %v735_v24 }
  0x77   :  { %v933_v31 = vpop.eup %932  ;;  %v460_v32 = vadd.f32 1.0, %v931_v30  ;;  %958 = vpow2.f32 %v736_v26 }
  0x78   :  { %v935_v33 = vpop.eup %934  ;;  %v461_v34 = vadd.f32 1.0, %v933_v31  ;;  %960 = vpow2.f32 %v737_v28 }
  0x79   :  { %v937_v35 = vpop.eup %936  ;;  %962 = vrcp.f32 %v460_v32  ;;  %v462_v36 = vadd.f32 1.0, %v935_v33 }
  0x7a   :  { %v939_v37 = vpop.eup %938  ;;  %964 = vrcp.f32 %v461_v34  ;;  %v463_v38 = vadd.f32 1.0, %v937_v35 }
  0x7b   :  { %v941_v39 = vpop.eup %940  ;;  %966 = vrcp.f32 %v462_v36  ;;  %v464_v40 = vadd.f32 1.0, %v939_v37 }
  0x7c   :  { %v943_v41 = vpop.eup %942  ;;  %968 = vrcp.f32 %v463_v38  ;;  %v465_v42 = vadd.f32 1.0, %v941_v39 }
  0x7d   :  { %v945_v43 = vpop.eup %944  ;;  %970 = vrcp.f32 %v464_v40  ;;  %v466_v44 = vadd.f32 1.0, %v943_v41 }
  0x7e   :  { %v947_v45 = vpop.eup %946  ;;  %972 = vrcp.f32 %v465_v42  ;;  %v467_v46 = vadd.f32 1.0, %v945_v43 }
  0x7f   :  { %v949_v47 = vpop.eup %948  ;;  %974 = vrcp.f32 %v466_v44  ;;  %v468_v48 = vadd.f32 1.0, %v947_v45 }
  0x80   :  { %v951_v49 = vpop.eup %950  ;;  %976 = vrcp.f32 %v467_v46  ;;  %v469_v50 = vadd.f32 1.0, %v949_v47 }
  0x81   :  { %v953_v51 = vpop.eup %952  ;;  %978 = vrcp.f32 %v468_v48  ;;  %v470_v52 = vadd.f32 1.0, %v951_v49 }
  0x82   :  { %v955_v53 = vpop.eup %954  ;;  %980 = vrcp.f32 %v469_v50  ;;  %v471_v54 = vadd.f32 1.0, %v953_v51 }
  0x83   :  { %v957_v55 = vpop.eup %956  ;;  %982 = vrcp.f32 %v470_v52  ;;  %v472_v56 = vadd.f32 1.0, %v955_v53 }
  0x84   :  { %v959_v57 = vpop.eup %958  ;;  %984 = vrcp.f32 %v471_v54  ;;  %v473_v58 = vadd.f32 1.0, %v957_v55 }
  0x85   :  { %v961_v59 = vpop.eup %960  ;;  %986 = vrcp.f32 %v472_v56  ;;  %v474_v60 = vadd.f32 1.0, %v959_v57 }
  0x86   :  { %v963_v61 = vpop.eup %962  ;;  %988 = vrcp.f32 %v473_v58  ;;  %v475_v62 = vadd.f32 1.0, %v961_v59 }
  0x87   :  { %v965_v63 = vpop.eup %964  ;;  %652 = vst [vmem:[%s1540_s3 + $0x180] sm:$0xff] %v963_v61  ;;  %990 = vrcp.f32 %v474_v60 }
  0x88   :  { %v967_v0 = vpop.eup %966  ;;  %653 = vst [vmem:[%s1540_s3 + $0x188] sm:$0xff] %v965_v63  ;;  %992 = vrcp.f32 %v475_v62 }
  0x89   :  { %v969_v3 = vpop.eup %968  ;;  %654 = vst [vmem:[%s1540_s3 + $0x190] sm:$0xff] %v967_v0 }
  0x8a   :  { %v971_v4 = vpop.eup %970  ;;  %655 = vst [vmem:[%s1540_s3 + $0x198] sm:$0xff] %v969_v3 }
  0x8b   :  { %v973_v5 = vpop.eup %972  ;;  %656 = vst [vmem:[%s1540_s3 + $0x1a0] sm:$0xff] %v971_v4 }
  0x8c   :  { %v975_v6 = vpop.eup %974  ;;  %657 = vst [vmem:[%s1540_s3 + $0x1a8] sm:$0xff] %v973_v5 }
  0x8d   :  { %v977_v1 = vpop.eup %976  ;;  %658 = vst [vmem:[%s1540_s3 + $0x1b0] sm:$0xff] %v975_v6 }
  0x8e   :  { %v979_v7 = vpop.eup %978  ;;  %659 = vst [vmem:[%s1540_s3 + $0x1b8] sm:$0xff] %v977_v1 }
  0x8f   :  { %v981_v8 = vpop.eup %980  ;;  %660 = vst [vmem:[%s1540_s3 + $0x1c0] sm:$0xff] %v979_v7 }
  0x90   :  { %v983_v9 = vpop.eup %982  ;;  %661 = vst [vmem:[%s1540_s3 + $0x1c8] sm:$0xff] %v981_v8 }
  0x91   :  { %v985_v10 = vpop.eup %984  ;;  %662 = vst [vmem:[%s1540_s3 + $0x1d0] sm:$0xff] %v983_v9 }
  0x92   :  { %v987_v2 = vpop.eup %986  ;;  %663 = vst [vmem:[%s1540_s3 + $0x1d8] sm:$0xff] %v985_v10 }
  0x93   :  { %v989_v11 = vpop.eup %988  ;;  %664 = vst [vmem:[%s1540_s3 + $0x1e0] sm:$0xff] %v987_v2 }
  0x94   :  { %v991_v12 = vpop.eup %990  ;;  %665 = vst [vmem:[%s1540_s3 + $0x1e8] sm:$0xff] %v989_v11 }
  0x95   :  { %v993_v13 = vpop.eup %992  ;;  %666 = vst [vmem:[%s1540_s3 + $0x1f0] sm:$0xff] %v991_v12 }
  0x96   :  { %667 = vst [vmem:[%s1540_s3 + $0x1f8] sm:$0xff] %v993_v13 }

</bundles_post_ra>
